<compile_context>
chip_gen: v6e
topology: v6e:2x2x1
jax: 0.10.0
libtpu: 0.0.40
codegen_flags: <defaults>
</compile_context>

<pallas_src>
import functools

import jax
import jax.numpy as jnp
from jax.experimental import pallas as pl
from jax.experimental.pallas import tpu as pltpu

BN_EPS = 1e-5


def _round_up(a, b):
    return (a + b - 1) // b * b


def _hardswish(y):
    # torch.nn.Hardswish: x * relu6(x + 3) / 6
    return y * jnp.clip(y + 3.0, 0.0, 6.0) * (1.0 / 6.0)


def _row_tile(rows, width, bytes_per=4, budget=1 << 19):
    """Row tile: multiple of 16, sized so one (tile, width) f32 block is ~<=512KB."""
    t = max(16, min(1024, budget // max(1, width * bytes_per)))
    t = max(16, (t // 16) * 16)
    return min(t, _round_up(rows, 16))


# ---------------------------------------------------------------------------
# Kernel 1: fused project(1x1) + residual + ConvNormActive(1x1)+BN+Hardswish.
#   p_new = x @ Wp + bp (+ p_old)
#   y     = act((z @ Wc_p [+ x @ Wc_x]) * scale + bias)
# ---------------------------------------------------------------------------
def _proj_cna_kernel(*refs, has_res, has_cx, apply_hswish):
    i = 0
    x_ref = refs[i]; i += 1
    res_ref = None
    if has_res:
        res_ref = refs[i]; i += 1
    wp_ref = refs[i]; i += 1
    bp_ref = refs[i]; i += 1
    wcx_ref = None
    if has_cx:
        wcx_ref = refs[i]; i += 1
    wcp_ref = refs[i]; i += 1
    sc_ref = refs[i]; i += 1
    b2_ref = refs[i]; i += 1
    p_ref = refs[i]; i += 1
    y_ref = refs[i]

    x = x_ref[...]                                          # bf16
    z = jnp.dot(x, wp_ref[...], preferred_element_type=jnp.float32) + bp_ref[...]
    if has_res:
        z = z + res_ref[...]
    p_ref[...] = z.astype(p_ref.dtype)

    acc = jnp.dot(z.astype(jnp.bfloat16), wcp_ref[...],
                  preferred_element_type=jnp.float32)
    if has_cx:
        acc = acc + jnp.dot(x, wcx_ref[...], preferred_element_type=jnp.float32)
    y = acc * sc_ref[...] + b2_ref[...]
    if apply_hswish:
        y = _hardswish(y)
    y_ref[...] = y.astype(y_ref.dtype)


def proj_cna(x2, p2, wp, bp, wcx, wcp, scale, bias2, *, apply_hswish,
             y_dtype, use_pallas=True):
    """Returns (p_new (M,pd) f32, y (M,cout) y_dtype)."""
    M, ip = x2.shape
    pd = wp.shape[1]
    cout = wcp.shape[1]

    x2 = x2.astype(jnp.bfloat16)                            # MXU-native operands
    wp_b = wp.astype(jnp.bfloat16)
    wcp_b = wcp.astype(jnp.bfloat16)
    wcx_b = None if wcx is None else wcx.astype(jnp.bfloat16)
    bp2 = bp.reshape(1, pd).astype(jnp.float32)
    sc2 = scale.reshape(1, cout).astype(jnp.float32)
    b22 = bias2.reshape(1, cout).astype(jnp.float32)
    p2f = None if p2 is None else p2.astype(jnp.float32)

    if not use_pallas:                                      # pure-JAX reference
        z = jnp.dot(x2, wp_b, preferred_element_type=jnp.float32) + bp2
        if p2f is not None:
            z = z + p2f
        acc = jnp.dot(z.astype(jnp.bfloat16), wcp_b,
                      preferred_element_type=jnp.float32)
        if wcx_b is not None:
            acc = acc + jnp.dot(x2, wcx_b, preferred_element_type=jnp.float32)
        y = acc * sc2 + b22
        if apply_hswish:
            y = _hardswish(y)
        return z.astype(jnp.float32), y.astype(y_dtype)

    tm = min(512, _round_up(M, 16))
    Mp = _round_up(M, tm)
    pad = Mp - M
    padrows = lambda a: a if pad == 0 else jnp.pad(a, ((0, pad), (0, 0)))

    args = [padrows(x2)]
    in_specs = [pl.BlockSpec((tm, ip), lambda i: (i, 0))]
    if p2f is not None:
        args.append(padrows(p2f))
        in_specs.append(pl.BlockSpec((tm, pd), lambda i: (i, 0)))
    small = [wp_b, bp2] + ([wcx_b] if wcx_b is not None else []) + [wcp_b, sc2, b22]
    for w_ in small:
        args.append(w_)
        in_specs.append(pl.BlockSpec(w_.shape, lambda i: (0, 0)))

    p_out, y_out = pl.pallas_call(
        functools.partial(_proj_cna_kernel, has_res=p2f is not None,
                          has_cx=wcx_b is not None, apply_hswish=apply_hswish),
        out_shape=(jax.ShapeDtypeStruct((Mp, pd), jnp.float32),
                   jax.ShapeDtypeStruct((Mp, cout), y_dtype)),
        grid=(Mp // tm,),
        in_specs=in_specs,
        out_specs=(pl.BlockSpec((tm, pd), lambda i: (i, 0)),
                   pl.BlockSpec((tm, cout), lambda i: (i, 0))),
        compiler_params=pltpu.CompilerParams(dimension_semantics=("parallel",)),
    )(*args)
    if pad:
        p_out, y_out = p_out[:M], y_out[:M]
    return p_out, y_out


# ---------------------------------------------------------------------------
# Kernel 2: depthwise stride-2 transposed 3x3 conv + BN(eval) + Hardswish.
# Works on (rows = N*H, W*C) tiles; the W(+1) shift is done in VMEM, the H(+1)
# shift uses one precomputed row-shifted copy of x.  4 even/odd output phases.
# ---------------------------------------------------------------------------
def _deconv_phases(x, xh, taps, s, b, c):
    zpad = jnp.zeros((x.shape[0], c), x.dtype)
    xw = jnp.concatenate([x[:, c:], zpad], axis=1)         # x[i, j+1]  (zero pad)
    xhw = jnp.concatenate([xh[:, c:], zpad], axis=1)       # x[i+1, j+1]
    t = lambda k: taps[k:k + 1, :]
    fin = lambda v: _hardswish(v * s + b)
    ee = fin(x * t(4))                                     # w[1,1]
    eo = fin(xw * t(3) + x * t(5))                         # w[1,0], w[1,2]
    oe = fin(xh * t(1) + x * t(7))                         # w[0,1], w[2,1]
    oo = fin(xhw * t(0) + xh * t(2) + xw * t(6) + x * t(8))
    return ee, eo, oe, oo


def _deconv_kernel(x_ref, xh_ref, tap_ref, sb_ref,
                   ee_ref, eo_ref, oe_ref, oo_ref, *, c):
    x = x_ref[...].astype(jnp.float32)
    xh = xh_ref[...].astype(jnp.float32)
    ee, eo, oe, oo = _deconv_phases(x, xh, tap_ref[...],
                                    sb_ref[0:1, :], sb_ref[1:2, :], c)
    ee_ref[...] = ee.astype(ee_ref.dtype)
    eo_ref[...] = eo.astype(eo_ref.dtype)
    oe_ref[...] = oe.astype(oe_ref.dtype)
    oo_ref[...] = oo.astype(oo_ref.dtype)


def _interleave_phases(ee, eo, oe, oo, N, H, W, C):
    ee, eo, oe, oo = (a.reshape(N, H, W, C) for a in (ee, eo, oe, oo))
    row_e = jnp.stack([ee, eo], axis=3).reshape(N, H, 2 * W, C)
    row_o = jnp.stack([oe, oo], axis=3).reshape(N, H, 2 * W, C)
    return jnp.stack([row_e, row_o], axis=2).reshape(N, 2 * H, 2 * W, C)


def depthwise_deconv_up(x, w9, bn_s, bn_b, use_pallas=True):
    # x: (N, H, W, C) -> (N, 2H, 2W, C)
    N, H, W, C = x.shape
    rows, wc = N * H, W * C
    xr = x.reshape(rows, wc)
    xh = jnp.concatenate(                                  # x[i+1, j], zero pad
        [x[:, 1:], jnp.zeros((N, 1, W, C), x.dtype)], axis=1).reshape(rows, wc)
    taps = jnp.tile(w9.astype(jnp.float32), (1, W))                  # (9, W*C)
    sb = jnp.stack([jnp.tile(bn_s.astype(jnp.float32), W),
                    jnp.tile(bn_b.astype(jnp.float32), W)], axis=0)  # (2, W*C)

    if use_pallas:
        tr = _row_tile(rows, wc)
        Rp = _round_up(rows, tr)
        pad = Rp - rows
        padrows = lambda a: a if pad == 0 else jnp.pad(a, ((0, pad), (0, 0)))
        outs = pl.pallas_call(
            functools.partial(_deconv_kernel, c=C),
            out_shape=tuple(jax.ShapeDtypeStruct((Rp, wc), jnp.bfloat16)
                            for _ in range(4)),
            grid=(Rp // tr,),
            in_specs=[pl.BlockSpec((tr, wc), lambda i: (i, 0)),
                      pl.BlockSpec((tr, wc), lambda i: (i, 0)),
                      pl.BlockSpec((9, wc), lambda i: (0, 0)),
                      pl.BlockSpec((2, wc), lambda i: (0, 0))],
            out_specs=tuple(pl.BlockSpec((tr, wc), lambda i: (i, 0))
                            for _ in range(4)),
            compiler_params=pltpu.CompilerParams(
                dimension_semantics=("parallel",)),
        )(padrows(xr), padrows(xh), taps, sb)
        ee, eo, oe, oo = (o[:rows] for o in outs)
    else:
        ee, eo, oe, oo = (a.astype(jnp.bfloat16) for a in _deconv_phases(
            xr.astype(jnp.float32), xh.astype(jnp.float32),
            taps, sb[0:1, :], sb[1:2, :], C))
    return _interleave_phases(ee, eo, oe, oo, N, H, W, C)


# ---------------------------------------------------------------------------
# Kernel 3: bilinear x2 (align_corners=False), fused H+W pass, 4 output phases.
#   out[2i]   = 0.25*x[i-1] + 0.75*x[i]     (edge replicate)
#   out[2i+1] = 0.75*x[i]   + 0.25*x[i+1]   (edge replicate)
# ---------------------------------------------------------------------------
def _bilerp_phases(p, pu, pdn, c):
    re_ = 0.25 * pu + 0.75 * p          # even output rows (pre column blend)
    ro_ = 0.75 * p + 0.25 * pdn         # odd output rows
    lsh = lambda a: jnp.concatenate([a[:, :c], a[:, :-c]], axis=1)   # j-1, repl.
    rsh = lambda a: jnp.concatenate([a[:, c:], a[:, -c:]], axis=1)   # j+1, repl.
    ee = 0.25 * lsh(re_) + 0.75 * re_
    eo = 0.75 * re_ + 0.25 * rsh(re_)
    oe = 0.25 * lsh(ro_) + 0.75 * ro_
    oo = 0.75 * ro_ + 0.25 * rsh(ro_)
    return ee, eo, oe, oo


def _bilerp_kernel(p_ref, pu_ref, pdn_ref, ee_ref, eo_ref, oe_ref, oo_ref, *, c):
    ee, eo, oe, oo = _bilerp_phases(p_ref[...], pu_ref[...], pdn_ref[...], c)
    ee_ref[...] = ee
    eo_ref[...] = eo
    oe_ref[...] = oe
    oo_ref[...] = oo


def bilinear_up2x(p, use_pallas=True):
    # p: (N, H, W, C) float32 -> (N, 2H, 2W, C)
    N, H, W, C = p.shape
    rows, wc = N * H, W * C
    pr = p.reshape(rows, wc)
    pu = jnp.concatenate([p[:, :1], p[:, :-1]], axis=1).reshape(rows, wc)
    pdn = jnp.concatenate([p[:, 1:], p[:, -1:]], axis=1).reshape(rows, wc)

    if use_pallas:
        tr = _row_tile(rows, wc)
        Rp = _round_up(rows, tr)
        pad = Rp - rows
        padrows = lambda a: a if pad == 0 else jnp.pad(a, ((0, pad), (0, 0)))
        outs = pl.pallas_call(
            functools.partial(_bilerp_kernel, c=C),
            out_shape=tuple(jax.ShapeDtypeStruct((Rp, wc), jnp.float32)
                            for _ in range(4)),
            grid=(Rp // tr,),
            in_specs=[pl.BlockSpec((tr, wc), lambda i: (i, 0))] * 3,
            out_specs=tuple(pl.BlockSpec((tr, wc), lambda i: (i, 0))
                            for _ in range(4)),
            compiler_params=pltpu.CompilerParams(
                dimension_semantics=("parallel",)),
        )(padrows(pr), padrows(pu), padrows(pdn))
        ee, eo, oe, oo = (o[:rows] for o in outs)
    else:
        ee, eo, oe, oo = _bilerp_phases(pr, pu, pdn, C)
    return _interleave_phases(ee, eo, oe, oo, N, H, W, C)


# ---------------------------------------------------------------------------
# SegPredictor forward
# ---------------------------------------------------------------------------
def seg_predictor_forward(x_nchw, params, use_pallas=True):
    x = jnp.transpose(x_nchw, (0, 2, 3, 1)).astype(jnp.bfloat16)     # -> NHWC
    pd = params['project_dim']
    num_layers = len(params['upsamples'])
    p = None                                 # p = 0.0 -> no residual at t == 0

    for t in range(num_layers):
        pr = params['projects'][t]
        up = params['upsamples'][t]
        n, h, w, ip = x.shape
        M = n * h * w
        # p = p + projects[t](x);  x = upsamples[t].cna(cat([x, p]))  (one kernel)
        s = up['cna_bn_gamma'] * jax.lax.rsqrt(up['cna_bn_var'] + BN_EPS)
        shift = (up['cna_b'] - up['cna_bn_mean']) * s + up['cna_bn_beta']
        op = up['cna_w'].shape[1]
        p2 = None if p is None else p.reshape(M, pd)
        p_new, y = proj_cna(x.reshape(M, ip), p2, pr['w'], pr['b'],
                            up['cna_w'][:ip], up['cna_w'][ip:], s, shift,
                            apply_hswish=True, y_dtype=jnp.bfloat16,
                            use_pallas=use_pallas)
        p = p_new.reshape(n, h, w, pd)
        y = y.reshape(n, h, w, op)
        # x = upsamples[t].up(y): depthwise ConvTranspose2d + BN + Hardswish
        s2 = up['up_bn_gamma'] * jax.lax.rsqrt(up['up_bn_var'] + BN_EPS)
        b2 = up['up_bn_beta'] - up['up_bn_mean'] * s2
        x = depthwise_deconv_up(y, up['dw_w'], s2, b2, use_pallas)
        # p = F.interpolate(p, scale_factor=2, mode='bilinear')
        p = bilinear_up2x(p, use_pallas)

    # x = p + projects[-1](x);  out = classifier(norm_layer(x))   (one kernel,
    # with BatchNorm folded into the classifier weights)
    pr = params['projects'][-1]
    n, h, w, ip = x.shape
    M = n * h * w
    s = params['bn_gamma'] * jax.lax.rsqrt(params['bn_var'] + BN_EPS)
    tsh = params['bn_beta'] - params['bn_mean'] * s
    w_eff = s[:, None] * params['cls_w']
    b_eff = params['cls_b'] + tsh @ params['cls_w']
    nc = params['cls_w'].shape[1]
    _, out = proj_cna(x.reshape(M, ip), p.reshape(M, pd), pr['w'], pr['b'],
                      None, w_eff, jnp.ones((nc,), jnp.float32), b_eff,
                      apply_hswish=False, y_dtype=jnp.float32,
                      use_pallas=use_pallas)
    out = out.reshape(n, h, w, nc)
    return jnp.transpose(out, (0, 3, 1, 2))               # back to NCHW


# ---------------------------------------------------------------------------
# Deterministic parameter initialization (shapes follow SegPredictor.__init__)
# ---------------------------------------------------------------------------
def init_params(key, in_planes, num_classes, num_layers):
    pd = int(min(max(in_planes // 2 ** num_layers, num_classes ** 0.5), num_classes))

    def nrm(k, shape, scale=1.0):
        return scale * jax.random.normal(k, shape, jnp.float32)

    params = {'project_dim': pd, 'projects': [], 'upsamples': []}
    ip = in_planes
    for t in range(num_layers):
        ks = jax.random.split(jax.random.fold_in(key, 10 * t), 16)
        params['projects'].append({
            'w': nrm(ks[0], (ip, pd), ip ** -0.5),          # Conv2d(ip, pd, 1) weight.T
            'b': nrm(ks[1], (pd,), 0.1),
        })
        op = ip
        if op > num_classes ** 0.5:
            op //= 2
        params['upsamples'].append({
            'cna_w': nrm(ks[2], (ip + pd, op), (ip + pd) ** -0.5),
            'cna_b': nrm(ks[3], (op,), 0.1),
            'cna_bn_gamma': 1.0 + nrm(ks[4], (op,), 0.1),
            'cna_bn_beta': nrm(ks[5], (op,), 0.1),
            'cna_bn_mean': nrm(ks[6], (op,), 0.1),
            'cna_bn_var': jax.random.uniform(ks[7], (op,), jnp.float32, 0.5, 1.5),
            'dw_w': nrm(ks[8], (9, op), 0.3),               # ConvTranspose2d(op,op,3,groups=op)
            'up_bn_gamma': 1.0 + nrm(ks[9], (op,), 0.1),
            'up_bn_beta': nrm(ks[10], (op,), 0.1),
            'up_bn_mean': nrm(ks[11], (op,), 0.1),
            'up_bn_var': jax.random.uniform(ks[12], (op,), jnp.float32, 0.5, 1.5),
        })
        ip = op
    ks = jax.random.split(jax.random.fold_in(key, 999), 8)
    params['projects'].append({'w': nrm(ks[0], (ip, pd), ip ** -0.5),
                               'b': nrm(ks[1], (pd,), 0.1)})
    params['bn_gamma'] = 1.0 + nrm(ks[2], (pd,), 0.1)
    params['bn_beta'] = nrm(ks[3], (pd,), 0.1)
    params['bn_mean'] = nrm(ks[4], (pd,), 0.1)
    params['bn_var'] = jax.random.uniform(ks[5], (pd,), jnp.float32, 0.5, 1.5)
    params['cls_w'] = nrm(ks[6], (pd, num_classes), pd ** -0.5)
    params['cls_b'] = nrm(ks[7], (num_classes,), 0.1)
    return params


if __name__ == "__main__":
    IN_PLANES, NUM_CLASSES, NUM_LAYERS = 16, 4, 2
    N, H, W = 2, 8, 8

    key = jax.random.PRNGKey(0)
    kx, kp = jax.random.split(key)
    params = init_params(kp, IN_PLANES, NUM_CLASSES, NUM_LAYERS)
    x = jax.random.normal(kx, (N, IN_PLANES, H, W), jnp.float32)   # NCHW input

    fwd = jax.jit(lambda xx: seg_predictor_forward(xx, params, use_pallas=True))
    out = jax.block_until_ready(fwd(x))

    # pure-JAX reference of the same decomposition (identical numerics/dtypes)
    ref = seg_predictor_forward(x, params, use_pallas=False)

    expect = (N, NUM_CLASSES, H * 2 ** NUM_LAYERS, W * 2 ** NUM_LAYERS)
    assert out.shape == expect, (out.shape, expect)
    assert bool(jnp.all(jnp.isfinite(out)))
    assert bool(jnp.allclose(out, ref, rtol=5e-3, atol=5e-3)), \
        float(jnp.max(jnp.abs(out - ref)))
    print("KERNEL_OK")
</pallas_src>

<mosaic_0001>
module attributes {stable_mosaic.version = 11 : i64} {
  func.func @_proj_cna_kernel(%arg0: i32, %arg1: memref<128x16xbf16, #tpu.memory_space<vmem>>, %arg2: memref<16x4xbf16, #tpu.memory_space<vmem>>, %arg3: memref<1x4xf32, #tpu.memory_space<vmem>>, %arg4: memref<16x8xbf16, #tpu.memory_space<vmem>>, %arg5: memref<4x8xbf16, #tpu.memory_space<vmem>>, %arg6: memref<1x8xf32, #tpu.memory_space<vmem>>, %arg7: memref<1x8xf32, #tpu.memory_space<vmem>>, %arg8: memref<128x4xf32, #tpu.memory_space<vmem>>, %arg9: memref<128x8xbf16, #tpu.memory_space<vmem>>) attributes {dimension_semantics = [#tpu.dimension_semantics<parallel>], iteration_bounds = array<i64: 1>, scalar_prefetch = 0 : i64, scratch_operands = 0 : i64, tpu.core_type = #tpu.core_type<tc>, window_params = [{transform_indices = @transform_0, window_bounds = array<i64: 128, 16>}, {pipeline_mode = #tpu.pipeline_mode<synchronous>, transform_indices = @transform_1, window_bounds = array<i64: 16, 4>}, {pipeline_mode = #tpu.pipeline_mode<synchronous>, transform_indices = @transform_2, window_bounds = array<i64: 1, 4>}, {pipeline_mode = #tpu.pipeline_mode<synchronous>, transform_indices = @transform_3, window_bounds = array<i64: 16, 8>}, {pipeline_mode = #tpu.pipeline_mode<synchronous>, transform_indices = @transform_4, window_bounds = array<i64: 4, 8>}, {pipeline_mode = #tpu.pipeline_mode<synchronous>, transform_indices = @transform_5, window_bounds = array<i64: 1, 8>}, {pipeline_mode = #tpu.pipeline_mode<synchronous>, transform_indices = @transform_6, window_bounds = array<i64: 1, 8>}, {transform_indices = @transform_7, window_bounds = array<i64: 128, 4>}, {transform_indices = @transform_8, window_bounds = array<i64: 128, 8>}]} {
    %c0 = arith.constant 0 : index
    %c0_0 = arith.constant 0 : index
    %0 = vector.load %arg1[%c0, %c0_0] : memref<128x16xbf16, #tpu.memory_space<vmem>>, vector<128x16xbf16>
    %c0_1 = arith.constant 0 : index
    %c0_2 = arith.constant 0 : index
    %1 = vector.load %arg2[%c0_1, %c0_2] : memref<16x4xbf16, #tpu.memory_space<vmem>>, vector<16x4xbf16>
    %cst = arith.constant dense<0.000000e+00> : vector<128x4xf32>
    %2 = tpu.matmul %0, %1, %cst {dimension_numbers = #tpu.dot_dimension_numbers<[1], [0], [0], [1], [0, 0, 1, 1], [], []>} : vector<128x16xbf16>, vector<16x4xbf16>, vector<128x4xf32> -> vector<128x4xf32>
    %c0_3 = arith.constant 0 : index
    %c0_4 = arith.constant 0 : index
    %3 = vector.load %arg3[%c0_3, %c0_4] : memref<1x4xf32, #tpu.memory_space<vmem>>, vector<1x4xf32>
    %4 = vector.broadcast %3 : vector<1x4xf32> to vector<128x4xf32>
    %5 = arith.addf %2, %4 : vector<128x4xf32>
    %c0_5 = arith.constant 0 : index
    %c0_6 = arith.constant 0 : index
    %6 = vector.load %arg8[%c0_5, %c0_6] : memref<128x4xf32, #tpu.memory_space<vmem>>, vector<128x4xf32>
    tpu.vector_store %arg8[%c0_5, %c0_6], %5 {strides = array<i32>} : memref<128x4xf32, #tpu.memory_space<vmem>>, vector<128x4xf32>,
    %7 = arith.truncf %5 : vector<128x4xf32> to vector<128x4xbf16>
    %c0_7 = arith.constant 0 : index
    %c0_8 = arith.constant 0 : index
    %8 = vector.load %arg5[%c0_7, %c0_8] : memref<4x8xbf16, #tpu.memory_space<vmem>>, vector<4x8xbf16>
    %cst_9 = arith.constant dense<0.000000e+00> : vector<128x8xf32>
    %9 = tpu.matmul %7, %8, %cst_9 {dimension_numbers = #tpu.dot_dimension_numbers<[1], [0], [0], [1], [0, 0, 1, 1], [], []>} : vector<128x4xbf16>, vector<4x8xbf16>, vector<128x8xf32> -> vector<128x8xf32>
    %c0_10 = arith.constant 0 : index
    %c0_11 = arith.constant 0 : index
    %10 = vector.load %arg4[%c0_10, %c0_11] : memref<16x8xbf16, #tpu.memory_space<vmem>>, vector<16x8xbf16>
    %cst_12 = arith.constant dense<0.000000e+00> : vector<128x8xf32>
    %11 = tpu.matmul %0, %10, %cst_12 {dimension_numbers = #tpu.dot_dimension_numbers<[1], [0], [0], [1], [0, 0, 1, 1], [], []>} : vector<128x16xbf16>, vector<16x8xbf16>, vector<128x8xf32> -> vector<128x8xf32>
    %12 = arith.addf %9, %11 : vector<128x8xf32>
    %c0_13 = arith.constant 0 : index
    %c0_14 = arith.constant 0 : index
    %13 = vector.load %arg6[%c0_13, %c0_14] : memref<1x8xf32, #tpu.memory_space<vmem>>, vector<1x8xf32>
    %14 = vector.broadcast %13 : vector<1x8xf32> to vector<128x8xf32>
    %15 = arith.mulf %12, %14 : vector<128x8xf32>
    %c0_15 = arith.constant 0 : index
    %c0_16 = arith.constant 0 : index
    %16 = vector.load %arg7[%c0_15, %c0_16] : memref<1x8xf32, #tpu.memory_space<vmem>>, vector<1x8xf32>
    %17 = vector.broadcast %16 : vector<1x8xf32> to vector<128x8xf32>
    %18 = arith.addf %15, %17 : vector<128x8xf32>
    %cst_17 = arith.constant 3.000000e+00 : f32
    %19 = vector.broadcast %cst_17 : f32 to vector<128x8xf32>
    %20 = arith.addf %18, %19 : vector<128x8xf32>
    %cst_18 = arith.constant 0.000000e+00 : f32
    %cst_19 = arith.constant 6.000000e+00 : f32
    %21 = vector.broadcast %cst_18 : f32 to vector<128x8xf32>
    %22 = arith.maximumf %21, %20 : vector<128x8xf32>
    %23 = vector.broadcast %cst_19 : f32 to vector<128x8xf32>
    %24 = arith.minimumf %23, %22 : vector<128x8xf32>
    %25 = arith.mulf %18, %24 : vector<128x8xf32>
    %cst_20 = arith.constant 0.166666672 : f32
    %26 = vector.broadcast %cst_20 : f32 to vector<128x8xf32>
    %27 = arith.mulf %25, %26 : vector<128x8xf32>
    %28 = arith.truncf %27 : vector<128x8xf32> to vector<128x8xbf16>
    %c0_21 = arith.constant 0 : index
    %c0_22 = arith.constant 0 : index
    %29 = vector.load %arg9[%c0_21, %c0_22] : memref<128x8xbf16, #tpu.memory_space<vmem>>, vector<128x8xbf16>
    tpu.vector_store %arg9[%c0_21, %c0_22], %28 {strides = array<i32>} : memref<128x8xbf16, #tpu.memory_space<vmem>>, vector<128x8xbf16>,
    return
  }
  func.func @transform_0(%arg0: i32) -> (i32, i32) {
    %c0_i32 = arith.constant 0 : i32
    %c0_i32_0 = arith.constant 0 : i32
    return %arg0, %c0_i32 : i32, i32
  }
  func.func @transform_1(%arg0: i32) -> (i32, i32) {
    %c0_i32 = arith.constant 0 : i32
    %c0_i32_0 = arith.constant 0 : i32
    %c0_i32_1 = arith.constant 0 : i32
    return %c0_i32, %c0_i32_0 : i32, i32
  }
  func.func @transform_2(%arg0: i32) -> (i32, i32) {
    %c0_i32 = arith.constant 0 : i32
    %c0_i32_0 = arith.constant 0 : i32
    %c0_i32_1 = arith.constant 0 : i32
    return %c0_i32, %c0_i32_0 : i32, i32
  }
  func.func @transform_3(%arg0: i32) -> (i32, i32) {
    %c0_i32 = arith.constant 0 : i32
    %c0_i32_0 = arith.constant 0 : i32
    %c0_i32_1 = arith.constant 0 : i32
    return %c0_i32, %c0_i32_0 : i32, i32
  }
  func.func @transform_4(%arg0: i32) -> (i32, i32) {
    %c0_i32 = arith.constant 0 : i32
    %c0_i32_0 = arith.constant 0 : i32
    %c0_i32_1 = arith.constant 0 : i32
    return %c0_i32, %c0_i32_0 : i32, i32
  }
  func.func @transform_5(%arg0: i32) -> (i32, i32) {
    %c0_i32 = arith.constant 0 : i32
    %c0_i32_0 = arith.constant 0 : i32
    %c0_i32_1 = arith.constant 0 : i32
    return %c0_i32, %c0_i32_0 : i32, i32
  }
  func.func @transform_6(%arg0: i32) -> (i32, i32) {
    %c0_i32 = arith.constant 0 : i32
    %c0_i32_0 = arith.constant 0 : i32
    %c0_i32_1 = arith.constant 0 : i32
    return %c0_i32, %c0_i32_0 : i32, i32
  }
  func.func @transform_7(%arg0: i32) -> (i32, i32) {
    %c0_i32 = arith.constant 0 : i32
    %c0_i32_0 = arith.constant 0 : i32
    return %arg0, %c0_i32 : i32, i32
  }
  func.func @transform_8(%arg0: i32) -> (i32, i32) {
    %c0_i32 = arith.constant 0 : i32
    %c0_i32_0 = arith.constant 0 : i32
    return %arg0, %c0_i32 : i32, i32
  }
}

module attributes {stable_mosaic.version = 11 : i64} {
  func.func @_deconv_kernel(%arg0: i32, %arg1: memref<16x64xbf16, #tpu.memory_space<vmem>>, %arg2: memref<16x64xbf16, #tpu.memory_space<vmem>>, %arg3: memref<9x64xf32, #tpu.memory_space<vmem>>, %arg4: memref<2x64xf32, #tpu.memory_space<vmem>>, %arg5: memref<16x64xbf16, #tpu.memory_space<vmem>>, %arg6: memref<16x64xbf16, #tpu.memory_space<vmem>>, %arg7: memref<16x64xbf16, #tpu.memory_space<vmem>>, %arg8: memref<16x64xbf16, #tpu.memory_space<vmem>>) attributes {dimension_semantics = [#tpu.dimension_semantics<parallel>], iteration_bounds = array<i64: 1>, scalar_prefetch = 0 : i64, scratch_operands = 0 : i64, tpu.core_type = #tpu.core_type<tc>, window_params = [{transform_indices = @transform_0, window_bounds = array<i64: 16, 64>}, {transform_indices = @transform_1, window_bounds = array<i64: 16, 64>}, {pipeline_mode = #tpu.pipeline_mode<synchronous>, transform_indices = @transform_2, window_bounds = array<i64: 9, 64>}, {pipeline_mode = #tpu.pipeline_mode<synchronous>, transform_indices = @transform_3, window_bounds = array<i64: 2, 64>}, {transform_indices = @transform_4, window_bounds = array<i64: 16, 64>}, {transform_indices = @transform_5, window_bounds = array<i64: 16, 64>}, {transform_indices = @transform_6, window_bounds = array<i64: 16, 64>}, {transform_indices = @transform_7, window_bounds = array<i64: 16, 64>}]} {
    %c0 = arith.constant 0 : index
    %c0_0 = arith.constant 0 : index
    %0 = vector.load %arg1[%c0, %c0_0] : memref<16x64xbf16, #tpu.memory_space<vmem>>, vector<16x64xbf16>
    %1 = arith.extf %0 : vector<16x64xbf16> to vector<16x64xf32>
    %c0_1 = arith.constant 0 : index
    %c0_2 = arith.constant 0 : index
    %2 = vector.load %arg2[%c0_1, %c0_2] : memref<16x64xbf16, #tpu.memory_space<vmem>>, vector<16x64xbf16>
    %3 = arith.extf %2 : vector<16x64xbf16> to vector<16x64xf32>
    %c0_3 = arith.constant 0 : index
    %c0_4 = arith.constant 0 : index
    %4 = vector.load %arg3[%c0_3, %c0_4] : memref<9x64xf32, #tpu.memory_space<vmem>>, vector<9x64xf32>
    %c0_5 = arith.constant 0 : index
    %c0_6 = arith.constant 0 : index
    %5 = vector.load %arg4[%c0_5, %c0_6] : memref<2x64xf32, #tpu.memory_space<vmem>>, vector<1x64xf32>
    %c1 = arith.constant 1 : index
    %c0_7 = arith.constant 0 : index
    %6 = vector.load %arg4[%c1, %c0_7] : memref<2x64xf32, #tpu.memory_space<vmem>>, vector<1x64xf32>
    %cst = arith.constant 0.000000e+00 : f32
    %7 = vector.broadcast %cst : f32 to vector<16x8xf32>
    %8 = vector.extract_strided_slice %1 {offsets = [0, 8], sizes = [16, 56], strides = [1, 1]} : vector<16x64xf32> to vector<16x56xf32>
    %9 = tpu.concatenate %8, %7 in 1 : vector<16x56xf32>, vector<16x8xf32> -> vector<16x64xf32>
    %10 = vector.extract_strided_slice %3 {offsets = [0, 8], sizes = [16, 56], strides = [1, 1]} : vector<16x64xf32> to vector<16x56xf32>
    %11 = tpu.concatenate %10, %7 in 1 : vector<16x56xf32>, vector<16x8xf32> -> vector<16x64xf32>
    %12 = vector.extract_strided_slice %4 {offsets = [4, 0], sizes = [1, 64], strides = [1, 1]} : vector<9x64xf32> to vector<1x64xf32>
    %13 = vector.broadcast %12 : vector<1x64xf32> to vector<16x64xf32>
    %14 = arith.mulf %1, %13 : vector<16x64xf32>
    %15 = vector.broadcast %5 : vector<1x64xf32> to vector<16x64xf32>
    %16 = arith.mulf %14, %15 : vector<16x64xf32>
    %17 = vector.broadcast %6 : vector<1x64xf32> to vector<16x64xf32>
    %18 = arith.addf %16, %17 : vector<16x64xf32>
    %cst_8 = arith.constant 3.000000e+00 : f32
    %19 = vector.broadcast %cst_8 : f32 to vector<16x64xf32>
    %20 = arith.addf %18, %19 : vector<16x64xf32>
    %cst_9 = arith.constant 0.000000e+00 : f32
    %cst_10 = arith.constant 6.000000e+00 : f32
    %21 = vector.broadcast %cst_9 : f32 to vector<16x64xf32>
    %22 = arith.maximumf %21, %20 : vector<16x64xf32>
    %23 = vector.broadcast %cst_10 : f32 to vector<16x64xf32>
    %24 = arith.minimumf %23, %22 : vector<16x64xf32>
    %25 = arith.mulf %18, %24 : vector<16x64xf32>
    %cst_11 = arith.constant 0.166666672 : f32
    %26 = vector.broadcast %cst_11 : f32 to vector<16x64xf32>
    %27 = arith.mulf %25, %26 : vector<16x64xf32>
    %28 = vector.extract_strided_slice %4 {offsets = [3, 0], sizes = [1, 64], strides = [1, 1]} : vector<9x64xf32> to vector<1x64xf32>
    %29 = vector.broadcast %28 : vector<1x64xf32> to vector<16x64xf32>
    %30 = arith.mulf %9, %29 : vector<16x64xf32>
    %31 = vector.extract_strided_slice %4 {offsets = [5, 0], sizes = [1, 64], strides = [1, 1]} : vector<9x64xf32> to vector<1x64xf32>
    %32 = vector.broadcast %31 : vector<1x64xf32> to vector<16x64xf32>
    %33 = arith.mulf %1, %32 : vector<16x64xf32>
    %34 = arith.addf %30, %33 : vector<16x64xf32>
    %35 = vector.broadcast %5 : vector<1x64xf32> to vector<16x64xf32>
    %36 = arith.mulf %34, %35 : vector<16x64xf32>
    %37 = vector.broadcast %6 : vector<1x64xf32> to vector<16x64xf32>
    %38 = arith.addf %36, %37 : vector<16x64xf32>
    %cst_12 = arith.constant 3.000000e+00 : f32
    %39 = vector.broadcast %cst_12 : f32 to vector<16x64xf32>
    %40 = arith.addf %38, %39 : vector<16x64xf32>
    %cst_13 = arith.constant 0.000000e+00 : f32
    %cst_14 = arith.constant 6.000000e+00 : f32
    %41 = vector.broadcast %cst_13 : f32 to vector<16x64xf32>
    %42 = arith.maximumf %41, %40 : vector<16x64xf32>
    %43 = vector.broadcast %cst_14 : f32 to vector<16x64xf32>
    %44 = arith.minimumf %43, %42 : vector<16x64xf32>
    %45 = arith.mulf %38, %44 : vector<16x64xf32>
    %cst_15 = arith.constant 0.166666672 : f32
    %46 = vector.broadcast %cst_15 : f32 to vector<16x64xf32>
    %47 = arith.mulf %45, %46 : vector<16x64xf32>
    %48 = vector.extract_strided_slice %4 {offsets = [1, 0], sizes = [1, 64], strides = [1, 1]} : vector<9x64xf32> to vector<1x64xf32>
    %49 = vector.broadcast %48 : vector<1x64xf32> to vector<16x64xf32>
    %50 = arith.mulf %3, %49 : vector<16x64xf32>
    %51 = vector.extract_strided_slice %4 {offsets = [7, 0], sizes = [1, 64], strides = [1, 1]} : vector<9x64xf32> to vector<1x64xf32>
    %52 = vector.broadcast %51 : vector<1x64xf32> to vector<16x64xf32>
    %53 = arith.mulf %1, %52 : vector<16x64xf32>
    %54 = arith.addf %50, %53 : vector<16x64xf32>
    %55 = vector.broadcast %5 : vector<1x64xf32> to vector<16x64xf32>
    %56 = arith.mulf %54, %55 : vector<16x64xf32>
    %57 = vector.broadcast %6 : vector<1x64xf32> to vector<16x64xf32>
    %58 = arith.addf %56, %57 : vector<16x64xf32>
    %cst_16 = arith.constant 3.000000e+00 : f32
    %59 = vector.broadcast %cst_16 : f32 to vector<16x64xf32>
    %60 = arith.addf %58, %59 : vector<16x64xf32>
    %cst_17 = arith.constant 0.000000e+00 : f32
    %cst_18 = arith.constant 6.000000e+00 : f32
    %61 = vector.broadcast %cst_17 : f32 to vector<16x64xf32>
    %62 = arith.maximumf %61, %60 : vector<16x64xf32>
    %63 = vector.broadcast %cst_18 : f32 to vector<16x64xf32>
    %64 = arith.minimumf %63, %62 : vector<16x64xf32>
    %65 = arith.mulf %58, %64 : vector<16x64xf32>
    %cst_19 = arith.constant 0.166666672 : f32
    %66 = vector.broadcast %cst_19 : f32 to vector<16x64xf32>
    %67 = arith.mulf %65, %66 : vector<16x64xf32>
    %68 = vector.extract_strided_slice %4 {offsets = [0, 0], sizes = [1, 64], strides = [1, 1]} : vector<9x64xf32> to vector<1x64xf32>
    %69 = vector.broadcast %68 : vector<1x64xf32> to vector<16x64xf32>
    %70 = arith.mulf %11, %69 : vector<16x64xf32>
    %71 = vector.extract_strided_slice %4 {offsets = [2, 0], sizes = [1, 64], strides = [1, 1]} : vector<9x64xf32> to vector<1x64xf32>
    %72 = vector.broadcast %71 : vector<1x64xf32> to vector<16x64xf32>
    %73 = arith.mulf %3, %72 : vector<16x64xf32>
    %74 = arith.addf %70, %73 : vector<16x64xf32>
    %75 = vector.extract_strided_slice %4 {offsets = [6, 0], sizes = [1, 64], strides = [1, 1]} : vector<9x64xf32> to vector<1x64xf32>
    %76 = vector.broadcast %75 : vector<1x64xf32> to vector<16x64xf32>
    %77 = arith.mulf %9, %76 : vector<16x64xf32>
    %78 = arith.addf %74, %77 : vector<16x64xf32>
    %79 = vector.extract_strided_slice %4 {offsets = [8, 0], sizes = [1, 64], strides = [1, 1]} : vector<9x64xf32> to vector<1x64xf32>
    %80 = vector.broadcast %79 : vector<1x64xf32> to vector<16x64xf32>
    %81 = arith.mulf %1, %80 : vector<16x64xf32>
    %82 = arith.addf %78, %81 : vector<16x64xf32>
    %83 = vector.broadcast %5 : vector<1x64xf32> to vector<16x64xf32>
    %84 = arith.mulf %82, %83 : vector<16x64xf32>
    %85 = vector.broadcast %6 : vector<1x64xf32> to vector<16x64xf32>
    %86 = arith.addf %84, %85 : vector<16x64xf32>
    %cst_20 = arith.constant 3.000000e+00 : f32
    %87 = vector.broadcast %cst_20 : f32 to vector<16x64xf32>
    %88 = arith.addf %86, %87 : vector<16x64xf32>
    %cst_21 = arith.constant 0.000000e+00 : f32
    %cst_22 = arith.constant 6.000000e+00 : f32
    %89 = vector.broadcast %cst_21 : f32 to vector<16x64xf32>
    %90 = arith.maximumf %89, %88 : vector<16x64xf32>
    %91 = vector.broadcast %cst_22 : f32 to vector<16x64xf32>
    %92 = arith.minimumf %91, %90 : vector<16x64xf32>
    %93 = arith.mulf %86, %92 : vector<16x64xf32>
    %cst_23 = arith.constant 0.166666672 : f32
    %94 = vector.broadcast %cst_23 : f32 to vector<16x64xf32>
    %95 = arith.mulf %93, %94 : vector<16x64xf32>
    %96 = arith.truncf %27 : vector<16x64xf32> to vector<16x64xbf16>
    %c0_24 = arith.constant 0 : index
    %c0_25 = arith.constant 0 : index
    %97 = vector.load %arg5[%c0_24, %c0_25] : memref<16x64xbf16, #tpu.memory_space<vmem>>, vector<16x64xbf16>
    tpu.vector_store %arg5[%c0_24, %c0_25], %96 {strides = array<i32>} : memref<16x64xbf16, #tpu.memory_space<vmem>>, vector<16x64xbf16>,
    %98 = arith.truncf %47 : vector<16x64xf32> to vector<16x64xbf16>
    %c0_26 = arith.constant 0 : index
    %c0_27 = arith.constant 0 : index
    %99 = vector.load %arg6[%c0_26, %c0_27] : memref<16x64xbf16, #tpu.memory_space<vmem>>, vector<16x64xbf16>
    tpu.vector_store %arg6[%c0_26, %c0_27], %98 {strides = array<i32>} : memref<16x64xbf16, #tpu.memory_space<vmem>>, vector<16x64xbf16>,
    %100 = arith.truncf %67 : vector<16x64xf32> to vector<16x64xbf16>
    %c0_28 = arith.constant 0 : index
    %c0_29 = arith.constant 0 : index
    %101 = vector.load %arg7[%c0_28, %c0_29] : memref<16x64xbf16, #tpu.memory_space<vmem>>, vector<16x64xbf16>
    tpu.vector_store %arg7[%c0_28, %c0_29], %100 {strides = array<i32>} : memref<16x64xbf16, #tpu.memory_space<vmem>>, vector<16x64xbf16>,
    %102 = arith.truncf %95 : vector<16x64xf32> to vector<16x64xbf16>
    %c0_30 = arith.constant 0 : index
    %c0_31 = arith.constant 0 : index
    %103 = vector.load %arg8[%c0_30, %c0_31] : memref<16x64xbf16, #tpu.memory_space<vmem>>, vector<16x64xbf16>
    tpu.vector_store %arg8[%c0_30, %c0_31], %102 {strides = array<i32>} : memref<16x64xbf16, #tpu.memory_space<vmem>>, vector<16x64xbf16>,
    return
  }
  func.func @transform_0(%arg0: i32) -> (i32, i32) {
    %c0_i32 = arith.constant 0 : i32
    %c0_i32_0 = arith.constant 0 : i32
    return %arg0, %c0_i32 : i32, i32
  }
  func.func @transform_1(%arg0: i32) -> (i32, i32) {
    %c0_i32 = arith.constant 0 : i32
    %c0_i32_0 = arith.constant 0 : i32
    return %arg0, %c0_i32 : i32, i32
  }
  func.func @transform_2(%arg0: i32) -> (i32, i32) {
    %c0_i32 = arith.constant 0 : i32
    %c0_i32_0 = arith.constant 0 : i32
    %c0_i32_1 = arith.constant 0 : i32
    return %c0_i32, %c0_i32_0 : i32, i32
  }
  func.func @transform_3(%arg0: i32) -> (i32, i32) {
    %c0_i32 = arith.constant 0 : i32
    %c0_i32_0 = arith.constant 0 : i32
    %c0_i32_1 = arith.constant 0 : i32
    return %c0_i32, %c0_i32_0 : i32, i32
  }
  func.func @transform_4(%arg0: i32) -> (i32, i32) {
    %c0_i32 = arith.constant 0 : i32
    %c0_i32_0 = arith.constant 0 : i32
    return %arg0, %c0_i32 : i32, i32
  }
  func.func @transform_5(%arg0: i32) -> (i32, i32) {
    %c0_i32 = arith.constant 0 : i32
    %c0_i32_0 = arith.constant 0 : i32
    return %arg0, %c0_i32 : i32, i32
  }
  func.func @transform_6(%arg0: i32) -> (i32, i32) {
    %c0_i32 = arith.constant 0 : i32
    %c0_i32_0 = arith.constant 0 : i32
    return %arg0, %c0_i32 : i32, i32
  }
  func.func @transform_7(%arg0: i32) -> (i32, i32) {
    %c0_i32 = arith.constant 0 : i32
    %c0_i32_0 = arith.constant 0 : i32
    return %arg0, %c0_i32 : i32, i32
  }
}

module attributes {stable_mosaic.version = 11 : i64} {
  func.func @_bilerp_kernel(%arg0: i32, %arg1: memref<16x32xf32, #tpu.memory_space<vmem>>, %arg2: memref<16x32xf32, #tpu.memory_space<vmem>>, %arg3: memref<16x32xf32, #tpu.memory_space<vmem>>, %arg4: memref<16x32xf32, #tpu.memory_space<vmem>>, %arg5: memref<16x32xf32, #tpu.memory_space<vmem>>, %arg6: memref<16x32xf32, #tpu.memory_space<vmem>>, %arg7: memref<16x32xf32, #tpu.memory_space<vmem>>) attributes {dimension_semantics = [#tpu.dimension_semantics<parallel>], iteration_bounds = array<i64: 1>, scalar_prefetch = 0 : i64, scratch_operands = 0 : i64, tpu.core_type = #tpu.core_type<tc>, window_params = [{transform_indices = @transform_0, window_bounds = array<i64: 16, 32>}, {transform_indices = @transform_1, window_bounds = array<i64: 16, 32>}, {transform_indices = @transform_2, window_bounds = array<i64: 16, 32>}, {transform_indices = @transform_3, window_bounds = array<i64: 16, 32>}, {transform_indices = @transform_4, window_bounds = array<i64: 16, 32>}, {transform_indices = @transform_5, window_bounds = array<i64: 16, 32>}, {transform_indices = @transform_6, window_bounds = array<i64: 16, 32>}]} {
    %c0 = arith.constant 0 : index
    %c0_0 = arith.constant 0 : index
    %0 = vector.load %arg1[%c0, %c0_0] : memref<16x32xf32, #tpu.memory_space<vmem>>, vector<16x32xf32>
    %c0_1 = arith.constant 0 : index
    %c0_2 = arith.constant 0 : index
    %1 = vector.load %arg2[%c0_1, %c0_2] : memref<16x32xf32, #tpu.memory_space<vmem>>, vector<16x32xf32>
    %c0_3 = arith.constant 0 : index
    %c0_4 = arith.constant 0 : index
    %2 = vector.load %arg3[%c0_3, %c0_4] : memref<16x32xf32, #tpu.memory_space<vmem>>, vector<16x32xf32>
    %cst = arith.constant 2.500000e-01 : f32
    %3 = vector.broadcast %cst : f32 to vector<16x32xf32>
    %4 = arith.mulf %3, %1 : vector<16x32xf32>
    %cst_5 = arith.constant 7.500000e-01 : f32
    %5 = vector.broadcast %cst_5 : f32 to vector<16x32xf32>
    %6 = arith.mulf %5, %0 : vector<16x32xf32>
    %7 = arith.addf %4, %6 : vector<16x32xf32>
    %cst_6 = arith.constant 7.500000e-01 : f32
    %8 = vector.broadcast %cst_6 : f32 to vector<16x32xf32>
    %9 = arith.mulf %8, %0 : vector<16x32xf32>
    %cst_7 = arith.constant 2.500000e-01 : f32
    %10 = vector.broadcast %cst_7 : f32 to vector<16x32xf32>
    %11 = arith.mulf %10, %2 : vector<16x32xf32>
    %12 = arith.addf %9, %11 : vector<16x32xf32>
    %13 = vector.extract_strided_slice %7 {offsets = [0, 0], sizes = [16, 4], strides = [1, 1]} : vector<16x32xf32> to vector<16x4xf32>
    %14 = vector.extract_strided_slice %7 {offsets = [0, 0], sizes = [16, 28], strides = [1, 1]} : vector<16x32xf32> to vector<16x28xf32>
    %15 = tpu.concatenate %13, %14 in 1 : vector<16x4xf32>, vector<16x28xf32> -> vector<16x32xf32>
    %cst_8 = arith.constant 2.500000e-01 : f32
    %16 = vector.broadcast %cst_8 : f32 to vector<16x32xf32>
    %17 = arith.mulf %16, %15 : vector<16x32xf32>
    %cst_9 = arith.constant 7.500000e-01 : f32
    %18 = vector.broadcast %cst_9 : f32 to vector<16x32xf32>
    %19 = arith.mulf %18, %7 : vector<16x32xf32>
    %20 = arith.addf %17, %19 : vector<16x32xf32>
    %cst_10 = arith.constant 7.500000e-01 : f32
    %21 = vector.broadcast %cst_10 : f32 to vector<16x32xf32>
    %22 = arith.mulf %21, %7 : vector<16x32xf32>
    %23 = vector.extract_strided_slice %7 {offsets = [0, 4], sizes = [16, 28], strides = [1, 1]} : vector<16x32xf32> to vector<16x28xf32>
    %24 = vector.extract_strided_slice %7 {offsets = [0, 28], sizes = [16, 4], strides = [1, 1]} : vector<16x32xf32> to vector<16x4xf32>
    %25 = tpu.concatenate %23, %24 in 1 : vector<16x28xf32>, vector<16x4xf32> -> vector<16x32xf32>
    %cst_11 = arith.constant 2.500000e-01 : f32
    %26 = vector.broadcast %cst_11 : f32 to vector<16x32xf32>
    %27 = arith.mulf %26, %25 : vector<16x32xf32>
    %28 = arith.addf %22, %27 : vector<16x32xf32>
    %29 = vector.extract_strided_slice %12 {offsets = [0, 0], sizes = [16, 4], strides = [1, 1]} : vector<16x32xf32> to vector<16x4xf32>
    %30 = vector.extract_strided_slice %12 {offsets = [0, 0], sizes = [16, 28], strides = [1, 1]} : vector<16x32xf32> to vector<16x28xf32>
    %31 = tpu.concatenate %29, %30 in 1 : vector<16x4xf32>, vector<16x28xf32> -> vector<16x32xf32>
    %cst_12 = arith.constant 2.500000e-01 : f32
    %32 = vector.broadcast %cst_12 : f32 to vector<16x32xf32>
    %33 = arith.mulf %32, %31 : vector<16x32xf32>
    %cst_13 = arith.constant 7.500000e-01 : f32
    %34 = vector.broadcast %cst_13 : f32 to vector<16x32xf32>
    %35 = arith.mulf %34, %12 : vector<16x32xf32>
    %36 = arith.addf %33, %35 : vector<16x32xf32>
    %cst_14 = arith.constant 7.500000e-01 : f32
    %37 = vector.broadcast %cst_14 : f32 to vector<16x32xf32>
    %38 = arith.mulf %37, %12 : vector<16x32xf32>
    %39 = vector.extract_strided_slice %12 {offsets = [0, 4], sizes = [16, 28], strides = [1, 1]} : vector<16x32xf32> to vector<16x28xf32>
    %40 = vector.extract_strided_slice %12 {offsets = [0, 28], sizes = [16, 4], strides = [1, 1]} : vector<16x32xf32> to vector<16x4xf32>
    %41 = tpu.concatenate %39, %40 in 1 : vector<16x28xf32>, vector<16x4xf32> -> vector<16x32xf32>
    %cst_15 = arith.constant 2.500000e-01 : f32
    %42 = vector.broadcast %cst_15 : f32 to vector<16x32xf32>
    %43 = arith.mulf %42, %41 : vector<16x32xf32>
    %44 = arith.addf %38, %43 : vector<16x32xf32>
    %c0_16 = arith.constant 0 : index
    %c0_17 = arith.constant 0 : index
    %45 = vector.load %arg4[%c0_16, %c0_17] : memref<16x32xf32, #tpu.memory_space<vmem>>, vector<16x32xf32>
    tpu.vector_store %arg4[%c0_16, %c0_17], %20 {strides = array<i32>} : memref<16x32xf32, #tpu.memory_space<vmem>>, vector<16x32xf32>,
    %c0_18 = arith.constant 0 : index
    %c0_19 = arith.constant 0 : index
    %46 = vector.load %arg5[%c0_18, %c0_19] : memref<16x32xf32, #tpu.memory_space<vmem>>, vector<16x32xf32>
    tpu.vector_store %arg5[%c0_18, %c0_19], %28 {strides = array<i32>} : memref<16x32xf32, #tpu.memory_space<vmem>>, vector<16x32xf32>,
    %c0_20 = arith.constant 0 : index
    %c0_21 = arith.constant 0 : index
    %47 = vector.load %arg6[%c0_20, %c0_21] : memref<16x32xf32, #tpu.memory_space<vmem>>, vector<16x32xf32>
    tpu.vector_store %arg6[%c0_20, %c0_21], %36 {strides = array<i32>} : memref<16x32xf32, #tpu.memory_space<vmem>>, vector<16x32xf32>,
    %c0_22 = arith.constant 0 : index
    %c0_23 = arith.constant 0 : index
    %48 = vector.load %arg7[%c0_22, %c0_23] : memref<16x32xf32, #tpu.memory_space<vmem>>, vector<16x32xf32>
    tpu.vector_store %arg7[%c0_22, %c0_23], %44 {strides = array<i32>} : memref<16x32xf32, #tpu.memory_space<vmem>>, vector<16x32xf32>,
    return
  }
  func.func @transform_0(%arg0: i32) -> (i32, i32) {
    %c0_i32 = arith.constant 0 : i32
    %c0_i32_0 = arith.constant 0 : i32
    return %arg0, %c0_i32 : i32, i32
  }
  func.func @transform_1(%arg0: i32) -> (i32, i32) {
    %c0_i32 = arith.constant 0 : i32
    %c0_i32_0 = arith.constant 0 : i32
    return %arg0, %c0_i32 : i32, i32
  }
  func.func @transform_2(%arg0: i32) -> (i32, i32) {
    %c0_i32 = arith.constant 0 : i32
    %c0_i32_0 = arith.constant 0 : i32
    return %arg0, %c0_i32 : i32, i32
  }
  func.func @transform_3(%arg0: i32) -> (i32, i32) {
    %c0_i32 = arith.constant 0 : i32
    %c0_i32_0 = arith.constant 0 : i32
    return %arg0, %c0_i32 : i32, i32
  }
  func.func @transform_4(%arg0: i32) -> (i32, i32) {
    %c0_i32 = arith.constant 0 : i32
    %c0_i32_0 = arith.constant 0 : i32
    return %arg0, %c0_i32 : i32, i32
  }
  func.func @transform_5(%arg0: i32) -> (i32, i32) {
    %c0_i32 = arith.constant 0 : i32
    %c0_i32_0 = arith.constant 0 : i32
    return %arg0, %c0_i32 : i32, i32
  }
  func.func @transform_6(%arg0: i32) -> (i32, i32) {
    %c0_i32 = arith.constant 0 : i32
    %c0_i32_0 = arith.constant 0 : i32
    return %arg0, %c0_i32 : i32, i32
  }
}

module attributes {stable_mosaic.version = 11 : i64} {
  func.func @_proj_cna_kernel(%arg0: i32, %arg1: memref<512x8xbf16, #tpu.memory_space<vmem>>, %arg2: memref<512x4xf32, #tpu.memory_space<vmem>>, %arg3: memref<8x4xbf16, #tpu.memory_space<vmem>>, %arg4: memref<1x4xf32, #tpu.memory_space<vmem>>, %arg5: memref<8x4xbf16, #tpu.memory_space<vmem>>, %arg6: memref<4x4xbf16, #tpu.memory_space<vmem>>, %arg7: memref<1x4xf32, #tpu.memory_space<vmem>>, %arg8: memref<1x4xf32, #tpu.memory_space<vmem>>, %arg9: memref<512x4xf32, #tpu.memory_space<vmem>>, %arg10: memref<512x4xbf16, #tpu.memory_space<vmem>>) attributes {dimension_semantics = [#tpu.dimension_semantics<parallel>], iteration_bounds = array<i64: 1>, scalar_prefetch = 0 : i64, scratch_operands = 0 : i64, tpu.core_type = #tpu.core_type<tc>, window_params = [{transform_indices = @transform_0, window_bounds = array<i64: 512, 8>}, {transform_indices = @transform_1, window_bounds = array<i64: 512, 4>}, {pipeline_mode = #tpu.pipeline_mode<synchronous>, transform_indices = @transform_2, window_bounds = array<i64: 8, 4>}, {pipeline_mode = #tpu.pipeline_mode<synchronous>, transform_indices = @transform_3, window_bounds = array<i64: 1, 4>}, {pipeline_mode = #tpu.pipeline_mode<synchronous>, transform_indices = @transform_4, window_bounds = array<i64: 8, 4>}, {pipeline_mode = #tpu.pipeline_mode<synchronous>, transform_indices = @transform_5, window_bounds = array<i64: 4, 4>}, {pipeline_mode = #tpu.pipeline_mode<synchronous>, transform_indices = @transform_6, window_bounds = array<i64: 1, 4>}, {pipeline_mode = #tpu.pipeline_mode<synchronous>, transform_indices = @transform_7, window_bounds = array<i64: 1, 4>}, {transform_indices = @transform_8, window_bounds = array<i64: 512, 4>}, {transform_indices = @transform_9, window_bounds = array<i64: 512, 4>}]} {
    %c0 = arith.constant 0 : index
    %c0_0 = arith.constant 0 : index
    %0 = vector.load %arg1[%c0, %c0_0] : memref<512x8xbf16, #tpu.memory_space<vmem>>, vector<512x8xbf16>
    %c0_1 = arith.constant 0 : index
    %c0_2 = arith.constant 0 : index
    %1 = vector.load %arg3[%c0_1, %c0_2] : memref<8x4xbf16, #tpu.memory_space<vmem>>, vector<8x4xbf16>
    %cst = arith.constant dense<0.000000e+00> : vector<512x4xf32>
    %2 = tpu.matmul %0, %1, %cst {dimension_numbers = #tpu.dot_dimension_numbers<[1], [0], [0], [1], [0, 0, 1, 1], [], []>} : vector<512x8xbf16>, vector<8x4xbf16>, vector<512x4xf32> -> vector<512x4xf32>
    %c0_3 = arith.constant 0 : index
    %c0_4 = arith.constant 0 : index
    %3 = vector.load %arg4[%c0_3, %c0_4] : memref<1x4xf32, #tpu.memory_space<vmem>>, vector<1x4xf32>
    %4 = vector.broadcast %3 : vector<1x4xf32> to vector<512x4xf32>
    %5 = arith.addf %2, %4 : vector<512x4xf32>
    %c0_5 = arith.constant 0 : index
    %c0_6 = arith.constant 0 : index
    %6 = vector.load %arg2[%c0_5, %c0_6] : memref<512x4xf32, #tpu.memory_space<vmem>>, vector<512x4xf32>
    %7 = arith.addf %5, %6 : vector<512x4xf32>
    %c0_7 = arith.constant 0 : index
    %c0_8 = arith.constant 0 : index
    %8 = vector.load %arg9[%c0_7, %c0_8] : memref<512x4xf32, #tpu.memory_space<vmem>>, vector<512x4xf32>
    tpu.vector_store %arg9[%c0_7, %c0_8], %7 {strides = array<i32>} : memref<512x4xf32, #tpu.memory_space<vmem>>, vector<512x4xf32>,
    %9 = arith.truncf %7 : vector<512x4xf32> to vector<512x4xbf16>
    %c0_9 = arith.constant 0 : index
    %c0_10 = arith.constant 0 : index
    %10 = vector.load %arg6[%c0_9, %c0_10] : memref<4x4xbf16, #tpu.memory_space<vmem>>, vector<4x4xbf16>
    %cst_11 = arith.constant dense<0.000000e+00> : vector<512x4xf32>
    %11 = tpu.matmul %9, %10, %cst_11 {dimension_numbers = #tpu.dot_dimension_numbers<[1], [0], [0], [1], [0, 0, 1, 1], [], []>} : vector<512x4xbf16>, vector<4x4xbf16>, vector<512x4xf32> -> vector<512x4xf32>
    %c0_12 = arith.constant 0 : index
    %c0_13 = arith.constant 0 : index
    %12 = vector.load %arg5[%c0_12, %c0_13] : memref<8x4xbf16, #tpu.memory_space<vmem>>, vector<8x4xbf16>
    %cst_14 = arith.constant dense<0.000000e+00> : vector<512x4xf32>
    %13 = tpu.matmul %0, %12, %cst_14 {dimension_numbers = #tpu.dot_dimension_numbers<[1], [0], [0], [1], [0, 0, 1, 1], [], []>} : vector<512x8xbf16>, vector<8x4xbf16>, vector<512x4xf32> -> vector<512x4xf32>
    %14 = arith.addf %11, %13 : vector<512x4xf32>
    %c0_15 = arith.constant 0 : index
    %c0_16 = arith.constant 0 : index
    %15 = vector.load %arg7[%c0_15, %c0_16] : memref<1x4xf32, #tpu.memory_space<vmem>>, vector<1x4xf32>
    %16 = vector.broadcast %15 : vector<1x4xf32> to vector<512x4xf32>
    %17 = arith.mulf %14, %16 : vector<512x4xf32>
    %c0_17 = arith.constant 0 : index
    %c0_18 = arith.constant 0 : index
    %18 = vector.load %arg8[%c0_17, %c0_18] : memref<1x4xf32, #tpu.memory_space<vmem>>, vector<1x4xf32>
    %19 = vector.broadcast %18 : vector<1x4xf32> to vector<512x4xf32>
    %20 = arith.addf %17, %19 : vector<512x4xf32>
    %cst_19 = arith.constant 3.000000e+00 : f32
    %21 = vector.broadcast %cst_19 : f32 to vector<512x4xf32>
    %22 = arith.addf %20, %21 : vector<512x4xf32>
    %cst_20 = arith.constant 0.000000e+00 : f32
    %cst_21 = arith.constant 6.000000e+00 : f32
    %23 = vector.broadcast %cst_20 : f32 to vector<512x4xf32>
    %24 = arith.maximumf %23, %22 : vector<512x4xf32>
    %25 = vector.broadcast %cst_21 : f32 to vector<512x4xf32>
    %26 = arith.minimumf %25, %24 : vector<512x4xf32>
    %27 = arith.mulf %20, %26 : vector<512x4xf32>
    %cst_22 = arith.constant 0.166666672 : f32
    %28 = vector.broadcast %cst_22 : f32 to vector<512x4xf32>
    %29 = arith.mulf %27, %28 : vector<512x4xf32>
    %30 = arith.truncf %29 : vector<512x4xf32> to vector<512x4xbf16>
    %c0_23 = arith.constant 0 : index
    %c0_24 = arith.constant 0 : index
    %31 = vector.load %arg10[%c0_23, %c0_24] : memref<512x4xbf16, #tpu.memory_space<vmem>>, vector<512x4xbf16>
    tpu.vector_store %arg10[%c0_23, %c0_24], %30 {strides = array<i32>} : memref<512x4xbf16, #tpu.memory_space<vmem>>, vector<512x4xbf16>,
    return
  }
  func.func @transform_0(%arg0: i32) -> (i32, i32) {
    %c0_i32 = arith.constant 0 : i32
    %c0_i32_0 = arith.constant 0 : i32
    return %arg0, %c0_i32 : i32, i32
  }
  func.func @transform_1(%arg0: i32) -> (i32, i32) {
    %c0_i32 = arith.constant 0 : i32
    %c0_i32_0 = arith.constant 0 : i32
    return %arg0, %c0_i32 : i32, i32
  }
  func.func @transform_2(%arg0: i32) -> (i32, i32) {
    %c0_i32 = arith.constant 0 : i32
    %c0_i32_0 = arith.constant 0 : i32
    %c0_i32_1 = arith.constant 0 : i32
    return %c0_i32, %c0_i32_0 : i32, i32
  }
  func.func @transform_3(%arg0: i32) -> (i32, i32) {
    %c0_i32 = arith.constant 0 : i32
    %c0_i32_0 = arith.constant 0 : i32
    %c0_i32_1 = arith.constant 0 : i32
    return %c0_i32, %c0_i32_0 : i32, i32
  }
  func.func @transform_4(%arg0: i32) -> (i32, i32) {
    %c0_i32 = arith.constant 0 : i32
    %c0_i32_0 = arith.constant 0 : i32
    %c0_i32_1 = arith.constant 0 : i32
    return %c0_i32, %c0_i32_0 : i32, i32
  }
  func.func @transform_5(%arg0: i32) -> (i32, i32) {
    %c0_i32 = arith.constant 0 : i32
    %c0_i32_0 = arith.constant 0 : i32
    %c0_i32_1 = arith.constant 0 : i32
    return %c0_i32, %c0_i32_0 : i32, i32
  }
  func.func @transform_6(%arg0: i32) -> (i32, i32) {
    %c0_i32 = arith.constant 0 : i32
    %c0_i32_0 = arith.constant 0 : i32
    %c0_i32_1 = arith.constant 0 : i32
    return %c0_i32, %c0_i32_0 : i32, i32
  }
  func.func @transform_7(%arg0: i32) -> (i32, i32) {
    %c0_i32 = arith.constant 0 : i32
    %c0_i32_0 = arith.constant 0 : i32
    %c0_i32_1 = arith.constant 0 : i32
    return %c0_i32, %c0_i32_0 : i32, i32
  }
  func.func @transform_8(%arg0: i32) -> (i32, i32) {
    %c0_i32 = arith.constant 0 : i32
    %c0_i32_0 = arith.constant 0 : i32
    return %arg0, %c0_i32 : i32, i32
  }
  func.func @transform_9(%arg0: i32) -> (i32, i32) {
    %c0_i32 = arith.constant 0 : i32
    %c0_i32_0 = arith.constant 0 : i32
    return %arg0, %c0_i32 : i32, i32
  }
}

module attributes {stable_mosaic.version = 11 : i64} {
  func.func @_deconv_kernel(%arg0: i32, %arg1: memref<32x64xbf16, #tpu.memory_space<vmem>>, %arg2: memref<32x64xbf16, #tpu.memory_space<vmem>>, %arg3: memref<9x64xf32, #tpu.memory_space<vmem>>, %arg4: memref<2x64xf32, #tpu.memory_space<vmem>>, %arg5: memref<32x64xbf16, #tpu.memory_space<vmem>>, %arg6: memref<32x64xbf16, #tpu.memory_space<vmem>>, %arg7: memref<32x64xbf16, #tpu.memory_space<vmem>>, %arg8: memref<32x64xbf16, #tpu.memory_space<vmem>>) attributes {dimension_semantics = [#tpu.dimension_semantics<parallel>], iteration_bounds = array<i64: 1>, scalar_prefetch = 0 : i64, scratch_operands = 0 : i64, tpu.core_type = #tpu.core_type<tc>, window_params = [{transform_indices = @transform_0, window_bounds = array<i64: 32, 64>}, {transform_indices = @transform_1, window_bounds = array<i64: 32, 64>}, {pipeline_mode = #tpu.pipeline_mode<synchronous>, transform_indices = @transform_2, window_bounds = array<i64: 9, 64>}, {pipeline_mode = #tpu.pipeline_mode<synchronous>, transform_indices = @transform_3, window_bounds = array<i64: 2, 64>}, {transform_indices = @transform_4, window_bounds = array<i64: 32, 64>}, {transform_indices = @transform_5, window_bounds = array<i64: 32, 64>}, {transform_indices = @transform_6, window_bounds = array<i64: 32, 64>}, {transform_indices = @transform_7, window_bounds = array<i64: 32, 64>}]} {
    %c0 = arith.constant 0 : index
    %c0_0 = arith.constant 0 : index
    %0 = vector.load %arg1[%c0, %c0_0] : memref<32x64xbf16, #tpu.memory_space<vmem>>, vector<32x64xbf16>
    %1 = arith.extf %0 : vector<32x64xbf16> to vector<32x64xf32>
    %c0_1 = arith.constant 0 : index
    %c0_2 = arith.constant 0 : index
    %2 = vector.load %arg2[%c0_1, %c0_2] : memref<32x64xbf16, #tpu.memory_space<vmem>>, vector<32x64xbf16>
    %3 = arith.extf %2 : vector<32x64xbf16> to vector<32x64xf32>
    %c0_3 = arith.constant 0 : index
    %c0_4 = arith.constant 0 : index
    %4 = vector.load %arg3[%c0_3, %c0_4] : memref<9x64xf32, #tpu.memory_space<vmem>>, vector<9x64xf32>
    %c0_5 = arith.constant 0 : index
    %c0_6 = arith.constant 0 : index
    %5 = vector.load %arg4[%c0_5, %c0_6] : memref<2x64xf32, #tpu.memory_space<vmem>>, vector<1x64xf32>
    %c1 = arith.constant 1 : index
    %c0_7 = arith.constant 0 : index
    %6 = vector.load %arg4[%c1, %c0_7] : memref<2x64xf32, #tpu.memory_space<vmem>>, vector<1x64xf32>
    %cst = arith.constant 0.000000e+00 : f32
    %7 = vector.broadcast %cst : f32 to vector<32x4xf32>
    %8 = vector.extract_strided_slice %1 {offsets = [0, 4], sizes = [32, 60], strides = [1, 1]} : vector<32x64xf32> to vector<32x60xf32>
    %9 = tpu.concatenate %8, %7 in 1 : vector<32x60xf32>, vector<32x4xf32> -> vector<32x64xf32>
    %10 = vector.extract_strided_slice %3 {offsets = [0, 4], sizes = [32, 60], strides = [1, 1]} : vector<32x64xf32> to vector<32x60xf32>
    %11 = tpu.concatenate %10, %7 in 1 : vector<32x60xf32>, vector<32x4xf32> -> vector<32x64xf32>
    %12 = vector.extract_strided_slice %4 {offsets = [4, 0], sizes = [1, 64], strides = [1, 1]} : vector<9x64xf32> to vector<1x64xf32>
    %13 = vector.broadcast %12 : vector<1x64xf32> to vector<32x64xf32>
    %14 = arith.mulf %1, %13 : vector<32x64xf32>
    %15 = vector.broadcast %5 : vector<1x64xf32> to vector<32x64xf32>
    %16 = arith.mulf %14, %15 : vector<32x64xf32>
    %17 = vector.broadcast %6 : vector<1x64xf32> to vector<32x64xf32>
    %18 = arith.addf %16, %17 : vector<32x64xf32>
    %cst_8 = arith.constant 3.000000e+00 : f32
    %19 = vector.broadcast %cst_8 : f32 to vector<32x64xf32>
    %20 = arith.addf %18, %19 : vector<32x64xf32>
    %cst_9 = arith.constant 0.000000e+00 : f32
    %cst_10 = arith.constant 6.000000e+00 : f32
    %21 = vector.broadcast %cst_9 : f32 to vector<32x64xf32>
    %22 = arith.maximumf %21, %20 : vector<32x64xf32>
    %23 = vector.broadcast %cst_10 : f32 to vector<32x64xf32>
    %24 = arith.minimumf %23, %22 : vector<32x64xf32>
    %25 = arith.mulf %18, %24 : vector<32x64xf32>
    %cst_11 = arith.constant 0.166666672 : f32
    %26 = vector.broadcast %cst_11 : f32 to vector<32x64xf32>
    %27 = arith.mulf %25, %26 : vector<32x64xf32>
    %28 = vector.extract_strided_slice %4 {offsets = [3, 0], sizes = [1, 64], strides = [1, 1]} : vector<9x64xf32> to vector<1x64xf32>
    %29 = vector.broadcast %28 : vector<1x64xf32> to vector<32x64xf32>
    %30 = arith.mulf %9, %29 : vector<32x64xf32>
    %31 = vector.extract_strided_slice %4 {offsets = [5, 0], sizes = [1, 64], strides = [1, 1]} : vector<9x64xf32> to vector<1x64xf32>
    %32 = vector.broadcast %31 : vector<1x64xf32> to vector<32x64xf32>
    %33 = arith.mulf %1, %32 : vector<32x64xf32>
    %34 = arith.addf %30, %33 : vector<32x64xf32>
    %35 = vector.broadcast %5 : vector<1x64xf32> to vector<32x64xf32>
    %36 = arith.mulf %34, %35 : vector<32x64xf32>
    %37 = vector.broadcast %6 : vector<1x64xf32> to vector<32x64xf32>
    %38 = arith.addf %36, %37 : vector<32x64xf32>
    %cst_12 = arith.constant 3.000000e+00 : f32
    %39 = vector.broadcast %cst_12 : f32 to vector<32x64xf32>
    %40 = arith.addf %38, %39 : vector<32x64xf32>
    %cst_13 = arith.constant 0.000000e+00 : f32
    %cst_14 = arith.constant 6.000000e+00 : f32
    %41 = vector.broadcast %cst_13 : f32 to vector<32x64xf32>
    %42 = arith.maximumf %41, %40 : vector<32x64xf32>
    %43 = vector.broadcast %cst_14 : f32 to vector<32x64xf32>
    %44 = arith.minimumf %43, %42 : vector<32x64xf32>
    %45 = arith.mulf %38, %44 : vector<32x64xf32>
    %cst_15 = arith.constant 0.166666672 : f32
    %46 = vector.broadcast %cst_15 : f32 to vector<32x64xf32>
    %47 = arith.mulf %45, %46 : vector<32x64xf32>
    %48 = vector.extract_strided_slice %4 {offsets = [1, 0], sizes = [1, 64], strides = [1, 1]} : vector<9x64xf32> to vector<1x64xf32>
    %49 = vector.broadcast %48 : vector<1x64xf32> to vector<32x64xf32>
    %50 = arith.mulf %3, %49 : vector<32x64xf32>
    %51 = vector.extract_strided_slice %4 {offsets = [7, 0], sizes = [1, 64], strides = [1, 1]} : vector<9x64xf32> to vector<1x64xf32>
    %52 = vector.broadcast %51 : vector<1x64xf32> to vector<32x64xf32>
    %53 = arith.mulf %1, %52 : vector<32x64xf32>
    %54 = arith.addf %50, %53 : vector<32x64xf32>
    %55 = vector.broadcast %5 : vector<1x64xf32> to vector<32x64xf32>
    %56 = arith.mulf %54, %55 : vector<32x64xf32>
    %57 = vector.broadcast %6 : vector<1x64xf32> to vector<32x64xf32>
    %58 = arith.addf %56, %57 : vector<32x64xf32>
    %cst_16 = arith.constant 3.000000e+00 : f32
    %59 = vector.broadcast %cst_16 : f32 to vector<32x64xf32>
    %60 = arith.addf %58, %59 : vector<32x64xf32>
    %cst_17 = arith.constant 0.000000e+00 : f32
    %cst_18 = arith.constant 6.000000e+00 : f32
    %61 = vector.broadcast %cst_17 : f32 to vector<32x64xf32>
    %62 = arith.maximumf %61, %60 : vector<32x64xf32>
    %63 = vector.broadcast %cst_18 : f32 to vector<32x64xf32>
    %64 = arith.minimumf %63, %62 : vector<32x64xf32>
    %65 = arith.mulf %58, %64 : vector<32x64xf32>
    %cst_19 = arith.constant 0.166666672 : f32
    %66 = vector.broadcast %cst_19 : f32 to vector<32x64xf32>
    %67 = arith.mulf %65, %66 : vector<32x64xf32>
    %68 = vector.extract_strided_slice %4 {offsets = [0, 0], sizes = [1, 64], strides = [1, 1]} : vector<9x64xf32> to vector<1x64xf32>
    %69 = vector.broadcast %68 : vector<1x64xf32> to vector<32x64xf32>
    %70 = arith.mulf %11, %69 : vector<32x64xf32>
    %71 = vector.extract_strided_slice %4 {offsets = [2, 0], sizes = [1, 64], strides = [1, 1]} : vector<9x64xf32> to vector<1x64xf32>
    %72 = vector.broadcast %71 : vector<1x64xf32> to vector<32x64xf32>
    %73 = arith.mulf %3, %72 : vector<32x64xf32>
    %74 = arith.addf %70, %73 : vector<32x64xf32>
    %75 = vector.extract_strided_slice %4 {offsets = [6, 0], sizes = [1, 64], strides = [1, 1]} : vector<9x64xf32> to vector<1x64xf32>
    %76 = vector.broadcast %75 : vector<1x64xf32> to vector<32x64xf32>
    %77 = arith.mulf %9, %76 : vector<32x64xf32>
    %78 = arith.addf %74, %77 : vector<32x64xf32>
    %79 = vector.extract_strided_slice %4 {offsets = [8, 0], sizes = [1, 64], strides = [1, 1]} : vector<9x64xf32> to vector<1x64xf32>
    %80 = vector.broadcast %79 : vector<1x64xf32> to vector<32x64xf32>
    %81 = arith.mulf %1, %80 : vector<32x64xf32>
    %82 = arith.addf %78, %81 : vector<32x64xf32>
    %83 = vector.broadcast %5 : vector<1x64xf32> to vector<32x64xf32>
    %84 = arith.mulf %82, %83 : vector<32x64xf32>
    %85 = vector.broadcast %6 : vector<1x64xf32> to vector<32x64xf32>
    %86 = arith.addf %84, %85 : vector<32x64xf32>
    %cst_20 = arith.constant 3.000000e+00 : f32
    %87 = vector.broadcast %cst_20 : f32 to vector<32x64xf32>
    %88 = arith.addf %86, %87 : vector<32x64xf32>
    %cst_21 = arith.constant 0.000000e+00 : f32
    %cst_22 = arith.constant 6.000000e+00 : f32
    %89 = vector.broadcast %cst_21 : f32 to vector<32x64xf32>
    %90 = arith.maximumf %89, %88 : vector<32x64xf32>
    %91 = vector.broadcast %cst_22 : f32 to vector<32x64xf32>
    %92 = arith.minimumf %91, %90 : vector<32x64xf32>
    %93 = arith.mulf %86, %92 : vector<32x64xf32>
    %cst_23 = arith.constant 0.166666672 : f32
    %94 = vector.broadcast %cst_23 : f32 to vector<32x64xf32>
    %95 = arith.mulf %93, %94 : vector<32x64xf32>
    %96 = arith.truncf %27 : vector<32x64xf32> to vector<32x64xbf16>
    %c0_24 = arith.constant 0 : index
    %c0_25 = arith.constant 0 : index
    %97 = vector.load %arg5[%c0_24, %c0_25] : memref<32x64xbf16, #tpu.memory_space<vmem>>, vector<32x64xbf16>
    tpu.vector_store %arg5[%c0_24, %c0_25], %96 {strides = array<i32>} : memref<32x64xbf16, #tpu.memory_space<vmem>>, vector<32x64xbf16>,
    %98 = arith.truncf %47 : vector<32x64xf32> to vector<32x64xbf16>
    %c0_26 = arith.constant 0 : index
    %c0_27 = arith.constant 0 : index
    %99 = vector.load %arg6[%c0_26, %c0_27] : memref<32x64xbf16, #tpu.memory_space<vmem>>, vector<32x64xbf16>
    tpu.vector_store %arg6[%c0_26, %c0_27], %98 {strides = array<i32>} : memref<32x64xbf16, #tpu.memory_space<vmem>>, vector<32x64xbf16>,
    %100 = arith.truncf %67 : vector<32x64xf32> to vector<32x64xbf16>
    %c0_28 = arith.constant 0 : index
    %c0_29 = arith.constant 0 : index
    %101 = vector.load %arg7[%c0_28, %c0_29] : memref<32x64xbf16, #tpu.memory_space<vmem>>, vector<32x64xbf16>
    tpu.vector_store %arg7[%c0_28, %c0_29], %100 {strides = array<i32>} : memref<32x64xbf16, #tpu.memory_space<vmem>>, vector<32x64xbf16>,
    %102 = arith.truncf %95 : vector<32x64xf32> to vector<32x64xbf16>
    %c0_30 = arith.constant 0 : index
    %c0_31 = arith.constant 0 : index
    %103 = vector.load %arg8[%c0_30, %c0_31] : memref<32x64xbf16, #tpu.memory_space<vmem>>, vector<32x64xbf16>
    tpu.vector_store %arg8[%c0_30, %c0_31], %102 {strides = array<i32>} : memref<32x64xbf16, #tpu.memory_space<vmem>>, vector<32x64xbf16>,
    return
  }
  func.func @transform_0(%arg0: i32) -> (i32, i32) {
    %c0_i32 = arith.constant 0 : i32
    %c0_i32_0 = arith.constant 0 : i32
    return %arg0, %c0_i32 : i32, i32
  }
  func.func @transform_1(%arg0: i32) -> (i32, i32) {
    %c0_i32 = arith.constant 0 : i32
    %c0_i32_0 = arith.constant 0 : i32
    return %arg0, %c0_i32 : i32, i32
  }
  func.func @transform_2(%arg0: i32) -> (i32, i32) {
    %c0_i32 = arith.constant 0 : i32
    %c0_i32_0 = arith.constant 0 : i32
    %c0_i32_1 = arith.constant 0 : i32
    return %c0_i32, %c0_i32_0 : i32, i32
  }
  func.func @transform_3(%arg0: i32) -> (i32, i32) {
    %c0_i32 = arith.constant 0 : i32
    %c0_i32_0 = arith.constant 0 : i32
    %c0_i32_1 = arith.constant 0 : i32
    return %c0_i32, %c0_i32_0 : i32, i32
  }
  func.func @transform_4(%arg0: i32) -> (i32, i32) {
    %c0_i32 = arith.constant 0 : i32
    %c0_i32_0 = arith.constant 0 : i32
    return %arg0, %c0_i32 : i32, i32
  }
  func.func @transform_5(%arg0: i32) -> (i32, i32) {
    %c0_i32 = arith.constant 0 : i32
    %c0_i32_0 = arith.constant 0 : i32
    return %arg0, %c0_i32 : i32, i32
  }
  func.func @transform_6(%arg0: i32) -> (i32, i32) {
    %c0_i32 = arith.constant 0 : i32
    %c0_i32_0 = arith.constant 0 : i32
    return %arg0, %c0_i32 : i32, i32
  }
  func.func @transform_7(%arg0: i32) -> (i32, i32) {
    %c0_i32 = arith.constant 0 : i32
    %c0_i32_0 = arith.constant 0 : i32
    return %arg0, %c0_i32 : i32, i32
  }
}

module attributes {stable_mosaic.version = 11 : i64} {
  func.func @_bilerp_kernel(%arg0: i32, %arg1: memref<32x64xf32, #tpu.memory_space<vmem>>, %arg2: memref<32x64xf32, #tpu.memory_space<vmem>>, %arg3: memref<32x64xf32, #tpu.memory_space<vmem>>, %arg4: memref<32x64xf32, #tpu.memory_space<vmem>>, %arg5: memref<32x64xf32, #tpu.memory_space<vmem>>, %arg6: memref<32x64xf32, #tpu.memory_space<vmem>>, %arg7: memref<32x64xf32, #tpu.memory_space<vmem>>) attributes {dimension_semantics = [#tpu.dimension_semantics<parallel>], iteration_bounds = array<i64: 1>, scalar_prefetch = 0 : i64, scratch_operands = 0 : i64, tpu.core_type = #tpu.core_type<tc>, window_params = [{transform_indices = @transform_0, window_bounds = array<i64: 32, 64>}, {transform_indices = @transform_1, window_bounds = array<i64: 32, 64>}, {transform_indices = @transform_2, window_bounds = array<i64: 32, 64>}, {transform_indices = @transform_3, window_bounds = array<i64: 32, 64>}, {transform_indices = @transform_4, window_bounds = array<i64: 32, 64>}, {transform_indices = @transform_5, window_bounds = array<i64: 32, 64>}, {transform_indices = @transform_6, window_bounds = array<i64: 32, 64>}]} {
    %c0 = arith.constant 0 : index
    %c0_0 = arith.constant 0 : index
    %0 = vector.load %arg1[%c0, %c0_0] : memref<32x64xf32, #tpu.memory_space<vmem>>, vector<32x64xf32>
    %c0_1 = arith.constant 0 : index
    %c0_2 = arith.constant 0 : index
    %1 = vector.load %arg2[%c0_1, %c0_2] : memref<32x64xf32, #tpu.memory_space<vmem>>, vector<32x64xf32>
    %c0_3 = arith.constant 0 : index
    %c0_4 = arith.constant 0 : index
    %2 = vector.load %arg3[%c0_3, %c0_4] : memref<32x64xf32, #tpu.memory_space<vmem>>, vector<32x64xf32>
    %cst = arith.constant 2.500000e-01 : f32
    %3 = vector.broadcast %cst : f32 to vector<32x64xf32>
    %4 = arith.mulf %3, %1 : vector<32x64xf32>
    %cst_5 = arith.constant 7.500000e-01 : f32
    %5 = vector.broadcast %cst_5 : f32 to vector<32x64xf32>
    %6 = arith.mulf %5, %0 : vector<32x64xf32>
    %7 = arith.addf %4, %6 : vector<32x64xf32>
    %cst_6 = arith.constant 7.500000e-01 : f32
    %8 = vector.broadcast %cst_6 : f32 to vector<32x64xf32>
    %9 = arith.mulf %8, %0 : vector<32x64xf32>
    %cst_7 = arith.constant 2.500000e-01 : f32
    %10 = vector.broadcast %cst_7 : f32 to vector<32x64xf32>
    %11 = arith.mulf %10, %2 : vector<32x64xf32>
    %12 = arith.addf %9, %11 : vector<32x64xf32>
    %13 = vector.extract_strided_slice %7 {offsets = [0, 0], sizes = [32, 4], strides = [1, 1]} : vector<32x64xf32> to vector<32x4xf32>
    %14 = vector.extract_strided_slice %7 {offsets = [0, 0], sizes = [32, 60], strides = [1, 1]} : vector<32x64xf32> to vector<32x60xf32>
    %15 = tpu.concatenate %13, %14 in 1 : vector<32x4xf32>, vector<32x60xf32> -> vector<32x64xf32>
    %cst_8 = arith.constant 2.500000e-01 : f32
    %16 = vector.broadcast %cst_8 : f32 to vector<32x64xf32>
    %17 = arith.mulf %16, %15 : vector<32x64xf32>
    %cst_9 = arith.constant 7.500000e-01 : f32
    %18 = vector.broadcast %cst_9 : f32 to vector<32x64xf32>
    %19 = arith.mulf %18, %7 : vector<32x64xf32>
    %20 = arith.addf %17, %19 : vector<32x64xf32>
    %cst_10 = arith.constant 7.500000e-01 : f32
    %21 = vector.broadcast %cst_10 : f32 to vector<32x64xf32>
    %22 = arith.mulf %21, %7 : vector<32x64xf32>
    %23 = vector.extract_strided_slice %7 {offsets = [0, 4], sizes = [32, 60], strides = [1, 1]} : vector<32x64xf32> to vector<32x60xf32>
    %24 = vector.extract_strided_slice %7 {offsets = [0, 60], sizes = [32, 4], strides = [1, 1]} : vector<32x64xf32> to vector<32x4xf32>
    %25 = tpu.concatenate %23, %24 in 1 : vector<32x60xf32>, vector<32x4xf32> -> vector<32x64xf32>
    %cst_11 = arith.constant 2.500000e-01 : f32
    %26 = vector.broadcast %cst_11 : f32 to vector<32x64xf32>
    %27 = arith.mulf %26, %25 : vector<32x64xf32>
    %28 = arith.addf %22, %27 : vector<32x64xf32>
    %29 = vector.extract_strided_slice %12 {offsets = [0, 0], sizes = [32, 4], strides = [1, 1]} : vector<32x64xf32> to vector<32x4xf32>
    %30 = vector.extract_strided_slice %12 {offsets = [0, 0], sizes = [32, 60], strides = [1, 1]} : vector<32x64xf32> to vector<32x60xf32>
    %31 = tpu.concatenate %29, %30 in 1 : vector<32x4xf32>, vector<32x60xf32> -> vector<32x64xf32>
    %cst_12 = arith.constant 2.500000e-01 : f32
    %32 = vector.broadcast %cst_12 : f32 to vector<32x64xf32>
    %33 = arith.mulf %32, %31 : vector<32x64xf32>
    %cst_13 = arith.constant 7.500000e-01 : f32
    %34 = vector.broadcast %cst_13 : f32 to vector<32x64xf32>
    %35 = arith.mulf %34, %12 : vector<32x64xf32>
    %36 = arith.addf %33, %35 : vector<32x64xf32>
    %cst_14 = arith.constant 7.500000e-01 : f32
    %37 = vector.broadcast %cst_14 : f32 to vector<32x64xf32>
    %38 = arith.mulf %37, %12 : vector<32x64xf32>
    %39 = vector.extract_strided_slice %12 {offsets = [0, 4], sizes = [32, 60], strides = [1, 1]} : vector<32x64xf32> to vector<32x60xf32>
    %40 = vector.extract_strided_slice %12 {offsets = [0, 60], sizes = [32, 4], strides = [1, 1]} : vector<32x64xf32> to vector<32x4xf32>
    %41 = tpu.concatenate %39, %40 in 1 : vector<32x60xf32>, vector<32x4xf32> -> vector<32x64xf32>
    %cst_15 = arith.constant 2.500000e-01 : f32
    %42 = vector.broadcast %cst_15 : f32 to vector<32x64xf32>
    %43 = arith.mulf %42, %41 : vector<32x64xf32>
    %44 = arith.addf %38, %43 : vector<32x64xf32>
    %c0_16 = arith.constant 0 : index
    %c0_17 = arith.constant 0 : index
    %45 = vector.load %arg4[%c0_16, %c0_17] : memref<32x64xf32, #tpu.memory_space<vmem>>, vector<32x64xf32>
    tpu.vector_store %arg4[%c0_16, %c0_17], %20 {strides = array<i32>} : memref<32x64xf32, #tpu.memory_space<vmem>>, vector<32x64xf32>,
    %c0_18 = arith.constant 0 : index
    %c0_19 = arith.constant 0 : index
    %46 = vector.load %arg5[%c0_18, %c0_19] : memref<32x64xf32, #tpu.memory_space<vmem>>, vector<32x64xf32>
    tpu.vector_store %arg5[%c0_18, %c0_19], %28 {strides = array<i32>} : memref<32x64xf32, #tpu.memory_space<vmem>>, vector<32x64xf32>,
    %c0_20 = arith.constant 0 : index
    %c0_21 = arith.constant 0 : index
    %47 = vector.load %arg6[%c0_20, %c0_21] : memref<32x64xf32, #tpu.memory_space<vmem>>, vector<32x64xf32>
    tpu.vector_store %arg6[%c0_20, %c0_21], %36 {strides = array<i32>} : memref<32x64xf32, #tpu.memory_space<vmem>>, vector<32x64xf32>,
    %c0_22 = arith.constant 0 : index
    %c0_23 = arith.constant 0 : index
    %48 = vector.load %arg7[%c0_22, %c0_23] : memref<32x64xf32, #tpu.memory_space<vmem>>, vector<32x64xf32>
    tpu.vector_store %arg7[%c0_22, %c0_23], %44 {strides = array<i32>} : memref<32x64xf32, #tpu.memory_space<vmem>>, vector<32x64xf32>,
    return
  }
  func.func @transform_0(%arg0: i32) -> (i32, i32) {
    %c0_i32 = arith.constant 0 : i32
    %c0_i32_0 = arith.constant 0 : i32
    return %arg0, %c0_i32 : i32, i32
  }
  func.func @transform_1(%arg0: i32) -> (i32, i32) {
    %c0_i32 = arith.constant 0 : i32
    %c0_i32_0 = arith.constant 0 : i32
    return %arg0, %c0_i32 : i32, i32
  }
  func.func @transform_2(%arg0: i32) -> (i32, i32) {
    %c0_i32 = arith.constant 0 : i32
    %c0_i32_0 = arith.constant 0 : i32
    return %arg0, %c0_i32 : i32, i32
  }
  func.func @transform_3(%arg0: i32) -> (i32, i32) {
    %c0_i32 = arith.constant 0 : i32
    %c0_i32_0 = arith.constant 0 : i32
    return %arg0, %c0_i32 : i32, i32
  }
  func.func @transform_4(%arg0: i32) -> (i32, i32) {
    %c0_i32 = arith.constant 0 : i32
    %c0_i32_0 = arith.constant 0 : i32
    return %arg0, %c0_i32 : i32, i32
  }
  func.func @transform_5(%arg0: i32) -> (i32, i32) {
    %c0_i32 = arith.constant 0 : i32
    %c0_i32_0 = arith.constant 0 : i32
    return %arg0, %c0_i32 : i32, i32
  }
  func.func @transform_6(%arg0: i32) -> (i32, i32) {
    %c0_i32 = arith.constant 0 : i32
    %c0_i32_0 = arith.constant 0 : i32
    return %arg0, %c0_i32 : i32, i32
  }
}

module attributes {stable_mosaic.version = 11 : i64} {
  func.func @_proj_cna_kernel(%arg0: i32, %arg1: memref<512x4xbf16, #tpu.memory_space<vmem>>, %arg2: memref<512x4xf32, #tpu.memory_space<vmem>>, %arg3: memref<4x4xbf16, #tpu.memory_space<vmem>>, %arg4: memref<1x4xf32, #tpu.memory_space<vmem>>, %arg5: memref<4x4xbf16, #tpu.memory_space<vmem>>, %arg6: memref<1x4xf32, #tpu.memory_space<vmem>>, %arg7: memref<1x4xf32, #tpu.memory_space<vmem>>, %arg8: memref<512x4xf32, #tpu.memory_space<vmem>>, %arg9: memref<512x4xf32, #tpu.memory_space<vmem>>) attributes {dimension_semantics = [#tpu.dimension_semantics<parallel>], iteration_bounds = array<i64: 4>, scalar_prefetch = 0 : i64, scratch_operands = 0 : i64, tpu.core_type = #tpu.core_type<tc>, window_params = [{transform_indices = @transform_0, window_bounds = array<i64: 512, 4>}, {transform_indices = @transform_1, window_bounds = array<i64: 512, 4>}, {pipeline_mode = #tpu.pipeline_mode<synchronous>, transform_indices = @transform_2, window_bounds = array<i64: 4, 4>}, {pipeline_mode = #tpu.pipeline_mode<synchronous>, transform_indices = @transform_3, window_bounds = array<i64: 1, 4>}, {pipeline_mode = #tpu.pipeline_mode<synchronous>, transform_indices = @transform_4, window_bounds = array<i64: 4, 4>}, {pipeline_mode = #tpu.pipeline_mode<synchronous>, transform_indices = @transform_5, window_bounds = array<i64: 1, 4>}, {pipeline_mode = #tpu.pipeline_mode<synchronous>, transform_indices = @transform_6, window_bounds = array<i64: 1, 4>}, {transform_indices = @transform_7, window_bounds = array<i64: 512, 4>}, {transform_indices = @transform_8, window_bounds = array<i64: 512, 4>}]} {
    %c0 = arith.constant 0 : index
    %c0_0 = arith.constant 0 : index
    %0 = vector.load %arg1[%c0, %c0_0] : memref<512x4xbf16, #tpu.memory_space<vmem>>, vector<512x4xbf16>
    %c0_1 = arith.constant 0 : index
    %c0_2 = arith.constant 0 : index
    %1 = vector.load %arg3[%c0_1, %c0_2] : memref<4x4xbf16, #tpu.memory_space<vmem>>, vector<4x4xbf16>
    %cst = arith.constant dense<0.000000e+00> : vector<512x4xf32>
    %2 = tpu.matmul %0, %1, %cst {dimension_numbers = #tpu.dot_dimension_numbers<[1], [0], [0], [1], [0, 0, 1, 1], [], []>} : vector<512x4xbf16>, vector<4x4xbf16>, vector<512x4xf32> -> vector<512x4xf32>
    %c0_3 = arith.constant 0 : index
    %c0_4 = arith.constant 0 : index
    %3 = vector.load %arg4[%c0_3, %c0_4] : memref<1x4xf32, #tpu.memory_space<vmem>>, vector<1x4xf32>
    %4 = vector.broadcast %3 : vector<1x4xf32> to vector<512x4xf32>
    %5 = arith.addf %2, %4 : vector<512x4xf32>
    %c0_5 = arith.constant 0 : index
    %c0_6 = arith.constant 0 : index
    %6 = vector.load %arg2[%c0_5, %c0_6] : memref<512x4xf32, #tpu.memory_space<vmem>>, vector<512x4xf32>
    %7 = arith.addf %5, %6 : vector<512x4xf32>
    %c0_7 = arith.constant 0 : index
    %c0_8 = arith.constant 0 : index
    %8 = vector.load %arg8[%c0_7, %c0_8] : memref<512x4xf32, #tpu.memory_space<vmem>>, vector<512x4xf32>
    tpu.vector_store %arg8[%c0_7, %c0_8], %7 {strides = array<i32>} : memref<512x4xf32, #tpu.memory_space<vmem>>, vector<512x4xf32>,
    %9 = arith.truncf %7 : vector<512x4xf32> to vector<512x4xbf16>
    %c0_9 = arith.constant 0 : index
    %c0_10 = arith.constant 0 : index
    %10 = vector.load %arg5[%c0_9, %c0_10] : memref<4x4xbf16, #tpu.memory_space<vmem>>, vector<4x4xbf16>
    %cst_11 = arith.constant dense<0.000000e+00> : vector<512x4xf32>
    %11 = tpu.matmul %9, %10, %cst_11 {dimension_numbers = #tpu.dot_dimension_numbers<[1], [0], [0], [1], [0, 0, 1, 1], [], []>} : vector<512x4xbf16>, vector<4x4xbf16>, vector<512x4xf32> -> vector<512x4xf32>
    %c0_12 = arith.constant 0 : index
    %c0_13 = arith.constant 0 : index
    %12 = vector.load %arg6[%c0_12, %c0_13] : memref<1x4xf32, #tpu.memory_space<vmem>>, vector<1x4xf32>
    %13 = vector.broadcast %12 : vector<1x4xf32> to vector<512x4xf32>
    %14 = arith.mulf %11, %13 : vector<512x4xf32>
    %c0_14 = arith.constant 0 : index
    %c0_15 = arith.constant 0 : index
    %15 = vector.load %arg7[%c0_14, %c0_15] : memref<1x4xf32, #tpu.memory_space<vmem>>, vector<1x4xf32>
    %16 = vector.broadcast %15 : vector<1x4xf32> to vector<512x4xf32>
    %17 = arith.addf %14, %16 : vector<512x4xf32>
    %c0_16 = arith.constant 0 : index
    %c0_17 = arith.constant 0 : index
    %18 = vector.load %arg9[%c0_16, %c0_17] : memref<512x4xf32, #tpu.memory_space<vmem>>, vector<512x4xf32>
    tpu.vector_store %arg9[%c0_16, %c0_17], %17 {strides = array<i32>} : memref<512x4xf32, #tpu.memory_space<vmem>>, vector<512x4xf32>,
    return
  }
  func.func @transform_0(%arg0: i32) -> (i32, i32) {
    %c0_i32 = arith.constant 0 : i32
    %c0_i32_0 = arith.constant 0 : i32
    return %arg0, %c0_i32 : i32, i32
  }
  func.func @transform_1(%arg0: i32) -> (i32, i32) {
    %c0_i32 = arith.constant 0 : i32
    %c0_i32_0 = arith.constant 0 : i32
    return %arg0, %c0_i32 : i32, i32
  }
  func.func @transform_2(%arg0: i32) -> (i32, i32) {
    %c0_i32 = arith.constant 0 : i32
    %c0_i32_0 = arith.constant 0 : i32
    %c0_i32_1 = arith.constant 0 : i32
    return %c0_i32, %c0_i32_0 : i32, i32
  }
  func.func @transform_3(%arg0: i32) -> (i32, i32) {
    %c0_i32 = arith.constant 0 : i32
    %c0_i32_0 = arith.constant 0 : i32
    %c0_i32_1 = arith.constant 0 : i32
    return %c0_i32, %c0_i32_0 : i32, i32
  }
  func.func @transform_4(%arg0: i32) -> (i32, i32) {
    %c0_i32 = arith.constant 0 : i32
    %c0_i32_0 = arith.constant 0 : i32
    %c0_i32_1 = arith.constant 0 : i32
    return %c0_i32, %c0_i32_0 : i32, i32
  }
  func.func @transform_5(%arg0: i32) -> (i32, i32) {
    %c0_i32 = arith.constant 0 : i32
    %c0_i32_0 = arith.constant 0 : i32
    %c0_i32_1 = arith.constant 0 : i32
    return %c0_i32, %c0_i32_0 : i32, i32
  }
  func.func @transform_6(%arg0: i32) -> (i32, i32) {
    %c0_i32 = arith.constant 0 : i32
    %c0_i32_0 = arith.constant 0 : i32
    %c0_i32_1 = arith.constant 0 : i32
    return %c0_i32, %c0_i32_0 : i32, i32
  }
  func.func @transform_7(%arg0: i32) -> (i32, i32) {
    %c0_i32 = arith.constant 0 : i32
    %c0_i32_0 = arith.constant 0 : i32
    return %arg0, %c0_i32 : i32, i32
  }
  func.func @transform_8(%arg0: i32) -> (i32, i32) {
    %c0_i32 = arith.constant 0 : i32
    %c0_i32_0 = arith.constant 0 : i32
    return %arg0, %c0_i32 : i32, i32
  }
}

</mosaic_0001>

<bundles_post_ra>
// kernel: tile.30
= control target key start
LH: loop header
LB: loop body
LE: loop exit
PB: predicated region body
PF: predicated region fallthrough
CT: control target
= control target key end

     0   :  { %s22_s0 = inlined_call_operand.vmem [shape: f32[8], index: 0, kind: input, shape index: {}]   ;;  %s23_s1 = inlined_call_operand.vmem [shape: f32[8,8], index: 1, kind: output, shape index: {}]  }
   0x1   :  { %v4_v0 = vld [vmem:[%s22_s0] ss:$0 sm:$0xff] }
   0x2   :  { %5 = vst [vmem:[%s23_s1] sm:$0xff] %v4_v0 }

// kernel: tile.42
= control target key start
LH: loop header
LB: loop body
LE: loop exit
PB: predicated region body
PF: predicated region fallthrough
CT: control target
= control target key end

     0   :  { %s28_s0 = inlined_call_operand.vmem [shape: f32[4], index: 0, kind: input, shape index: {}]   ;;  %s29_s1 = inlined_call_operand.vmem [shape: f32[16,4], index: 1, kind: output, shape index: {}]  }
   0x1   :  { %v4_v0 = vld [vmem:[%s28_s0] ss:$0 sm:$0xff] }
   0x2   :  { %5 = vst [vmem:[%s29_s1] sm:$0xff] %v4_v0  ;;  %8 = vst [vmem:[%s29_s1 + $0x8] sm:$0xff] %v4_v0 }

// kernel: tile.34
= control target key start
LH: loop header
LB: loop body
LE: loop exit
PB: predicated region body
PF: predicated region fallthrough
CT: control target
= control target key end

     0   :  { %s69_s10 = smov 56   ;;  %s70_s11 = smov 40   ;;  %vm3_vm0 = vcmask 64512   ;;  %vm9_vm1 = vcmask 523712   ;;  %vm15_vm2 = vcmask 458112   ;;  %vm21_vm3 = vcmask 392512   ;;  %s113_s0 = inlined_call_operand.vmem [shape: f32[8,8], index: 0, kind: input, shape index: {}]   ;;  %s114_s1 = inlined_call_operand.vmem [shape: f32[1,64], index: 1, kind: output, shape index: {}]  }
   0x1   :  { %v55_v0 = vld [vmem:[%s113_s0 + $0x7] sm:$0x1]   ;;  %v57_v1 = vld [vmem:[%s113_s0 + $0x5] sm:$0x1]   ;;  %v56_v2 = vld [vmem:[%s113_s0 + $0x6] sm:$0x1]  }
   0x2   :  { %7 = vrot.lane.b32.xlu0 %v55_v0, %s69_s10  ;;  %19 = vrot.lane.b32.xlu1 %v57_v1, %s70_s11  ;;  %v58_v3 = vld [vmem:[%s113_s0 + $0x4] sm:$0x1]   ;;  %v2_v4 = vld [vmem:[%s113_s0] sm:$0x1]   ;;  %s71_s18 = smov 48   ;;  %s72_s19 = smov 32  }
   0x3   :  { %4 = vst.msk [vmem:[#allocation0] sm:$0x1] %vm3_vm0, %v2_v4   ;;  %v59_v5 = vld [vmem:[%s113_s0 + $0x3] sm:$0x1]   ;;  %v60_v6 = vld [vmem:[%s113_s0 + $0x2] sm:$0x1]  }
   0x4   :  { %s73_s24 = smov 24   ;;  %s74_s25 = smov 16   ;;  %v61_v7 = vld [vmem:[%s113_s0 + $0x1] sm:$0x1]   ;;  %vm27_vm4 = vcmask 326912   ;;  %vm33_vm5 = vcmask 261312  }
   0x5   :  { %s75_s0 = smov 8   ;;  %vm39_vm6 = vcmask 195712   ;;  %vm45_vm7 = vcmask 130112  }
   0x6   :  { %13 = vrot.lane.b32.xlu0 %v56_v2, %s71_s18  ;;  %25 = vrot.lane.b32.xlu1 %v58_v3, %s72_s19 }
   0xa   :  { %31 = vrot.lane.b32.xlu0 %v59_v5, %s73_s24  ;;  %37 = vrot.lane.b32.xlu1 %v60_v6, %s74_s25 }
   0xe   :  { %43 = vrot.lane.b32.xlu0 %v61_v7, %s75_s0 }
  0x74   :  { %v8_v8 = vpop.permute.xlu0 %7   ;;  %v20_v9 = vpop.permute.xlu1 %19  }
  0x75   :  { %10 = vst.msk [vmem:[#allocation0] sm:$0x1] %vm9_vm1, %v8_v8  }
  0x78   :  { %v14_v10 = vpop.permute.xlu0 %13   ;;  %v26_v11 = vpop.permute.xlu1 %25  }
  0x79   :  { %16 = vst.msk [vmem:[#allocation0] sm:$0x1] %vm15_vm2, %v14_v10  }
  0x7a   :  { %22 = vst.msk [vmem:[#allocation0] sm:$0x1] %vm21_vm3, %v20_v9  }
  0x7b   :  { %28 = vst.msk [vmem:[#allocation0] sm:$0x1] %vm27_vm4, %v26_v11  }
  0x7c   :  { %v32_v12 = vpop.permute.xlu0 %31   ;;  %v38_v13 = vpop.permute.xlu1 %37  }
  0x7d   :  { %34 = vst.msk [vmem:[#allocation0] sm:$0x1] %vm33_vm5, %v32_v12  }
  0x7e   :  { %40 = vst.msk [vmem:[#allocation0] sm:$0x1] %vm39_vm6, %v38_v13  }
  0x80   :  { %v44_v14 = vpop.permute.xlu0 %43  }
  0x81   :  { %46 = vst.msk [vmem:[#allocation0] sm:$0x1] %vm45_vm7, %v44_v14  }
  0x88   :  { %v51_v15 = vld [vmem:[#allocation0] sm:$0x1] }
  0x89   :  { %54 = vst [vmem:[%s114_s1] sm:$0x1] %v51_v15 }

// kernel: tile.46
= control target key start
LH: loop header
LB: loop body
LE: loop exit
PB: predicated region body
PF: predicated region fallthrough
CT: control target
= control target key end

     0   :  { %s133_s10 = smov 60   ;;  %s134_s11 = smov 52   ;;  %vm3_vm0 = vcmask 31744   ;;  %vm9_vm1 = vcmask 523744   ;;  %vm15_vm2 = vcmask 490944   ;;  %vm21_vm3 = vcmask 458144   ;;  %s209_s0 = inlined_call_operand.vmem [shape: f32[16,4], index: 0, kind: input, shape index: {}]   ;;  %s210_s1 = inlined_call_operand.vmem [shape: f32[1,64], index: 1, kind: output, shape index: {}]  }
   0x1   :  { %v103_v0 = vld [vmem:[%s209_s0 + $0xf] sm:$0x1]   ;;  %v105_v1 = vld [vmem:[%s209_s0 + $0xd] sm:$0x1]   ;;  %v104_v2 = vld [vmem:[%s209_s0 + $0xe] sm:$0x1]  }
   0x2   :  { %7 = vrot.lane.b32.xlu0 %v103_v0, %s133_s10  ;;  %19 = vrot.lane.b32.xlu1 %v105_v1, %s134_s11  ;;  %v106_v3 = vld [vmem:[%s209_s0 + $0xc] sm:$0x1]   ;;  %s135_s16 = smov 56   ;;  %s136_s17 = smov 48   ;;  %v107_v4 = vld [vmem:[%s209_s0 + $0xb] sm:$0x1]  }
   0x3   :  { %v108_v5 = vld [vmem:[%s209_s0 + $0xa] sm:$0x1]   ;;  %v2_v6 = vld [vmem:[%s209_s0] sm:$0x1]   ;;  %s137_s24 = smov 44   ;;  %s138_s25 = smov 40  }
   0x4   :  { %4 = vst.msk [vmem:[#allocation0] sm:$0x1] %vm3_vm0, %v2_v6   ;;  %v109_v7 = vld [vmem:[%s209_s0 + $0x9] sm:$0x1]   ;;  %v110_v8 = vld [vmem:[%s209_s0 + $0x8] sm:$0x1]  }
   0x5   :  { %s139_s30 = smov 36   ;;  %s140_s2 = smov 32   ;;  %v111_v9 = vld [vmem:[%s209_s0 + $0x7] sm:$0x1]   ;;  %v112_v10 = vld [vmem:[%s209_s0 + $0x6] sm:$0x1]  }
   0x6   :  { %13 = vrot.lane.b32.xlu0 %v104_v2, %s135_s16  ;;  %25 = vrot.lane.b32.xlu1 %v106_v3, %s136_s17  ;;  %s141_s7 = smov 28   ;;  %s142_s8 = smov 24   ;;  %v113_v11 = vld [vmem:[%s209_s0 + $0x5] sm:$0x1]   ;;  %v114_v12 = vld [vmem:[%s209_s0 + $0x4] sm:$0x1]  }
   0x7   :  { %s143_s13 = smov 20   ;;  %s144_s14 = smov 16   ;;  %v115_v13 = vld [vmem:[%s209_s0 + $0x3] sm:$0x1]   ;;  %v116_v14 = vld [vmem:[%s209_s0 + $0x2] sm:$0x1]  }
   0x8   :  { %s145_s19 = smov 12   ;;  %s146_s20 = smov 8   ;;  %v117_v15 = vld [vmem:[%s209_s0 + $0x1] sm:$0x1]   ;;  %vm27_vm4 = vcmask 425344   ;;  %vm33_vm5 = vcmask 392544  }
   0x9   :  { %s147_s0 = smov 4   ;;  %vm39_vm6 = vcmask 359744   ;;  %vm45_vm7 = vcmask 326944   ;;  %vm51_vm8 = vcmask 294144   ;;  %vm57_vm9 = vcmask 261344  }
   0xa   :  { %31 = vrot.lane.b32.xlu0 %v107_v4, %s137_s24  ;;  %37 = vrot.lane.b32.xlu1 %v108_v5, %s138_s25  ;;  %vm63_vm10 = vcmask 228544   ;;  %vm69_vm11 = vcmask 195744   ;;  %vm75_vm12 = vcmask 162944   ;;  %vm81_vm13 = vcmask 130144  }
   0xb   :  { %vm87_vm14 = vcmask 97344   ;;  %vm93_vm15 = vcmask 64544  }
   0xe   :  { %43 = vrot.lane.b32.xlu0 %v109_v7, %s139_s30  ;;  %49 = vrot.lane.b32.xlu1 %v110_v8, %s140_s2 }
  0x12   :  { %55 = vrot.lane.b32.xlu0 %v111_v9, %s141_s7  ;;  %61 = vrot.lane.b32.xlu1 %v112_v10, %s142_s8 }
  0x16   :  { %67 = vrot.lane.b32.xlu0 %v113_v11, %s143_s13  ;;  %73 = vrot.lane.b32.xlu1 %v114_v12, %s144_s14 }
  0x1a   :  { %79 = vrot.lane.b32.xlu0 %v115_v13, %s145_s19  ;;  %85 = vrot.lane.b32.xlu1 %v116_v14, %s146_s20 }
  0x1e   :  { %91 = vrot.lane.b32.xlu0 %v117_v15, %s147_s0 }
  0x74   :  { %v8_v16 = vpop.permute.xlu0 %7   ;;  %v20_v17 = vpop.permute.xlu1 %19  }
  0x75   :  { %10 = vst.msk [vmem:[#allocation0] sm:$0x1] %vm9_vm1, %v8_v16  }
  0x78   :  { %v14_v18 = vpop.permute.xlu0 %13   ;;  %v26_v19 = vpop.permute.xlu1 %25  }
  0x79   :  { %16 = vst.msk [vmem:[#allocation0] sm:$0x1] %vm15_vm2, %v14_v18  }
  0x7a   :  { %22 = vst.msk [vmem:[#allocation0] sm:$0x1] %vm21_vm3, %v20_v17  }
  0x7b   :  { %28 = vst.msk [vmem:[#allocation0] sm:$0x1] %vm27_vm4, %v26_v19  }
  0x7c   :  { %v32_v20 = vpop.permute.xlu0 %31   ;;  %v38_v21 = vpop.permute.xlu1 %37  }
  0x7d   :  { %34 = vst.msk [vmem:[#allocation0] sm:$0x1] %vm33_vm5, %v32_v20  }
  0x7e   :  { %40 = vst.msk [vmem:[#allocation0] sm:$0x1] %vm39_vm6, %v38_v21  }
  0x80   :  { %v44_v22 = vpop.permute.xlu0 %43   ;;  %v50_v23 = vpop.permute.xlu1 %49  }
  0x81   :  { %46 = vst.msk [vmem:[#allocation0] sm:$0x1] %vm45_vm7, %v44_v22  }
  0x82   :  { %52 = vst.msk [vmem:[#allocation0] sm:$0x1] %vm51_vm8, %v50_v23  }
  0x84   :  { %v56_v24 = vpop.permute.xlu0 %55   ;;  %v62_v25 = vpop.permute.xlu1 %61  }
  0x85   :  { %58 = vst.msk [vmem:[#allocation0] sm:$0x1] %vm57_vm9, %v56_v24  }
  0x86   :  { %64 = vst.msk [vmem:[#allocation0] sm:$0x1] %vm63_vm10, %v62_v25  }
  0x88   :  { %v68_v26 = vpop.permute.xlu0 %67   ;;  %v74_v27 = vpop.permute.xlu1 %73  }
  0x89   :  { %70 = vst.msk [vmem:[#allocation0] sm:$0x1] %vm69_vm11, %v68_v26  }
  0x8a   :  { %76 = vst.msk [vmem:[#allocation0] sm:$0x1] %vm75_vm12, %v74_v27  }
  0x8c   :  { %v80_v28 = vpop.permute.xlu0 %79   ;;  %v86_v29 = vpop.permute.xlu1 %85  }
  0x8d   :  { %82 = vst.msk [vmem:[#allocation0] sm:$0x1] %vm81_vm13, %v80_v28  }
  0x8e   :  { %88 = vst.msk [vmem:[#allocation0] sm:$0x1] %vm87_vm14, %v86_v29  }
  0x90   :  { %v92_v30 = vpop.permute.xlu0 %91  }
  0x91   :  { %94 = vst.msk [vmem:[#allocation0] sm:$0x1] %vm93_vm15, %v92_v30  }
  0x98   :  { %v99_v31 = vld [vmem:[#allocation0] sm:$0x1] }
  0x99   :  { %102 = vst [vmem:[%s210_s1] sm:$0x1] %v99_v31 }

// kernel: tile.27
= control target key start
LH: loop header
LB: loop body
LE: loop exit
PB: predicated region body
PF: predicated region fallthrough
CT: control target
= control target key end

     0   :  { %vm4_vm0 = vcmask 1047556   ;;  %s169_s14 = smov 48   ;;  %s170_s15 = smov 56   ;;  %vm6_vm1 = vcmask 64512   ;;  %vm21_vm2 = vcmask 523712   ;;  %vm38_vm3 = vcmask 458112   ;;  %s314_s0 = inlined_call_operand.vmem [shape: f32[9,8,8], index: 0, kind: input, shape index: {}]   ;;  %s315_s1 = inlined_call_operand.vmem [shape: f32[9,64], index: 1, kind: output, shape index: {}]  }
   0x1   :  { %v138_v0 = vld [vmem:[%s314_s0 + $0x6] ss:$8 sm:$0xf]   ;;  %v134_v3 = vld [vmem:[%s314_s0 + $0x7] ss:$8 sm:$0xf]  }
   0x2   :  { %v139_v1 = vld [vmem:[%s314_s0 + $0x6] ss:$8 sm:$0xf0]   ;;  %v135_v4 = vld [vmem:[%s314_s0 + $0x7] ss:$8 sm:$0xf0]  }
   0x3   :  { %v35_v2 = vsel %vm4_vm0, %v139_v1, %v138_v0  ;;  %v18_v5 = vsel %vm4_vm0, %v135_v4, %v134_v3  ;;  %v140_v6 = vld [vmem:[%s314_s0 + $0x46] sm:$0x1]   ;;  %v136_v7 = vld [vmem:[%s314_s0 + $0x47] sm:$0x1]   ;;  %v144_v10 = vld [vmem:[%s314_s0 + $0x45] sm:$0x1]  }
   0x4   :  { %36 = vrot.lane.b32.xlu1 %v35_v2, %s169_s14  ;;  %19 = vrot.lane.b32.xlu0 %v18_v5, %s170_s15  ;;  %v142_v8 = vld [vmem:[%s314_s0 + $0x5] ss:$8 sm:$0xf]   ;;  %v146_v12 = vld [vmem:[%s314_s0 + $0x4] ss:$8 sm:$0xf]  }
   0x5   :  { %v143_v9 = vld [vmem:[%s314_s0 + $0x5] ss:$8 sm:$0xf0]   ;;  %v147_v13 = vld [vmem:[%s314_s0 + $0x4] ss:$8 sm:$0xf0]  }
   0x6   :  { %v52_v11 = vsel %vm4_vm0, %v143_v9, %v142_v8  ;;  %s171_s30 = smov 40   ;;  %v148_v14 = vld [vmem:[%s314_s0 + $0x44] sm:$0x1]   ;;  %v2_v15 = vld [vmem:[%s314_s0] ss:$8 sm:$0xf]   ;;  %v69_v18 = vsel %vm4_vm0, %v147_v13, %v146_v12 }
   0x7   :  { %v3_v16 = vld [vmem:[%s314_s0] ss:$8 sm:$0xf0]   ;;  %v150_v20 = vld [vmem:[%s314_s0 + $0x3] ss:$8 sm:$0xf]  }
   0x8   :  { %42 = vrot.lane.b32.xlu1 %v140_v6, %s169_s14  ;;  %25 = vrot.lane.b32.xlu0 %v136_v7, %s170_s15  ;;  %v132_v17 = vld [vmem:[%s314_s0 + $0x40] sm:$0x1]   ;;  %v5_v19 = vsel %vm4_vm0, %v3_v16, %v2_v15  ;;  %v151_v21 = vld [vmem:[%s314_s0 + $0x3] ss:$8 sm:$0xf0]   ;;  %s172_s18 = smov 32  }
   0x9   :  { %133 = vst.msk [vmem:[%s315_s1 + $0x8] sm:$0x1] %vm6_vm1, %v132_v17   ;;  %7 = vst.msk [vmem:[%s315_s1] sm:$0xff] %vm6_vm1, %v5_v19   ;;  %v152_v22 = vld [vmem:[%s314_s0 + $0x43] sm:$0x1]   ;;  %v86_v23 = vsel %vm4_vm0, %v151_v21, %v150_v20  ;;  %s173_s25 = smov 24  }
   0xa   :  { %v154_v24 = vld [vmem:[%s314_s0 + $0x2] ss:$8 sm:$0xf]   ;;  %v158_v28 = vld [vmem:[%s314_s0 + $0x1] ss:$8 sm:$0xf]  }
   0xb   :  { %v155_v25 = vld [vmem:[%s314_s0 + $0x2] ss:$8 sm:$0xf0]   ;;  %v159_v29 = vld [vmem:[%s314_s0 + $0x1] ss:$8 sm:$0xf0]  }
   0xc   :  { %59 = vrot.lane.b32.xlu1 %v144_v10, %s171_s30  ;;  %53 = vrot.lane.b32.xlu0 %v52_v11, %s171_s30  ;;  %v156_v26 = vld [vmem:[%s314_s0 + $0x42] sm:$0x1]   ;;  %v103_v27 = vsel %vm4_vm0, %v155_v25, %v154_v24  ;;  %s174_s3 = smov 16   ;;  %v160_v30 = vld [vmem:[%s314_s0 + $0x41] sm:$0x1]   ;;  %v120_v31 = vsel %vm4_vm0, %v159_v29, %v158_v28  ;;  %s175_s0 = smov 8  }
   0xd   :  { %vm55_vm4 = vcmask 392512   ;;  %vm72_vm5 = vcmask 326912   ;;  %vm89_vm6 = vcmask 261312   ;;  %vm106_vm7 = vcmask 195712  }
   0xe   :  { %vm123_vm8 = vcmask 130112  }
  0x10   :  { %76 = vrot.lane.b32.xlu1 %v148_v14, %s172_s18  ;;  %70 = vrot.lane.b32.xlu0 %v69_v18, %s172_s18 }
  0x14   :  { %93 = vrot.lane.b32.xlu1 %v152_v22, %s173_s25  ;;  %87 = vrot.lane.b32.xlu0 %v86_v23, %s173_s25 }
  0x18   :  { %110 = vrot.lane.b32.xlu1 %v156_v26, %s174_s3  ;;  %104 = vrot.lane.b32.xlu0 %v103_v27, %s174_s3 }
  0x1c   :  { %127 = vrot.lane.b32.xlu1 %v160_v30, %s175_s0  ;;  %121 = vrot.lane.b32.xlu0 %v120_v31, %s175_s0 }
  0x76   :  { %v37_v32 = vpop.permute.xlu1 %36   ;;  %v20_v33 = vpop.permute.xlu0 %19  }
  0x77   :  { %22 = vst.msk [vmem:[%s315_s1] sm:$0xff] %vm21_vm2, %v20_v33  }
  0x78   :  { %39 = vst.msk [vmem:[%s315_s1] sm:$0xff] %vm38_vm3, %v37_v32  }
  0x7a   :  { %v43_v34 = vpop.permute.xlu1 %42   ;;  %v26_v35 = vpop.permute.xlu0 %25  }
  0x7b   :  { %137 = vst.msk [vmem:[%s315_s1 + $0x8] sm:$0x1] %vm21_vm2, %v26_v35  }
  0x7c   :  { %141 = vst.msk [vmem:[%s315_s1 + $0x8] sm:$0x1] %vm38_vm3, %v43_v34  }
  0x7e   :  { %v60_v36 = vpop.permute.xlu1 %59   ;;  %v54_v37 = vpop.permute.xlu0 %53  }
  0x7f   :  { %145 = vst.msk [vmem:[%s315_s1 + $0x8] sm:$0x1] %vm55_vm4, %v60_v36   ;;  %56 = vst.msk [vmem:[%s315_s1] sm:$0xff] %vm55_vm4, %v54_v37  }
  0x82   :  { %v77_v38 = vpop.permute.xlu1 %76   ;;  %v71_v39 = vpop.permute.xlu0 %70  }
  0x83   :  { %149 = vst.msk [vmem:[%s315_s1 + $0x8] sm:$0x1] %vm72_vm5, %v77_v38   ;;  %73 = vst.msk [vmem:[%s315_s1] sm:$0xff] %vm72_vm5, %v71_v39  }
  0x86   :  { %v94_v40 = vpop.permute.xlu1 %93   ;;  %v88_v41 = vpop.permute.xlu0 %87  }
  0x87   :  { %153 = vst.msk [vmem:[%s315_s1 + $0x8] sm:$0x1] %vm89_vm6, %v94_v40   ;;  %90 = vst.msk [vmem:[%s315_s1] sm:$0xff] %vm89_vm6, %v88_v41  }
  0x8a   :  { %v111_v42 = vpop.permute.xlu1 %110   ;;  %v105_v43 = vpop.permute.xlu0 %104  }
  0x8b   :  { %157 = vst.msk [vmem:[%s315_s1 + $0x8] sm:$0x1] %vm106_vm7, %v111_v42   ;;  %107 = vst.msk [vmem:[%s315_s1] sm:$0xff] %vm106_vm7, %v105_v43  }
  0x8e   :  { %v128_v44 = vpop.permute.xlu1 %127   ;;  %v122_v45 = vpop.permute.xlu0 %121  }
  0x8f   :  { %161 = vst.msk [vmem:[%s315_s1 + $0x8] sm:$0x1] %vm123_vm8, %v128_v44   ;;  %124 = vst.msk [vmem:[%s315_s1] sm:$0xff] %vm123_vm8, %v122_v45  }

// kernel: _lambda_.8
= control target key start
LH: loop header
LB: loop body
LE: loop exit
PB: predicated region body
PF: predicated region fallthrough
CT: control target
= control target key end

     0   :  { %v54_v0 = vlaneseq  ;;  %vm190_vm0 = vcmask 519168   ;;  %vm41_vm1 = vcmask 457728   ;;  %s406_s1 = inlined_call_operand.vmem [shape: bf16[16,64], index: 1, kind: input, shape index: {}]   ;;  %s407_s0 = inlined_call_operand.vmem [shape: bf16[16,64], index: 0, kind: input, shape index: {}]   ;;  %s408_s2 = inlined_call_operand.vmem [shape: f32[9,64], index: 2, kind: input, shape index: {}]   ;;  %s409_s3 = inlined_call_operand.vmem [shape: f32[2,64], index: 3, kind: input, shape index: {}]   ;;  %s410_s4 = inlined_call_operand.vmem [shape: bf16[16,64], index: 4, kind: output, shape index: {0}]   ;;  %s411_s6 = inlined_call_operand.vmem [shape: bf16[16,64], index: 6, kind: output, shape index: {2}]   ;;  %s412_s5 = inlined_call_operand.vmem [shape: bf16[16,64], index: 5, kind: output, shape index: {1}]   ;;  %s413_s7 = inlined_call_operand.vmem [shape: bf16[16,64], index: 7, kind: output, shape index: {3}]  }
   0x1   :  { %v263_v1 = vld [vmem:[%s406_s1] sm:$0xff]   ;;  %s277_s1 = smov 120   ;;  %v241_v29 = vld [vmem:[%s408_s2 + $0x8] ss:$0 sm:$0xff] }
   0x2   :  { %v264_v2 = vunpack.c.l.bf16 %v263_v1  ;;  %v265_v3 = vunpack.c.h.bf16 %v263_v1  ;;  %v55_v4 = vshrl.u32 %v54_v0, 7  ;;  %v259_v5 = vld [vmem:[%s407_s0] sm:$0xff]  }
   0x3   :  { %v260_v6 = vunpack.c.l.bf16 %v259_v5  ;;  %v261_v7 = vunpack.c.h.bf16 %v259_v5  ;;  %v29_v8 = vld [vmem:[%s408_s2] sm:$0xff] }
   0x4   :  { %v56_v9 = vsub.s32 4, %v55_v4  ;;  %v112_v10 = vsub.s32 1, %v55_v4  ;;  %v118_v11 = vsub.s32 7, %v55_v4  ;;  %v267_v12 = vpack.i.bf16 %v265_v3, %v264_v2  ;;  %v337_v30 = vld [vmem:[%s409_s3] ss:$0 sm:$0xff] }
   0x5   :  { %v272_v13 = vpack.i.bf16 %v261_v7, %v260_v6  ;;  %v140_v14 = vsub.s32 0, %v55_v4  ;;  %v146_v15 = vsub.s32 2, %v55_v4  ;;  %v84_v16 = vsub.s32 3, %v55_v4  ;;  %v346_v39 = vld [vmem:[%s409_s3 + $0x1] ss:$0 sm:$0xff] }
   0x6   :  { %v57_v17 = vrot.slane %v29_v8, %v56_v9  ;;  %v113_v18 = vrot.slane %v29_v8, %v112_v10  ;;  %v119_v19 = vrot.slane %v29_v8, %v118_v11  ;;  %268 = vrot.lane.b32.xlu0 %v267_v12, %s277_s1  ;;  %v90_v20 = vsub.s32 5, %v55_v4 }
   0x7   :  { %v327_v21 = vrot.slane %v29_v8, %v140_v14  ;;  %v147_v22 = vrot.slane %v29_v8, %v146_v15  ;;  %v329_v23 = vrot.slane %v29_v8, %v84_v16  ;;  %v154_v24 = vsub.s32 6, %v55_v4 }
   0x8   :  { %v115_v25 = vmul.f32 %v265_v3, %v113_v18  ;;  %v58_v26 = vmul.f32 %v260_v6, %v57_v17  ;;  %v59_v27 = vmul.f32 %v261_v7, %v57_v17  ;;  %v114_v28 = vmul.f32 %v264_v2, %v113_v18 }
   0x9   :  { %v120_v31 = vmul.f32 %v260_v6, %v119_v19  ;;  %v121_v32 = vmul.f32 %v261_v7, %v119_v19  ;;  %v149_v33 = vmul.f32 %v265_v3, %v147_v22  ;;  %v148_v34 = vmul.f32 %v264_v2, %v147_v22 }
   0xa   :  { %v64_v35 = vmul.f32 %v337_v30, %v58_v26  ;;  %v65_v36 = vmul.f32 %v337_v30, %v59_v27  ;;  %273 = vrot.lane.b32.xlu0 %v272_v13, %s277_s1  ;;  %v91_v37 = vrot.slane %v29_v8, %v90_v20  ;;  %v341_v38 = vrot.slane %v29_v8, %v154_v24 }
   0xb   :  { %v122_v40 = vadd.f32 %v120_v31, %v114_v28  ;;  %v123_v41 = vadd.f32 %v121_v32, %v115_v25  ;;  %v348_v42 = vmul.f32 %v261_v7, %v241_v29  ;;  %v350_v43 = vmul.f32 %v260_v6, %v241_v29 }
   0xc   :  { %v70_v44 = vadd.f32 %v346_v39, %v64_v35  ;;  %v71_v45 = vadd.f32 %v346_v39, %v65_v36  ;;  %v93_v46 = vmul.f32 %v261_v7, %v91_v37  ;;  %v92_v47 = vmul.f32 %v260_v6, %v91_v37 }
   0xd   :  { %v124_v48 = vmul.f32 %v337_v30, %v122_v40  ;;  %v125_v49 = vmul.f32 %v337_v30, %v123_v41 }
   0xe   :  { %v72_v50 = vadd.f32 3.0, %v70_v44  ;;  %v73_v51 = vadd.f32 3.0, %v71_v45 }
   0xf   :  { %v126_v52 = vadd.f32 %v346_v39, %v124_v48  ;;  %v127_v53 = vadd.f32 %v346_v39, %v125_v49 }
  0x10   :  { %v74_v54 = vmax.f32 %v72_v50, 0.0  ;;  %v75_v55 = vmax.f32 %v73_v51, 0.0 }
  0x11   :  { %v128_v56 = vadd.f32 3.0, %v126_v52  ;;  %v129_v57 = vadd.f32 3.0, %v127_v53 }
  0x12   :  { %v76_v58 = vmin.f32 %v74_v54, 6.0  ;;  %v77_v59 = vmin.f32 %v75_v55, 6.0 }
  0x13   :  { %v130_v60 = vmax.f32 %v128_v56, 0.0  ;;  %v131_v61 = vmax.f32 %v129_v57, 0.0 }
  0x14   :  { %v78_v62 = vmul.f32 %v76_v58, %v70_v44  ;;  %v79_v63 = vmul.f32 %v77_v59, %v71_v45 }
  0x15   :  { %v132_v0 = vmin.f32 %v130_v60, 6.0  ;;  %v133_v1 = vmin.f32 %v131_v61, 6.0 }
  0x16   :  { %v80_v2 = vmul.f32 0.16666667, %v78_v62  ;;  %v81_v3 = vmul.f32 0.16666667, %v79_v63 }
  0x17   :  { %v134_v4 = vmul.f32 %v132_v0, %v126_v52  ;;  %v135_v5 = vmul.f32 %v133_v1, %v127_v53 }
  0x18   :  { %v250_v6 = vpack.c.bf16 %v80_v2, %v80_v2  ;;  %v251_v7 = vpack.c.bf16 %v81_v3, %v81_v3 }
  0x19   :  { %v136_v8 = vmul.f32 0.16666667, %v134_v4  ;;  %v137_v9 = vmul.f32 0.16666667, %v135_v5 }
  0x1a   :  { %191 = vst.msk [vmem:[%s410_s4] sm:$0xf] %vm190_vm0, %v250_v6  ;;  %192 = vst.msk [vmem:[%s410_s4 + $0x4] sm:$0xf] %vm190_vm0, %v251_v7 }
  0x1b   :  { %v254_v10 = vpack.c.bf16 %v136_v8, %v136_v8  ;;  %v255_v11 = vpack.c.bf16 %v137_v9, %v137_v9 }
  0x1d   :  { %211 = vst.msk [vmem:[%s411_s6] sm:$0xf] %vm190_vm0, %v254_v10  ;;  %212 = vst.msk [vmem:[%s411_s6 + $0x4] sm:$0xf] %vm190_vm0, %v255_v11 }
  0x78   :  { %v269_v12 = vpop.permute.xlu0 %268 }
  0x79   :  { %v271_v13 = vunpack.i.h.bf16 %v269_v12  ;;  %v270_v14 = vunpack.i.l.bf16 %v269_v12 }
  0x7b   :  { %v53_v15 = vsel %vm41_vm1, %v271_v13, 0.0  ;;  %v52_v16 = vsel %vm41_vm1, %v270_v14, 0.0 }
  0x7c   :  { %v143_v17 = vmul.f32 %v327_v21, %v53_v15  ;;  %v142_v18 = vmul.f32 %v327_v21, %v52_v16  ;;  %v274_v19 = vpop.permute.xlu0 %273 }
  0x7d   :  { %v276_v20 = vunpack.i.h.bf16 %v274_v19  ;;  %v275_v22 = vunpack.i.l.bf16 %v274_v19 }
  0x7e   :  { %v151_v24 = vadd.f32 %v149_v33, %v143_v17  ;;  %v150_v25 = vadd.f32 %v148_v34, %v142_v18 }
  0x7f   :  { %v43_v26 = vsel %vm41_vm1, %v276_v20, 0.0  ;;  %v42_v27 = vsel %vm41_vm1, %v275_v22, 0.0 }
  0x80   :  { %v87_v28 = vmul.f32 %v329_v23, %v43_v26  ;;  %v157_v29 = vmul.f32 %v341_v38, %v43_v26  ;;  %v86_v31 = vmul.f32 %v329_v23, %v42_v27  ;;  %v156_v32 = vmul.f32 %v341_v38, %v42_v27 }
  0x82   :  { %v95_v35 = vadd.f32 %v93_v46, %v87_v28  ;;  %v159_v36 = vadd.f32 %v157_v29, %v151_v24  ;;  %v94_v37 = vadd.f32 %v92_v47, %v86_v31  ;;  %v158_v40 = vadd.f32 %v156_v32, %v150_v25 }
  0x84   :  { %v97_v21 = vmul.f32 %v337_v30, %v95_v35  ;;  %v167_v41 = vadd.f32 %v348_v42, %v159_v36  ;;  %v96_v33 = vmul.f32 %v337_v30, %v94_v37  ;;  %v166_v34 = vadd.f32 %v350_v43, %v158_v40 }
  0x86   :  { %v99_v44 = vadd.f32 %v346_v39, %v97_v21  ;;  %v169_v45 = vmul.f32 %v337_v30, %v167_v41  ;;  %v98_v23 = vadd.f32 %v346_v39, %v96_v33  ;;  %v168_v38 = vmul.f32 %v337_v30, %v166_v34 }
  0x88   :  { %v101_v46 = vadd.f32 3.0, %v99_v44  ;;  %v171_v47 = vadd.f32 %v346_v39, %v169_v45  ;;  %v100_v48 = vadd.f32 3.0, %v98_v23  ;;  %v170_v49 = vadd.f32 %v346_v39, %v168_v38 }
  0x8a   :  { %v103_v50 = vmax.f32 %v101_v46, 0.0  ;;  %v173_v42 = vadd.f32 3.0, %v171_v47  ;;  %v102_v51 = vmax.f32 %v100_v48, 0.0  ;;  %v172_v52 = vadd.f32 3.0, %v170_v49 }
  0x8c   :  { %v105_v53 = vmin.f32 %v103_v50, 6.0  ;;  %v175_v43 = vmax.f32 %v173_v42, 0.0  ;;  %v104_v54 = vmin.f32 %v102_v51, 6.0  ;;  %v174_v55 = vmax.f32 %v172_v52, 0.0 }
  0x8e   :  { %v107_v56 = vmul.f32 %v105_v53, %v99_v44  ;;  %v177_v57 = vmin.f32 %v175_v43, 6.0  ;;  %v106_v58 = vmul.f32 %v104_v54, %v98_v23  ;;  %v176_v59 = vmin.f32 %v174_v55, 6.0 }
  0x90   :  { %v109_v60 = vmul.f32 0.16666667, %v107_v56  ;;  %v179_v30 = vmul.f32 %v177_v57, %v171_v47  ;;  %v108_v61 = vmul.f32 0.16666667, %v106_v58  ;;  %v178_v62 = vmul.f32 %v176_v59, %v170_v49 }
  0x92   :  { %v181_v63 = vmul.f32 0.16666667, %v179_v30  ;;  %v253_v0 = vpack.c.bf16 %v109_v60, %v109_v60  ;;  %v180_v1 = vmul.f32 0.16666667, %v178_v62  ;;  %v252_v39 = vpack.c.bf16 %v108_v61, %v108_v61 }
  0x94   :  { %202 = vst.msk [vmem:[%s412_s5 + $0x4] sm:$0xf] %vm190_vm0, %v253_v0  ;;  %v257_v2 = vpack.c.bf16 %v181_v63, %v181_v63  ;;  %201 = vst.msk [vmem:[%s412_s5] sm:$0xf] %vm190_vm0, %v252_v39  ;;  %v256_v3 = vpack.c.bf16 %v180_v1, %v180_v1 }
  0x96   :  { %222 = vst.msk [vmem:[%s413_s7 + $0x4] sm:$0xf] %vm190_vm0, %v257_v2  ;;  %221 = vst.msk [vmem:[%s413_s7] sm:$0xf] %vm190_vm0, %v256_v3 }

// kernel: _lambda_.7
= control target key start
LH: loop header
LB: loop body
LE: loop exit
PB: predicated region body
PF: predicated region fallthrough
CT: control target
= control target key end

     0   :  { %vm100_vm0 = vcmask 130048   ;;  %vm377_vm1 = vcmask 1041408   ;;  %vm222_vm2 = vcmask 31744   ;;  %vm668_vm3 = vcmask 60416   ;;  %s1131_s1 = inlined_call_operand.vmem [shape: bf16[16,4], index: 1, kind: input, shape index: {}]   ;;  %s1132_s0 = inlined_call_operand.vmem [shape: bf16[128,16], index: 0, kind: input, shape index: {}]   ;;  %s1133_s3 = inlined_call_operand.vmem [shape: bf16[16,8], index: 3, kind: input, shape index: {}]   ;;  %s1134_s4 = inlined_call_operand.vmem [shape: bf16[4,8], index: 4, kind: input, shape index: {}]   ;;  %s1135_s2 = inlined_call_operand.vmem [shape: f32[1,4], index: 2, kind: input, shape index: {}]   ;;  %s1136_s7 = inlined_call_operand.vmem [shape: f32[128,4], index: 7, kind: output, shape index: {0}]   ;;  %s1137_s5 = inlined_call_operand.vmem [shape: f32[1,8], index: 5, kind: input, shape index: {}]   ;;  %s1138_s6 = inlined_call_operand.vmem [shape: f32[1,8], index: 6, kind: input, shape index: {}]   ;;  %s1139_s8 = inlined_call_operand.vmem [shape: bf16[128,8], index: 8, kind: output, shape index: {1}]  }
   0x1   :  { %v846_v0 = vld [vmem:[%s1131_s1] sm:$0xff]   ;;  %v848_v2 = vld [vmem:[%s1132_s0 + $0x8] sm:$0xff]   ;;  %v849_v3 = vld [vmem:[%s1132_s0 + $0x10] sm:$0xff]  }
   0x2   :  { %v847_v1 = vld [vmem:[%s1132_s0] sm:$0xff]   ;;  %789 = vmatprep.subr.bf16.mxu0 %v846_v0  ;;  %843 = vmatprep.subr.bf16.mxu1 %v846_v0  ;;  %v852_v5 = vld [vmem:[%s1132_s0 + $0x28] sm:$0xff]   ;;  %v853_v6 = vld [vmem:[%s1132_s0 + $0x30] sm:$0xff]  }
   0x3   :  { %790 = vmatpush3.bf16.msra.mxu0 %v846_v0  ;;  %791 = vmatprep.mubr.msk.bf16.mxu0 %vm100_vm0, %v847_v1  ;;  %v851_v4 = vld [vmem:[%s1132_s0 + $0x20] sm:$0xff]   ;;  %v850_v8 = vld [vmem:[%s1132_s0 + $0x18] sm:$0xff]  }
   0x4   :  { %844 = vmatpush3.bf16.msra.mxu1 %v846_v0  ;;  %799 = vmatprep.mubr.msk.bf16.mxu1 %vm100_vm0, %v851_v4  ;;  %v855_v7 = vld [vmem:[%s1133_s3] sm:$0xff]   ;;  %v854_v11 = vld [vmem:[%s1132_s0 + $0x38] sm:$0xff]  }
   0x5   :  { %v247_v9 = vld [vmem:[%s1134_s4] sm:$0x3]  ;;  %807 = vmatprep.subr.bf16.mxu1 %v855_v7 }
   0x6   :  { %792 = vmatmul.mubr.msk.bf16.vlgmr.msra.gmra.mxu0 %vm100_vm0, %v848_v2  ;;  %845 = vmatprep.subr.msk.bf16.mxu0 %vm377_vm1, %v247_v9  ;;  %v379_v10 = vsel %vm377_vm1, %v247_v9, 0  ;;  %v693_v12 = vld [vmem:[%s1135_s2] ss:$0 sm:$0xff] }
   0x7   :  { %795 = vmatprep.mubr.msk.bf16.mxu0 %vm100_vm0, %v849_v3  ;;  %800 = vmatmul.mubr.msk.bf16.vlgmr.msra.gmra.mxu1 %vm100_vm0, %v852_v5  ;;  %v1028_v61 = vld [vmem:[%s1137_s5] ss:$0 sm:$0xff] }
   0x8   :  { %803 = vmatprep.mubr.msk.bf16.mxu1 %vm100_vm0, %v853_v6  ;;  %808 = vmatpush3.bf16.msra.mxu1 %v855_v7  ;;  %v1033_v0 = vld [vmem:[%s1138_s6] ss:$0 sm:$0xff] }
   0x9   :  { %826 = vmatpush3.bf16.msra.mxu0 %v379_v10 }
   0xe   :  { %796 = vmatmul.mubr.msk.bf16.gmra.mxu0 %vm100_vm0, %v850_v8 }
   0xf   :  { %804 = vmatmul.mubr.msk.bf16.gmra.mxu1 %vm100_vm0, %v854_v11 }
  0x10   :  { %809 = vmatprep.mubr.msk.bf16.mxu1 %vm100_vm0, %v847_v1 }
  0x17   :  { %810 = vmatmul.mubr.msk.bf16.vlgmr.msra.gmra.mxu1 %vm100_vm0, %v848_v2 }
  0x18   :  { %813 = vmatprep.mubr.msk.bf16.mxu1 %vm100_vm0, %v849_v3 }
  0x1f   :  { %814 = vmatmul.mubr.msk.bf16.gmra.mxu1 %vm100_vm0, %v850_v8 }
  0x20   :  { %817 = vmatprep.mubr.msk.bf16.mxu1 %vm100_vm0, %v851_v4 }
  0x27   :  { %818 = vmatmul.mubr.msk.bf16.gmra.mxu1 %vm100_vm0, %v852_v5 }
  0x28   :  { %821 = vmatprep.mubr.msk.bf16.mxu1 %vm100_vm0, %v853_v6 }
  0x2f   :  { %822 = vmatmul.mubr.msk.bf16.gmra.mxu1 %vm100_vm0, %v854_v11 }
  0xc6   :  { %v793_v13 = vpop.f32.mrf.mxu0 }
  0xc7   :  { %v168_v14 = vadd.f32 %v793_v13, %v693_v12  ;;  %v801_v16 = vpop.f32.mrf.mxu1 }
  0xc8   :  { %v159_v15 = vpop.f32.mrf.mxu0  ;;  %v200_v18 = vadd.f32 %v801_v16, %v693_v12 }
  0xc9   :  { %225 = vst.msk [vmem:[%s1136_s7 + $0x10] sm:$0xff] %vm222_vm2, %v168_v14  ;;  %v160_v17 = vadd.f32 %v693_v12, %v159_v15  ;;  %v191_v20 = vpop.f32.mrf.mxu1 }
  0xca   :  { %v794_v19 = vpop.f32.mrf.mxu0  ;;  %233 = vst.msk [vmem:[%s1136_s7 + $0x50] sm:$0xff] %vm222_vm2, %v200_v18  ;;  %v192_v22 = vadd.f32 %v693_v12, %v191_v20 }
  0xcb   :  { %223 = vst.msk [vmem:[%s1136_s7] sm:$0xff] %vm222_vm2, %v160_v17  ;;  %v171_v21 = vadd.f32 %v794_v19, %v693_v12  ;;  %v802_v24 = vpop.f32.mrf.mxu1 }
  0xcc   :  { %v162_v23 = vpop.f32.mrf.mxu0  ;;  %231 = vst.msk [vmem:[%s1136_s7 + $0x40] sm:$0xff] %vm222_vm2, %v192_v22  ;;  %v203_v26 = vadd.f32 %v802_v24, %v693_v12 }
  0xcd   :  { %226 = vst.msk [vmem:[%s1136_s7 + $0x18] sm:$0xff] %vm222_vm2, %v171_v21  ;;  %v163_v25 = vadd.f32 %v693_v12, %v162_v23  ;;  %v194_v28 = vpop.f32.mrf.mxu1  ;;  %v240_v32 = vpack.c.bf16 %v171_v21, %v168_v14 }
  0xce   :  { %v797_v27 = vpop.f32.mrf.mxu0  ;;  %234 = vst.msk [vmem:[%s1136_s7 + $0x58] sm:$0xff] %vm222_vm2, %v203_v26  ;;  %v195_v31 = vadd.f32 %v693_v12, %v194_v28  ;;  %v244_v51 = vpack.c.bf16 %v203_v26, %v200_v18 }
  0xcf   :  { %224 = vst.msk [vmem:[%s1136_s7 + $0x8] sm:$0xff] %vm222_vm2, %v163_v25  ;;  %v239_v29 = vpack.c.bf16 %v163_v25, %v160_v17  ;;  %v184_v30 = vadd.f32 %v797_v27, %v693_v12  ;;  %v805_v34 = vpop.f32.mrf.mxu1 }
  0xd0   :  { %v175_v33 = vpop.f32.mrf.mxu0  ;;  %232 = vst.msk [vmem:[%s1136_s7 + $0x48] sm:$0xff] %vm222_vm2, %v195_v31  ;;  %v216_v36 = vadd.f32 %v805_v34, %v693_v12  ;;  %v243_v47 = vpack.c.bf16 %v195_v31, %v192_v22 }
  0xd1   :  { %229 = vst.msk [vmem:[%s1136_s7 + $0x30] sm:$0xff] %vm222_vm2, %v184_v30  ;;  %v176_v35 = vadd.f32 %v693_v12, %v175_v33  ;;  %827 = vmatprep.mubr.msk.bf16.mxu0 %vm222_vm2, %v239_v29  ;;  %v207_v38 = vpop.f32.mrf.mxu1 }
  0xd2   :  { %v798_v37 = vpop.f32.mrf.mxu0  ;;  %828 = vmatmul.mubr.msk.bf16.vlgmr.msra.gmra.mxu0 %vm222_vm2, %v240_v32  ;;  %237 = vst.msk [vmem:[%s1136_s7 + $0x70] sm:$0xff] %vm222_vm2, %v216_v36  ;;  %v208_v40 = vadd.f32 %v693_v12, %v207_v38 }
  0xd3   :  { %227 = vst.msk [vmem:[%s1136_s7 + $0x20] sm:$0xff] %vm222_vm2, %v176_v35  ;;  %v187_v39 = vadd.f32 %v798_v37, %v693_v12  ;;  %v806_v42 = vpop.f32.mrf.mxu1 }
  0xd4   :  { %v178_v41 = vpop.f32.mrf.mxu0  ;;  %235 = vst.msk [vmem:[%s1136_s7 + $0x60] sm:$0xff] %vm222_vm2, %v208_v40  ;;  %v219_v44 = vadd.f32 %v806_v42, %v693_v12 }
  0xd5   :  { %230 = vst.msk [vmem:[%s1136_s7 + $0x38] sm:$0xff] %vm222_vm2, %v187_v39  ;;  %v179_v43 = vadd.f32 %v693_v12, %v178_v41  ;;  %v210_v45 = vpop.f32.mrf.mxu1  ;;  %v242_v49 = vpack.c.bf16 %v187_v39, %v184_v30 }
  0xd6   :  { %238 = vst.msk [vmem:[%s1136_s7 + $0x78] sm:$0xff] %vm222_vm2, %v219_v44  ;;  %v211_v48 = vadd.f32 %v693_v12, %v210_v45  ;;  %v246_v52 = vpack.c.bf16 %v219_v44, %v216_v36 }
  0xd7   :  { %228 = vst.msk [vmem:[%s1136_s7 + $0x28] sm:$0xff] %vm222_vm2, %v179_v43  ;;  %v241_v46 = vpack.c.bf16 %v179_v43, %v176_v35  ;;  %v811_v53 = vpop.f32.mrf.mxu1 }
  0xd8   :  { %236 = vst.msk [vmem:[%s1136_s7 + $0x68] sm:$0xff] %vm222_vm2, %v211_v48  ;;  %v245_v50 = vpack.c.bf16 %v211_v48, %v208_v40 }
  0xd9   :  { %831 = vmatprep.mubr.msk.bf16.mxu0 %vm222_vm2, %v241_v46  ;;  %v290_v54 = vpop.f32.mrf.mxu1 }
  0xda   :  { %832 = vmatmul.mubr.msk.bf16.gmra.mxu0 %vm222_vm2, %v242_v49 }
  0xdb   :  { %835 = vmatprep.mubr.msk.bf16.mxu0 %vm222_vm2, %v243_v47  ;;  %v812_v55 = vpop.f32.mrf.mxu1 }
  0xdd   :  { %v293_v56 = vpop.f32.mrf.mxu1 }
  0xdf   :  { %v815_v57 = vpop.f32.mrf.mxu1 }
  0xe1   :  { %v306_v58 = vpop.f32.mrf.mxu1 }
  0xe2   :  { %836 = vmatmul.mubr.msk.bf16.gmra.mxu0 %vm222_vm2, %v244_v51 }
  0xe3   :  { %839 = vmatprep.mubr.msk.bf16.mxu0 %vm222_vm2, %v245_v50  ;;  %v816_v59 = vpop.f32.mrf.mxu1 }
  0xe5   :  { %v309_v63 = vpop.f32.mrf.mxu1 }
  0xe7   :  { %v819_v8 = vpop.f32.mrf.mxu1 }
  0xe9   :  { %v322_v19 = vpop.f32.mrf.mxu1 }
  0xea   :  { %840 = vmatmul.mubr.msk.bf16.gmra.mxu0 %vm222_vm2, %v246_v52 }
  0xeb   :  { %v820_v33 = vpop.f32.mrf.mxu1 }
  0xed   :  { %v325_v51 = vpop.f32.mrf.mxu1 }
 0x192   :  { %v829_v60 = vpop.f32.mrf.mxu0 }
 0x193   :  { %v424_v62 = vadd.f32 %v829_v60, %v811_v53 }
 0x194   :  { %v415_v1 = vpop.f32.mrf.mxu0 }
 0x195   :  { %v487_v2 = vmul.f32 %v1028_v61, %v424_v62  ;;  %v416_v3 = vadd.f32 %v415_v1, %v290_v54 }
 0x196   :  { %v830_v4 = vpop.f32.mrf.mxu0 }
 0x197   :  { %v510_v5 = vadd.f32 %v1033_v0, %v487_v2  ;;  %v485_v6 = vmul.f32 %v1028_v61, %v416_v3  ;;  %v427_v7 = vadd.f32 %v830_v4, %v812_v55 }
 0x198   :  { %v418_v9 = vpop.f32.mrf.mxu0 }
 0x199   :  { %v526_v10 = vadd.f32 3.0, %v510_v5  ;;  %v508_v11 = vadd.f32 %v1033_v0, %v485_v6  ;;  %v488_v12 = vmul.f32 %v1028_v61, %v427_v7  ;;  %v419_v13 = vadd.f32 %v418_v9, %v293_v56  ;;  %v823_v7 = vpop.f32.mrf.mxu1 }
 0x19a   :  { %v833_v14 = vpop.f32.mrf.mxu0 }
 0x19b   :  { %v542_v15 = vmax.f32 %v526_v10, 0.0  ;;  %v524_v16 = vadd.f32 3.0, %v508_v11  ;;  %v511_v17 = vadd.f32 %v1033_v0, %v488_v12  ;;  %v486_v18 = vmul.f32 %v1028_v61, %v419_v13 }
 0x19c   :  { %v440_v20 = vadd.f32 %v833_v14, %v815_v57  ;;  %v431_v21 = vpop.f32.mrf.mxu0 }
 0x19d   :  { %v558_v22 = vmin.f32 %v542_v15, 6.0  ;;  %v540_v23 = vmax.f32 %v524_v16, 0.0  ;;  %v527_v24 = vadd.f32 3.0, %v511_v17  ;;  %v509_v25 = vadd.f32 %v1033_v0, %v486_v18 }
 0x19e   :  { %v491_v26 = vmul.f32 %v1028_v61, %v440_v20  ;;  %v432_v27 = vadd.f32 %v431_v21, %v306_v58  ;;  %v834_v28 = vpop.f32.mrf.mxu0 }
 0x19f   :  { %v574_v29 = vmul.f32 %v558_v22, %v510_v5  ;;  %v556_v30 = vmin.f32 %v540_v23, 6.0  ;;  %v543_v31 = vmax.f32 %v527_v24, 0.0  ;;  %v525_v32 = vadd.f32 3.0, %v509_v25 }
 0x1a0   :  { %v514_v34 = vadd.f32 %v1033_v0, %v491_v26  ;;  %v489_v35 = vmul.f32 %v1028_v61, %v432_v27  ;;  %v443_v36 = vadd.f32 %v834_v28, %v816_v59  ;;  %v434_v37 = vpop.f32.mrf.mxu0 }
 0x1a1   :  { %v590_v38 = vmul.f32 0.16666667, %v574_v29  ;;  %v572_v39 = vmul.f32 %v556_v30, %v508_v11  ;;  %v559_v40 = vmin.f32 %v543_v31, 6.0  ;;  %v541_v41 = vmax.f32 %v525_v32, 0.0 }
 0x1a2   :  { %v530_v42 = vadd.f32 3.0, %v514_v34  ;;  %v512_v43 = vadd.f32 %v1033_v0, %v489_v35  ;;  %v492_v44 = vmul.f32 %v1028_v61, %v443_v36  ;;  %v435_v45 = vadd.f32 %v434_v37, %v309_v63  ;;  %v837_v46 = vpop.f32.mrf.mxu0 }
 0x1a3   :  { %v748_v47 = vpack.c.bf16 %v590_v38, %v590_v38  ;;  %v588_v48 = vmul.f32 0.16666667, %v572_v39  ;;  %v575_v49 = vmul.f32 %v559_v40, %v511_v17  ;;  %v557_v50 = vmin.f32 %v541_v41, 6.0 }
 0x1a4   :  { %v546_v52 = vmax.f32 %v530_v42, 0.0  ;;  %v528_v53 = vadd.f32 3.0, %v512_v43  ;;  %v515_v54 = vadd.f32 %v1033_v0, %v492_v44  ;;  %v490_v55 = vmul.f32 %v1028_v61, %v435_v45  ;;  %v447_v56 = vpop.f32.mrf.mxu0 }
 0x1a5   :  { %671 = vst.msk [vmem:[%s1139_s8 + $0x8] sm:$0xf] %vm668_vm3, %v748_v47  ;;  %v746_v57 = vpack.c.bf16 %v588_v48, %v588_v48  ;;  %v591_v58 = vmul.f32 0.16666667, %v575_v49  ;;  %v573_v59 = vmul.f32 %v557_v50, %v509_v25  ;;  %v456_v60 = vadd.f32 %v837_v46, %v819_v8  ;;  %v338_v25 = vpop.f32.mrf.mxu1 }
 0x1a6   :  { %v562_v62 = vmin.f32 %v546_v52, 6.0  ;;  %v544_v63 = vmax.f32 %v528_v53, 0.0  ;;  %v531_v1 = vadd.f32 3.0, %v515_v54  ;;  %v513_v2 = vadd.f32 %v1033_v0, %v490_v55  ;;  %v838_v3 = vpop.f32.mrf.mxu0 }
 0x1a7   :  { %669 = vst.msk [vmem:[%s1139_s8] sm:$0xf] %vm668_vm3, %v746_v57  ;;  %v749_v4 = vpack.c.bf16 %v591_v58, %v591_v58  ;;  %v589_v5 = vmul.f32 0.16666667, %v573_v59  ;;  %v495_v6 = vmul.f32 %v1028_v61, %v456_v60  ;;  %v448_v9 = vadd.f32 %v447_v56, %v322_v19  ;;  %v824_v45 = vpop.f32.mrf.mxu1 }
 0x1a8   :  { %v578_v10 = vmul.f32 %v562_v62, %v514_v34  ;;  %v560_v11 = vmin.f32 %v544_v63, 6.0  ;;  %v547_v8 = vmax.f32 %v531_v1, 0.0  ;;  %v529_v12 = vadd.f32 3.0, %v513_v2  ;;  %v450_v13 = vpop.f32.mrf.mxu0 }
 0x1a9   :  { %672 = vst.msk [vmem:[%s1139_s8 + $0xc] sm:$0xf] %vm668_vm3, %v749_v4  ;;  %v747_v14 = vpack.c.bf16 %v589_v5, %v589_v5  ;;  %v518_v15 = vadd.f32 %v1033_v0, %v495_v6  ;;  %v493_v16 = vmul.f32 %v1028_v61, %v448_v9  ;;  %v459_v17 = vadd.f32 %v838_v3, %v820_v33 }
 0x1aa   :  { %v594_v18 = vmul.f32 0.16666667, %v578_v10  ;;  %v576_v20 = vmul.f32 %v560_v11, %v512_v43  ;;  %v563_v21 = vmin.f32 %v547_v8, 6.0  ;;  %v545_v19 = vmax.f32 %v529_v12, 0.0  ;;  %v841_v22 = vpop.f32.mrf.mxu0 }
 0x1ab   :  { %670 = vst.msk [vmem:[%s1139_s8 + $0x4] sm:$0xf] %vm668_vm3, %v747_v14  ;;  %v534_v23 = vadd.f32 3.0, %v518_v15  ;;  %v516_v24 = vadd.f32 %v1033_v0, %v493_v16  ;;  %v496_v26 = vmul.f32 %v1028_v61, %v459_v17  ;;  %v451_v27 = vadd.f32 %v450_v13, %v325_v51 }
 0x1ac   :  { %v752_v28 = vpack.c.bf16 %v594_v18, %v594_v18  ;;  %v592_v29 = vmul.f32 0.16666667, %v576_v20  ;;  %v579_v30 = vmul.f32 %v563_v21, %v515_v54  ;;  %v561_v31 = vmin.f32 %v545_v19, 6.0  ;;  %v463_v32 = vpop.f32.mrf.mxu0 }
 0x1ad   :  { %v550_v33 = vmax.f32 %v534_v23, 0.0  ;;  %v532_v34 = vadd.f32 3.0, %v516_v24  ;;  %v519_v35 = vadd.f32 %v1033_v0, %v496_v26  ;;  %v494_v36 = vmul.f32 %v1028_v61, %v451_v27 }
 0x1ae   :  { %675 = vst.msk [vmem:[%s1139_s8 + $0x18] sm:$0xf] %vm668_vm3, %v752_v28  ;;  %v750_v37 = vpack.c.bf16 %v592_v29, %v592_v29  ;;  %v595_v38 = vmul.f32 0.16666667, %v579_v30  ;;  %v577_v39 = vmul.f32 %v561_v31, %v513_v2  ;;  %v472_v40 = vadd.f32 %v841_v22, %v823_v7  ;;  %v842_v41 = vpop.f32.mrf.mxu0  ;;  %v341_v2 = vpop.f32.mrf.mxu1 }
 0x1af   :  { %v566_v42 = vmin.f32 %v550_v33, 6.0  ;;  %v548_v43 = vmax.f32 %v532_v34, 0.0  ;;  %v535_v44 = vadd.f32 3.0, %v519_v35  ;;  %v517_v46 = vadd.f32 %v1033_v0, %v494_v36 }
 0x1b0   :  { %673 = vst.msk [vmem:[%s1139_s8 + $0x10] sm:$0xf] %vm668_vm3, %v750_v37  ;;  %v753_v47 = vpack.c.bf16 %v595_v38, %v595_v38  ;;  %v593_v48 = vmul.f32 0.16666667, %v577_v39  ;;  %v499_v49 = vmul.f32 %v1028_v61, %v472_v40  ;;  %v464_v50 = vadd.f32 %v463_v32, %v338_v25  ;;  %v466_v55 = vpop.f32.mrf.mxu0 }
 0x1b1   :  { %v582_v51 = vmul.f32 %v566_v42, %v518_v15  ;;  %v564_v52 = vmin.f32 %v548_v43, 6.0  ;;  %v551_v53 = vmax.f32 %v535_v44, 0.0  ;;  %v533_v54 = vadd.f32 3.0, %v517_v46 }
 0x1b2   :  { %676 = vst.msk [vmem:[%s1139_s8 + $0x1c] sm:$0xf] %vm668_vm3, %v753_v47  ;;  %v751_v56 = vpack.c.bf16 %v593_v48, %v593_v48  ;;  %v522_v57 = vadd.f32 %v1033_v0, %v499_v49  ;;  %v497_v58 = vmul.f32 %v1028_v61, %v464_v50  ;;  %v475_v59 = vadd.f32 %v842_v41, %v824_v45 }
 0x1b3   :  { %v598_v60 = vmul.f32 0.16666667, %v582_v51  ;;  %v580_v62 = vmul.f32 %v564_v52, %v516_v24  ;;  %v567_v63 = vmin.f32 %v551_v53, 6.0  ;;  %v549_v1 = vmax.f32 %v533_v54, 0.0 }
 0x1b4   :  { %674 = vst.msk [vmem:[%s1139_s8 + $0x14] sm:$0xf] %vm668_vm3, %v751_v56  ;;  %v538_v3 = vadd.f32 3.0, %v522_v57  ;;  %v520_v4 = vadd.f32 %v1033_v0, %v497_v58  ;;  %v500_v5 = vmul.f32 %v1028_v61, %v475_v59  ;;  %v467_v6 = vadd.f32 %v466_v55, %v341_v2 }
 0x1b5   :  { %v756_v7 = vpack.c.bf16 %v598_v60, %v598_v60  ;;  %v596_v9 = vmul.f32 0.16666667, %v580_v62  ;;  %v583_v10 = vmul.f32 %v567_v63, %v519_v35  ;;  %v565_v11 = vmin.f32 %v549_v1, 6.0 }
 0x1b6   :  { %v554_v8 = vmax.f32 %v538_v3, 0.0  ;;  %v536_v12 = vadd.f32 3.0, %v520_v4  ;;  %v523_v13 = vadd.f32 %v1033_v0, %v500_v5  ;;  %v498_v14 = vmul.f32 %v1028_v61, %v467_v6 }
 0x1b7   :  { %679 = vst.msk [vmem:[%s1139_s8 + $0x28] sm:$0xf] %vm668_vm3, %v756_v7  ;;  %v754_v15 = vpack.c.bf16 %v596_v9, %v596_v9  ;;  %v599_v16 = vmul.f32 0.16666667, %v583_v10  ;;  %v581_v17 = vmul.f32 %v565_v11, %v517_v46 }
 0x1b8   :  { %v570_v18 = vmin.f32 %v554_v8, 6.0  ;;  %v552_v20 = vmax.f32 %v536_v12, 0.0  ;;  %v539_v21 = vadd.f32 3.0, %v523_v13  ;;  %v521_v19 = vadd.f32 %v1033_v0, %v498_v14 }
 0x1b9   :  { %677 = vst.msk [vmem:[%s1139_s8 + $0x20] sm:$0xf] %vm668_vm3, %v754_v15  ;;  %v757_v22 = vpack.c.bf16 %v599_v16, %v599_v16  ;;  %v597_v61 = vmul.f32 0.16666667, %v581_v17 }
 0x1ba   :  { %v586_v23 = vmul.f32 %v570_v18, %v522_v57  ;;  %v568_v24 = vmin.f32 %v552_v20, 6.0  ;;  %v555_v25 = vmax.f32 %v539_v21, 0.0  ;;  %v537_v26 = vadd.f32 3.0, %v521_v19 }
 0x1bb   :  { %680 = vst.msk [vmem:[%s1139_s8 + $0x2c] sm:$0xf] %vm668_vm3, %v757_v22  ;;  %v755_v27 = vpack.c.bf16 %v597_v61, %v597_v61 }
 0x1bc   :  { %v602_v28 = vmul.f32 0.16666667, %v586_v23  ;;  %v584_v29 = vmul.f32 %v568_v24, %v520_v4  ;;  %v571_v0 = vmin.f32 %v555_v25, 6.0  ;;  %v553_v30 = vmax.f32 %v537_v26, 0.0 }
 0x1bd   :  { %678 = vst.msk [vmem:[%s1139_s8 + $0x24] sm:$0xf] %vm668_vm3, %v755_v27 }
 0x1be   :  { %v760_v31 = vpack.c.bf16 %v602_v28, %v602_v28  ;;  %v600_v32 = vmul.f32 0.16666667, %v584_v29  ;;  %v587_v33 = vmul.f32 %v571_v0, %v523_v13  ;;  %v569_v34 = vmin.f32 %v553_v30, 6.0 }
 0x1c0   :  { %683 = vst.msk [vmem:[%s1139_s8 + $0x38] sm:$0xf] %vm668_vm3, %v760_v31  ;;  %v758_v35 = vpack.c.bf16 %v600_v32, %v600_v32  ;;  %v603_v36 = vmul.f32 0.16666667, %v587_v33  ;;  %v585_v37 = vmul.f32 %v569_v34, %v521_v19 }
 0x1c2   :  { %681 = vst.msk [vmem:[%s1139_s8 + $0x30] sm:$0xf] %vm668_vm3, %v758_v35  ;;  %v761_v38 = vpack.c.bf16 %v603_v36, %v603_v36  ;;  %v601_v39 = vmul.f32 0.16666667, %v585_v37 }
 0x1c4   :  { %684 = vst.msk [vmem:[%s1139_s8 + $0x3c] sm:$0xf] %vm668_vm3, %v761_v38  ;;  %v759_v40 = vpack.c.bf16 %v601_v39, %v601_v39 }
 0x1c6   :  { %682 = vst.msk [vmem:[%s1139_s8 + $0x34] sm:$0xf] %vm668_vm3, %v759_v40 }

// kernel: _lambda_.9
= control target key start
LH: loop header
LB: loop body
LE: loop exit
PB: predicated region body
PF: predicated region fallthrough
CT: control target
= control target key end

     0   :  { %s119_s9 = smov 124   ;;  %vm57_vm0 = vcmask 228352   ;;  %vm42_vm1 = vcmask 31744   ;;  %vm92_vm2 = vcmask 261120   ;;  %s214_s0 = inlined_call_operand.vmem [shape: f32[16,32], index: 0, kind: input, shape index: {}]   ;;  %s215_s1 = inlined_call_operand.vmem [shape: f32[16,32], index: 1, kind: input, shape index: {}]   ;;  %s216_s2 = inlined_call_operand.vmem [shape: f32[16,32], index: 2, kind: input, shape index: {}]   ;;  %s217_s4 = inlined_call_operand.vmem [shape: f32[16,32], index: 4, kind: output, shape index: {1}]   ;;  %s218_s3 = inlined_call_operand.vmem [shape: f32[16,32], index: 3, kind: output, shape index: {0}]   ;;  %s219_s5 = inlined_call_operand.vmem [shape: f32[16,32], index: 5, kind: output, shape index: {2}]   ;;  %s220_s6 = inlined_call_operand.vmem [shape: f32[16,32], index: 6, kind: output, shape index: {3}]  }
   0x1   :  { %v18_v0 = vld [vmem:[%s214_s0] sm:$0xff]  ;;  %v19_v2 = vld [vmem:[%s214_s0 + $0x8] sm:$0xff]  ;;  %s120_s0 = smov 4  }
   0x2   :  { %v20_v1 = vld [vmem:[%s215_s1] sm:$0xff]  ;;  %v26_v4 = vmul.f32 0.75, %v18_v0  ;;  %v21_v5 = vld [vmem:[%s215_s1 + $0x8] sm:$0xff]  ;;  %v27_v6 = vmul.f32 0.75, %v19_v2 }
   0x3   :  { %v24_v3 = vmul.f32 0.25, %v20_v1  ;;  %v25_v7 = vmul.f32 0.25, %v21_v5  ;;  %v23_v8 = vld [vmem:[%s216_s2 + $0x8] sm:$0xff]  ;;  %v22_v9 = vld [vmem:[%s216_s2] sm:$0xff] }
   0x4   :  { %v31_v12 = vmul.f32 0.25, %v23_v8  ;;  %v30_v13 = vmul.f32 0.25, %v22_v9 }
   0x5   :  { %v28_v10 = vadd.f32 %v26_v4, %v24_v3  ;;  %v29_v11 = vadd.f32 %v27_v6, %v25_v7 }
   0x6   :  { %v33_v14 = vadd.f32 %v31_v12, %v27_v6  ;;  %v32_v15 = vadd.f32 %v30_v13, %v26_v4 }
   0x7   :  { %51 = vrot.lane.b32.xlu1 %v28_v10, %s119_s9  ;;  %36 = vrot.lane.b32.xlu0 %v28_v10, %s120_s0  ;;  %v47_v17 = vmul.f32 0.75, %v28_v10  ;;  %v48_v25 = vmul.f32 0.75, %v29_v11 }
   0x8   :  { %v77_v34 = vmul.f32 0.75, %v33_v14  ;;  %v76_v36 = vmul.f32 0.75, %v32_v15 }
   0xb   :  { %53 = vrot.lane.b32.xlu1 %v29_v11, %s119_s9  ;;  %38 = vrot.lane.b32.xlu0 %v29_v11, %s120_s0 }
   0xf   :  { %68 = vrot.lane.b32.xlu1 %v33_v14, %s120_s0  ;;  %66 = vrot.lane.b32.xlu0 %v32_v15, %s120_s0 }
  0x13   :  { %82 = vrot.lane.b32.xlu1 %v33_v14, %s119_s9  ;;  %80 = vrot.lane.b32.xlu0 %v32_v15, %s119_s9 }
  0x79   :  { %v52_v16 = vpop.permute.xlu1 %51  ;;  %v37_v18 = vpop.permute.xlu0 %36 }
  0x7a   :  { %v58_v19 = vsel %vm57_vm0, %v52_v16, %v28_v10  ;;  %v43_v20 = vsel %vm42_vm1, %v28_v10, %v37_v18 }
  0x7b   :  { %v60_v21 = vmul.f32 0.25, %v58_v19  ;;  %v45_v22 = vmul.f32 0.25, %v43_v20 }
  0x7d   :  { %v62_v23 = vadd.f32 %v60_v21, %v47_v17  ;;  %v49_v24 = vadd.f32 %v47_v17, %v45_v22  ;;  %v54_v26 = vpop.permute.xlu1 %53  ;;  %v39_v27 = vpop.permute.xlu0 %38 }
  0x7e   :  { %v59_v28 = vsel %vm57_vm0, %v54_v26, %v29_v11  ;;  %v44_v29 = vsel %vm42_vm1, %v29_v11, %v39_v27 }
  0x7f   :  { %95 = vst.msk [vmem:[%s217_s4] sm:$0xff] %vm92_vm2, %v62_v23  ;;  %93 = vst.msk [vmem:[%s218_s3] sm:$0xff] %vm92_vm2, %v49_v24  ;;  %v61_v30 = vmul.f32 0.25, %v59_v28  ;;  %v46_v31 = vmul.f32 0.25, %v44_v29 }
  0x81   :  { %v63_v32 = vadd.f32 %v61_v30, %v48_v25  ;;  %v50_v33 = vadd.f32 %v48_v25, %v46_v31  ;;  %v69_v35 = vpop.permute.xlu1 %68  ;;  %v67_v37 = vpop.permute.xlu0 %66 }
  0x82   :  { %v73_v38 = vsel %vm42_vm1, %v33_v14, %v69_v35  ;;  %v72_v39 = vsel %vm42_vm1, %v32_v15, %v67_v37 }
  0x83   :  { %96 = vst.msk [vmem:[%s217_s4 + $0x8] sm:$0xff] %vm92_vm2, %v63_v32  ;;  %94 = vst.msk [vmem:[%s218_s3 + $0x8] sm:$0xff] %vm92_vm2, %v50_v33  ;;  %v75_v40 = vmul.f32 0.25, %v73_v38  ;;  %v74_v41 = vmul.f32 0.25, %v72_v39 }
  0x85   :  { %v79_v42 = vadd.f32 %v77_v34, %v75_v40  ;;  %v78_v43 = vadd.f32 %v76_v36, %v74_v41  ;;  %v83_v44 = vpop.permute.xlu1 %82  ;;  %v81_v45 = vpop.permute.xlu0 %80 }
  0x86   :  { %v87_v46 = vsel %vm57_vm0, %v83_v44, %v33_v14  ;;  %v86_v47 = vsel %vm57_vm0, %v81_v45, %v32_v15 }
  0x87   :  { %98 = vst.msk [vmem:[%s219_s5 + $0x8] sm:$0xff] %vm92_vm2, %v79_v42  ;;  %97 = vst.msk [vmem:[%s219_s5] sm:$0xff] %vm92_vm2, %v78_v43  ;;  %v89_v48 = vmul.f32 0.25, %v87_v46  ;;  %v88_v49 = vmul.f32 0.25, %v86_v47 }
  0x89   :  { %v91_v50 = vadd.f32 %v89_v48, %v77_v34  ;;  %v90_v51 = vadd.f32 %v88_v49, %v76_v36 }
  0x8b   :  { %100 = vst.msk [vmem:[%s220_s6 + $0x8] sm:$0xff] %vm92_vm2, %v91_v50  ;;  %99 = vst.msk [vmem:[%s220_s6] sm:$0xff] %vm92_vm2, %v90_v51 }

// kernel: _lambda_.10
= control target key start
LH: loop header
LB: loop body
LE: loop exit
PB: predicated region body
PF: predicated region fallthrough
CT: control target
= control target key end

     0   :  { %vm361_vm0 = vcmask 1043456   ;;  %vm264_vm1 = vcmask 64512   ;;  %vm1269_vm2 = vcmask 1041408   ;;  %vm782_vm3 = vcmask 31744   ;;  %s4491_s2 = inlined_call_operand.vmem [shape: bf16[8,4], index: 2, kind: input, shape index: {}]   ;;  %s4492_s0 = inlined_call_operand.vmem [shape: bf16[512,8], index: 0, kind: input, shape index: {}]   ;;  %s4493_s4 = inlined_call_operand.vmem [shape: bf16[8,4], index: 4, kind: input, shape index: {}]   ;;  %s4494_s5 = inlined_call_operand.vmem [shape: bf16[4,4], index: 5, kind: input, shape index: {}]   ;;  %s4495_s3 = inlined_call_operand.vmem [shape: f32[1,4], index: 3, kind: input, shape index: {}]   ;;  %s4496_s1 = inlined_call_operand.vmem [shape: f32[512,4], index: 1, kind: input, shape index: {}]   ;;  %s4497_s8 = inlined_call_operand.vmem [shape: f32[512,4], index: 8, kind: output, shape index: {0}]   ;;  %s4498_s6 = inlined_call_operand.vmem [shape: f32[1,4], index: 6, kind: input, shape index: {}]   ;;  %s4499_s7 = inlined_call_operand.vmem [shape: f32[1,4], index: 7, kind: input, shape index: {}]   ;;  %s4500_s9 = inlined_call_operand.vmem [shape: bf16[512,4], index: 9, kind: output, shape index: {1}]  }
   0x1   :  { %v96_v0 = vld [vmem:[%s4491_s2] sm:$0xf]  ;;  %v3013_v3 = vld [vmem:[%s4492_s0 + $0x8] sm:$0xff]   ;;  %v3020_v4 = vld [vmem:[%s4492_s0 + $0x10] sm:$0xff]   ;;  %vm2280_vm4 = vcmask 27648  }
   0x2   :  { %2911 = vmatprep.subr.msk.bf16.mxu0 %vm361_vm0, %v96_v0  ;;  %v363_v1 = vsel %vm361_vm0, %v96_v0, 0  ;;  %v3007_v2 = vld [vmem:[%s4492_s0] sm:$0xff]   ;;  %2912 = vmatprep.subr.msk.bf16.mxu1 %vm361_vm0, %v96_v0  ;;  %v3029_v5 = vld [vmem:[%s4492_s0 + $0x18] sm:$0xff]   ;;  %v3043_v7 = vld [vmem:[%s4492_s0 + $0x28] sm:$0xff]  }
   0x3   :  { %2712 = vmatpush3.bf16.msra.mxu0 %v363_v1  ;;  %2910 = vmatpush3.bf16.msra.mxu1 %v363_v1  ;;  %v3034_v6 = vld [vmem:[%s4492_s0 + $0x20] sm:$0xff]   ;;  %v3048_v8 = vld [vmem:[%s4492_s0 + $0x30] sm:$0xff]   ;;  %v3058_v10 = vld [vmem:[%s4492_s0 + $0x88] sm:$0xff]  }
   0x4   :  { %2713 = vmatprep.mubr.msk.bf16.mxu0 %vm264_vm1, %v3007_v2  ;;  %v3053_v9 = vld [vmem:[%s4492_s0 + $0x80] sm:$0xff]   ;;  %v3065_v11 = vld [vmem:[%s4492_s0 + $0x90] sm:$0xff]   ;;  %v2922_v12 = vld [vmem:[%s4492_s0 + $0x38] sm:$0xff]  }
   0x5   :  { %2745 = vmatprep.mubr.msk.bf16.mxu1 %vm264_vm1, %v3053_v9  ;;  %v3081_v13 = vld [vmem:[%s4492_s0 + $0x98] sm:$0xff]   ;;  %v3086_v14 = vld [vmem:[%s4492_s0 + $0xa0] sm:$0xff]   ;;  %v3100_v16 = vld [vmem:[%s4492_s0 + $0xa8] sm:$0xff]  }
   0x6   :  { %2714 = vmatmul.mubr.msk.bf16.vlgmr.msra.gmra.mxu0 %vm264_vm1, %v3013_v3  ;;  %2746 = vmatmul.mubr.msk.bf16.vlgmr.msra.gmra.mxu1 %vm264_vm1, %v3058_v10  ;;  %v2923_v15 = vld [vmem:[%s4492_s0 + $0x40] sm:$0xff]   ;;  %v2924_v19 = vld [vmem:[%s4492_s0 + $0x48] sm:$0xff]   ;;  %v2937_v20 = vld [vmem:[%s4492_s0 + $0xb0] sm:$0xff]  }
   0x7   :  { %2717 = vmatprep.mubr.msk.bf16.mxu0 %vm264_vm1, %v3020_v4  ;;  %2749 = vmatprep.mubr.msk.bf16.mxu1 %vm264_vm1, %v3065_v11  ;;  %v880_v17 = vld [vmem:[%s4493_s4] sm:$0xf]  ;;  %v2925_v23 = vld [vmem:[%s4492_s0 + $0x50] sm:$0xff]   ;;  %v2938_v24 = vld [vmem:[%s4492_s0 + $0xb8] sm:$0xff]  }
   0x8   :  { %v879_v18 = vld [vmem:[%s4494_s5] sm:$0x3]  ;;  %2913 = vmatprep.subr.msk.bf16.mxu1 %vm361_vm0, %v880_v17  ;;  %v882_v21 = vsel %vm361_vm0, %v880_v17, 0  ;;  %v2926_v25 = vld [vmem:[%s4492_s0 + $0x58] sm:$0xff]   ;;  %v2940_v28 = vld [vmem:[%s4492_s0 + $0xc8] sm:$0xff]  }
   0x9   :  { %2914 = vmatprep.subr.msk.bf16.mxu0 %vm1269_vm2, %v879_v18  ;;  %v1271_v22 = vsel %vm1269_vm2, %v879_v18, 0  ;;  %2778 = vmatpush3.bf16.msra.mxu1 %v882_v21  ;;  %v2939_v26 = vld [vmem:[%s4492_s0 + $0xc0] sm:$0xff]   ;;  %v2928_v29 = vld [vmem:[%s4492_s0 + $0x68] sm:$0xff]   ;;  %v2941_v30 = vld [vmem:[%s4492_s0 + $0xd0] sm:$0xff]  }
   0xa   :  { %2844 = vmatpush3.bf16.msra.mxu0 %v1271_v22  ;;  %v2927_v27 = vld [vmem:[%s4492_s0 + $0x60] sm:$0xff]   ;;  %v2929_v31 = vld [vmem:[%s4492_s0 + $0x70] sm:$0xff]   ;;  %v2942_v32 = vld [vmem:[%s4492_s0 + $0xd8] sm:$0xff]  }
   0xb   :  { %v2930_v33 = vld [vmem:[%s4492_s0 + $0x78] sm:$0xff]   ;;  %v2943_v34 = vld [vmem:[%s4492_s0 + $0xe0] sm:$0xff]   ;;  %v2944_v35 = vld [vmem:[%s4492_s0 + $0xe8] sm:$0xff]  }
   0xc   :  { %v2945_v36 = vld [vmem:[%s4492_s0 + $0xf0] sm:$0xff]   ;;  %v2946_v37 = vld [vmem:[%s4492_s0 + $0xf8] sm:$0xff]   ;;  %v3225_v38 = vld [vmem:[%s4495_s3] ss:$0 sm:$0xff] }
   0xd   :  { %v656_v40 = vld [vmem:[%s4496_s1 + $0x10] sm:$0xff]  ;;  %v654_v43 = vld [vmem:[%s4496_s1] sm:$0xff]  ;;  %v657_v47 = vld [vmem:[%s4496_s1 + $0x18] sm:$0xff] }
   0xe   :  { %2718 = vmatmul.mubr.msk.bf16.gmra.mxu0 %vm264_vm1, %v3029_v5  ;;  %2750 = vmatmul.mubr.msk.bf16.gmra.mxu1 %vm264_vm1, %v3081_v13  ;;  %v655_v51 = vld [vmem:[%s4496_s1 + $0x8] sm:$0xff]  ;;  %v660_v55 = vld [vmem:[%s4496_s1 + $0x30] sm:$0xff]  ;;  %v658_v59 = vld [vmem:[%s4496_s1 + $0x20] sm:$0xff] }
   0xf   :  { %2721 = vmatprep.mubr.msk.bf16.mxu0 %vm264_vm1, %v3034_v6  ;;  %2753 = vmatprep.mubr.msk.bf16.mxu1 %vm264_vm1, %v3086_v14  ;;  %v661_v1 = vld [vmem:[%s4496_s1 + $0x38] sm:$0xff]  ;;  %v662_v18 = vld [vmem:[%s4496_s1 + $0x40] sm:$0xff] }
  0x16   :  { %2722 = vmatmul.mubr.msk.bf16.gmra.mxu0 %vm264_vm1, %v3043_v7  ;;  %2754 = vmatmul.mubr.msk.bf16.gmra.mxu1 %vm264_vm1, %v3100_v16 }
  0x17   :  { %2725 = vmatprep.mubr.msk.bf16.mxu0 %vm264_vm1, %v3048_v8  ;;  %2757 = vmatprep.mubr.msk.bf16.mxu1 %vm264_vm1, %v2937_v20 }
  0x1e   :  { %2726 = vmatmul.mubr.msk.bf16.gmra.mxu0 %vm264_vm1, %v2922_v12  ;;  %2758 = vmatmul.mubr.msk.bf16.gmra.mxu1 %vm264_vm1, %v2938_v24 }
  0x1f   :  { %2729 = vmatprep.mubr.msk.bf16.mxu0 %vm264_vm1, %v2923_v15  ;;  %2761 = vmatprep.mubr.msk.bf16.mxu1 %vm264_vm1, %v2939_v26 }
  0x26   :  { %2730 = vmatmul.mubr.msk.bf16.gmra.mxu0 %vm264_vm1, %v2924_v19  ;;  %2762 = vmatmul.mubr.msk.bf16.gmra.mxu1 %vm264_vm1, %v2940_v28 }
  0x27   :  { %2733 = vmatprep.mubr.msk.bf16.mxu0 %vm264_vm1, %v2925_v23  ;;  %2765 = vmatprep.mubr.msk.bf16.mxu1 %vm264_vm1, %v2941_v30 }
  0x2e   :  { %2734 = vmatmul.mubr.msk.bf16.gmra.mxu0 %vm264_vm1, %v2926_v25  ;;  %2766 = vmatmul.mubr.msk.bf16.gmra.mxu1 %vm264_vm1, %v2942_v32 }
  0x2f   :  { %2737 = vmatprep.mubr.msk.bf16.mxu0 %vm264_vm1, %v2927_v27  ;;  %2769 = vmatprep.mubr.msk.bf16.mxu1 %vm264_vm1, %v2943_v34 }
  0x36   :  { %2738 = vmatmul.mubr.msk.bf16.gmra.mxu0 %vm264_vm1, %v2928_v29  ;;  %2770 = vmatmul.mubr.msk.bf16.gmra.mxu1 %vm264_vm1, %v2944_v35 }
  0x37   :  { %2741 = vmatprep.mubr.msk.bf16.mxu0 %vm264_vm1, %v2929_v31  ;;  %2773 = vmatprep.mubr.msk.bf16.mxu1 %vm264_vm1, %v2945_v36 }
  0x3e   :  { %2742 = vmatmul.mubr.msk.bf16.gmra.mxu0 %vm264_vm1, %v2930_v33  ;;  %2774 = vmatmul.mubr.msk.bf16.gmra.mxu1 %vm264_vm1, %v2946_v37 }
  0x3f   :  { %2779 = vmatprep.mubr.msk.bf16.mxu1 %vm264_vm1, %v3007_v2 }
  0x46   :  { %2780 = vmatmul.mubr.msk.bf16.vlgmr.msra.gmra.mxu1 %vm264_vm1, %v3013_v3 }
  0x47   :  { %2783 = vmatprep.mubr.msk.bf16.mxu1 %vm264_vm1, %v3020_v4 }
  0x4e   :  { %2784 = vmatmul.mubr.msk.bf16.gmra.mxu1 %vm264_vm1, %v3029_v5  ;;  %v659_v5 = vld [vmem:[%s4496_s1 + $0x28] sm:$0xff] }
  0x4f   :  { %2787 = vmatprep.mubr.msk.bf16.mxu1 %vm264_vm1, %v3034_v6 }
  0x56   :  { %2788 = vmatmul.mubr.msk.bf16.gmra.mxu1 %vm264_vm1, %v3043_v7 }
  0x57   :  { %2791 = vmatprep.mubr.msk.bf16.mxu1 %vm264_vm1, %v3048_v8 }
  0x5e   :  { %2792 = vmatmul.mubr.msk.bf16.gmra.mxu1 %vm264_vm1, %v2922_v12 }
  0x5f   :  { %2795 = vmatprep.mubr.msk.bf16.mxu1 %vm264_vm1, %v2923_v15 }
  0x66   :  { %2796 = vmatmul.mubr.msk.bf16.gmra.mxu1 %vm264_vm1, %v2924_v19 }
  0x67   :  { %2799 = vmatprep.mubr.msk.bf16.mxu1 %vm264_vm1, %v2925_v23 }
  0x6e   :  { %2800 = vmatmul.mubr.msk.bf16.gmra.mxu1 %vm264_vm1, %v2926_v25  ;;  %v689_v25 = vld [vmem:[%s4496_s1 + $0x118] sm:$0xff] }
  0x6f   :  { %2803 = vmatprep.mubr.msk.bf16.mxu1 %vm264_vm1, %v2927_v27 }
  0x76   :  { %2804 = vmatmul.mubr.msk.bf16.gmra.mxu1 %vm264_vm1, %v2928_v29 }
  0x77   :  { %2807 = vmatprep.mubr.msk.bf16.mxu1 %vm264_vm1, %v2929_v31 }
  0x7e   :  { %2808 = vmatmul.mubr.msk.bf16.gmra.mxu1 %vm264_vm1, %v2930_v33 }
  0x7f   :  { %2811 = vmatprep.mubr.msk.bf16.mxu1 %vm264_vm1, %v3053_v9  ;;  %v688_v9 = vld [vmem:[%s4496_s1 + $0x110] sm:$0xff] }
  0x86   :  { %2812 = vmatmul.mubr.msk.bf16.gmra.mxu1 %vm264_vm1, %v3058_v10 }
  0x87   :  { %2815 = vmatprep.mubr.msk.bf16.mxu1 %vm264_vm1, %v3065_v11  ;;  %v664_v11 = vld [vmem:[%s4496_s1 + $0x50] sm:$0xff] }
  0x8e   :  { %2816 = vmatmul.mubr.msk.bf16.gmra.mxu1 %vm264_vm1, %v3081_v13 }
  0x8f   :  { %2819 = vmatprep.mubr.msk.bf16.mxu1 %vm264_vm1, %v3086_v14 }
  0x96   :  { %2820 = vmatmul.mubr.msk.bf16.gmra.mxu1 %vm264_vm1, %v3100_v16  ;;  %v686_v16 = vld [vmem:[%s4496_s1 + $0x100] sm:$0xff] }
  0x97   :  { %2823 = vmatprep.mubr.msk.bf16.mxu1 %vm264_vm1, %v2937_v20 }
  0x9e   :  { %2824 = vmatmul.mubr.msk.bf16.gmra.mxu1 %vm264_vm1, %v2938_v24 }
  0x9f   :  { %2827 = vmatprep.mubr.msk.bf16.mxu1 %vm264_vm1, %v2939_v26 }
  0xa6   :  { %2828 = vmatmul.mubr.msk.bf16.gmra.mxu1 %vm264_vm1, %v2940_v28  ;;  %v665_v28 = vld [vmem:[%s4496_s1 + $0x58] sm:$0xff] }
  0xa7   :  { %2831 = vmatprep.mubr.msk.bf16.mxu1 %vm264_vm1, %v2941_v30 }
  0xae   :  { %2832 = vmatmul.mubr.msk.bf16.gmra.mxu1 %vm264_vm1, %v2942_v32 }
  0xaf   :  { %2835 = vmatprep.mubr.msk.bf16.mxu1 %vm264_vm1, %v2943_v34  ;;  %v687_v34 = vld [vmem:[%s4496_s1 + $0x108] sm:$0xff] }
  0xb6   :  { %2836 = vmatmul.mubr.msk.bf16.gmra.mxu1 %vm264_vm1, %v2944_v35 }
  0xb7   :  { %2839 = vmatprep.mubr.msk.bf16.mxu1 %vm264_vm1, %v2945_v36  ;;  %v663_v36 = vld [vmem:[%s4496_s1 + $0x48] sm:$0xff] }
  0xbe   :  { %2840 = vmatmul.mubr.msk.bf16.gmra.mxu1 %vm264_vm1, %v2946_v37 }
  0xc6   :  { %v2715_v39 = vpop.f32.mrf.mxu0  ;;  %v2747_v8 = vpop.f32.mrf.mxu1 }
  0xc7   :  { %v408_v41 = vadd.f32 %v2715_v39, %v3225_v38  ;;  %v536_v12 = vadd.f32 %v2747_v8, %v3225_v38 }
  0xc8   :  { %v399_v42 = vpop.f32.mrf.mxu0  ;;  %v527_v15 = vpop.f32.mrf.mxu1 }
  0xc9   :  { %v720_v44 = vadd.f32 %v656_v40, %v408_v41  ;;  %v400_v45 = vadd.f32 %v3225_v38, %v399_v42  ;;  %v3306_v19 = vadd.f32 %v688_v9, %v536_v12  ;;  %v528_v20 = vadd.f32 %v3225_v38, %v527_v15  ;;  %v672_v15 = vld [vmem:[%s4496_s1 + $0x90] sm:$0xff] }
  0xca   :  { %v2716_v46 = vpop.f32.mrf.mxu0  ;;  %v2748_v24 = vpop.f32.mrf.mxu1 }
  0xcb   :  { %785 = vst.msk [vmem:[%s4497_s8 + $0x10] sm:$0xff] %vm782_vm3, %v720_v44  ;;  %v718_v48 = vadd.f32 %v654_v43, %v400_v45  ;;  %v411_v49 = vadd.f32 %v2716_v46, %v3225_v38  ;;  %817 = vst.msk [vmem:[%s4497_s8 + $0x110] sm:$0xff] %vm782_vm3, %v3306_v19  ;;  %v3327_v29 = vadd.f32 %v686_v16, %v528_v20  ;;  %v692_v43 = vld [vmem:[%s4496_s1 + $0x130] sm:$0xff] }
  0xcc   :  { %v402_v50 = vpop.f32.mrf.mxu0  ;;  %v539_v30 = vadd.f32 %v2748_v24, %v3225_v38  ;;  %v530_v33 = vpop.f32.mrf.mxu1  ;;  %v668_v45 = vld [vmem:[%s4496_s1 + $0x70] sm:$0xff]  ;;  %v670_v24 = vld [vmem:[%s4496_s1 + $0x80] sm:$0xff] }
  0xcd   :  { %783 = vst.msk [vmem:[%s4497_s8] sm:$0xff] %vm782_vm3, %v718_v48  ;;  %v721_v52 = vadd.f32 %v657_v47, %v411_v49  ;;  %v403_v53 = vadd.f32 %v3225_v38, %v402_v50  ;;  %815 = vst.msk [vmem:[%s4497_s8 + $0x100] sm:$0xff] %vm782_vm3, %v3327_v29  ;;  %v531_v39 = vadd.f32 %v3225_v38, %v530_v33 }
  0xce   :  { %v2719_v54 = vpop.f32.mrf.mxu0  ;;  %v3349_v37 = vadd.f32 %v689_v25, %v539_v30  ;;  %v2751_v42 = vpop.f32.mrf.mxu1 }
  0xcf   :  { %786 = vst.msk [vmem:[%s4497_s8 + $0x18] sm:$0xff] %vm782_vm3, %v721_v52  ;;  %v719_v56 = vadd.f32 %v655_v51, %v403_v53  ;;  %v424_v57 = vadd.f32 %v2719_v54, %v3225_v38  ;;  %v848_v63 = vpack.c.bf16 %v721_v52, %v720_v44  ;;  %v3368_v46 = vadd.f32 %v687_v34, %v531_v39  ;;  %v690_v51 = vld [vmem:[%s4496_s1 + $0x120] sm:$0xff] }
  0xd0   :  { %v415_v58 = vpop.f32.mrf.mxu0  ;;  %818 = vst.msk [vmem:[%s4497_s8 + $0x118] sm:$0xff] %vm782_vm3, %v3349_v37  ;;  %v552_v47 = vadd.f32 %v2751_v42, %v3225_v38  ;;  %v543_v50 = vpop.f32.mrf.mxu1  ;;  %v666_v53 = vld [vmem:[%s4496_s1 + $0x60] sm:$0xff] }
  0xd1   :  { %784 = vst.msk [vmem:[%s4497_s8 + $0x8] sm:$0xff] %vm782_vm3, %v719_v56  ;;  %v847_v60 = vpack.c.bf16 %v719_v56, %v718_v48  ;;  %v724_v61 = vadd.f32 %v660_v55, %v424_v57  ;;  %v416_v62 = vadd.f32 %v3225_v38, %v415_v58  ;;  %816 = vst.msk [vmem:[%s4497_s8 + $0x108] sm:$0xff] %vm782_vm3, %v3368_v46 }
  0xd2   :  { %v2720_v0 = vpop.f32.mrf.mxu0  ;;  %v3387_v54 = vadd.f32 %v692_v43, %v552_v47  ;;  %v544_v55 = vadd.f32 %v3225_v38, %v543_v50  ;;  %v695_v43 = vld [vmem:[%s4496_s1 + $0x148] sm:$0xff] }
  0xd3   :  { %789 = vst.msk [vmem:[%s4497_s8 + $0x30] sm:$0xff] %vm782_vm3, %v724_v61  ;;  %v722_v2 = vadd.f32 %v658_v59, %v416_v62  ;;  %v427_v3 = vadd.f32 %v2720_v0, %v3225_v38  ;;  %2845 = vmatprep.mubr.msk.bf16.mxu0 %vm782_vm3, %v847_v60  ;;  %v2752_v59 = vpop.f32.mrf.mxu1  ;;  %v693_v60 = vld [vmem:[%s4496_s1 + $0x138] sm:$0xff] }
  0xd4   :  { %v418_v4 = vpop.f32.mrf.mxu0  ;;  %2846 = vmatmul.mubr.msk.bf16.vlgmr.msra.gmra.mxu0 %vm782_vm3, %v848_v63  ;;  %v669_v63 = vld [vmem:[%s4496_s1 + $0x78] sm:$0xff]  ;;  %821 = vst.msk [vmem:[%s4497_s8 + $0x130] sm:$0xff] %vm782_vm3, %v3387_v54  ;;  %v3409_v0 = vadd.f32 %v690_v51, %v544_v55  ;;  %v676_v55 = vld [vmem:[%s4496_s1 + $0xb0] sm:$0xff] }
  0xd5   :  { %787 = vst.msk [vmem:[%s4497_s8 + $0x20] sm:$0xff] %vm782_vm3, %v722_v2  ;;  %v725_v6 = vadd.f32 %v661_v1, %v427_v3  ;;  %v419_v7 = vadd.f32 %v3225_v38, %v418_v4  ;;  %v555_v1 = vadd.f32 %v2752_v59, %v3225_v38  ;;  %v546_v4 = vpop.f32.mrf.mxu1 }
  0xd6   :  { %v2723_v10 = vpop.f32.mrf.mxu0  ;;  %819 = vst.msk [vmem:[%s4497_s8 + $0x120] sm:$0xff] %vm782_vm3, %v3409_v0  ;;  %v547_v9 = vadd.f32 %v3225_v38, %v546_v4 }
  0xd7   :  { %790 = vst.msk [vmem:[%s4497_s8 + $0x38] sm:$0xff] %vm782_vm3, %v725_v6  ;;  %v723_v13 = vadd.f32 %v659_v5, %v419_v7  ;;  %v440_v14 = vadd.f32 %v2723_v10, %v3225_v38  ;;  %v850_v26 = vpack.c.bf16 %v725_v6, %v724_v61  ;;  %v691_v5 = vld [vmem:[%s4496_s1 + $0x128] sm:$0xff]  ;;  %v3431_v8 = vadd.f32 %v693_v60, %v555_v1  ;;  %v2755_v12 = vpop.f32.mrf.mxu1 }
  0xd8   :  { %v431_v17 = vpop.f32.mrf.mxu0  ;;  %v667_v7 = vld [vmem:[%s4496_s1 + $0x68] sm:$0xff]  ;;  %v3450_v16 = vadd.f32 %v691_v5, %v547_v9 }
  0xd9   :  { %788 = vst.msk [vmem:[%s4497_s8 + $0x28] sm:$0xff] %vm782_vm3, %v723_v13  ;;  %v849_v21 = vpack.c.bf16 %v723_v13, %v722_v2  ;;  %v3313_v22 = vadd.f32 %v664_v11, %v440_v14  ;;  %v432_v23 = vadd.f32 %v3225_v38, %v431_v17  ;;  %v696_v13 = vld [vmem:[%s4496_s1 + $0x150] sm:$0xff]  ;;  %822 = vst.msk [vmem:[%s4497_s8 + $0x138] sm:$0xff] %vm782_vm3, %v3431_v8 }
  0xda   :  { %v2724_v27 = vpop.f32.mrf.mxu0  ;;  %v568_v17 = vadd.f32 %v2755_v12, %v3225_v38  ;;  %820 = vst.msk [vmem:[%s4497_s8 + $0x128] sm:$0xff] %vm782_vm3, %v3450_v16 }
  0xdb   :  { %793 = vst.msk [vmem:[%s4497_s8 + $0x50] sm:$0xff] %vm782_vm3, %v3313_v22  ;;  %v726_v31 = vadd.f32 %v662_v18, %v432_v23  ;;  %v443_v32 = vadd.f32 %v2724_v27, %v3225_v38  ;;  %2849 = vmatprep.mubr.msk.bf16.mxu0 %vm782_vm3, %v849_v21  ;;  %v559_v21 = vpop.f32.mrf.mxu1 }
  0xdc   :  { %v434_v35 = vpop.f32.mrf.mxu0  ;;  %2850 = vmatmul.mubr.msk.bf16.gmra.mxu0 %vm782_vm3, %v850_v26  ;;  %v3469_v25 = vadd.f32 %v696_v13, %v568_v17  ;;  %v560_v26 = vadd.f32 %v3225_v38, %v559_v21  ;;  %v675_v21 = vld [vmem:[%s4496_s1 + $0xa8] sm:$0xff] }
  0xdd   :  { %791 = vst.msk [vmem:[%s4497_s8 + $0x40] sm:$0xff] %vm782_vm3, %v726_v31  ;;  %v729_v40 = vadd.f32 %v665_v28, %v443_v32  ;;  %v435_v41 = vadd.f32 %v3225_v38, %v434_v35  ;;  %v697_v32 = vld [vmem:[%s4496_s1 + $0x158] sm:$0xff] }
  0xde   :  { %v2727_v44 = vpop.f32.mrf.mxu0  ;;  %v673_v35 = vld [vmem:[%s4496_s1 + $0x98] sm:$0xff]  ;;  %825 = vst.msk [vmem:[%s4497_s8 + $0x150] sm:$0xff] %vm782_vm3, %v3469_v25 }
  0xdf   :  { %794 = vst.msk [vmem:[%s4497_s8 + $0x58] sm:$0xff] %vm782_vm3, %v729_v40  ;;  %v727_v48 = vadd.f32 %v663_v36, %v435_v41  ;;  %v456_v49 = vadd.f32 %v2727_v44, %v3225_v38  ;;  %v852_v61 = vpack.c.bf16 %v729_v40, %v3313_v22  ;;  %v694_v22 = vld [vmem:[%s4496_s1 + $0x140] sm:$0xff] }
  0xe0   :  { %v447_v52 = vpop.f32.mrf.mxu0  ;;  %v3491_v36 = vadd.f32 %v694_v22, %v560_v26 }
  0xe1   :  { %792 = vst.msk [vmem:[%s4497_s8 + $0x48] sm:$0xff] %vm782_vm3, %v727_v48  ;;  %v851_v56 = vpack.c.bf16 %v727_v48, %v726_v31  ;;  %v3394_v57 = vadd.f32 %v668_v45, %v456_v49  ;;  %v448_v58 = vadd.f32 %v3225_v38, %v447_v52  ;;  %v2756_v31 = vpop.f32.mrf.mxu1  ;;  %v671_v45 = vld [vmem:[%s4496_s1 + $0x88] sm:$0xff]  ;;  %v700_v52 = vld [vmem:[%s4496_s1 + $0x170] sm:$0xff] }
  0xe2   :  { %v2728_v62 = vpop.f32.mrf.mxu0  ;;  %v571_v39 = vadd.f32 %v2756_v31, %v3225_v38  ;;  %823 = vst.msk [vmem:[%s4497_s8 + $0x140] sm:$0xff] %vm782_vm3, %v3491_v36  ;;  %v680_v31 = vld [vmem:[%s4496_s1 + $0xd0] sm:$0xff] }
  0xe3   :  { %797 = vst.msk [vmem:[%s4497_s8 + $0x70] sm:$0xff] %vm782_vm3, %v3394_v57  ;;  %v730_v2 = vadd.f32 %v666_v53, %v448_v58  ;;  %v459_v3 = vadd.f32 %v2728_v62, %v3225_v38  ;;  %2853 = vmatprep.mubr.msk.bf16.mxu0 %vm782_vm3, %v851_v56  ;;  %v562_v42 = vpop.f32.mrf.mxu1 }
  0xe4   :  { %v450_v6 = vpop.f32.mrf.mxu0  ;;  %2854 = vmatmul.mubr.msk.bf16.gmra.mxu0 %vm782_vm3, %v852_v61  ;;  %v3513_v47 = vadd.f32 %v697_v32, %v571_v39  ;;  %v563_v48 = vadd.f32 %v3225_v38, %v562_v42  ;;  %v698_v61 = vld [vmem:[%s4496_s1 + $0x160] sm:$0xff] }
  0xe5   :  { %795 = vst.msk [vmem:[%s4497_s8 + $0x60] sm:$0xff] %vm782_vm3, %v730_v2  ;;  %v733_v10 = vadd.f32 %v669_v63, %v459_v3  ;;  %v451_v11 = vadd.f32 %v3225_v38, %v450_v6  ;;  %v2759_v51 = vpop.f32.mrf.mxu1  ;;  %v674_v63 = vld [vmem:[%s4496_s1 + $0xa0] sm:$0xff] }
  0xe6   :  { %v2731_v14 = vpop.f32.mrf.mxu0  ;;  %826 = vst.msk [vmem:[%s4497_s8 + $0x158] sm:$0xff] %vm782_vm3, %v3513_v47  ;;  %v3532_v56 = vadd.f32 %v695_v43, %v563_v48  ;;  %v678_v42 = vld [vmem:[%s4496_s1 + $0xc0] sm:$0xff] }
  0xe7   :  { %798 = vst.msk [vmem:[%s4497_s8 + $0x78] sm:$0xff] %vm782_vm3, %v733_v10  ;;  %v731_v18 = vadd.f32 %v667_v7, %v451_v11  ;;  %v472_v20 = vadd.f32 %v2731_v14, %v3225_v38  ;;  %v854_v33 = vpack.c.bf16 %v733_v10, %v3394_v57  ;;  %v584_v57 = vadd.f32 %v2759_v51, %v3225_v38  ;;  %v575_v60 = vpop.f32.mrf.mxu1  ;;  %v701_v7 = vld [vmem:[%s4496_s1 + $0x178] sm:$0xff] }
  0xe8   :  { %v463_v23 = vpop.f32.mrf.mxu0  ;;  %824 = vst.msk [vmem:[%s4497_s8 + $0x148] sm:$0xff] %vm782_vm3, %v3532_v56  ;;  %v677_v11 = vld [vmem:[%s4496_s1 + $0xb8] sm:$0xff] }
  0xe9   :  { %796 = vst.msk [vmem:[%s4497_s8 + $0x68] sm:$0xff] %vm782_vm3, %v731_v18  ;;  %v853_v27 = vpack.c.bf16 %v731_v18, %v730_v2  ;;  %v3476_v28 = vadd.f32 %v672_v15, %v472_v20  ;;  %v464_v30 = vadd.f32 %v3225_v38, %v463_v23  ;;  %v3551_v1 = vadd.f32 %v700_v52, %v584_v57  ;;  %v2760_v6 = vpop.f32.mrf.mxu1  ;;  %v699_v18 = vld [vmem:[%s4496_s1 + $0x168] sm:$0xff]  ;;  %v705_v51 = vld [vmem:[%s4496_s1 + $0x198] sm:$0xff] }
  0xea   :  { %v2732_v34 = vpop.f32.mrf.mxu0  ;;  %v576_v2 = vadd.f32 %v3225_v38, %v575_v60  ;;  %v587_v13 = vadd.f32 %v2760_v6, %v3225_v38 }
  0xeb   :  { %801 = vst.msk [vmem:[%s4497_s8 + $0x90] sm:$0xff] %vm782_vm3, %v3476_v28  ;;  %v734_v40 = vadd.f32 %v670_v24, %v464_v30  ;;  %v475_v41 = vadd.f32 %v2732_v34, %v3225_v38  ;;  %2857 = vmatprep.mubr.msk.bf16.mxu0 %vm782_vm3, %v853_v27  ;;  %829 = vst.msk [vmem:[%s4497_s8 + $0x170] sm:$0xff] %vm782_vm3, %v3551_v1  ;;  %v578_v17 = vpop.f32.mrf.mxu1 }
  0xec   :  { %v466_v44 = vpop.f32.mrf.mxu0  ;;  %2858 = vmatmul.mubr.msk.bf16.gmra.mxu0 %vm782_vm3, %v854_v33  ;;  %v3573_v12 = vadd.f32 %v698_v61, %v576_v2  ;;  %v3595_v22 = vadd.f32 %v701_v7, %v587_v13  ;;  %v579_v23 = vadd.f32 %v3225_v38, %v578_v17  ;;  %v679_v2 = vld [vmem:[%s4496_s1 + $0xc8] sm:$0xff] }
  0xed   :  { %799 = vst.msk [vmem:[%s4497_s8 + $0x80] sm:$0xff] %vm782_vm3, %v734_v40  ;;  %v737_v49 = vadd.f32 %v673_v35, %v475_v41  ;;  %v467_v50 = vadd.f32 %v3225_v38, %v466_v44  ;;  %v2763_v27 = vpop.f32.mrf.mxu1 }
  0xee   :  { %v2735_v53 = vpop.f32.mrf.mxu0  ;;  %827 = vst.msk [vmem:[%s4497_s8 + $0x160] sm:$0xff] %vm782_vm3, %v3573_v12  ;;  %830 = vst.msk [vmem:[%s4497_s8 + $0x178] sm:$0xff] %vm782_vm3, %v3595_v22  ;;  %v3614_v32 = vadd.f32 %v699_v18, %v579_v23  ;;  %v600_v33 = vadd.f32 %v2763_v27, %v3225_v38  ;;  %v682_v23 = vld [vmem:[%s4496_s1 + $0xe0] sm:$0xff] }
  0xef   :  { %802 = vst.msk [vmem:[%s4497_s8 + $0x98] sm:$0xff] %vm782_vm3, %v737_v49  ;;  %v735_v58 = vadd.f32 %v671_v45, %v467_v50  ;;  %v488_v59 = vadd.f32 %v2735_v53, %v3225_v38  ;;  %v856_v9 = vpack.c.bf16 %v737_v49, %v3476_v28  ;;  %v704_v28 = vld [vmem:[%s4496_s1 + $0x190] sm:$0xff]  ;;  %v591_v39 = vpop.f32.mrf.mxu1 }
  0xf0   :  { %v479_v62 = vpop.f32.mrf.mxu0  ;;  %828 = vst.msk [vmem:[%s4497_s8 + $0x168] sm:$0xff] %vm782_vm3, %v3614_v32  ;;  %v3633_v43 = vadd.f32 %v704_v28, %v600_v33  ;;  %v592_v44 = vadd.f32 %v3225_v38, %v591_v39  ;;  %v709_v33 = vld [vmem:[%s4496_s1 + $0x1b8] sm:$0xff] }
  0xf1   :  { %800 = vst.msk [vmem:[%s4497_s8 + $0x88] sm:$0xff] %vm782_vm3, %v735_v58  ;;  %v855_v3 = vpack.c.bf16 %v735_v58, %v734_v40  ;;  %v3558_v4 = vadd.f32 %v676_v55, %v488_v59  ;;  %v480_v5 = vadd.f32 %v3225_v38, %v479_v62  ;;  %v702_v40 = vld [vmem:[%s4496_s1 + $0x180] sm:$0xff]  ;;  %v2764_v50 = vpop.f32.mrf.mxu1  ;;  %v681_v55 = vld [vmem:[%s4496_s1 + $0xd8] sm:$0xff]  ;;  %v703_v62 = vld [vmem:[%s4496_s1 + $0x188] sm:$0xff] }
  0xf2   :  { %v2736_v10 = vpop.f32.mrf.mxu0  ;;  %833 = vst.msk [vmem:[%s4497_s8 + $0x190] sm:$0xff] %vm782_vm3, %v3633_v43  ;;  %v3655_v57 = vadd.f32 %v702_v40, %v592_v44  ;;  %v603_v58 = vadd.f32 %v2764_v50, %v3225_v38  ;;  %v685_v39 = vld [vmem:[%s4496_s1 + $0xf8] sm:$0xff]  ;;  %v683_v50 = vld [vmem:[%s4496_s1 + $0xe8] sm:$0xff] }
  0xf3   :  { %805 = vst.msk [vmem:[%s4497_s8 + $0xb0] sm:$0xff] %vm782_vm3, %v3558_v4  ;;  %v738_v14 = vadd.f32 %v674_v63, %v480_v5  ;;  %v491_v15 = vadd.f32 %v2736_v10, %v3225_v38  ;;  %2861 = vmatprep.mubr.msk.bf16.mxu0 %vm782_vm3, %v855_v3  ;;  %v594_v61 = vpop.f32.mrf.mxu1 }
  0xf4   :  { %v482_v20 = vpop.f32.mrf.mxu0  ;;  %2862 = vmatmul.mubr.msk.bf16.gmra.mxu0 %vm782_vm3, %v856_v9  ;;  %831 = vst.msk [vmem:[%s4497_s8 + $0x180] sm:$0xff] %vm782_vm3, %v3655_v57  ;;  %v3677_v3 = vadd.f32 %v705_v51, %v603_v58  ;;  %v708_v9 = vld [vmem:[%s4496_s1 + $0x1b0] sm:$0xff] }
  0xf5   :  { %803 = vst.msk [vmem:[%s4497_s8 + $0xa0] sm:$0xff] %vm782_vm3, %v738_v14  ;;  %v741_v24 = vadd.f32 %v677_v11, %v491_v15  ;;  %v483_v26 = vadd.f32 %v3225_v38, %v482_v20  ;;  %v2767_v7 = vpop.f32.mrf.mxu1  ;;  %v684_v11 = vld [vmem:[%s4496_s1 + $0xf0] sm:$0xff]  ;;  %v706_v20 = vld [vmem:[%s4496_s1 + $0x1a0] sm:$0xff] }
  0xf6   :  { %v2739_v30 = vpop.f32.mrf.mxu0  ;;  %834 = vst.msk [vmem:[%s4497_s8 + $0x198] sm:$0xff] %vm782_vm3, %v3677_v3 }
  0xf7   :  { %806 = vst.msk [vmem:[%s4497_s8 + $0xb8] sm:$0xff] %vm782_vm3, %v741_v24  ;;  %v739_v34 = vadd.f32 %v675_v21, %v483_v26  ;;  %v504_v35 = vadd.f32 %v2739_v30, %v3225_v38  ;;  %v858_v52 = vpack.c.bf16 %v741_v24, %v3558_v4  ;;  %v595_v4 = vadd.f32 %v3225_v38, %v594_v61  ;;  %v607_v18 = vpop.f32.mrf.mxu1 }
  0xf8   :  { %v495_v41 = vpop.f32.mrf.mxu0  ;;  %v608_v26 = vadd.f32 %v3225_v38, %v607_v18 }
  0xf9   :  { %804 = vst.msk [vmem:[%s4497_s8 + $0xa8] sm:$0xff] %vm782_vm3, %v739_v34  ;;  %v857_v45 = vpack.c.bf16 %v739_v34, %v738_v14  ;;  %v3640_v48 = vadd.f32 %v680_v31, %v504_v35  ;;  %v496_v49 = vadd.f32 %v3225_v38, %v495_v41  ;;  %v3696_v13 = vadd.f32 %v703_v62, %v595_v4  ;;  %v2768_v31 = vpop.f32.mrf.mxu1 }
  0xfa   :  { %v2740_v53 = vpop.f32.mrf.mxu0  ;;  %v616_v14 = vadd.f32 %v2767_v7, %v3225_v38  ;;  %v3735_v40 = vadd.f32 %v706_v20, %v608_v26  ;;  %v619_v41 = vadd.f32 %v2768_v31, %v3225_v38  ;;  %v863_v7 = vpack.c.bf16 %v3368_v46, %v3327_v29  ;;  %v711_v29 = vld [vmem:[%s4496_s1 + $0x1c8] sm:$0xff] }
  0xfb   :  { %809 = vst.msk [vmem:[%s4497_s8 + $0xd0] sm:$0xff] %vm782_vm3, %v3640_v48  ;;  %v742_v59 = vadd.f32 %v678_v42, %v496_v49  ;;  %v507_v60 = vadd.f32 %v2740_v53, %v3225_v38  ;;  %2865 = vmatprep.mubr.msk.bf16.mxu0 %vm782_vm3, %v857_v45  ;;  %832 = vst.msk [vmem:[%s4497_s8 + $0x188] sm:$0xff] %vm782_vm3, %v3696_v13  ;;  %v610_v45 = vpop.f32.mrf.mxu1 }
  0xfc   :  { %v498_v63 = vpop.f32.mrf.mxu0  ;;  %2866 = vmatmul.mubr.msk.bf16.gmra.mxu0 %vm782_vm3, %v858_v52  ;;  %v3715_v24 = vadd.f32 %v708_v9, %v616_v14  ;;  %835 = vst.msk [vmem:[%s4497_s8 + $0x1a0] sm:$0xff] %vm782_vm3, %v3735_v40  ;;  %v3756_v51 = vadd.f32 %v709_v33, %v619_v41  ;;  %v611_v52 = vadd.f32 %v3225_v38, %v610_v45 }
  0xfd   :  { %807 = vst.msk [vmem:[%s4497_s8 + $0xc0] sm:$0xff] %vm782_vm3, %v742_v59  ;;  %v745_v5 = vadd.f32 %v681_v55, %v507_v60  ;;  %v499_v6 = vadd.f32 %v3225_v38, %v498_v63  ;;  %v2771_v58 = vpop.f32.mrf.mxu1  ;;  %v865_v33 = vpack.c.bf16 %v3450_v16, %v3409_v0  ;;  %v715_v0 = vld [vmem:[%s4496_s1 + $0x1e8] sm:$0xff]  ;;  %v867_v45 = vpack.c.bf16 %v3532_v56, %v3491_v36 }
  0xfe   :  { %v2743_v10 = vpop.f32.mrf.mxu0  ;;  %837 = vst.msk [vmem:[%s4497_s8 + $0x1b0] sm:$0xff] %vm782_vm3, %v3715_v24  ;;  %838 = vst.msk [vmem:[%s4497_s8 + $0x1b8] sm:$0xff] %vm782_vm3, %v3756_v51  ;;  %v632_v61 = vadd.f32 %v2771_v58, %v3225_v38  ;;  %v871_v36 = vpack.c.bf16 %v3696_v13, %v3655_v57 }
  0xff   :  { %810 = vst.msk [vmem:[%s4497_s8 + $0xd8] sm:$0xff] %vm782_vm3, %v745_v5  ;;  %v743_v15 = vadd.f32 %v679_v2, %v499_v6  ;;  %v520_v17 = vadd.f32 %v2743_v10, %v3225_v38  ;;  %v860_v34 = vpack.c.bf16 %v745_v5, %v3640_v48  ;;  %v707_v48 = vld [vmem:[%s4496_s1 + $0x1a8] sm:$0xff]  ;;  %v623_v63 = vpop.f32.mrf.mxu1  ;;  %v710_v2 = vld [vmem:[%s4496_s1 + $0x1c0] sm:$0xff]  ;;  %v713_v10 = vld [vmem:[%s4496_s1 + $0x1d8] sm:$0xff] }
 0x100   :  { %v511_v21 = vpop.f32.mrf.mxu0  ;;  %v3772_v60 = vadd.f32 %v707_v48, %v611_v52  ;;  %v624_v5 = vadd.f32 %v3225_v38, %v623_v63  ;;  %v866_v48 = vpack.c.bf16 %v3431_v8, %v3387_v54  ;;  %v870_v54 = vpack.c.bf16 %v3595_v22, %v3551_v1 }
 0x101   :  { %808 = vst.msk [vmem:[%s4497_s8 + $0xc8] sm:$0xff] %vm782_vm3, %v743_v15  ;;  %v859_v27 = vpack.c.bf16 %v743_v15, %v742_v59  ;;  %v748_v28 = vadd.f32 %v684_v11, %v520_v17  ;;  %v512_v30 = vadd.f32 %v3225_v38, %v511_v21  ;;  %v712_v59 = vld [vmem:[%s4496_s1 + $0x1d0] sm:$0xff]  ;;  %v2772_v9 = vpop.f32.mrf.mxu1  ;;  %v874_v22 = vpack.c.bf16 %v3756_v51, %v3715_v24 }
 0x102   :  { %v2744_v35 = vpop.f32.mrf.mxu0  ;;  %836 = vst.msk [vmem:[%s4497_s8 + $0x1a8] sm:$0xff] %vm782_vm3, %v3772_v60  ;;  %v3787_v4 = vadd.f32 %v712_v59, %v632_v61  ;;  %v3804_v14 = vadd.f32 %v710_v2, %v624_v5  ;;  %v635_v15 = vadd.f32 %v2772_v9, %v3225_v38  ;;  %v716_v21 = vld [vmem:[%s4496_s1 + $0x1f0] sm:$0xff] }
 0x103   :  { %813 = vst.msk [vmem:[%s4497_s8 + $0xf0] sm:$0xff] %vm782_vm3, %v748_v28  ;;  %v746_v42 = vadd.f32 %v682_v23, %v512_v30  ;;  %v523_v44 = vadd.f32 %v2744_v35, %v3225_v38  ;;  %2869 = vmatprep.mubr.msk.bf16.mxu0 %vm782_vm3, %v859_v27  ;;  %v626_v17 = vpop.f32.mrf.mxu1  ;;  %v717_v35 = vld [vmem:[%s4496_s1 + $0x1f8] sm:$0xff] }
 0x104   :  { %v514_v49 = vpop.f32.mrf.mxu0  ;;  %2870 = vmatmul.mubr.msk.bf16.gmra.mxu0 %vm782_vm3, %v860_v34  ;;  %841 = vst.msk [vmem:[%s4497_s8 + $0x1d0] sm:$0xff] %vm782_vm3, %v3787_v4  ;;  %839 = vst.msk [vmem:[%s4497_s8 + $0x1c0] sm:$0xff] %vm782_vm3, %v3804_v14  ;;  %v777_v46 = vadd.f32 %v713_v10, %v635_v15  ;;  %v627_v18 = vadd.f32 %v3225_v38, %v626_v17 }
 0x105   :  { %811 = vst.msk [vmem:[%s4497_s8 + $0xe0] sm:$0xff] %vm782_vm3, %v746_v42  ;;  %v749_v53 = vadd.f32 %v685_v39, %v523_v44  ;;  %v515_v55 = vadd.f32 %v3225_v38, %v514_v49  ;;  %v2775_v20 = vpop.f32.mrf.mxu1  ;;  %v864_v39 = vpack.c.bf16 %v3349_v37, %v3306_v19  ;;  %v868_v49 = vpack.c.bf16 %v3513_v47, %v3469_v25 }
 0x106   :  { %842 = vst.msk [vmem:[%s4497_s8 + $0x1d8] sm:$0xff] %vm782_vm3, %v777_v46  ;;  %v775_v23 = vadd.f32 %v711_v29, %v627_v18  ;;  %v648_v26 = vadd.f32 %v2775_v20, %v3225_v38  ;;  %v873_v25 = vpack.c.bf16 %v3772_v60, %v3735_v40  ;;  %v3947_v29 = vld [vmem:[%s4498_s6] ss:$0 sm:$0xff] }
 0x107   :  { %814 = vst.msk [vmem:[%s4497_s8 + $0xf8] sm:$0xff] %vm782_vm3, %v749_v53  ;;  %v747_v62 = vadd.f32 %v683_v50, %v515_v55  ;;  %v862_v11 = vpack.c.bf16 %v749_v53, %v748_v28  ;;  %v639_v27 = vpop.f32.mrf.mxu1  ;;  %v714_v28 = vld [vmem:[%s4496_s1 + $0x1e0] sm:$0xff] }
 0x108   :  { %840 = vst.msk [vmem:[%s4497_s8 + $0x1c8] sm:$0xff] %vm782_vm3, %v775_v23  ;;  %v780_v30 = vadd.f32 %v716_v21, %v648_v26  ;;  %v640_v31 = vadd.f32 %v3225_v38, %v639_v27  ;;  %v875_v57 = vpack.c.bf16 %v775_v23, %v3804_v14  ;;  %v3954_v20 = vld [vmem:[%s4499_s7] ss:$0 sm:$0xff] }
 0x109   :  { %812 = vst.msk [vmem:[%s4497_s8 + $0xe8] sm:$0xff] %vm782_vm3, %v747_v62  ;;  %v861_v6 = vpack.c.bf16 %v747_v62, %v746_v42  ;;  %v2776_v34 = vpop.f32.mrf.mxu1 }
 0x10a   :  { %845 = vst.msk [vmem:[%s4497_s8 + $0x1f0] sm:$0xff] %vm782_vm3, %v780_v30  ;;  %v778_v41 = vadd.f32 %v714_v28, %v640_v31  ;;  %v651_v42 = vadd.f32 %v2776_v34, %v3225_v38 }
 0x10b   :  { %2873 = vmatprep.mubr.msk.bf16.mxu0 %vm782_vm3, %v861_v6  ;;  %v642_v44 = vpop.f32.mrf.mxu1 }
 0x10c   :  { %2874 = vmatmul.mubr.msk.bf16.gmra.mxu0 %vm782_vm3, %v862_v11  ;;  %843 = vst.msk [vmem:[%s4497_s8 + $0x1e0] sm:$0xff] %vm782_vm3, %v778_v41  ;;  %v781_v19 = vadd.f32 %v717_v35, %v651_v42  ;;  %v643_v37 = vadd.f32 %v3225_v38, %v642_v44  ;;  %v869_v38 = vpack.c.bf16 %v3614_v32, %v3573_v12 }
 0x10d   :  { %2877 = vmatprep.mubr.msk.bf16.mxu0 %vm782_vm3, %v863_v7  ;;  %v2781_v50 = vpop.f32.mrf.mxu1  ;;  %v872_v12 = vpack.c.bf16 %v3677_v3, %v3633_v43  ;;  %v876_v3 = vpack.c.bf16 %v777_v46, %v3787_v4 }
 0x10e   :  { %846 = vst.msk [vmem:[%s4497_s8 + $0x1f8] sm:$0xff] %vm782_vm3, %v781_v19  ;;  %v779_v16 = vadd.f32 %v715_v0, %v643_v37  ;;  %v878_v24 = vpack.c.bf16 %v781_v19, %v780_v30 }
 0x10f   :  { %v918_v56 = vpop.f32.mrf.mxu1 }
 0x110   :  { %844 = vst.msk [vmem:[%s4497_s8 + $0x1e8] sm:$0xff] %vm782_vm3, %v779_v16  ;;  %v877_v40 = vpack.c.bf16 %v779_v16, %v778_v41 }
 0x111   :  { %v2782_v8 = vpop.f32.mrf.mxu1 }
 0x113   :  { %v921_v47 = vpop.f32.mrf.mxu1 }
 0x114   :  { %2878 = vmatmul.mubr.msk.bf16.gmra.mxu0 %vm782_vm3, %v864_v39 }
 0x115   :  { %2881 = vmatprep.mubr.msk.bf16.mxu0 %vm782_vm3, %v865_v33  ;;  %v2785_v32 = vpop.f32.mrf.mxu1 }
 0x117   :  { %v3890_v1 = vpop.f32.mrf.mxu1 }
 0x119   :  { %v3896_v13 = vpop.f32.mrf.mxu1 }
 0x11b   :  { %v3898_v43 = vpop.f32.mrf.mxu1 }
 0x11c   :  { %2882 = vmatmul.mubr.msk.bf16.gmra.mxu0 %vm782_vm3, %v866_v48 }
 0x11d   :  { %2885 = vmatprep.mubr.msk.bf16.mxu0 %vm782_vm3, %v867_v45  ;;  %v3903_v52 = vpop.f32.mrf.mxu1 }
 0x11f   :  { %v3905_v53 = vpop.f32.mrf.mxu1 }
 0x121   :  { %v3908_v51 = vpop.f32.mrf.mxu1 }
 0x123   :  { %v3910_v55 = vpop.f32.mrf.mxu1 }
 0x124   :  { %2886 = vmatmul.mubr.msk.bf16.gmra.mxu0 %vm782_vm3, %v868_v49 }
 0x125   :  { %2889 = vmatprep.mubr.msk.bf16.mxu0 %vm782_vm3, %v869_v38  ;;  %v3912_v58 = vpop.f32.mrf.mxu1 }
 0x127   :  { %v3914_v59 = vpop.f32.mrf.mxu1 }
 0x129   :  { %v3916_v60 = vpop.f32.mrf.mxu1 }
 0x12b   :  { %v3918_v61 = vpop.f32.mrf.mxu1 }
 0x12c   :  { %2890 = vmatmul.mubr.msk.bf16.gmra.mxu0 %vm782_vm3, %v870_v54 }
 0x12d   :  { %2893 = vmatprep.mubr.msk.bf16.mxu0 %vm782_vm3, %v871_v36  ;;  %v3920_v62 = vpop.f32.mrf.mxu1 }
 0x12f   :  { %v3922_v63 = vpop.f32.mrf.mxu1 }
 0x131   :  { %v3924_v2 = vpop.f32.mrf.mxu1 }
 0x133   :  { %v3926_v4 = vpop.f32.mrf.mxu1 }
 0x134   :  { %2894 = vmatmul.mubr.msk.bf16.gmra.mxu0 %vm782_vm3, %v872_v12 }
 0x135   :  { %2897 = vmatprep.mubr.msk.bf16.mxu0 %vm782_vm3, %v873_v25  ;;  %v3928_v5 = vpop.f32.mrf.mxu1 }
 0x137   :  { %v3930_v6 = vpop.f32.mrf.mxu1 }
 0x139   :  { %v3932_v7 = vpop.f32.mrf.mxu1 }
 0x13b   :  { %v3934_v9 = vpop.f32.mrf.mxu1 }
 0x13c   :  { %2898 = vmatmul.mubr.msk.bf16.gmra.mxu0 %vm782_vm3, %v874_v22 }
 0x13d   :  { %2901 = vmatprep.mubr.msk.bf16.mxu0 %vm782_vm3, %v875_v57  ;;  %v3936_v10 = vpop.f32.mrf.mxu1 }
 0x13f   :  { %v3938_v11 = vpop.f32.mrf.mxu1 }
 0x141   :  { %v3940_v14 = vpop.f32.mrf.mxu1 }
 0x143   :  { %v3942_v15 = vpop.f32.mrf.mxu1 }
 0x144   :  { %2902 = vmatmul.mubr.msk.bf16.gmra.mxu0 %vm782_vm3, %v876_v3 }
 0x145   :  { %2905 = vmatprep.mubr.msk.bf16.mxu0 %vm782_vm3, %v877_v40  ;;  %v3949_v18 = vpop.f32.mrf.mxu1 }
 0x147   :  { %v3959_v33 = vpop.f32.mrf.mxu1 }
 0x149   :  { %v3965_v45 = vpop.f32.mrf.mxu1 }
 0x14b   :  { %v3970_v40 = vpop.f32.mrf.mxu1 }
 0x14c   :  { %2906 = vmatmul.mubr.msk.bf16.gmra.mxu0 %vm782_vm3, %v878_v24 }
 0x194   :  { %v2847_v17 = vpop.f32.mrf.mxu0 }
 0x195   :  { %v1316_v46 = vadd.f32 %v2847_v17, %v2781_v50 }
 0x196   :  { %v1307_v21 = vpop.f32.mrf.mxu0 }
 0x197   :  { %v1571_v23 = vmul.f32 %v3947_v29, %v1316_v46  ;;  %v1308_v26 = vadd.f32 %v1307_v21, %v918_v56 }
 0x198   :  { %v2848_v27 = vpop.f32.mrf.mxu0 }
 0x199   :  { %v1642_v28 = vadd.f32 %v3954_v20, %v1571_v23  ;;  %v1569_v30 = vmul.f32 %v3947_v29, %v1308_v26  ;;  %v1319_v31 = vadd.f32 %v2848_v27, %v2782_v8 }
 0x19a   :  { %v1310_v34 = vpop.f32.mrf.mxu0 }
 0x19b   :  { %v1706_v35 = vadd.f32 3.0, %v1642_v28  ;;  %v1640_v39 = vadd.f32 %v3954_v20, %v1569_v30  ;;  %v1572_v41 = vmul.f32 %v3947_v29, %v1319_v31  ;;  %v1311_v42 = vadd.f32 %v1310_v34, %v921_v47 }
 0x19c   :  { %v2851_v44 = vpop.f32.mrf.mxu0 }
 0x19d   :  { %v1770_v0 = vmax.f32 %v1706_v35, 0.0  ;;  %v1704_v19 = vadd.f32 3.0, %v1640_v39  ;;  %v1643_v37 = vadd.f32 %v3954_v20, %v1572_v41  ;;  %v1570_v16 = vmul.f32 %v3947_v29, %v1311_v42 }
 0x19e   :  { %v1332_v48 = vadd.f32 %v2851_v44, %v2785_v32  ;;  %v1323_v38 = vpop.f32.mrf.mxu0  ;;  %v3978_v44 = vpop.f32.mrf.mxu1 }
 0x19f   :  { %v1834_v49 = vmin.f32 %v1770_v0, 6.0  ;;  %v1768_v50 = vmax.f32 %v1704_v19, 0.0  ;;  %v1707_v36 = vadd.f32 3.0, %v1643_v37  ;;  %v1641_v56 = vadd.f32 %v3954_v20, %v1570_v16 }
 0x1a0   :  { %v1575_v54 = vmul.f32 %v3947_v29, %v1332_v48  ;;  %v1324_v8 = vadd.f32 %v1323_v38, %v3890_v1  ;;  %v2852_v25 = vpop.f32.mrf.mxu0 }
 0x1a1   :  { %v1898_v47 = vmul.f32 %v1834_v49, %v1642_v28  ;;  %v1832_v12 = vmin.f32 %v1768_v50, 6.0  ;;  %v1771_v57 = vmax.f32 %v1707_v36, 0.0  ;;  %v1705_v22 = vadd.f32 3.0, %v1641_v56 }
 0x1a2   :  { %v1646_v32 = vadd.f32 %v3954_v20, %v1575_v54  ;;  %v1573_v3 = vmul.f32 %v3947_v29, %v1324_v8  ;;  %v1335_v24 = vadd.f32 %v2852_v25, %v3896_v13  ;;  %v1326_v17 = vpop.f32.mrf.mxu0 }
 0x1a3   :  { %v1962_v46 = vmul.f32 0.16666667, %v1898_v47  ;;  %v1896_v21 = vmul.f32 %v1832_v12, %v1640_v39  ;;  %v1835_v23 = vmin.f32 %v1771_v57, 6.0  ;;  %v1769_v26 = vmax.f32 %v1705_v22, 0.0 }
 0x1a4   :  { %v1710_v1 = vadd.f32 3.0, %v1646_v32  ;;  %v1644_v27 = vadd.f32 %v3954_v20, %v1573_v3  ;;  %v1576_v28 = vmul.f32 %v3947_v29, %v1335_v24  ;;  %v1327_v30 = vadd.f32 %v1326_v17, %v3898_v43  ;;  %v2855_v31 = vpop.f32.mrf.mxu0 }
 0x1a5   :  { %v2550_v34 = vpack.c.bf16 %v1962_v46, %v1962_v46  ;;  %v1960_v35 = vmul.f32 0.16666667, %v1896_v21  ;;  %v1899_v41 = vmul.f32 %v1835_v23, %v1643_v37  ;;  %v1833_v42 = vmin.f32 %v1769_v26, 6.0 }
 0x1a6   :  { %v1774_v13 = vmax.f32 %v1710_v1, 0.0  ;;  %v1708_v0 = vadd.f32 3.0, %v1644_v27  ;;  %v1647_v39 = vadd.f32 %v3954_v20, %v1576_v28  ;;  %v1574_v19 = vmul.f32 %v3947_v29, %v1327_v30  ;;  %v1339_v16 = vpop.f32.mrf.mxu0 }
 0x1a7   :  { %2283 = vst.msk [vmem:[%s4500_s9 + $0x8] sm:$0xf] %vm2280_vm4, %v2550_v34  ;;  %v2548_v43 = vpack.c.bf16 %v1960_v35, %v1960_v35  ;;  %v1963_v48 = vmul.f32 0.16666667, %v1899_v41  ;;  %v1897_v38 = vmul.f32 %v1833_v42, %v1641_v56  ;;  %v1348_v37 = vadd.f32 %v2855_v31, %v3903_v52  ;;  %v3994_v56 = vpop.f32.mrf.mxu1 }
 0x1a8   :  { %v1838_v49 = vmin.f32 %v1774_v13, 6.0  ;;  %v1772_v50 = vmax.f32 %v1708_v0, 0.0  ;;  %v1711_v36 = vadd.f32 3.0, %v1647_v39  ;;  %v1645_v54 = vadd.f32 %v3954_v20, %v1574_v19  ;;  %v2856_v8 = vpop.f32.mrf.mxu0 }
 0x1a9   :  { %2281 = vst.msk [vmem:[%s4500_s9] sm:$0xf] %vm2280_vm4, %v2548_v43  ;;  %v2551_v25 = vpack.c.bf16 %v1963_v48, %v1963_v48  ;;  %v1961_v47 = vmul.f32 0.16666667, %v1897_v38  ;;  %v1579_v12 = vmul.f32 %v3947_v29, %v1348_v37  ;;  %v1340_v57 = vadd.f32 %v1339_v16, %v3905_v53  ;;  %v4010_v42 = vpop.f32.mrf.mxu1 }
 0x1aa   :  { %v1902_v52 = vmul.f32 %v1838_v49, %v1646_v32  ;;  %v1836_v22 = vmin.f32 %v1772_v50, 6.0  ;;  %v1775_v3 = vmax.f32 %v1711_v36, 0.0  ;;  %v1709_v24 = vadd.f32 3.0, %v1645_v54  ;;  %v1342_v17 = vpop.f32.mrf.mxu0 }
 0x1ab   :  { %2284 = vst.msk [vmem:[%s4500_s9 + $0xc] sm:$0xf] %vm2280_vm4, %v2551_v25  ;;  %v2549_v46 = vpack.c.bf16 %v1961_v47, %v1961_v47  ;;  %v1650_v21 = vadd.f32 %v3954_v20, %v1579_v12  ;;  %v1577_v23 = vmul.f32 %v3947_v29, %v1340_v57  ;;  %v1351_v26 = vadd.f32 %v2856_v8, %v3908_v51  ;;  %v4020_v12 = vpop.f32.mrf.mxu1 }
 0x1ac   :  { %v1966_v53 = vmul.f32 0.16666667, %v1902_v52  ;;  %v1900_v1 = vmul.f32 %v1836_v22, %v1644_v27  ;;  %v1839_v28 = vmin.f32 %v1775_v3, 6.0  ;;  %v1773_v32 = vmax.f32 %v1709_v24, 0.0  ;;  %v2859_v30 = vpop.f32.mrf.mxu0 }
 0x1ad   :  { %2282 = vst.msk [vmem:[%s4500_s9 + $0x4] sm:$0xf] %vm2280_vm4, %v2549_v46  ;;  %v1714_v31 = vadd.f32 3.0, %v1650_v21  ;;  %v1648_v34 = vadd.f32 %v3954_v20, %v1577_v23  ;;  %v1580_v35 = vmul.f32 %v3947_v29, %v1351_v26  ;;  %v1343_v41 = vadd.f32 %v1342_v17, %v3910_v55 }
 0x1ae   :  { %v2554_v51 = vpack.c.bf16 %v1966_v53, %v1966_v53  ;;  %v1964_v13 = vmul.f32 0.16666667, %v1900_v1  ;;  %v1903_v27 = vmul.f32 %v1839_v28, %v1647_v39  ;;  %v1837_v0 = vmin.f32 %v1773_v32, 6.0  ;;  %v1355_v19 = vpop.f32.mrf.mxu0 }
 0x1af   :  { %v1778_v16 = vmax.f32 %v1714_v31, 0.0  ;;  %v1712_v43 = vadd.f32 3.0, %v1648_v34  ;;  %v1651_v48 = vadd.f32 %v3954_v20, %v1580_v35  ;;  %v1578_v38 = vmul.f32 %v3947_v29, %v1343_v41  ;;  %v4035_v31 = vpop.f32.mrf.mxu1 }
 0x1b0   :  { %2287 = vst.msk [vmem:[%s4500_s9 + $0x18] sm:$0xf] %vm2280_vm4, %v2554_v51  ;;  %v2552_v37 = vpack.c.bf16 %v1964_v13, %v1964_v13  ;;  %v1967_v55 = vmul.f32 0.16666667, %v1903_v27  ;;  %v1901_v49 = vmul.f32 %v1837_v0, %v1645_v54  ;;  %v1364_v50 = vadd.f32 %v2859_v30, %v3912_v58  ;;  %v2860_v36 = vpop.f32.mrf.mxu0 }
 0x1b1   :  { %v1842_v39 = vmin.f32 %v1778_v16, 6.0  ;;  %v1776_v8 = vmax.f32 %v1712_v43, 0.0  ;;  %v1715_v25 = vadd.f32 3.0, %v1651_v48  ;;  %v1649_v47 = vadd.f32 %v3954_v20, %v1578_v38 }
 0x1b2   :  { %2285 = vst.msk [vmem:[%s4500_s9 + $0x10] sm:$0xf] %vm2280_vm4, %v2552_v37  ;;  %v2555_v57 = vpack.c.bf16 %v1967_v55, %v1967_v55  ;;  %v1965_v52 = vmul.f32 0.16666667, %v1901_v49  ;;  %v1583_v22 = vmul.f32 %v3947_v29, %v1364_v50  ;;  %v1356_v54 = vadd.f32 %v1355_v19, %v3914_v59  ;;  %v1358_v58 = vpop.f32.mrf.mxu0 }
 0x1b3   :  { %v1906_v3 = vmul.f32 %v1842_v39, %v1650_v21  ;;  %v1840_v24 = vmin.f32 %v1776_v8, 6.0  ;;  %v1779_v17 = vmax.f32 %v1715_v25, 0.0  ;;  %v1713_v46 = vadd.f32 3.0, %v1649_v47  ;;  %v4051_v39 = vpop.f32.mrf.mxu1 }
 0x1b4   :  { %2288 = vst.msk [vmem:[%s4500_s9 + $0x1c] sm:$0xf] %vm2280_vm4, %v2555_v57  ;;  %v2553_v23 = vpack.c.bf16 %v1965_v52, %v1965_v52  ;;  %v1654_v26 = vadd.f32 %v3954_v20, %v1583_v22  ;;  %v1581_v53 = vmul.f32 %v3947_v29, %v1356_v54  ;;  %v1367_v1 = vadd.f32 %v2860_v36, %v3916_v60  ;;  %v2863_v28 = vpop.f32.mrf.mxu0 }
 0x1b5   :  { %v1970_v32 = vmul.f32 0.16666667, %v1906_v3  ;;  %v1904_v59 = vmul.f32 %v1840_v24, %v1648_v34  ;;  %v1843_v30 = vmin.f32 %v1779_v17, 6.0  ;;  %v1777_v21 = vmax.f32 %v1713_v46, 0.0 }
 0x1b6   :  { %2286 = vst.msk [vmem:[%s4500_s9 + $0x14] sm:$0xf] %vm2280_vm4, %v2553_v23  ;;  %v1718_v35 = vadd.f32 3.0, %v1654_v26  ;;  %v1652_v41 = vadd.f32 %v3954_v20, %v1581_v53  ;;  %v1584_v51 = vmul.f32 %v3947_v29, %v1367_v1  ;;  %v1359_v13 = vadd.f32 %v1358_v58, %v3918_v61  ;;  %v1371_v60 = vpop.f32.mrf.mxu0 }
 0x1b7   :  { %v2558_v27 = vpack.c.bf16 %v1970_v32, %v1970_v32  ;;  %v1968_v0 = vmul.f32 0.16666667, %v1904_v59  ;;  %v1907_v34 = vmul.f32 %v1843_v30, %v1651_v48  ;;  %v1841_v19 = vmin.f32 %v1777_v21, 6.0  ;;  %v4067_v32 = vpop.f32.mrf.mxu1 }
 0x1b8   :  { %v1782_v16 = vmax.f32 %v1718_v35, 0.0  ;;  %v1716_v43 = vadd.f32 3.0, %v1652_v41  ;;  %v1655_v38 = vadd.f32 %v3954_v20, %v1584_v51  ;;  %v1582_v37 = vmul.f32 %v3947_v29, %v1359_v13  ;;  %v2864_v55 = vpop.f32.mrf.mxu0 }
 0x1b9   :  { %2291 = vst.msk [vmem:[%s4500_s9 + $0x28] sm:$0xf] %vm2280_vm4, %v2558_v27  ;;  %v2556_v49 = vpack.c.bf16 %v1968_v0, %v1968_v0  ;;  %v1971_v50 = vmul.f32 0.16666667, %v1907_v34  ;;  %v1905_v61 = vmul.f32 %v1841_v19, %v1649_v47  ;;  %v1380_v36 = vadd.f32 %v2863_v28, %v3920_v62 }
 0x1ba   :  { %v1846_v48 = vmin.f32 %v1782_v16, 6.0  ;;  %v1780_v8 = vmax.f32 %v1716_v43, 0.0  ;;  %v1719_v25 = vadd.f32 3.0, %v1655_v38  ;;  %v1653_v57 = vadd.f32 %v3954_v20, %v1582_v37  ;;  %v1374_v52 = vpop.f32.mrf.mxu0 }
 0x1bb   :  { %2289 = vst.msk [vmem:[%s4500_s9 + $0x20] sm:$0xf] %vm2280_vm4, %v2556_v49  ;;  %v2559_v22 = vpack.c.bf16 %v1971_v50, %v1971_v50  ;;  %v1969_v54 = vmul.f32 0.16666667, %v1905_v61  ;;  %v1587_v58 = vmul.f32 %v3947_v29, %v1380_v36  ;;  %v1372_v47 = vadd.f32 %v1371_v60, %v3922_v63 }
 0x1bc   :  { %v1910_v62 = vmul.f32 %v1846_v48, %v1654_v26  ;;  %v1844_v3 = vmin.f32 %v1780_v8, 6.0  ;;  %v1783_v24 = vmax.f32 %v1719_v25, 0.0  ;;  %v1717_v17 = vadd.f32 3.0, %v1653_v57  ;;  %v2867_v46 = vpop.f32.mrf.mxu0 }
 0x1bd   :  { %2292 = vst.msk [vmem:[%s4500_s9 + $0x2c] sm:$0xf] %vm2280_vm4, %v2559_v22  ;;  %v2557_v23 = vpack.c.bf16 %v1969_v54, %v1969_v54  ;;  %v1658_v53 = vadd.f32 %v3954_v20, %v1587_v58  ;;  %v1585_v1 = vmul.f32 %v3947_v29, %v1372_v47  ;;  %v1383_v28 = vadd.f32 %v2864_v55, %v3924_v2  ;;  %v4078_v55 = vpop.f32.mrf.mxu1 }
 0x1be   :  { %v1974_v63 = vmul.f32 0.16666667, %v1910_v62  ;;  %v1908_v26 = vmul.f32 %v1844_v3, %v1652_v41  ;;  %v1847_v59 = vmin.f32 %v1783_v24, 6.0  ;;  %v1781_v30 = vmax.f32 %v1717_v17, 0.0  ;;  %v1387_v21 = vpop.f32.mrf.mxu0 }
 0x1bf   :  { %2290 = vst.msk [vmem:[%s4500_s9 + $0x24] sm:$0xf] %vm2280_vm4, %v2557_v23  ;;  %v1722_v35 = vadd.f32 3.0, %v1658_v53  ;;  %v1656_v51 = vadd.f32 %v3954_v20, %v1585_v1  ;;  %v1588_v13 = vmul.f32 %v3947_v29, %v1383_v28  ;;  %v1375_v60 = vadd.f32 %v1374_v52, %v3926_v4  ;;  %v4092_v24 = vpop.f32.mrf.mxu1 }
 0x1c0   :  { %v2562_v2 = vpack.c.bf16 %v1974_v63, %v1974_v63  ;;  %v1972_v27 = vmul.f32 0.16666667, %v1908_v26  ;;  %v1911_v0 = vmul.f32 %v1847_v59, %v1655_v38  ;;  %v1845_v34 = vmin.f32 %v1781_v30, 6.0  ;;  %v2868_v41 = vpop.f32.mrf.mxu0 }
 0x1c1   :  { %v1786_v19 = vmax.f32 %v1722_v35, 0.0  ;;  %v1720_v16 = vadd.f32 3.0, %v1656_v51  ;;  %v1659_v43 = vadd.f32 %v3954_v20, %v1588_v13  ;;  %v1586_v37 = vmul.f32 %v3947_v29, %v1375_v60 }
 0x1c2   :  { %2295 = vst.msk [vmem:[%s4500_s9 + $0x38] sm:$0xf] %vm2280_vm4, %v2562_v2  ;;  %v2560_v49 = vpack.c.bf16 %v1972_v27, %v1972_v27  ;;  %v1975_v4 = vmul.f32 0.16666667, %v1911_v0  ;;  %v1909_v50 = vmul.f32 %v1845_v34, %v1653_v57  ;;  %v1396_v38 = vadd.f32 %v2867_v46, %v3928_v5  ;;  %v1390_v61 = vpop.f32.mrf.mxu0 }
 0x1c3   :  { %v1850_v36 = vmin.f32 %v1786_v19, 6.0  ;;  %v1784_v48 = vmax.f32 %v1720_v16, 0.0  ;;  %v1723_v8 = vadd.f32 3.0, %v1659_v43  ;;  %v1657_v25 = vadd.f32 %v3954_v20, %v1586_v37 }
 0x1c4   :  { %2293 = vst.msk [vmem:[%s4500_s9 + $0x30] sm:$0xf] %vm2280_vm4, %v2560_v49  ;;  %v2563_v52 = vpack.c.bf16 %v1975_v4, %v1975_v4  ;;  %v1973_v22 = vmul.f32 0.16666667, %v1909_v50  ;;  %v1591_v54 = vmul.f32 %v3947_v29, %v1396_v38  ;;  %v1388_v58 = vadd.f32 %v1387_v21, %v3930_v6  ;;  %v2871_v57 = vpop.f32.mrf.mxu0 }
 0x1c5   :  { %v1914_v47 = vmul.f32 %v1850_v36, %v1658_v53  ;;  %v1848_v5 = vmin.f32 %v1784_v48, 6.0  ;;  %v1787_v62 = vmax.f32 %v1723_v8, 0.0  ;;  %v1721_v3 = vadd.f32 3.0, %v1657_v25 }
 0x1c6   :  { %2296 = vst.msk [vmem:[%s4500_s9 + $0x3c] sm:$0xf] %vm2280_vm4, %v2563_v52  ;;  %v2561_v17 = vpack.c.bf16 %v1973_v22, %v1973_v22  ;;  %v1662_v46 = vadd.f32 %v3954_v20, %v1591_v54  ;;  %v1589_v23 = vmul.f32 %v3947_v29, %v1388_v58  ;;  %v1399_v1 = vadd.f32 %v2868_v41, %v3932_v7  ;;  %v1403_v6 = vpop.f32.mrf.mxu0 }
 0x1c7   :  { %v1978_v28 = vmul.f32 0.16666667, %v1914_v47  ;;  %v1912_v53 = vmul.f32 %v1848_v5, %v1656_v51  ;;  %v1851_v63 = vmin.f32 %v1787_v62, 6.0  ;;  %v1785_v26 = vmax.f32 %v1721_v3, 0.0  ;;  %v4108_v51 = vpop.f32.mrf.mxu1 }
 0x1c8   :  { %2294 = vst.msk [vmem:[%s4500_s9 + $0x34] sm:$0xf] %vm2280_vm4, %v2561_v17  ;;  %v1726_v59 = vadd.f32 3.0, %v1662_v46  ;;  %v1660_v30 = vadd.f32 %v3954_v20, %v1589_v23  ;;  %v1592_v21 = vmul.f32 %v3947_v29, %v1399_v1  ;;  %v1391_v35 = vadd.f32 %v1390_v61, %v3934_v9  ;;  %v2872_v13 = vpop.f32.mrf.mxu0 }
 0x1c9   :  { %v2566_v60 = vpack.c.bf16 %v1978_v28, %v1978_v28  ;;  %v1976_v7 = vmul.f32 0.16666667, %v1912_v53  ;;  %v1915_v2 = vmul.f32 %v1851_v63, %v1659_v43  ;;  %v1849_v27 = vmin.f32 %v1785_v26, 6.0 }
 0x1ca   :  { %v1790_v0 = vmax.f32 %v1726_v59, 0.0  ;;  %v1724_v34 = vadd.f32 3.0, %v1660_v30  ;;  %v1663_v41 = vadd.f32 %v3954_v20, %v1592_v21  ;;  %v1590_v19 = vmul.f32 %v3947_v29, %v1391_v35  ;;  %v1406_v16 = vpop.f32.mrf.mxu0 }
 0x1cb   :  { %2299 = vst.msk [vmem:[%s4500_s9 + $0x48] sm:$0xf] %vm2280_vm4, %v2566_v60  ;;  %v2564_v9 = vpack.c.bf16 %v1976_v7, %v1976_v7  ;;  %v1979_v37 = vmul.f32 0.16666667, %v1915_v2  ;;  %v1913_v49 = vmul.f32 %v1849_v27, %v1657_v25  ;;  %v1412_v43 = vadd.f32 %v2871_v57, %v3936_v10  ;;  %v4124_v25 = vpop.f32.mrf.mxu1 }
 0x1cc   :  { %v1854_v4 = vmin.f32 %v1790_v0, 6.0  ;;  %v1788_v50 = vmax.f32 %v1724_v34, 0.0  ;;  %v1727_v38 = vadd.f32 3.0, %v1663_v41  ;;  %v1661_v61 = vadd.f32 %v3954_v20, %v1590_v19  ;;  %v2875_v36 = vpop.f32.mrf.mxu0 }
 0x1cd   :  { %2297 = vst.msk [vmem:[%s4500_s9 + $0x40] sm:$0xf] %vm2280_vm4, %v2564_v9  ;;  %v2567_v48 = vpack.c.bf16 %v1979_v37, %v1979_v37  ;;  %v1977_v8 = vmul.f32 0.16666667, %v1913_v49  ;;  %v1595_v52 = vmul.f32 %v3947_v29, %v1412_v43  ;;  %v1404_v22 = vadd.f32 %v1403_v6, %v3938_v11  ;;  %v4140_v59 = vpop.f32.mrf.mxu1 }
 0x1ce   :  { %v1918_v10 = vmul.f32 %v1854_v4, %v1662_v46  ;;  %v1852_v54 = vmin.f32 %v1788_v50, 6.0  ;;  %v1791_v58 = vmax.f32 %v1727_v38, 0.0  ;;  %v1725_v57 = vadd.f32 3.0, %v1661_v61  ;;  %v1419_v47 = vpop.f32.mrf.mxu0 }
 0x1cf   :  { %2300 = vst.msk [vmem:[%s4500_s9 + $0x4c] sm:$0xf] %vm2280_vm4, %v2567_v48  ;;  %v2565_v5 = vpack.c.bf16 %v1977_v8, %v1977_v8  ;;  %v1666_v62 = vadd.f32 %v3954_v20, %v1595_v52  ;;  %v1593_v3 = vmul.f32 %v3947_v29, %v1404_v22  ;;  %v1415_v17 = vadd.f32 %v2872_v13, %v3940_v14  ;;  %v4150_v43 = vpop.f32.mrf.mxu1 }
 0x1d0   :  { %v1982_v11 = vmul.f32 0.16666667, %v1918_v10  ;;  %v1916_v23 = vmul.f32 %v1852_v54, %v1660_v30  ;;  %v1855_v1 = vmin.f32 %v1791_v58, 6.0  ;;  %v1789_v46 = vmax.f32 %v1725_v57, 0.0  ;;  %v2876_v6 = vpop.f32.mrf.mxu0 }
 0x1d1   :  { %2298 = vst.msk [vmem:[%s4500_s9 + $0x44] sm:$0xf] %vm2280_vm4, %v2565_v5  ;;  %v1730_v28 = vadd.f32 3.0, %v1666_v62  ;;  %v1664_v53 = vadd.f32 %v3954_v20, %v1593_v3  ;;  %v1596_v63 = vmul.f32 %v3947_v29, %v1415_v17  ;;  %v1407_v26 = vadd.f32 %v1406_v16, %v3942_v15  ;;  %v4165_v3 = vpop.f32.mrf.mxu1 }
 0x1d2   :  { %v2570_v14 = vpack.c.bf16 %v1982_v11, %v1982_v11  ;;  %v1980_v21 = vmul.f32 0.16666667, %v1916_v23  ;;  %v1919_v30 = vmul.f32 %v1855_v1, %v1663_v41  ;;  %v1853_v35 = vmin.f32 %v1789_v46, 6.0  ;;  %v1422_v13 = vpop.f32.mrf.mxu0 }
 0x1d3   :  { %v1794_v60 = vmax.f32 %v1730_v28, 0.0  ;;  %v1728_v7 = vadd.f32 3.0, %v1664_v53  ;;  %v1667_v2 = vadd.f32 %v3954_v20, %v1596_v63  ;;  %v1594_v27 = vmul.f32 %v3947_v29, %v1407_v26 }
 0x1d4   :  { %2303 = vst.msk [vmem:[%s4500_s9 + $0x58] sm:$0xf] %vm2280_vm4, %v2570_v14  ;;  %v2568_v0 = vpack.c.bf16 %v1980_v21, %v1980_v21  ;;  %v1983_v15 = vmul.f32 0.16666667, %v1919_v30  ;;  %v1917_v34 = vmul.f32 %v1853_v35, %v1661_v61  ;;  %v1428_v19 = vadd.f32 %v2875_v36, %v3949_v18  ;;  %v2879_v16 = vpop.f32.mrf.mxu0 }
 0x1d5   :  { %v1858_v41 = vmin.f32 %v1794_v60, 6.0  ;;  %v1792_v9 = vmax.f32 %v1728_v7, 0.0  ;;  %v1731_v37 = vadd.f32 3.0, %v1667_v2  ;;  %v1665_v49 = vadd.f32 %v3954_v20, %v1594_v27  ;;  %v4181_v7 = vpop.f32.mrf.mxu1 }
 0x1d6   :  { %2301 = vst.msk [vmem:[%s4500_s9 + $0x50] sm:$0xf] %vm2280_vm4, %v2568_v0  ;;  %v2571_v4 = vpack.c.bf16 %v1983_v15, %v1983_v15  ;;  %v1981_v50 = vmul.f32 0.16666667, %v1917_v34  ;;  %v1599_v38 = vmul.f32 %v3947_v29, %v1428_v19  ;;  %v1420_v61 = vadd.f32 %v1419_v47, %v3959_v33  ;;  %v1435_v18 = vpop.f32.mrf.mxu0 }
 0x1d7   :  { %v1922_v36 = vmul.f32 %v1858_v41, %v1666_v62  ;;  %v1856_v48 = vmin.f32 %v1792_v9, 6.0  ;;  %v1795_v8 = vmax.f32 %v1731_v37, 0.0  ;;  %v1729_v52 = vadd.f32 3.0, %v1665_v49 }
 0x1d8   :  { %2304 = vst.msk [vmem:[%s4500_s9 + $0x5c] sm:$0xf] %vm2280_vm4, %v2571_v4  ;;  %v2569_v22 = vpack.c.bf16 %v1981_v50, %v1981_v50  ;;  %v1670_v10 = vadd.f32 %v3954_v20, %v1599_v38  ;;  %v1597_v54 = vmul.f32 %v3947_v29, %v1420_v61  ;;  %v1431_v58 = vadd.f32 %v2876_v6, %v3965_v45  ;;  %v2880_v57 = vpop.f32.mrf.mxu0 }
 0x1d9   :  { %v1986_v5 = vmul.f32 0.16666667, %v1922_v36  ;;  %v1920_v33 = vmul.f32 %v1856_v48, %v1664_v53  ;;  %v1859_v47 = vmin.f32 %v1795_v8, 6.0  ;;  %v1793_v62 = vmax.f32 %v1729_v52, 0.0  ;;  %v4197_v8 = vpop.f32.mrf.mxu1 }
 0x1da   :  { %2302 = vst.msk [vmem:[%s4500_s9 + $0x54] sm:$0xf] %vm2280_vm4, %v2569_v22  ;;  %v1734_v17 = vadd.f32 3.0, %v1670_v10  ;;  %v1668_v11 = vadd.f32 %v3954_v20, %v1597_v54  ;;  %v1600_v23 = vmul.f32 %v3947_v29, %v1431_v58  ;;  %v1423_v1 = vadd.f32 %v1422_v13, %v3970_v40  ;;  %v1438_v45 = vpop.f32.mrf.mxu0 }
 0x1db   :  { %v2574_v46 = vpack.c.bf16 %v1986_v5, %v1986_v5  ;;  %v1984_v6 = vmul.f32 0.16666667, %v1920_v33  ;;  %v1923_v28 = vmul.f32 %v1859_v47, %v1667_v2  ;;  %v1857_v53 = vmin.f32 %v1793_v62, 6.0 }
 0x1dc   :  { %v1798_v63 = vmax.f32 %v1734_v17, 0.0  ;;  %v1732_v26 = vadd.f32 3.0, %v1668_v11  ;;  %v1671_v14 = vadd.f32 %v3954_v20, %v1600_v23  ;;  %v1598_v21 = vmul.f32 %v3947_v29, %v1423_v1  ;;  %v2883_v30 = vpop.f32.mrf.mxu0 }
 0x1dd   :  { %2307 = vst.msk [vmem:[%s4500_s9 + $0x68] sm:$0xf] %vm2280_vm4, %v2574_v46  ;;  %v2572_v35 = vpack.c.bf16 %v1984_v6, %v1984_v6  ;;  %v1987_v60 = vmul.f32 0.16666667, %v1923_v28  ;;  %v1921_v40 = vmul.f32 %v1857_v53, %v1665_v49  ;;  %v1444_v13 = vadd.f32 %v2879_v16, %v3978_v44  ;;  %v4208_v6 = vpop.f32.mrf.mxu1 }
 0x1de   :  { %v1862_v2 = vmin.f32 %v1798_v63, 6.0  ;;  %v1796_v27 = vmax.f32 %v1732_v26, 0.0  ;;  %v1735_v0 = vadd.f32 3.0, %v1671_v14  ;;  %v1669_v15 = vadd.f32 %v3954_v20, %v1598_v21  ;;  %v1451_v34 = vpop.f32.mrf.mxu0 }
 0x1df   :  { %2305 = vst.msk [vmem:[%s4500_s9 + $0x60] sm:$0xf] %vm2280_vm4, %v2572_v35  ;;  %v2575_v19 = vpack.c.bf16 %v1987_v60, %v1987_v60  ;;  %v1985_v41 = vmul.f32 0.16666667, %v1921_v40  ;;  %v1603_v9 = vmul.f32 %v3947_v29, %v1444_v13  ;;  %v1436_v37 = vadd.f32 %v1435_v18, %v3994_v56 }
 0x1e0   :  { %v1926_v44 = vmul.f32 %v1862_v2, %v1670_v10  ;;  %v1860_v16 = vmin.f32 %v1796_v27, 6.0  ;;  %v1799_v49 = vmax.f32 %v1735_v0, 0.0  ;;  %v1733_v4 = vadd.f32 3.0, %v1669_v15  ;;  %v2884_v50 = vpop.f32.mrf.mxu0 }
 0x1e1   :  { %2308 = vst.msk [vmem:[%s4500_s9 + $0x6c] sm:$0xf] %vm2280_vm4, %v2575_v19  ;;  %v2573_v38 = vpack.c.bf16 %v1985_v41, %v1985_v41  ;;  %v1674_v61 = vadd.f32 %v3954_v20, %v1603_v9  ;;  %v1601_v36 = vmul.f32 %v3947_v29, %v1436_v37  ;;  %v1447_v48 = vadd.f32 %v2880_v57, %v4010_v42  ;;  %v4222_v19 = vpop.f32.mrf.mxu1 }
 0x1e2   :  { %v1990_v56 = vmul.f32 0.16666667, %v1926_v44  ;;  %v1924_v18 = vmul.f32 %v1860_v16, %v1668_v11  ;;  %v1863_v52 = vmin.f32 %v1799_v49, 6.0  ;;  %v1797_v22 = vmax.f32 %v1733_v4, 0.0  ;;  %v1454_v10 = vpop.f32.mrf.mxu0 }
 0x1e3   :  { %2306 = vst.msk [vmem:[%s4500_s9 + $0x64] sm:$0xf] %vm2280_vm4, %v2573_v38  ;;  %v1738_v54 = vadd.f32 3.0, %v1674_v61  ;;  %v1672_v58 = vadd.f32 %v3954_v20, %v1601_v36  ;;  %v1604_v5 = vmul.f32 %v3947_v29, %v1447_v48  ;;  %v1439_v33 = vadd.f32 %v1438_v45, %v4020_v12 }
 0x1e4   :  { %v2578_v42 = vpack.c.bf16 %v1990_v56, %v1990_v56  ;;  %v1988_v57 = vmul.f32 0.16666667, %v1924_v18  ;;  %v1927_v47 = vmul.f32 %v1863_v52, %v1671_v14  ;;  %v1861_v62 = vmin.f32 %v1797_v22, 6.0  ;;  %v2887_v17 = vpop.f32.mrf.mxu0  ;;  %v4238_v22 = vpop.f32.mrf.mxu1 }
 0x1e5   :  { %v1802_v11 = vmax.f32 %v1738_v54, 0.0  ;;  %v1736_v23 = vadd.f32 3.0, %v1672_v58  ;;  %v1675_v1 = vadd.f32 %v3954_v20, %v1604_v5  ;;  %v1602_v46 = vmul.f32 %v3947_v29, %v1439_v33 }
 0x1e6   :  { %2311 = vst.msk [vmem:[%s4500_s9 + $0x78] sm:$0xf] %vm2280_vm4, %v2578_v42  ;;  %v2576_v28 = vpack.c.bf16 %v1988_v57, %v1988_v57  ;;  %v1991_v12 = vmul.f32 0.16666667, %v1927_v47  ;;  %v1925_v45 = vmul.f32 %v1861_v62, %v1669_v15  ;;  %v1460_v53 = vadd.f32 %v2883_v30, %v4035_v31  ;;  %v1467_v63 = vpop.f32.mrf.mxu0 }
 0x1e7   :  { %v1866_v26 = vmin.f32 %v1802_v11, 6.0  ;;  %v1800_v14 = vmax.f32 %v1736_v23, 0.0  ;;  %v1739_v21 = vadd.f32 3.0, %v1675_v1  ;;  %v1673_v35 = vadd.f32 %v3954_v20, %v1602_v46 }
 0x1e8   :  { %2309 = vst.msk [vmem:[%s4500_s9 + $0x70] sm:$0xf] %vm2280_vm4, %v2576_v28  ;;  %v2579_v60 = vpack.c.bf16 %v1991_v12, %v1991_v12  ;;  %v1989_v40 = vmul.f32 0.16666667, %v1925_v45  ;;  %v1607_v13 = vmul.f32 %v3947_v29, %v1460_v53  ;;  %v1452_v2 = vadd.f32 %v1451_v34, %v4051_v39  ;;  %v2888_v27 = vpop.f32.mrf.mxu0 }
 0x1e9   :  { %v1930_v0 = vmul.f32 %v1866_v26, %v1674_v61  ;;  %v1864_v31 = vmin.f32 %v1800_v14, 6.0  ;;  %v1803_v30 = vmax.f32 %v1739_v21, 0.0  ;;  %v1737_v15 = vadd.f32 3.0, %v1673_v35  ;;  %v4254_v26 = vpop.f32.mrf.mxu1 }
 0x1ea   :  { %2312 = vst.msk [vmem:[%s4500_s9 + $0x7c] sm:$0xf] %vm2280_vm4, %v2579_v60  ;;  %v2577_v41 = vpack.c.bf16 %v1989_v40, %v1989_v40  ;;  %v1678_v9 = vadd.f32 %v3954_v20, %v1607_v13  ;;  %v1605_v37 = vmul.f32 %v3947_v29, %v1452_v2  ;;  %v1463_v44 = vadd.f32 %v2884_v50, %v4067_v32  ;;  %v1470_v39 = vpop.f32.mrf.mxu0 }
 0x1eb   :  { %v1994_v34 = vmul.f32 0.16666667, %v1930_v0  ;;  %v1928_v16 = vmul.f32 %v1864_v31, %v1672_v58  ;;  %v1867_v49 = vmin.f32 %v1803_v30, 6.0  ;;  %v1801_v4 = vmax.f32 %v1737_v15, 0.0 }
 0x1ec   :  { %2310 = vst.msk [vmem:[%s4500_s9 + $0x74] sm:$0xf] %vm2280_vm4, %v2577_v41  ;;  %v1742_v38 = vadd.f32 3.0, %v1678_v9  ;;  %v1676_v61 = vadd.f32 %v3954_v20, %v1605_v37  ;;  %v1608_v36 = vmul.f32 %v3947_v29, %v1463_v44  ;;  %v1455_v48 = vadd.f32 %v1454_v10, %v4078_v55  ;;  %v2891_v56 = vpop.f32.mrf.mxu0  ;;  %v4274_v44 = vpop.f32.mrf.mxu1 }
 0x1ed   :  { %v2582_v18 = vpack.c.bf16 %v1994_v34, %v1994_v34  ;;  %v1992_v32 = vmul.f32 0.16666667, %v1928_v16  ;;  %v1931_v50 = vmul.f32 %v1867_v49, %v1675_v1  ;;  %v1865_v52 = vmin.f32 %v1801_v4, 6.0 }
 0x1ee   :  { %v1806_v54 = vmax.f32 %v1742_v38, 0.0  ;;  %v1740_v58 = vadd.f32 3.0, %v1676_v61  ;;  %v1679_v5 = vadd.f32 %v3954_v20, %v1608_v36  ;;  %v1606_v33 = vmul.f32 %v3947_v29, %v1455_v48  ;;  %v1483_v42 = vpop.f32.mrf.mxu0 }
 0x1ef   :  { %2315 = vst.msk [vmem:[%s4500_s9 + $0x88] sm:$0xf] %vm2280_vm4, %v2582_v18  ;;  %v2580_v55 = vpack.c.bf16 %v1992_v32, %v1992_v32  ;;  %v1995_v10 = vmul.f32 0.16666667, %v1931_v50  ;;  %v1929_v57 = vmul.f32 %v1865_v52, %v1673_v35  ;;  %v1476_v47 = vadd.f32 %v2887_v17, %v4092_v24 }
 0x1f0   :  { %v1870_v62 = vmin.f32 %v1806_v54, 6.0  ;;  %v1804_v11 = vmax.f32 %v1740_v58, 0.0  ;;  %v1743_v23 = vadd.f32 3.0, %v1679_v5  ;;  %v1677_v1 = vadd.f32 %v3954_v20, %v1606_v33  ;;  %v2892_v46 = vpop.f32.mrf.mxu0 }
 0x1f1   :  { %2313 = vst.msk [vmem:[%s4500_s9 + $0x80] sm:$0xf] %vm2280_vm4, %v2580_v55  ;;  %v2583_v28 = vpack.c.bf16 %v1995_v10, %v1995_v10  ;;  %v1993_v12 = vmul.f32 0.16666667, %v1929_v57  ;;  %v1611_v45 = vmul.f32 %v3947_v29, %v1476_v47  ;;  %v1468_v53 = vadd.f32 %v1467_v63, %v4108_v51 }
 0x1f2   :  { %v1934_v24 = vmul.f32 %v1870_v62, %v1678_v9  ;;  %v1868_v17 = vmin.f32 %v1804_v11, 6.0  ;;  %v1807_v14 = vmax.f32 %v1743_v23, 0.0  ;;  %v1741_v21 = vadd.f32 3.0, %v1677_v1  ;;  %v4256_v35 = vpop.f32.mrf.mxu0 }
 0x1f3   :  { %2316 = vst.msk [vmem:[%s4500_s9 + $0x8c] sm:$0xf] %vm2280_vm4, %v2583_v28  ;;  %v2581_v60 = vpack.c.bf16 %v1993_v12, %v1993_v12  ;;  %v1682_v40 = vadd.f32 %v3954_v20, %v1611_v45  ;;  %v1609_v13 = vmul.f32 %v3947_v29, %v1468_v53  ;;  %v1479_v51 = vadd.f32 %v2888_v27, %v4124_v25 }
 0x1f4   :  { %v1998_v63 = vmul.f32 0.16666667, %v1934_v24  ;;  %v1932_v2 = vmul.f32 %v1868_v17, %v1676_v61  ;;  %v1871_v0 = vmin.f32 %v1807_v14, 6.0  ;;  %v1805_v31 = vmax.f32 %v1741_v21, 0.0  ;;  %v4265_v30 = vpop.f32.mrf.mxu0 }
 0x1f5   :  { %2314 = vst.msk [vmem:[%s4500_s9 + $0x84] sm:$0xf] %vm2280_vm4, %v2581_v60  ;;  %v1746_v15 = vadd.f32 3.0, %v1682_v40  ;;  %v1680_v41 = vadd.f32 %v3954_v20, %v1609_v13  ;;  %v1612_v9 = vmul.f32 %v3947_v29, %v1479_v51  ;;  %v1471_v37 = vadd.f32 %v1470_v39, %v4140_v59 }
 0x1f6   :  { %v2586_v25 = vpack.c.bf16 %v1998_v63, %v1998_v63  ;;  %v1996_v27 = vmul.f32 0.16666667, %v1932_v2  ;;  %v1935_v34 = vmul.f32 %v1871_v0, %v1679_v5  ;;  %v1869_v16 = vmin.f32 %v1805_v31, 6.0  ;;  %v4276_v49 = vpop.f32.mrf.mxu0  ;;  %v4288_v5 = vpop.f32.mrf.mxu1 }
 0x1f7   :  { %v1810_v4 = vmax.f32 %v1746_v15, 0.0  ;;  %v1744_v38 = vadd.f32 3.0, %v1680_v41  ;;  %v1683_v61 = vadd.f32 %v3954_v20, %v1612_v9  ;;  %v1610_v36 = vmul.f32 %v3947_v29, %v1471_v37 }
 0x1f8   :  { %2319 = vst.msk [vmem:[%s4500_s9 + $0x98] sm:$0xf] %vm2280_vm4, %v2586_v25  ;;  %v2584_v59 = vpack.c.bf16 %v1996_v27, %v1996_v27  ;;  %v1999_v39 = vmul.f32 0.16666667, %v1935_v34  ;;  %v1933_v48 = vmul.f32 %v1869_v16, %v1677_v1  ;;  %v1492_v18 = vadd.f32 %v2891_v56, %v4150_v43  ;;  %v4285_v32 = vpop.f32.mrf.mxu0  ;;  %v4307_v17 = vpop.f32.mrf.mxu1 }
 0x1f9   :  { %v1874_v50 = vmin.f32 %v1810_v4, 6.0  ;;  %v1808_v52 = vmax.f32 %v1744_v38, 0.0  ;;  %v1747_v54 = vadd.f32 3.0, %v1683_v61  ;;  %v1681_v58 = vadd.f32 %v3954_v20, %v1610_v36 }
 0x1fa   :  { %2317 = vst.msk [vmem:[%s4500_s9 + $0x90] sm:$0xf] %vm2280_vm4, %v2584_v59  ;;  %v2587_v33 = vpack.c.bf16 %v1999_v39, %v1999_v39  ;;  %v1997_v55 = vmul.f32 0.16666667, %v1933_v48  ;;  %v1615_v10 = vmul.f32 %v3947_v29, %v1492_v18  ;;  %v1484_v43 = vadd.f32 %v1483_v42, %v4165_v3  ;;  %v4296_v56 = vpop.f32.mrf.mxu0  ;;  %v4339_v25 = vpop.f32.mrf.mxu1 }
 0x1fb   :  { %v1938_v57 = vmul.f32 %v1874_v50, %v1682_v40  ;;  %v1872_v47 = vmin.f32 %v1808_v52, 6.0  ;;  %v1811_v62 = vmax.f32 %v1747_v54, 0.0  ;;  %v1745_v11 = vadd.f32 3.0, %v1681_v58 }
 0x1fc   :  { %2320 = vst.msk [vmem:[%s4500_s9 + $0x9c] sm:$0xf] %vm2280_vm4, %v2587_v33  ;;  %v2585_v23 = vpack.c.bf16 %v1997_v55, %v1997_v55  ;;  %v1686_v1 = vadd.f32 %v3954_v20, %v1615_v10  ;;  %v1613_v28 = vmul.f32 %v3947_v29, %v1484_v43  ;;  %v1495_v12 = vadd.f32 %v2892_v46, %v4181_v7  ;;  %v4305_v45 = vpop.f32.mrf.mxu0  ;;  %v4316_v29 = vld [vmem:[%s4499_s7] ss:$0 sm:$0xff] }
 0x1fd   :  { %v2002_v3 = vmul.f32 0.16666667, %v1938_v57  ;;  %v1936_v42 = vmul.f32 %v1872_v47, %v1680_v41  ;;  %v1875_v53 = vmin.f32 %v1811_v62, 6.0  ;;  %v1809_v24 = vmax.f32 %v1745_v11, 0.0  ;;  %v4322_v7 = vld [vmem:[%s4498_s6] ss:$0 sm:$0xff] }
 0x1fe   :  { %2318 = vst.msk [vmem:[%s4500_s9 + $0x94] sm:$0xf] %vm2280_vm4, %v2585_v23  ;;  %v1750_v14 = vadd.f32 3.0, %v1686_v1  ;;  %v1684_v20 = vadd.f32 %v4316_v29, %v1613_v28  ;;  %v1616_v46 = vmul.f32 %v4322_v7, %v1495_v12  ;;  %v1487_v21 = vadd.f32 %v4256_v35, %v4197_v8  ;;  %v4327_v60 = vpop.f32.mrf.mxu0 }
 0x1ff   :  { %v2590_v40 = vpack.c.bf16 %v2002_v3, %v2002_v3  ;;  %v2000_v13 = vmul.f32 0.16666667, %v1936_v42  ;;  %v1939_v51 = vmul.f32 %v1875_v53, %v1683_v61  ;;  %v1873_v63 = vmin.f32 %v1809_v24, 6.0 }
 0x200   :  { %v1814_v2 = vmax.f32 %v1750_v14, 0.0  ;;  %v1748_v0 = vadd.f32 3.0, %v1684_v20  ;;  %v1687_v31 = vadd.f32 %v4316_v29, %v1616_v46  ;;  %v1614_v15 = vmul.f32 %v4322_v7, %v1487_v21  ;;  %v4331_v41 = vpop.f32.mrf.mxu0 }
 0x201   :  { %2323 = vst.msk [vmem:[%s4500_s9 + $0xa8] sm:$0xf] %vm2280_vm4, %v2590_v40  ;;  %v2588_v8 = vpack.c.bf16 %v2000_v13, %v2000_v13  ;;  %v2003_v35 = vmul.f32 0.16666667, %v1939_v51  ;;  %v1937_v9 = vmul.f32 %v1873_v63, %v1681_v58  ;;  %v1508_v37 = vadd.f32 %v4265_v30, %v4208_v6 }
 0x202   :  { %v1878_v27 = vmin.f32 %v1814_v2, 6.0  ;;  %v1812_v34 = vmax.f32 %v1748_v0, 0.0  ;;  %v1751_v16 = vadd.f32 3.0, %v1687_v31  ;;  %v1685_v4 = vadd.f32 %v4316_v29, %v1614_v15  ;;  %v4342_v38 = vpop.f32.mrf.mxu0 }
 0x203   :  { %2321 = vst.msk [vmem:[%s4500_s9 + $0xa0] sm:$0xf] %vm2280_vm4, %v2588_v8  ;;  %v2591_v61 = vpack.c.bf16 %v2003_v35, %v2003_v35  ;;  %v2001_v36 = vmul.f32 0.16666667, %v1937_v9  ;;  %v1619_v59 = vmul.f32 %v4322_v7, %v1508_v37  ;;  %v1500_v6 = vadd.f32 %v4276_v49, %v4222_v19  ;;  %v4361_v19 = vpop.f32.mrf.mxu1 }
 0x204   :  { %v1942_v30 = vmul.f32 %v1878_v27, %v1686_v1  ;;  %v1876_v39 = vmin.f32 %v1812_v34, 6.0  ;;  %v1815_v48 = vmax.f32 %v1751_v16, 0.0  ;;  %v1749_v18 = vadd.f32 3.0, %v1685_v4  ;;  %v4351_v50 = vpop.f32.mrf.mxu0 }
 0x205   :  { %2324 = vst.msk [vmem:[%s4500_s9 + $0xac] sm:$0xf] %vm2280_vm4, %v2591_v61  ;;  %v2589_v52 = vpack.c.bf16 %v2001_v36, %v2001_v36  ;;  %v1690_v54 = vadd.f32 %v4316_v29, %v1619_v59  ;;  %v1617_v58 = vmul.f32 %v4322_v7, %v1500_v6  ;;  %v1511_v33 = vadd.f32 %v4285_v32, %v4238_v22  ;;  %v1142_v24 = vpop.f32.mrf.mxu1 }
 0x206   :  { %v2006_v49 = vmul.f32 0.16666667, %v1942_v30  ;;  %v1940_v55 = vmul.f32 %v1876_v39, %v1684_v20  ;;  %v1879_v10 = vmin.f32 %v1815_v48, 6.0  ;;  %v1813_v43 = vmax.f32 %v1749_v18, 0.0  ;;  %v4371_v22 = vpop.f32.mrf.mxu0 }
 0x207   :  { %2322 = vst.msk [vmem:[%s4500_s9 + $0xa4] sm:$0xf] %vm2280_vm4, %v2589_v52  ;;  %v1754_v57 = vadd.f32 3.0, %v1690_v54  ;;  %v1688_v47 = vadd.f32 %v4316_v29, %v1617_v58  ;;  %v1620_v62 = vmul.f32 %v4322_v7, %v1511_v33  ;;  %v1503_v11 = vadd.f32 %v4296_v56, %v4254_v26  ;;  %v2838_v35 = vpop.f32.mrf.mxu1 }
 0x208   :  { %v2594_v32 = vpack.c.bf16 %v2006_v49, %v2006_v49  ;;  %v2004_v23 = vmul.f32 0.16666667, %v1940_v55  ;;  %v1943_v1 = vmul.f32 %v1879_v10, %v1687_v31  ;;  %v1877_v28 = vmin.f32 %v1813_v43, 6.0  ;;  %v2904_v51 = vpop.f32.mrf.mxu0 }
 0x209   :  { %v1818_v12 = vmax.f32 %v1754_v57, 0.0  ;;  %v1752_v3 = vadd.f32 3.0, %v1688_v47  ;;  %v1691_v42 = vadd.f32 %v4316_v29, %v1620_v62  ;;  %v1618_v53 = vmul.f32 %v4322_v7, %v1503_v11  ;;  %v1145_v18 = vpop.f32.mrf.mxu1 }
 0x20a   :  { %2327 = vst.msk [vmem:[%s4500_s9 + $0xb8] sm:$0xf] %vm2280_vm4, %v2594_v32  ;;  %v2592_v14 = vpack.c.bf16 %v2004_v23, %v2004_v23  ;;  %v2007_v26 = vmul.f32 0.16666667, %v1943_v1  ;;  %v1941_v56 = vmul.f32 %v1877_v28, %v1685_v4  ;;  %v1524_v20 = vadd.f32 %v4305_v45, %v4274_v44  ;;  %v1534_v61 = vpop.f32.mrf.mxu0 }
 0x20b   :  { %v1882_v46 = vmin.f32 %v1818_v12, 6.0  ;;  %v1816_v21 = vmax.f32 %v1752_v3, 0.0  ;;  %v1755_v40 = vadd.f32 3.0, %v1691_v42  ;;  %v1689_v13 = vadd.f32 %v4316_v29, %v1618_v53  ;;  %v2841_v1 = vpop.f32.mrf.mxu1 }
 0x20c   :  { %2325 = vst.msk [vmem:[%s4500_s9 + $0xb0] sm:$0xf] %vm2280_vm4, %v2592_v14  ;;  %v2595_v63 = vpack.c.bf16 %v2007_v26, %v2007_v26  ;;  %v2005_v2 = vmul.f32 0.16666667, %v1941_v56  ;;  %v1623_v0 = vmul.f32 %v4322_v7, %v1524_v20  ;;  %v1516_v31 = vadd.f32 %v4327_v60, %v4288_v5 }
 0x20d   :  { %v1946_v15 = vmul.f32 %v1882_v46, %v1690_v54  ;;  %v1880_v44 = vmin.f32 %v1816_v21, 6.0  ;;  %v1819_v45 = vmax.f32 %v1755_v40, 0.0  ;;  %v1753_v8 = vadd.f32 3.0, %v1689_v13 }
 0x20e   :  { %2328 = vst.msk [vmem:[%s4500_s9 + $0xbc] sm:$0xf] %vm2280_vm4, %v2595_v63  ;;  %v2593_v9 = vpack.c.bf16 %v2005_v2, %v2005_v2  ;;  %v1694_v37 = vadd.f32 %v4316_v29, %v1623_v0  ;;  %v1621_v27 = vmul.f32 %v4322_v7, %v1516_v31  ;;  %v1527_v34 = vadd.f32 %v4331_v41, %v4307_v17 }
 0x20f   :  { %v2010_v16 = vmul.f32 0.16666667, %v1946_v15  ;;  %v1944_v5 = vmul.f32 %v1880_v44, %v1688_v47  ;;  %v1883_v60 = vmin.f32 %v1819_v45, 6.0  ;;  %v1817_v4 = vmax.f32 %v1753_v8, 0.0 }
 0x210   :  { %2326 = vst.msk [vmem:[%s4500_s9 + $0xb4] sm:$0xf] %vm2280_vm4, %v2593_v9  ;;  %v1758_v36 = vadd.f32 3.0, %v1694_v37  ;;  %v1692_v59 = vadd.f32 %v4316_v29, %v1621_v27  ;;  %v1624_v6 = vmul.f32 %v4322_v7, %v1527_v34  ;;  %v1519_v30 = vadd.f32 %v4342_v38, %v4339_v25  ;;  %v2907_v38 = vpop.f32.mrf.mxu0 }
 0x211   :  { %v2598_v39 = vpack.c.bf16 %v2010_v16, %v2010_v16  ;;  %v2008_v17 = vmul.f32 0.16666667, %v1944_v5  ;;  %v1947_v41 = vmul.f32 %v1883_v60, %v1691_v42  ;;  %v1881_v48 = vmin.f32 %v1817_v4, 6.0 }
 0x212   :  { %v1822_v52 = vmax.f32 %v1758_v36, 0.0  ;;  %v1756_v54 = vadd.f32 3.0, %v1692_v59  ;;  %v1695_v58 = vadd.f32 %v4316_v29, %v1624_v6  ;;  %v1622_v33 = vmul.f32 %v4322_v7, %v1519_v30  ;;  %v1547_v56 = vpop.f32.mrf.mxu0 }
 0x213   :  { %2331 = vst.msk [vmem:[%s4500_s9 + $0xc8] sm:$0xf] %vm2280_vm4, %v2598_v39  ;;  %v2596_v49 = vpack.c.bf16 %v2008_v17, %v2008_v17  ;;  %v2011_v55 = vmul.f32 0.16666667, %v1947_v41  ;;  %v1945_v10 = vmul.f32 %v1881_v48, %v1689_v13  ;;  %v1540_v25 = vadd.f32 %v4351_v50, %v4361_v19  ;;  %v1158_v13 = vpop.f32.mrf.mxu1 }
 0x214   :  { %v1886_v43 = vmin.f32 %v1822_v52, 6.0  ;;  %v1820_v57 = vmax.f32 %v1756_v54, 0.0  ;;  %v1759_v47 = vadd.f32 3.0, %v1695_v58  ;;  %v1693_v62 = vadd.f32 %v4316_v29, %v1622_v33  ;;  %v2908_v9 = vpop.f32.mrf.mxu0 }
 0x215   :  { %2329 = vst.msk [vmem:[%s4500_s9 + $0xc0] sm:$0xf] %vm2280_vm4, %v2596_v49  ;;  %v2599_v11 = vpack.c.bf16 %v2011_v55, %v2011_v55  ;;  %v2009_v32 = vmul.f32 0.16666667, %v1945_v10  ;;  %v1627_v23 = vmul.f32 %v4322_v7, %v1540_v25  ;;  %v1532_v28 = vadd.f32 %v4371_v22, %v1142_v24 }
 0x216   :  { %v1950_v12 = vmul.f32 %v1886_v43, %v1694_v37  ;;  %v1884_v50 = vmin.f32 %v1820_v57, 6.0  ;;  %v1823_v19 = vmax.f32 %v1759_v47, 0.0  ;;  %v1757_v3 = vadd.f32 3.0, %v1693_v62  ;;  %v1550_v52 = vpop.f32.mrf.mxu0 }
 0x217   :  { %2332 = vst.msk [vmem:[%s4500_s9 + $0xcc] sm:$0xf] %vm2280_vm4, %v2599_v11  ;;  %v2597_v42 = vpack.c.bf16 %v2009_v32, %v2009_v32  ;;  %v1698_v53 = vadd.f32 %v4316_v29, %v1627_v23  ;;  %v1625_v14 = vmul.f32 %v4322_v7, %v1532_v28  ;;  %v1543_v26 = vadd.f32 %v2904_v51, %v2838_v35 }
 0x218   :  { %v2014_v20 = vmul.f32 0.16666667, %v1950_v12  ;;  %v1948_v46 = vmul.f32 %v1884_v50, %v1692_v59  ;;  %v1887_v21 = vmin.f32 %v1823_v19, 6.0  ;;  %v1821_v22 = vmax.f32 %v1757_v3, 0.0 }
 0x219   :  { %2330 = vst.msk [vmem:[%s4500_s9 + $0xc4] sm:$0xf] %vm2280_vm4, %v2597_v42  ;;  %v1762_v24 = vadd.f32 3.0, %v1698_v53  ;;  %v1696_v40 = vadd.f32 %v4316_v29, %v1625_v14  ;;  %v1628_v63 = vmul.f32 %v4322_v7, %v1543_v26  ;;  %v1535_v2 = vadd.f32 %v1534_v61, %v1145_v18  ;;  %v2842_v61 = vpop.f32.mrf.mxu1 }
 0x21a   :  { %v2602_v0 = vpack.c.bf16 %v2014_v20, %v2014_v20  ;;  %v2012_v31 = vmul.f32 0.16666667, %v1948_v46  ;;  %v1951_v51 = vmul.f32 %v1887_v21, %v1695_v58  ;;  %v1885_v15 = vmin.f32 %v1821_v22, 6.0 }
 0x21b   :  { %v1826_v44 = vmax.f32 %v1762_v24, 0.0  ;;  %v1760_v45 = vadd.f32 3.0, %v1696_v40  ;;  %v1699_v8 = vadd.f32 %v4316_v29, %v1628_v63  ;;  %v1626_v35 = vmul.f32 %v4322_v7, %v1535_v2  ;;  %v1161_v43 = vpop.f32.mrf.mxu1 }
 0x21c   :  { %2335 = vst.msk [vmem:[%s4500_s9 + $0xd8] sm:$0xf] %vm2280_vm4, %v2602_v0  ;;  %v2600_v37 = vpack.c.bf16 %v2012_v31, %v2012_v31  ;;  %v2015_v27 = vmul.f32 0.16666667, %v1951_v51  ;;  %v1949_v34 = vmul.f32 %v1885_v15, %v1693_v62  ;;  %v1556_v16 = vadd.f32 %v2907_v38, %v2841_v1 }
 0x21d   :  { %v1890_v5 = vmin.f32 %v1826_v44, 6.0  ;;  %v1824_v60 = vmax.f32 %v1760_v45, 0.0  ;;  %v1763_v4 = vadd.f32 3.0, %v1699_v8  ;;  %v1697_v36 = vadd.f32 %v4316_v29, %v1626_v35 }
 0x21e   :  { %2333 = vst.msk [vmem:[%s4500_s9 + $0xd0] sm:$0xf] %vm2280_vm4, %v2600_v37  ;;  %v2603_v59 = vpack.c.bf16 %v2015_v27, %v2015_v27  ;;  %v2013_v6 = vmul.f32 0.16666667, %v1949_v34  ;;  %v1631_v30 = vmul.f32 %v4322_v7, %v1556_v16  ;;  %v1548_v39 = vadd.f32 %v1547_v56, %v1158_v13 }
 0x21f   :  { %v1954_v17 = vmul.f32 %v1890_v5, %v1698_v53  ;;  %v1888_v41 = vmin.f32 %v1824_v60, 6.0  ;;  %v1827_v48 = vmax.f32 %v1763_v4, 0.0  ;;  %v1761_v18 = vadd.f32 3.0, %v1697_v36 }
 0x220   :  { %2336 = vst.msk [vmem:[%s4500_s9 + $0xdc] sm:$0xf] %vm2280_vm4, %v2603_v59  ;;  %v2601_v54 = vpack.c.bf16 %v2013_v6, %v2013_v6  ;;  %v1702_v58 = vadd.f32 %v4316_v29, %v1631_v30  ;;  %v1629_v33 = vmul.f32 %v4322_v7, %v1548_v39  ;;  %v1559_v49 = vadd.f32 %v2908_v9, %v2842_v61 }
 0x221   :  { %v2018_v55 = vmul.f32 0.16666667, %v1954_v17  ;;  %v1952_v10 = vmul.f32 %v1888_v41, %v1696_v40  ;;  %v1891_v25 = vmin.f32 %v1827_v48, 6.0  ;;  %v1825_v38 = vmax.f32 %v1761_v18, 0.0 }
 0x222   :  { %2334 = vst.msk [vmem:[%s4500_s9 + $0xd4] sm:$0xf] %vm2280_vm4, %v2601_v54  ;;  %v1766_v57 = vadd.f32 3.0, %v1702_v58  ;;  %v1700_v47 = vadd.f32 %v4316_v29, %v1629_v33  ;;  %v1632_v62 = vmul.f32 %v4322_v7, %v1559_v49  ;;  %v1551_v11 = vadd.f32 %v1550_v52, %v1161_v43 }
 0x223   :  { %v2606_v32 = vpack.c.bf16 %v2018_v55, %v2018_v55  ;;  %v2016_v23 = vmul.f32 0.16666667, %v1952_v10  ;;  %v1955_v1 = vmul.f32 %v1891_v25, %v1699_v8  ;;  %v1889_v28 = vmin.f32 %v1825_v38, 6.0 }
 0x224   :  { %v1830_v12 = vmax.f32 %v1766_v57, 0.0  ;;  %v1764_v50 = vadd.f32 3.0, %v1700_v47  ;;  %v1703_v19 = vadd.f32 %v4316_v29, %v1632_v62  ;;  %v1630_v3 = vmul.f32 %v4322_v7, %v1551_v11 }
 0x225   :  { %2339 = vst.msk [vmem:[%s4500_s9 + $0xe8] sm:$0xf] %vm2280_vm4, %v2606_v32  ;;  %v2604_v42 = vpack.c.bf16 %v2016_v23, %v2016_v23  ;;  %v2019_v53 = vmul.f32 0.16666667, %v1955_v1  ;;  %v1953_v14 = vmul.f32 %v1889_v28, %v1697_v36 }
 0x226   :  { %v1894_v26 = vmin.f32 %v1830_v12, 6.0  ;;  %v1828_v56 = vmax.f32 %v1764_v50, 0.0  ;;  %v1767_v20 = vadd.f32 3.0, %v1703_v19  ;;  %v1701_v46 = vadd.f32 %v4316_v29, %v1630_v3 }
 0x227   :  { %2337 = vst.msk [vmem:[%s4500_s9 + $0xe0] sm:$0xf] %vm2280_vm4, %v2604_v42  ;;  %v2607_v21 = vpack.c.bf16 %v2019_v53, %v2019_v53  ;;  %v2017_v7 = vmul.f32 0.16666667, %v1953_v14 }
 0x228   :  { %v1958_v22 = vmul.f32 %v1894_v26, %v1702_v58  ;;  %v1892_v24 = vmin.f32 %v1828_v56, 6.0  ;;  %v1831_v40 = vmax.f32 %v1767_v20, 0.0  ;;  %v1765_v13 = vadd.f32 3.0, %v1701_v46 }
 0x229   :  { %2340 = vst.msk [vmem:[%s4500_s9 + $0xec] sm:$0xf] %vm2280_vm4, %v2607_v21  ;;  %v2605_v63 = vpack.c.bf16 %v2017_v7, %v2017_v7 }
 0x22a   :  { %v2022_v2 = vmul.f32 0.16666667, %v1958_v22  ;;  %v1956_v0 = vmul.f32 %v1892_v24, %v1700_v47  ;;  %v1895_v29 = vmin.f32 %v1831_v40, 6.0  ;;  %v1829_v31 = vmax.f32 %v1765_v13, 0.0 }
 0x22b   :  { %2338 = vst.msk [vmem:[%s4500_s9 + $0xe4] sm:$0xf] %vm2280_vm4, %v2605_v63 }
 0x22c   :  { %v2610_v51 = vpack.c.bf16 %v2022_v2, %v2022_v2  ;;  %v2020_v15 = vmul.f32 0.16666667, %v1956_v0  ;;  %v1959_v44 = vmul.f32 %v1895_v29, %v1703_v19  ;;  %v1893_v45 = vmin.f32 %v1829_v31, 6.0 }
 0x22e   :  { %2343 = vst.msk [vmem:[%s4500_s9 + $0xf8] sm:$0xf] %vm2280_vm4, %v2610_v51  ;;  %v2608_v8 = vpack.c.bf16 %v2020_v15, %v2020_v15  ;;  %v2023_v35 = vmul.f32 0.16666667, %v1959_v44  ;;  %v1957_v9 = vmul.f32 %v1893_v45, %v1701_v46 }
 0x230   :  { %2341 = vst.msk [vmem:[%s4500_s9 + $0xf0] sm:$0xf] %vm2280_vm4, %v2608_v8  ;;  %v2611_v37 = vpack.c.bf16 %v2023_v35, %v2023_v35  ;;  %v2021_v27 = vmul.f32 0.16666667, %v1957_v9 }
 0x232   :  { %2344 = vst.msk [vmem:[%s4500_s9 + $0xfc] sm:$0xf] %vm2280_vm4, %v2611_v37  ;;  %v2609_v34 = vpack.c.bf16 %v2021_v27, %v2021_v27 }
 0x234   :  { %2342 = vst.msk [vmem:[%s4500_s9 + $0xf4] sm:$0xf] %vm2280_vm4, %v2609_v34 }

// kernel: _lambda_.11
= control target key start
LH: loop header
LB: loop body
LE: loop exit
PB: predicated region body
PF: predicated region fallthrough
CT: control target
= control target key end

     0   :  { %v82_v0 = vlaneseq  ;;  %vm310_vm0 = vcmask 519168   ;;  %vm57_vm1 = vcmask 490496   ;;  %s732_s1 = inlined_call_operand.vmem [shape: bf16[32,64], index: 1, kind: input, shape index: {}]   ;;  %s733_s0 = inlined_call_operand.vmem [shape: bf16[32,64], index: 0, kind: input, shape index: {}]   ;;  %s734_s2 = inlined_call_operand.vmem [shape: f32[9,64], index: 2, kind: input, shape index: {}]   ;;  %s735_s3 = inlined_call_operand.vmem [shape: f32[2,64], index: 3, kind: input, shape index: {}]   ;;  %s736_s4 = inlined_call_operand.vmem [shape: bf16[32,64], index: 4, kind: output, shape index: {0}]   ;;  %s737_s6 = inlined_call_operand.vmem [shape: bf16[32,64], index: 6, kind: output, shape index: {2}]   ;;  %s738_s5 = inlined_call_operand.vmem [shape: bf16[32,64], index: 5, kind: output, shape index: {1}]   ;;  %s739_s7 = inlined_call_operand.vmem [shape: bf16[32,64], index: 7, kind: output, shape index: {3}]  }
   0x1   :  { %v435_v1 = vld [vmem:[%s732_s1] sm:$0xff]   ;;  %v443_v2 = vld [vmem:[%s732_s1 + $0x8] sm:$0xff]  }
   0x2   :  { %v512_v3 = vunpack.c.l.bf16 %v435_v1  ;;  %v514_v4 = vunpack.c.h.bf16 %v435_v1  ;;  %v516_v5 = vshrl.u32 %v82_v0, 7  ;;  %v427_v6 = vld [vmem:[%s733_s0] sm:$0xff]   ;;  %v521_v7 = vunpack.c.l.bf16 %v443_v2  ;;  %v442_v10 = vld [vmem:[%s733_s0 + $0x8] sm:$0xff]   ;;  %s465_s0 = smov 124  }
   0x3   :  { %v523_v8 = vunpack.c.l.bf16 %v427_v6  ;;  %v525_v9 = vunpack.c.h.bf16 %v427_v6  ;;  %v530_v11 = vunpack.c.h.bf16 %v443_v2  ;;  %v540_v16 = vld [vmem:[%s734_s2] sm:$0xff]  ;;  %v546_v19 = vunpack.c.l.bf16 %v442_v10 }
   0x4   :  { %v84_v12 = vsub.s32 4, %v516_v5  ;;  %v176_v13 = vsub.s32 1, %v516_v5  ;;  %v184_v14 = vsub.s32 7, %v516_v5  ;;  %v445_v15 = vpack.i.bf16 %v514_v4, %v512_v3  ;;  %v566_v33 = vld [vmem:[%s735_s3] ss:$0 sm:$0xff] }
   0x5   :  { %v455_v17 = vpack.i.bf16 %v525_v9, %v523_v8  ;;  %v450_v18 = vpack.i.bf16 %v530_v11, %v521_v7  ;;  %v548_v20 = vunpack.c.h.bf16 %v442_v10  ;;  %v224_v24 = vsub.s32 0, %v516_v5  ;;  %v579_v42 = vld [vmem:[%s735_s3 + $0x1] ss:$0 sm:$0xff] }
   0x6   :  { %v85_v21 = vrot.slane %v540_v16, %v84_v12  ;;  %v177_v22 = vrot.slane %v540_v16, %v176_v13  ;;  %v185_v23 = vrot.slane %v540_v16, %v184_v14  ;;  %446 = vrot.lane.b32.xlu0 %v445_v15, %s465_s0  ;;  %v232_v26 = vsub.s32 2, %v516_v5 }
   0x7   :  { %456 = vrot.lane.b32.xlu1 %v455_v17, %s465_s0  ;;  %v460_v25 = vpack.i.bf16 %v548_v20, %v546_v19  ;;  %v128_v27 = vsub.s32 3, %v516_v5  ;;  %v136_v28 = vsub.s32 5, %v516_v5 }
   0x8   :  { %v179_v29 = vmul.f32 %v514_v4, %v177_v22  ;;  %v86_v30 = vmul.f32 %v523_v8, %v85_v21  ;;  %v87_v31 = vmul.f32 %v525_v9, %v85_v21  ;;  %v178_v32 = vmul.f32 %v512_v3, %v177_v22 }
   0x9   :  { %v186_v34 = vmul.f32 %v523_v8, %v185_v23  ;;  %v187_v35 = vmul.f32 %v525_v9, %v185_v23  ;;  %v181_v36 = vmul.f32 %v530_v11, %v177_v22  ;;  %v180_v37 = vmul.f32 %v521_v7, %v177_v22 }
   0xa   :  { %v94_v38 = vmul.f32 %v566_v33, %v86_v30  ;;  %v95_v39 = vmul.f32 %v566_v33, %v87_v31  ;;  %451 = vrot.lane.b32.xlu0 %v450_v18, %s465_s0  ;;  %v88_v40 = vmul.f32 %v546_v19, %v85_v21  ;;  %v89_v41 = vmul.f32 %v548_v20, %v85_v21 }
   0xb   :  { %v190_v43 = vadd.f32 %v186_v34, %v178_v32  ;;  %v191_v44 = vadd.f32 %v187_v35, %v179_v29  ;;  %v188_v45 = vmul.f32 %v546_v19, %v185_v23  ;;  %v189_v46 = vmul.f32 %v548_v20, %v185_v23  ;;  %461 = vrot.lane.b32.xlu1 %v460_v25, %s465_s0 }
   0xc   :  { %v102_v47 = vadd.f32 %v579_v42, %v94_v38  ;;  %v103_v48 = vadd.f32 %v579_v42, %v95_v39  ;;  %v96_v49 = vmul.f32 %v566_v33, %v88_v40  ;;  %v97_v50 = vmul.f32 %v566_v33, %v89_v41 }
   0xd   :  { %v194_v51 = vmul.f32 %v566_v33, %v190_v43  ;;  %v195_v52 = vmul.f32 %v566_v33, %v191_v44  ;;  %v192_v53 = vadd.f32 %v188_v45, %v180_v37  ;;  %v193_v54 = vadd.f32 %v189_v46, %v181_v36 }
   0xe   :  { %v106_v55 = vadd.f32 3.0, %v102_v47  ;;  %v107_v56 = vadd.f32 3.0, %v103_v48  ;;  %v104_v57 = vadd.f32 %v579_v42, %v96_v49  ;;  %v105_v58 = vadd.f32 %v579_v42, %v97_v50 }
   0xf   :  { %v198_v59 = vadd.f32 %v579_v42, %v194_v51  ;;  %v199_v60 = vadd.f32 %v579_v42, %v195_v52  ;;  %v196_v61 = vmul.f32 %v566_v33, %v192_v53  ;;  %v197_v62 = vmul.f32 %v566_v33, %v193_v54 }
  0x10   :  { %v110_v63 = vmax.f32 %v106_v55, 0.0  ;;  %v111_v0 = vmax.f32 %v107_v56, 0.0  ;;  %v108_v1 = vadd.f32 3.0, %v104_v57  ;;  %v109_v2 = vadd.f32 3.0, %v105_v58 }
  0x11   :  { %v202_v6 = vadd.f32 3.0, %v198_v59  ;;  %v203_v10 = vadd.f32 3.0, %v199_v60  ;;  %v200_v12 = vadd.f32 %v579_v42, %v196_v61  ;;  %v201_v13 = vadd.f32 %v579_v42, %v197_v62 }
  0x12   :  { %v114_v14 = vmin.f32 %v110_v63, 6.0  ;;  %v115_v15 = vmin.f32 %v111_v0, 6.0  ;;  %v112_v17 = vmax.f32 %v108_v1, 0.0  ;;  %v113_v18 = vmax.f32 %v109_v2, 0.0 }
  0x13   :  { %v206_v21 = vmax.f32 %v202_v6, 0.0  ;;  %v207_v22 = vmax.f32 %v203_v10, 0.0  ;;  %v204_v23 = vadd.f32 3.0, %v200_v12  ;;  %v205_v25 = vadd.f32 3.0, %v201_v13 }
  0x14   :  { %v118_v29 = vmul.f32 %v114_v14, %v102_v47  ;;  %v119_v30 = vmul.f32 %v115_v15, %v103_v48  ;;  %v116_v31 = vmin.f32 %v112_v17, 6.0  ;;  %v117_v32 = vmin.f32 %v113_v18, 6.0 }
  0x15   :  { %v210_v34 = vmin.f32 %v206_v21, 6.0  ;;  %v211_v35 = vmin.f32 %v207_v22, 6.0  ;;  %v208_v36 = vmax.f32 %v204_v23, 0.0  ;;  %v209_v37 = vmax.f32 %v205_v25, 0.0 }
  0x16   :  { %v122_v38 = vmul.f32 0.16666667, %v118_v29  ;;  %v123_v39 = vmul.f32 0.16666667, %v119_v30  ;;  %v120_v40 = vmul.f32 %v116_v31, %v104_v57  ;;  %v121_v41 = vmul.f32 %v117_v32, %v105_v58 }
  0x17   :  { %v214_v43 = vmul.f32 %v210_v34, %v198_v59  ;;  %v215_v44 = vmul.f32 %v211_v35, %v199_v60  ;;  %v212_v45 = vmin.f32 %v208_v36, 6.0  ;;  %v213_v46 = vmin.f32 %v209_v37, 6.0  ;;  %v393_v59 = vld [vmem:[%s734_s2 + $0x8] ss:$0 sm:$0xff] }
  0x18   :  { %v410_v49 = vpack.c.bf16 %v122_v38, %v122_v38  ;;  %v411_v50 = vpack.c.bf16 %v123_v39, %v123_v39  ;;  %v124_v51 = vmul.f32 0.16666667, %v120_v40  ;;  %v125_v52 = vmul.f32 0.16666667, %v121_v41 }
  0x19   :  { %v218_v47 = vmul.f32 0.16666667, %v214_v43  ;;  %v219_v48 = vmul.f32 0.16666667, %v215_v44  ;;  %v216_v53 = vmul.f32 %v212_v45, %v200_v12  ;;  %v217_v54 = vmul.f32 %v213_v46, %v201_v13 }
  0x1a   :  { %311 = vst.msk [vmem:[%s736_s4] sm:$0xf] %vm310_vm0, %v410_v49  ;;  %312 = vst.msk [vmem:[%s736_s4 + $0x4] sm:$0xf] %vm310_vm0, %v411_v50  ;;  %v412_v55 = vpack.c.bf16 %v124_v51, %v124_v51  ;;  %v413_v56 = vpack.c.bf16 %v125_v52, %v125_v52  ;;  %v608_v57 = vrot.slane %v540_v16, %v224_v24  ;;  %v244_v2 = vsub.s32 6, %v516_v5 }
  0x1b   :  { %v233_v58 = vrot.slane %v540_v16, %v232_v26  ;;  %v418_v60 = vpack.c.bf16 %v218_v47, %v218_v47  ;;  %v419_v61 = vpack.c.bf16 %v219_v48, %v219_v48  ;;  %v220_v62 = vmul.f32 0.16666667, %v216_v53 }
  0x1c   :  { %v221_v63 = vmul.f32 0.16666667, %v217_v54  ;;  %313 = vst.msk [vmem:[%s736_s4 + $0x8] sm:$0xf] %vm310_vm0, %v412_v55  ;;  %314 = vst.msk [vmem:[%s736_s4 + $0xc] sm:$0xf] %vm310_vm0, %v413_v56  ;;  %v629_v0 = vrot.slane %v540_v16, %v128_v27  ;;  %v137_v1 = vrot.slane %v540_v16, %v136_v28  ;;  %v259_v27 = vmul.f32 %v525_v9, %v393_v59 }
  0x1d   :  { %v235_v24 = vmul.f32 %v514_v4, %v233_v58  ;;  %v234_v26 = vmul.f32 %v512_v3, %v233_v58  ;;  %351 = vst.msk [vmem:[%s737_s6] sm:$0xf] %vm310_vm0, %v418_v60  ;;  %352 = vst.msk [vmem:[%s737_s6 + $0x4] sm:$0xf] %vm310_vm0, %v419_v61  ;;  %v420_v3 = vpack.c.bf16 %v220_v62, %v220_v62 }
  0x1e   :  { %v421_v4 = vpack.c.bf16 %v221_v63, %v221_v63  ;;  %v139_v6 = vmul.f32 %v525_v9, %v137_v1  ;;  %v138_v28 = vmul.f32 %v523_v8, %v137_v1  ;;  %v258_v10 = vmul.f32 %v523_v8, %v393_v59 }
  0x1f   :  { %v236_v12 = vmul.f32 %v521_v7, %v233_v58  ;;  %353 = vst.msk [vmem:[%s737_s6 + $0x8] sm:$0xf] %vm310_vm0, %v420_v3  ;;  %v245_v5 = vrot.slane %v540_v16, %v244_v2  ;;  %v237_v9 = vmul.f32 %v530_v11, %v233_v58  ;;  %v140_v13 = vmul.f32 %v546_v19, %v137_v1 }
  0x20   :  { %354 = vst.msk [vmem:[%s737_s6 + $0xc] sm:$0xf] %vm310_vm0, %v421_v4  ;;  %v141_v8 = vmul.f32 %v548_v20, %v137_v1  ;;  %v661_v7 = vmul.f32 %v546_v19, %v393_v59  ;;  %v664_v14 = vmul.f32 %v548_v20, %v393_v59 }
  0x78   :  { %v447_v15 = vpop.permute.xlu0 %446 }
  0x79   :  { %v449_v17 = vunpack.i.h.bf16 %v447_v15  ;;  %v448_v18 = vunpack.i.l.bf16 %v447_v15  ;;  %v457_v21 = vpop.permute.xlu1 %456 }
  0x7a   :  { %v459_v22 = vunpack.i.h.bf16 %v457_v21  ;;  %v458_v23 = vunpack.i.l.bf16 %v457_v21 }
  0x7b   :  { %v79_v16 = vsel %vm57_vm1, %v449_v17, 0.0  ;;  %v78_v11 = vsel %vm57_vm1, %v448_v18, 0.0 }
  0x7c   :  { %v227_v25 = vmul.f32 %v608_v57, %v79_v16  ;;  %v226_v29 = vmul.f32 %v608_v57, %v78_v11  ;;  %v59_v19 = vsel %vm57_vm1, %v459_v22, 0.0  ;;  %v58_v20 = vsel %vm57_vm1, %v458_v23, 0.0  ;;  %v452_v30 = vpop.permute.xlu0 %451 }
  0x7d   :  { %v131_v31 = vmul.f32 %v629_v0, %v59_v19  ;;  %v247_v32 = vmul.f32 %v245_v5, %v59_v19  ;;  %v130_v34 = vmul.f32 %v629_v0, %v58_v20  ;;  %v246_v35 = vmul.f32 %v245_v5, %v58_v20  ;;  %v462_v36 = vpop.permute.xlu1 %461 }
  0x7e   :  { %v239_v37 = vadd.f32 %v235_v24, %v227_v25  ;;  %v238_v38 = vadd.f32 %v234_v26, %v226_v29  ;;  %v454_v39 = vunpack.i.h.bf16 %v452_v30  ;;  %v453_v40 = vunpack.i.l.bf16 %v452_v30 }
  0x7f   :  { %v143_v41 = vadd.f32 %v139_v6, %v131_v31  ;;  %v142_v43 = vadd.f32 %v138_v28, %v130_v34  ;;  %v464_v44 = vunpack.i.h.bf16 %v462_v36  ;;  %v463_v45 = vunpack.i.l.bf16 %v462_v36 }
  0x80   :  { %v251_v46 = vadd.f32 %v247_v32, %v239_v37  ;;  %v250_v49 = vadd.f32 %v246_v35, %v238_v38  ;;  %v81_v50 = vsel %vm57_vm1, %v454_v39, 0.0  ;;  %v80_v51 = vsel %vm57_vm1, %v453_v40, 0.0 }
  0x81   :  { %v147_v52 = vmul.f32 %v566_v33, %v143_v41  ;;  %v146_v47 = vmul.f32 %v566_v33, %v142_v43  ;;  %v229_v48 = vmul.f32 %v608_v57, %v81_v50  ;;  %v228_v53 = vmul.f32 %v608_v57, %v80_v51 }
  0x82   :  { %v263_v54 = vadd.f32 %v259_v27, %v251_v46  ;;  %v262_v55 = vadd.f32 %v258_v10, %v250_v49  ;;  %v61_v56 = vsel %vm57_vm1, %v464_v44, 0.0  ;;  %v60_v58 = vsel %vm57_vm1, %v463_v45, 0.0 }
  0x83   :  { %v151_v59 = vadd.f32 %v579_v42, %v147_v52  ;;  %v150_v60 = vadd.f32 %v579_v42, %v146_v47  ;;  %v241_v61 = vadd.f32 %v237_v9, %v229_v48  ;;  %v240_v62 = vadd.f32 %v236_v12, %v228_v53 }
  0x84   :  { %v267_v63 = vmul.f32 %v566_v33, %v263_v54  ;;  %v266_v24 = vmul.f32 %v566_v33, %v262_v55  ;;  %v133_v26 = vmul.f32 %v629_v0, %v61_v56  ;;  %v249_v1 = vmul.f32 %v245_v5, %v61_v56 }
  0x85   :  { %v155_v57 = vadd.f32 3.0, %v151_v59  ;;  %v154_v3 = vadd.f32 3.0, %v150_v60  ;;  %v132_v4 = vmul.f32 %v629_v0, %v60_v58  ;;  %v248_v2 = vmul.f32 %v245_v5, %v60_v58 }
  0x86   :  { %v271_v27 = vadd.f32 %v579_v42, %v267_v63  ;;  %v270_v6 = vadd.f32 %v579_v42, %v266_v24  ;;  %v145_v28 = vadd.f32 %v141_v8, %v133_v26  ;;  %v253_v10 = vadd.f32 %v249_v1, %v241_v61 }
  0x87   :  { %v159_v9 = vmax.f32 %v155_v57, 0.0  ;;  %v158_v12 = vmax.f32 %v154_v3, 0.0  ;;  %v144_v15 = vadd.f32 %v140_v13, %v132_v4  ;;  %v252_v17 = vadd.f32 %v248_v2, %v240_v62 }
  0x88   :  { %v275_v18 = vadd.f32 3.0, %v271_v27  ;;  %v274_v21 = vadd.f32 3.0, %v270_v6  ;;  %v149_v22 = vmul.f32 %v566_v33, %v145_v28  ;;  %v265_v23 = vadd.f32 %v664_v14, %v253_v10 }
  0x89   :  { %v163_v16 = vmin.f32 %v159_v9, 6.0  ;;  %v162_v11 = vmin.f32 %v158_v12, 6.0  ;;  %v148_v0 = vmul.f32 %v566_v33, %v144_v15  ;;  %v264_v5 = vadd.f32 %v661_v7, %v252_v17 }
  0x8a   :  { %v279_v25 = vmax.f32 %v275_v18, 0.0  ;;  %v278_v29 = vmax.f32 %v274_v21, 0.0  ;;  %v153_v8 = vadd.f32 %v579_v42, %v149_v22  ;;  %v269_v19 = vmul.f32 %v566_v33, %v265_v23 }
  0x8b   :  { %v167_v13 = vmul.f32 %v163_v16, %v151_v59  ;;  %v166_v20 = vmul.f32 %v162_v11, %v150_v60  ;;  %v152_v30 = vadd.f32 %v579_v42, %v148_v0  ;;  %v268_v31 = vmul.f32 %v566_v33, %v264_v5 }
  0x8c   :  { %v283_v32 = vmin.f32 %v279_v25, 6.0  ;;  %v282_v14 = vmin.f32 %v278_v29, 6.0  ;;  %v157_v34 = vadd.f32 3.0, %v153_v8  ;;  %v273_v35 = vadd.f32 %v579_v42, %v269_v19 }
  0x8d   :  { %v171_v36 = vmul.f32 0.16666667, %v167_v13  ;;  %v170_v37 = vmul.f32 0.16666667, %v166_v20  ;;  %v156_v7 = vadd.f32 3.0, %v152_v30  ;;  %v272_v38 = vadd.f32 %v579_v42, %v268_v31 }
  0x8e   :  { %v287_v39 = vmul.f32 %v283_v32, %v271_v27  ;;  %v286_v40 = vmul.f32 %v282_v14, %v270_v6  ;;  %v161_v41 = vmax.f32 %v157_v34, 0.0  ;;  %v277_v43 = vadd.f32 3.0, %v273_v35 }
  0x8f   :  { %v415_v44 = vpack.c.bf16 %v171_v36, %v171_v36  ;;  %v414_v45 = vpack.c.bf16 %v170_v37, %v170_v37  ;;  %v160_v46 = vmax.f32 %v156_v7, 0.0  ;;  %v276_v49 = vadd.f32 3.0, %v272_v38 }
  0x90   :  { %v291_v50 = vmul.f32 0.16666667, %v287_v39  ;;  %v290_v33 = vmul.f32 0.16666667, %v286_v40  ;;  %v165_v51 = vmin.f32 %v161_v41, 6.0  ;;  %v281_v52 = vmax.f32 %v277_v43, 0.0 }
  0x91   :  { %332 = vst.msk [vmem:[%s738_s5 + $0x4] sm:$0xf] %vm310_vm0, %v415_v44  ;;  %331 = vst.msk [vmem:[%s738_s5] sm:$0xf] %vm310_vm0, %v414_v45  ;;  %v164_v42 = vmin.f32 %v160_v46, 6.0  ;;  %v280_v47 = vmax.f32 %v276_v49, 0.0 }
  0x92   :  { %v423_v48 = vpack.c.bf16 %v291_v50, %v291_v50  ;;  %v422_v53 = vpack.c.bf16 %v290_v33, %v290_v33  ;;  %v169_v54 = vmul.f32 %v165_v51, %v153_v8  ;;  %v285_v55 = vmin.f32 %v281_v52, 6.0 }
  0x93   :  { %v168_v56 = vmul.f32 %v164_v42, %v152_v30  ;;  %v284_v58 = vmin.f32 %v280_v47, 6.0 }
  0x94   :  { %372 = vst.msk [vmem:[%s739_s7 + $0x4] sm:$0xf] %vm310_vm0, %v423_v48  ;;  %371 = vst.msk [vmem:[%s739_s7] sm:$0xf] %vm310_vm0, %v422_v53  ;;  %v173_v59 = vmul.f32 0.16666667, %v169_v54  ;;  %v289_v60 = vmul.f32 %v285_v55, %v273_v35 }
  0x95   :  { %v172_v61 = vmul.f32 0.16666667, %v168_v56  ;;  %v288_v62 = vmul.f32 %v284_v58, %v272_v38 }
  0x96   :  { %v293_v63 = vmul.f32 0.16666667, %v289_v60  ;;  %v417_v24 = vpack.c.bf16 %v173_v59, %v173_v59 }
  0x97   :  { %v292_v26 = vmul.f32 0.16666667, %v288_v62  ;;  %v416_v1 = vpack.c.bf16 %v172_v61, %v172_v61 }
  0x98   :  { %334 = vst.msk [vmem:[%s738_s5 + $0xc] sm:$0xf] %vm310_vm0, %v417_v24  ;;  %v425_v57 = vpack.c.bf16 %v293_v63, %v293_v63 }
  0x99   :  { %333 = vst.msk [vmem:[%s738_s5 + $0x8] sm:$0xf] %vm310_vm0, %v416_v1  ;;  %v424_v3 = vpack.c.bf16 %v292_v26, %v292_v26 }
  0x9a   :  { %374 = vst.msk [vmem:[%s739_s7 + $0xc] sm:$0xf] %vm310_vm0, %v425_v57 }
  0x9b   :  { %373 = vst.msk [vmem:[%s739_s7 + $0x8] sm:$0xf] %vm310_vm0, %v424_v3 }

// kernel: _lambda_.12
= control target key start
LH: loop header
LB: loop body
LE: loop exit
PB: predicated region body
PF: predicated region fallthrough
CT: control target
= control target key end

     0   :  { %s199_s13 = smov 4   ;;  %s200_s16 = smov 124   ;;  %vm66_vm0 = vcmask 31744   ;;  %vm164_vm1 = vcmask 523264   ;;  %vm95_vm2 = vcmask 490496   ;;  %s401_s0 = inlined_call_operand.vmem [shape: f32[32,64], index: 0, kind: input, shape index: {}]   ;;  %s402_s1 = inlined_call_operand.vmem [shape: f32[32,64], index: 1, kind: input, shape index: {}]   ;;  %s403_s2 = inlined_call_operand.vmem [shape: f32[32,64], index: 2, kind: input, shape index: {}]   ;;  %s404_s3 = inlined_call_operand.vmem [shape: f32[32,64], index: 3, kind: output, shape index: {0}]   ;;  %s405_s4 = inlined_call_operand.vmem [shape: f32[32,64], index: 4, kind: output, shape index: {1}]   ;;  %s406_s5 = inlined_call_operand.vmem [shape: f32[32,64], index: 5, kind: output, shape index: {2}]   ;;  %s407_s6 = inlined_call_operand.vmem [shape: f32[32,64], index: 6, kind: output, shape index: {3}]  }
   0x1   :  { %v20_v0 = vld [vmem:[%s401_s0 + $0x10] sm:$0xff]  ;;  %v18_v2 = vld [vmem:[%s401_s0] sm:$0xff]  ;;  %v21_v7 = vld [vmem:[%s401_s0 + $0x18] sm:$0xff] }
   0x2   :  { %v24_v1 = vld [vmem:[%s402_s1 + $0x10] sm:$0xff]  ;;  %v36_v4 = vmul.f32 0.75, %v20_v0  ;;  %v22_v5 = vld [vmem:[%s402_s1] sm:$0xff]  ;;  %v34_v6 = vmul.f32 0.75, %v18_v2  ;;  %v25_v8 = vld [vmem:[%s402_s1 + $0x18] sm:$0xff]  ;;  %v37_v11 = vmul.f32 0.75, %v21_v7 }
   0x3   :  { %v32_v3 = vmul.f32 0.25, %v24_v1  ;;  %v30_v9 = vmul.f32 0.25, %v22_v5  ;;  %v33_v10 = vmul.f32 0.25, %v25_v8  ;;  %v19_v12 = vld [vmem:[%s401_s0 + $0x8] sm:$0xff]  ;;  %v26_v21 = vld [vmem:[%s403_s2] sm:$0xff]  ;;  %v29_v24 = vld [vmem:[%s403_s2 + $0x18] sm:$0xff] }
   0x4   :  { %v23_v13 = vld [vmem:[%s402_s1 + $0x8] sm:$0xff]  ;;  %v35_v16 = vmul.f32 0.75, %v19_v12  ;;  %v42_v23 = vmul.f32 0.25, %v26_v21  ;;  %v28_v25 = vld [vmem:[%s403_s2 + $0x10] sm:$0xff]  ;;  %v45_v27 = vmul.f32 0.25, %v29_v24 }
   0x5   :  { %v260_v14 = vadd.f32 %v36_v4, %v32_v3  ;;  %v31_v15 = vmul.f32 0.25, %v23_v13  ;;  %v262_v17 = vadd.f32 %v34_v6, %v30_v9  ;;  %v265_v18 = vadd.f32 %v37_v11, %v33_v10  ;;  %v27_v20 = vld [vmem:[%s403_s2 + $0x8] sm:$0xff] }
   0x6   :  { %v43_v22 = vmul.f32 0.25, %v27_v20  ;;  %v286_v28 = vadd.f32 %v42_v23, %v34_v6  ;;  %v44_v29 = vmul.f32 0.25, %v28_v25  ;;  %v289_v30 = vadd.f32 %v45_v27, %v37_v11 }
   0x7   :  { %58 = vrot.lane.b32.xlu1 %v260_v14, %s199_s13  ;;  %54 = vrot.lane.b32.xlu0 %v262_v17, %s199_s13  ;;  %v39_v19 = vadd.f32 %v35_v16, %v31_v15  ;;  %v77_v33 = vmul.f32 0.75, %v260_v14  ;;  %v75_v36 = vmul.f32 0.75, %v262_v17  ;;  %v78_v41 = vmul.f32 0.75, %v265_v18 }
   0x8   :  { %v283_v26 = vadd.f32 %v43_v22, %v35_v16  ;;  %v292_v31 = vadd.f32 %v44_v29, %v36_v4  ;;  %v132_v7 = vmul.f32 0.75, %v286_v28  ;;  %v135_v13 = vmul.f32 0.75, %v289_v30 }
   0x9   :  { %v76_v45 = vmul.f32 0.75, %v39_v19 }
   0xa   :  { %v133_v3 = vmul.f32 0.75, %v283_v26 }
   0xb   :  { %60 = vrot.lane.b32.xlu1 %v265_v18, %s199_s13  ;;  %56 = vrot.lane.b32.xlu0 %v39_v19, %s199_s13 }
   0xf   :  { %85 = vrot.lane.b32.xlu1 %v39_v19, %s200_s16  ;;  %83 = vrot.lane.b32.xlu0 %v262_v17, %s200_s16 }
  0x13   :  { %89 = vrot.lane.b32.xlu1 %v265_v18, %s200_s16  ;;  %87 = vrot.lane.b32.xlu0 %v260_v14, %s200_s16 }
  0x17   :  { %114 = vrot.lane.b32.xlu1 %v283_v26, %s199_s13  ;;  %112 = vrot.lane.b32.xlu0 %v286_v28, %s199_s13 }
  0x1b   :  { %118 = vrot.lane.b32.xlu1 %v289_v30, %s199_s13  ;;  %116 = vrot.lane.b32.xlu0 %v292_v31, %s199_s13 }
  0x1f   :  { %142 = vrot.lane.b32.xlu1 %v283_v26, %s200_s16  ;;  %140 = vrot.lane.b32.xlu0 %v286_v28, %s200_s16 }
  0x23   :  { %146 = vrot.lane.b32.xlu1 %v289_v30, %s200_s16  ;;  %144 = vrot.lane.b32.xlu0 %v292_v31, %s200_s16 }
  0x79   :  { %v59_v32 = vpop.permute.xlu1 %58  ;;  %v55_v35 = vpop.permute.xlu0 %54 }
  0x7a   :  { %v69_v34 = vsel %vm66_vm0, %v260_v14, %v59_v32  ;;  %v67_v38 = vsel %vm66_vm0, %v262_v17, %v55_v35 }
  0x7b   :  { %v73_v37 = vmul.f32 0.25, %v69_v34  ;;  %v71_v39 = vmul.f32 0.25, %v67_v38 }
  0x7d   :  { %v81_v40 = vadd.f32 %v77_v33, %v73_v37  ;;  %v61_v42 = vpop.permute.xlu1 %60  ;;  %v79_v43 = vadd.f32 %v75_v36, %v71_v39  ;;  %v57_v46 = vpop.permute.xlu0 %56 }
  0x7e   :  { %v70_v44 = vsel %vm66_vm0, %v265_v18, %v61_v42  ;;  %v68_v48 = vsel %vm66_vm0, %v39_v19, %v57_v46 }
  0x7f   :  { %167 = vst.msk [vmem:[%s404_s3 + $0x10] sm:$0xff] %vm164_vm1, %v81_v40  ;;  %v74_v47 = vmul.f32 0.25, %v70_v44  ;;  %165 = vst.msk [vmem:[%s404_s3] sm:$0xff] %vm164_vm1, %v79_v43  ;;  %v72_v49 = vmul.f32 0.25, %v68_v48 }
  0x81   :  { %v82_v50 = vadd.f32 %v78_v41, %v74_v47  ;;  %v86_v51 = vpop.permute.xlu1 %85  ;;  %v80_v52 = vadd.f32 %v76_v45, %v72_v49  ;;  %v84_v54 = vpop.permute.xlu0 %83 }
  0x82   :  { %v97_v53 = vsel %vm95_vm2, %v86_v51, %v39_v19  ;;  %v96_v56 = vsel %vm95_vm2, %v84_v54, %v262_v17  ;;  %v134_v17 = vmul.f32 0.75, %v292_v31 }
  0x83   :  { %168 = vst.msk [vmem:[%s404_s3 + $0x18] sm:$0xff] %vm164_vm1, %v82_v50  ;;  %v101_v55 = vmul.f32 0.25, %v97_v53  ;;  %166 = vst.msk [vmem:[%s404_s3 + $0x8] sm:$0xff] %vm164_vm1, %v80_v52  ;;  %v100_v57 = vmul.f32 0.25, %v96_v56 }
  0x85   :  { %v105_v58 = vadd.f32 %v101_v55, %v76_v45  ;;  %v90_v59 = vpop.permute.xlu1 %89  ;;  %v104_v60 = vadd.f32 %v100_v57, %v75_v36  ;;  %v88_v62 = vpop.permute.xlu0 %87 }
  0x86   :  { %v99_v61 = vsel %vm95_vm2, %v90_v59, %v265_v18  ;;  %v98_v0 = vsel %vm95_vm2, %v88_v62, %v260_v14 }
  0x87   :  { %170 = vst.msk [vmem:[%s405_s4 + $0x8] sm:$0xff] %vm164_vm1, %v105_v58  ;;  %v103_v63 = vmul.f32 0.25, %v99_v61  ;;  %169 = vst.msk [vmem:[%s405_s4] sm:$0xff] %vm164_vm1, %v104_v60  ;;  %v102_v1 = vmul.f32 0.25, %v98_v0 }
  0x89   :  { %v107_v2 = vadd.f32 %v103_v63, %v78_v41  ;;  %v115_v4 = vpop.permute.xlu1 %114  ;;  %v106_v5 = vadd.f32 %v102_v1, %v77_v33  ;;  %v113_v8 = vpop.permute.xlu0 %112 }
  0x8a   :  { %v125_v6 = vsel %vm66_vm0, %v283_v26, %v115_v4  ;;  %v124_v10 = vsel %vm66_vm0, %v286_v28, %v113_v8 }
  0x8b   :  { %172 = vst.msk [vmem:[%s405_s4 + $0x18] sm:$0xff] %vm164_vm1, %v107_v2  ;;  %v129_v9 = vmul.f32 0.25, %v125_v6  ;;  %171 = vst.msk [vmem:[%s405_s4 + $0x10] sm:$0xff] %vm164_vm1, %v106_v5  ;;  %v128_v11 = vmul.f32 0.25, %v124_v10 }
  0x8d   :  { %v137_v12 = vadd.f32 %v133_v3, %v129_v9  ;;  %v119_v14 = vpop.permute.xlu1 %118  ;;  %v136_v15 = vadd.f32 %v132_v7, %v128_v11  ;;  %v117_v18 = vpop.permute.xlu0 %116 }
  0x8e   :  { %v127_v16 = vsel %vm66_vm0, %v289_v30, %v119_v14  ;;  %v126_v20 = vsel %vm66_vm0, %v292_v31, %v117_v18 }
  0x8f   :  { %174 = vst.msk [vmem:[%s406_s5 + $0x8] sm:$0xff] %vm164_vm1, %v137_v12  ;;  %v131_v19 = vmul.f32 0.25, %v127_v16  ;;  %173 = vst.msk [vmem:[%s406_s5] sm:$0xff] %vm164_vm1, %v136_v15  ;;  %v130_v21 = vmul.f32 0.25, %v126_v20 }
  0x91   :  { %v139_v22 = vadd.f32 %v135_v13, %v131_v19  ;;  %v143_v23 = vpop.permute.xlu1 %142  ;;  %v138_v24 = vadd.f32 %v134_v17, %v130_v21  ;;  %v141_v27 = vpop.permute.xlu0 %140 }
  0x92   :  { %v153_v25 = vsel %vm95_vm2, %v143_v23, %v283_v26  ;;  %v152_v32 = vsel %vm95_vm2, %v141_v27, %v286_v28 }
  0x93   :  { %176 = vst.msk [vmem:[%s406_s5 + $0x18] sm:$0xff] %vm164_vm1, %v139_v22  ;;  %v157_v29 = vmul.f32 0.25, %v153_v25  ;;  %175 = vst.msk [vmem:[%s406_s5 + $0x10] sm:$0xff] %vm164_vm1, %v138_v24  ;;  %v156_v33 = vmul.f32 0.25, %v152_v32 }
  0x95   :  { %v161_v34 = vadd.f32 %v157_v29, %v133_v3  ;;  %v147_v35 = vpop.permute.xlu1 %146  ;;  %v160_v36 = vadd.f32 %v156_v33, %v132_v7  ;;  %v145_v37 = vpop.permute.xlu0 %144 }
  0x96   :  { %v155_v26 = vsel %vm95_vm2, %v147_v35, %v289_v30  ;;  %v154_v28 = vsel %vm95_vm2, %v145_v37, %v292_v31 }
  0x97   :  { %178 = vst.msk [vmem:[%s407_s6 + $0x8] sm:$0xff] %vm164_vm1, %v161_v34  ;;  %v159_v38 = vmul.f32 0.25, %v155_v26  ;;  %177 = vst.msk [vmem:[%s407_s6] sm:$0xff] %vm164_vm1, %v160_v36  ;;  %v158_v39 = vmul.f32 0.25, %v154_v28 }
  0x99   :  { %v163_v40 = vadd.f32 %v159_v38, %v135_v13  ;;  %v162_v41 = vadd.f32 %v158_v39, %v134_v17 }
  0x9b   :  { %180 = vst.msk [vmem:[%s407_s6 + $0x18] sm:$0xff] %vm164_vm1, %v163_v40  ;;  %179 = vst.msk [vmem:[%s407_s6 + $0x10] sm:$0xff] %vm164_vm1, %v162_v41 }

// kernel: _lambda_.13
= control target key start
LH: loop header
LB: loop body
LE: loop exit
PB: predicated region body
PF: predicated region fallthrough
CT: control target
= control target key end

     0   :  { %14 = vsyncpa [#allocation3], 0  ;;  %s3167_s0 = inlined_call_operand.vmem [shape: bf16[2048,4], index: 0, kind: input, shape index: {}]   ;;  %s3168_s1 = inlined_call_operand.vmem [shape: f32[2048,4], index: 1, kind: input, shape index: {}]   ;;  %s3169_s2 = inlined_call_operand.vmem [shape: bf16[4,4], index: 2, kind: input, shape index: {}]   ;;  %s3170_s3 = inlined_call_operand.vmem [shape: f32[1,4], index: 3, kind: input, shape index: {}]   ;;  %s3171_s4 = inlined_call_operand.vmem [shape: bf16[4,4], index: 4, kind: input, shape index: {}]   ;;  %s3172_s5 = inlined_call_operand.vmem [shape: f32[1,4], index: 5, kind: input, shape index: {}]   ;;  %s3173_s6 = inlined_call_operand.vmem [shape: f32[1,4], index: 6, kind: input, shape index: {}]   ;;  %s3174_s7 = inlined_call_operand.hbm [shape: f32[2048,4], index: 7, kind: output, shape index: {0}]   ;;  %s3175_s8 = inlined_call_operand.vmem [shape: f32[2048,4], index: 8, kind: output, shape index: {1}]  }
   0x1   :  { %16 = vsyncpa [#allocation3 + $0x1], 0  ;;  %s2406_s27 = smov 0   ;;  %s2408_s28 = smov 0  }
   0x2   :  { %s2410_s29 = smov 0   ;;  %s2412_s30 = smov 0  }
   0x3 LB: > { %s2427_s9 = sadd.s32 4294967295, %s2356_s30   ;;  %s1907_s10 = sadd.s32 4294967294, %s2356_s30   ;;  %s2356_s30 = sphi %s2412_s30, %s3181_s30   ;;  %s2352_s29 = sphi %s2410_s29, %s3180_s29   ;;  %s2348_s28 = sphi %s2408_s28, %s3179_s28   ;;  %s2344_s27 = sphi %s2406_s27, %s3178_s27  }
   0x4   : > { %s2431_s11 = sadd.s32 1, %s2356_s30   ;;  %s186_s12 = sadd.s32 1, %s2352_s29 }
   0x5   : > { %s183_s13 = ssub.s32 %s2356_s30, %s2431_s11  ;;  %p196_p0 = scmp.ne.s32.totalorder %s2352_s29, %s2348_s28 }
   0x6   : > { %p184_p1 = scmp.eq.s32.totalorder %s183_s13, 0  ;;  %p197_p2 = scmp.eq.s32.totalorder %s2427_s9, 3 }
   0x7   : > { %p202_p3 = scmp.ne.s32.totalorder %s2348_s28, %s2344_s27  ;;  %p203_p4 = scmp.eq.s32.totalorder %s1907_s10, 3 }
   0x8   : > { %s2442_s14 = scalar_select %p184_p1, %s2352_s29, %s186_s12  }
   0x9   : > { %p2444_p5 = por %p197_p2, %p196_p0  ;;  %p2448_p6 = por %p203_p4, %p202_p3 }
   0xa   : > { %p1910_p7 = scmp.ge.s32.totalorder %s2356_s30, 1  ;;  %p280_p8 = scmp.lt.s32.totalorder %s2356_s30, 5 }
   0xc   : > { %p281_p9 = pnand %p1910_p7, %p280_p8 }
   0xd   : > { %s1912_s19 = sshll.u32 (!%p281_p9), %s2427_s9, 6  ;;  %s314_s10 = sand.u32 (!%p281_p9), 1, %s2348_s28  }
   0xe   : > { %284 = sbr.rel (%p281_p9) target bundleno = 565 (0x235), region = 48  ;;  %p325_p10 = scmp.lt.s32.totalorder (!%p281_p9), %s1912_s19, 255 }
   0xf   : > { %s1911_s21 = sshll.u32 (!%p281_p9), %s314_s10, 9 }
  0x10   : > { %s2558_s22 = scalar_lea.vmem (!%p281_p9), [#allocation2], %s1911_s21 }
  0x11   : > { %s1804_s21 = sshll.u32 (!%p281_p9), %s2558_s22, 4  ;;  %s2870_s21 = int_to_ptr.vmem [resolvable:$true] %s1804_s21 }
  0x13   : > { %v408_v0 = vld [vmem:[%s3169_s2] sm:$0x3]  ;;  %vm673_vm0 = vcmask 1041408   ;;  %s3183_s19 = smov (!%p325_p10, %s1912_s19), 255  ;;  %vm576_vm1 = vcmask 31744  }
  0x14   : > { %2221 = vmatprep.subr.msk.bf16.mxu0 %vm673_vm0, %v408_v0  ;;  %v675_v1 = vsel %vm673_vm0, %v408_v0, 0  ;;  %s1913_s20 = sshll.u32 %s3183_s19, 2  ;;  %v1190_v23 = vld [vmem:[%s3171_s4] sm:$0x3]  ;;  %s1915_s26 = sshll.u32 %s3183_s19, 3 }
  0x15   : > { %2090 = vmatpush3.bf16.msra.mxu0 %v675_v1  ;;  %s2466_s23 = scalar_lea.vmem %s3167_s0, %s1913_s20  ;;  %2222 = vmatprep.subr.msk.bf16.mxu1 %vm673_vm0, %v1190_v23  ;;  %v1288_v24 = vsel %vm673_vm0, %v1190_v23, 0  ;;  %s2544_s17 = scalar_lea.vmem %s3168_s1, %s1915_s26  ;;  %v2549_v36 = vld [vmem:[%s3170_s3] ss:$0 sm:$0xff] }
  0x16   : > { %v2264_v2 = vld [vmem:[%s2466_s23] sm:$0xff]   ;;  %v2265_v3 = vld [vmem:[%s2466_s23 + $0x8] sm:$0xff]   ;;  %v2266_v4 = vld [vmem:[%s2466_s23 + $0x10] sm:$0xff]   ;;  %2156 = vmatpush3.bf16.msra.mxu1 %v1288_v24  ;;  %s2853_s13 = scalar_lea.vmem %s3175_s8, %s1915_s26  ;;  %s2022_s20 = sshll.u32 %s2427_s9, 13 }
  0x17   : > { %2091 = vmatprep.mubr.msk.bf16.mxu0 %vm576_vm1, %v2264_v2  ;;  %v2267_v5 = vld [vmem:[%s2466_s23 + $0x18] sm:$0xff]   ;;  %v2268_v6 = vld [vmem:[%s2466_s23 + $0x20] sm:$0xff]   ;;  %v2269_v7 = vld [vmem:[%s2466_s23 + $0x28] sm:$0xff]   ;;  %s2866_s24 = scalar_lea.hbm %s3174_s7, %s2022_s20  ;;  %s2878_s9 = scalar_lea.sflag [#allocation3], %s314_s10 }
  0x18   : > { %2092 = vmatmul.mubr.msk.bf16.vlgmr.msra.gmra.mxu0 %vm576_vm1, %v2265_v3  ;;  %v2270_v8 = vld [vmem:[%s2466_s23 + $0x30] sm:$0xff]   ;;  %v2271_v9 = vld [vmem:[%s2466_s23 + $0x38] sm:$0xff]   ;;  %v2272_v10 = vld [vmem:[%s2466_s23 + $0x40] sm:$0xff]   ;;  %s2296_s26 = scalar_lea.vmem %s2870_s21, 8192 }
  0x19   : > { %2095 = vmatprep.mubr.msk.bf16.mxu0 %vm576_vm1, %v2266_v4  ;;  %v2273_v11 = vld [vmem:[%s2466_s23 + $0x48] sm:$0xff]   ;;  %v2274_v12 = vld [vmem:[%s2466_s23 + $0x50] sm:$0xff]   ;;  %v2275_v13 = vld [vmem:[%s2466_s23 + $0x58] sm:$0xff]   ;;  %p2297_p11 = scmp.ne.s32.totalorder %s2870_s21, %s2296_s26 }
  0x1a   : > { %v2276_v14 = vld [vmem:[%s2466_s23 + $0x60] sm:$0xff]   ;;  %v2277_v15 = vld [vmem:[%s2466_s23 + $0x68] sm:$0xff]   ;;  %v2278_v16 = vld [vmem:[%s2466_s23 + $0x70] sm:$0xff]  }
  0x1b   : > { %v2279_v17 = vld [vmem:[%s2466_s23 + $0x78] sm:$0xff]   ;;  %v2280_v18 = vld [vmem:[%s2466_s23 + $0x80] sm:$0xff]   ;;  %v2281_v19 = vld [vmem:[%s2466_s23 + $0x88] sm:$0xff]   ;;  %p2298_p12 = pnand %p2297_p11, %p2444_p5 }
  0x1c   : > { %v2282_v20 = vld [vmem:[%s2466_s23 + $0x90] sm:$0xff]   ;;  %v2283_v21 = vld [vmem:[%s2466_s23 + $0x98] sm:$0xff]   ;;  %v2284_v22 = vld [vmem:[%s2466_s23 + $0xa0] sm:$0xff]  }
  0x1d   : > { %v2285_v25 = vld [vmem:[%s2466_s23 + $0xa8] sm:$0xff]   ;;  %v2286_v26 = vld [vmem:[%s2466_s23 + $0xb0] sm:$0xff]   ;;  %v2287_v27 = vld [vmem:[%s2466_s23 + $0xb8] sm:$0xff]   ;;  %p2299_p13 = pneg %p2298_p12 }
  0x1e   : > { %v2288_v28 = vld [vmem:[%s2466_s23 + $0xc0] sm:$0xff]   ;;  %v2289_v29 = vld [vmem:[%s2466_s23 + $0xc8] sm:$0xff]   ;;  %v2290_v30 = vld [vmem:[%s2466_s23 + $0xd0] sm:$0xff]  }
  0x1f   : > { %v2291_v31 = vld [vmem:[%s2466_s23 + $0xd8] sm:$0xff]   ;;  %v2292_v32 = vld [vmem:[%s2466_s23 + $0xe0] sm:$0xff]   ;;  %v2293_v33 = vld [vmem:[%s2466_s23 + $0xe8] sm:$0xff]  }
  0x20   : > { %2096 = vmatmul.mubr.msk.bf16.gmra.mxu0 %vm576_vm1, %v2267_v5  ;;  %v2294_v34 = vld [vmem:[%s2466_s23 + $0xf0] sm:$0xff]   ;;  %v2295_v35 = vld [vmem:[%s2466_s23 + $0xf8] sm:$0xff]   ;;  %v966_v41 = vld [vmem:[%s2544_s17] sm:$0xff] }
  0x21   : > { %2099 = vmatprep.mubr.msk.bf16.mxu0 %vm576_vm1, %v2268_v6  ;;  %v968_v38 = vld [vmem:[%s2544_s17 + $0x10] sm:$0xff]  ;;  %v969_v45 = vld [vmem:[%s2544_s17 + $0x18] sm:$0xff]  ;;  %v967_v49 = vld [vmem:[%s2544_s17 + $0x8] sm:$0xff] }
  0x22   : > { %v972_v53 = vld [vmem:[%s2544_s17 + $0x30] sm:$0xff]  ;;  %v970_v57 = vld [vmem:[%s2544_s17 + $0x20] sm:$0xff]  ;;  %v973_v63 = vld [vmem:[%s2544_s17 + $0x38] sm:$0xff] }
  0x23   : > { %v971_v3 = vld [vmem:[%s2544_s17 + $0x28] sm:$0xff] }
  0x28   : > { %2100 = vmatmul.mubr.msk.bf16.gmra.mxu0 %vm576_vm1, %v2269_v7  ;;  %v976_v7 = vld [vmem:[%s2544_s17 + $0x50] sm:$0xff] }
  0x29   : > { %2103 = vmatprep.mubr.msk.bf16.mxu0 %vm576_vm1, %v2270_v8 }
  0x30   : > { %2104 = vmatmul.mubr.msk.bf16.gmra.mxu0 %vm576_vm1, %v2271_v9 }
  0x31   : > { %2107 = vmatprep.mubr.msk.bf16.mxu0 %vm576_vm1, %v2272_v10 }
  0x38   : > { %2108 = vmatmul.mubr.msk.bf16.gmra.mxu0 %vm576_vm1, %v2273_v11  ;;  %v974_v11 = vld [vmem:[%s2544_s17 + $0x40] sm:$0xff] }
  0x39   : > { %2111 = vmatprep.mubr.msk.bf16.mxu0 %vm576_vm1, %v2274_v12 }
  0x40   : > { %2112 = vmatmul.mubr.msk.bf16.gmra.mxu0 %vm576_vm1, %v2275_v13 }
  0x41   : > { %2115 = vmatprep.mubr.msk.bf16.mxu0 %vm576_vm1, %v2276_v14 }
  0x48   : > { %2116 = vmatmul.mubr.msk.bf16.gmra.mxu0 %vm576_vm1, %v2277_v15 }
  0x49   : > { %2119 = vmatprep.mubr.msk.bf16.mxu0 %vm576_vm1, %v2278_v16 }
  0x50   : > { %2120 = vmatmul.mubr.msk.bf16.gmra.mxu0 %vm576_vm1, %v2279_v17  ;;  %v977_v17 = vld [vmem:[%s2544_s17 + $0x58] sm:$0xff] }
  0x51   : > { %2123 = vmatprep.mubr.msk.bf16.mxu0 %vm576_vm1, %v2280_v18 }
  0x58   : > { %2124 = vmatmul.mubr.msk.bf16.gmra.mxu0 %vm576_vm1, %v2281_v19 }
  0x59   : > { %2127 = vmatprep.mubr.msk.bf16.mxu0 %vm576_vm1, %v2282_v20 }
  0x60   : > { %2128 = vmatmul.mubr.msk.bf16.gmra.mxu0 %vm576_vm1, %v2283_v21  ;;  %v975_v21 = vld [vmem:[%s2544_s17 + $0x48] sm:$0xff] }
  0x61   : > { %2131 = vmatprep.mubr.msk.bf16.mxu0 %vm576_vm1, %v2284_v22 }
  0x68   : > { %2132 = vmatmul.mubr.msk.bf16.gmra.mxu0 %vm576_vm1, %v2285_v25  ;;  %v980_v25 = vld [vmem:[%s2544_s17 + $0x70] sm:$0xff] }
  0x69   : > { %2135 = vmatprep.mubr.msk.bf16.mxu0 %vm576_vm1, %v2286_v26 }
  0x70   : > { %2136 = vmatmul.mubr.msk.bf16.gmra.mxu0 %vm576_vm1, %v2287_v27 }
  0x71   : > { %2139 = vmatprep.mubr.msk.bf16.mxu0 %vm576_vm1, %v2288_v28 }
  0x78   : > { %2140 = vmatmul.mubr.msk.bf16.gmra.mxu0 %vm576_vm1, %v2289_v29  ;;  %v978_v29 = vld [vmem:[%s2544_s17 + $0x60] sm:$0xff] }
  0x79   : > { %2143 = vmatprep.mubr.msk.bf16.mxu0 %vm576_vm1, %v2290_v30 }
  0x80   : > { %2144 = vmatmul.mubr.msk.bf16.gmra.mxu0 %vm576_vm1, %v2291_v31 }
  0x81   : > { %2147 = vmatprep.mubr.msk.bf16.mxu0 %vm576_vm1, %v2292_v32 }
  0x88   : > { %2148 = vmatmul.mubr.msk.bf16.gmra.mxu0 %vm576_vm1, %v2293_v33 }
  0x89   : > { %2151 = vmatprep.mubr.msk.bf16.mxu0 %vm576_vm1, %v2294_v34 }
  0x90   : > { %2152 = vmatmul.mubr.msk.bf16.gmra.mxu0 %vm576_vm1, %v2295_v35  ;;  %v981_v35 = vld [vmem:[%s2544_s17 + $0x78] sm:$0xff] }
  0xd8   : > { %v2093_v37 = vpop.f32.mrf.mxu0 }
  0xd9   : > { %v720_v39 = vadd.f32 %v2093_v37, %v2549_v36 }
  0xda   : > { %v711_v40 = vpop.f32.mrf.mxu0 }
  0xdb   : > { %v1032_v42 = vadd.f32 %v968_v38, %v720_v39  ;;  %v712_v43 = vadd.f32 %v2549_v36, %v711_v40  ;;  %v979_v40 = vld [vmem:[%s2544_s17 + $0x68] sm:$0xff] }
  0xdc   : > { %v2094_v44 = vpop.f32.mrf.mxu0 }
  0xdd   : > { %1096 = vst.msk [vmem:[%s2558_s22 + $0x10] sm:$0xff] %vm576_vm1, %v1032_v42  ;;  %v1030_v46 = vadd.f32 %v966_v41, %v712_v43  ;;  %v723_v47 = vadd.f32 %v2094_v44, %v2549_v36  ;;  %v984_v44 = vld [vmem:[%s2544_s17 + $0x90] sm:$0xff] }
  0xde   : > { %v714_v48 = vpop.f32.mrf.mxu0 }
  0xdf   : > { %1094 = vst.msk [vmem:[%s2558_s22] sm:$0xff] %vm576_vm1, %v1030_v46  ;;  %v1033_v50 = vadd.f32 %v969_v45, %v723_v47  ;;  %v715_v51 = vadd.f32 %v2549_v36, %v714_v48  ;;  %v982_v48 = vld [vmem:[%s2544_s17 + $0x80] sm:$0xff] }
  0xe0   : > { %v2097_v52 = vpop.f32.mrf.mxu0 }
  0xe1   : > { %1097 = vst.msk [vmem:[%s2558_s22 + $0x18] sm:$0xff] %vm576_vm1, %v1033_v50  ;;  %v1031_v54 = vadd.f32 %v967_v49, %v715_v51  ;;  %v736_v55 = vadd.f32 %v2097_v52, %v2549_v36  ;;  %v1159_v61 = vpack.c.bf16 %v1033_v50, %v1032_v42 }
  0xe2   : > { %v727_v56 = vpop.f32.mrf.mxu0 }
  0xe3   : > { %1095 = vst.msk [vmem:[%s2558_s22 + $0x8] sm:$0xff] %vm576_vm1, %v1031_v54  ;;  %v1036_v58 = vadd.f32 %v972_v53, %v736_v55  ;;  %v728_v59 = vadd.f32 %v2549_v36, %v727_v56  ;;  %v1158_v60 = vpack.c.bf16 %v1031_v54, %v1030_v46  ;;  %v985_v54 = vld [vmem:[%s2544_s17 + $0x98] sm:$0xff] }
  0xe4   : > { %v2098_v62 = vpop.f32.mrf.mxu0 }
  0xe5   : > { %1100 = vst.msk [vmem:[%s2558_s22 + $0x30] sm:$0xff] %vm576_vm1, %v1036_v58  ;;  %v1034_v0 = vadd.f32 %v970_v57, %v728_v59  ;;  %v739_v1 = vadd.f32 %v2098_v62, %v2549_v36  ;;  %2157 = vmatprep.mubr.msk.bf16.mxu1 %vm576_vm1, %v1158_v60  ;;  %v988_v62 = vld [vmem:[%s2544_s17 + $0xb0] sm:$0xff] }
  0xe6   : > { %v730_v2 = vpop.f32.mrf.mxu0  ;;  %2158 = vmatmul.mubr.msk.bf16.vlgmr.msra.gmra.mxu1 %vm576_vm1, %v1159_v61 }
  0xe7   : > { %1098 = vst.msk [vmem:[%s2558_s22 + $0x20] sm:$0xff] %vm576_vm1, %v1034_v0  ;;  %v1037_v4 = vadd.f32 %v973_v63, %v739_v1  ;;  %v731_v5 = vadd.f32 %v2549_v36, %v730_v2  ;;  %v986_v2 = vld [vmem:[%s2544_s17 + $0xa0] sm:$0xff] }
  0xe8   : > { %v2101_v6 = vpop.f32.mrf.mxu0 }
  0xe9   : > { %1101 = vst.msk [vmem:[%s2558_s22 + $0x38] sm:$0xff] %vm576_vm1, %v1037_v4  ;;  %v1035_v8 = vadd.f32 %v971_v3, %v731_v5  ;;  %v752_v9 = vadd.f32 %v2101_v6, %v2549_v36  ;;  %v1161_v15 = vpack.c.bf16 %v1037_v4, %v1036_v58  ;;  %v983_v58 = vld [vmem:[%s2544_s17 + $0x88] sm:$0xff] }
  0xea   : > { %v743_v10 = vpop.f32.mrf.mxu0 }
  0xeb   : > { %1099 = vst.msk [vmem:[%s2558_s22 + $0x28] sm:$0xff] %vm576_vm1, %v1035_v8  ;;  %v1160_v12 = vpack.c.bf16 %v1035_v8, %v1034_v0  ;;  %v1040_v13 = vadd.f32 %v976_v7, %v752_v9  ;;  %v744_v14 = vadd.f32 %v2549_v36, %v743_v10  ;;  %v989_v8 = vld [vmem:[%s2544_s17 + $0xb8] sm:$0xff] }
  0xec   : > { %v2102_v16 = vpop.f32.mrf.mxu0 }
  0xed   : > { %1104 = vst.msk [vmem:[%s2558_s22 + $0x50] sm:$0xff] %vm576_vm1, %v1040_v13  ;;  %v1038_v18 = vadd.f32 %v974_v11, %v744_v14  ;;  %v755_v19 = vadd.f32 %v2102_v16, %v2549_v36  ;;  %2161 = vmatprep.mubr.msk.bf16.mxu1 %vm576_vm1, %v1160_v12  ;;  %v987_v12 = vld [vmem:[%s2544_s17 + $0xa8] sm:$0xff]  ;;  %v992_v16 = vld [vmem:[%s2544_s17 + $0xd0] sm:$0xff] }
  0xee   : > { %v746_v20 = vpop.f32.mrf.mxu0  ;;  %2162 = vmatmul.mubr.msk.bf16.gmra.mxu1 %vm576_vm1, %v1161_v15 }
  0xef   : > { %1102 = vst.msk [vmem:[%s2558_s22 + $0x40] sm:$0xff] %vm576_vm1, %v1038_v18  ;;  %v1041_v22 = vadd.f32 %v977_v17, %v755_v19  ;;  %v747_v23 = vadd.f32 %v2549_v36, %v746_v20  ;;  %v990_v20 = vld [vmem:[%s2544_s17 + $0xc0] sm:$0xff] }
  0xf0   : > { %v2105_v24 = vpop.f32.mrf.mxu0 }
  0xf1   : > { %1105 = vst.msk [vmem:[%s2558_s22 + $0x58] sm:$0xff] %vm576_vm1, %v1041_v22  ;;  %v1039_v26 = vadd.f32 %v975_v21, %v747_v23  ;;  %v768_v27 = vadd.f32 %v2105_v24, %v2549_v36  ;;  %v1163_v33 = vpack.c.bf16 %v1041_v22, %v1040_v13 }
  0xf2   : > { %v759_v28 = vpop.f32.mrf.mxu0 }
  0xf3   : > { %1103 = vst.msk [vmem:[%s2558_s22 + $0x48] sm:$0xff] %vm576_vm1, %v1039_v26  ;;  %v1162_v30 = vpack.c.bf16 %v1039_v26, %v1038_v18  ;;  %v1044_v31 = vadd.f32 %v980_v25, %v768_v27  ;;  %v760_v32 = vadd.f32 %v2549_v36, %v759_v28  ;;  %v993_v26 = vld [vmem:[%s2544_s17 + $0xd8] sm:$0xff] }
  0xf4   : > { %v2106_v34 = vpop.f32.mrf.mxu0 }
  0xf5   : > { %1108 = vst.msk [vmem:[%s2558_s22 + $0x70] sm:$0xff] %vm576_vm1, %v1044_v31  ;;  %v1042_v37 = vadd.f32 %v978_v29, %v760_v32  ;;  %v771_v38 = vadd.f32 %v2106_v34, %v2549_v36  ;;  %2165 = vmatprep.mubr.msk.bf16.mxu1 %vm576_vm1, %v1162_v30  ;;  %v991_v30 = vld [vmem:[%s2544_s17 + $0xc8] sm:$0xff]  ;;  %v996_v34 = vld [vmem:[%s2544_s17 + $0xf0] sm:$0xff] }
  0xf6   : > { %v762_v39 = vpop.f32.mrf.mxu0  ;;  %2166 = vmatmul.mubr.msk.bf16.gmra.mxu1 %vm576_vm1, %v1163_v33 }
  0xf7   : > { %1106 = vst.msk [vmem:[%s2558_s22 + $0x60] sm:$0xff] %vm576_vm1, %v1042_v37  ;;  %v1045_v41 = vadd.f32 %v981_v35, %v771_v38  ;;  %v763_v42 = vadd.f32 %v2549_v36, %v762_v39  ;;  %v994_v39 = vld [vmem:[%s2544_s17 + $0xe0] sm:$0xff] }
  0xf8   : > { %v2109_v43 = vpop.f32.mrf.mxu0 }
  0xf9   : > { %1109 = vst.msk [vmem:[%s2558_s22 + $0x78] sm:$0xff] %vm576_vm1, %v1045_v41  ;;  %v1043_v45 = vadd.f32 %v979_v40, %v763_v42  ;;  %v784_v46 = vadd.f32 %v2109_v43, %v2549_v36  ;;  %v1165_v52 = vpack.c.bf16 %v1045_v41, %v1044_v31 }
  0xfa   : > { %v775_v47 = vpop.f32.mrf.mxu0 }
  0xfb   : > { %1107 = vst.msk [vmem:[%s2558_s22 + $0x68] sm:$0xff] %vm576_vm1, %v1043_v45  ;;  %v1164_v49 = vpack.c.bf16 %v1043_v45, %v1042_v37  ;;  %v1048_v50 = vadd.f32 %v984_v44, %v784_v46  ;;  %v776_v51 = vadd.f32 %v2549_v36, %v775_v47  ;;  %v997_v45 = vld [vmem:[%s2544_s17 + $0xf8] sm:$0xff] }
  0xfc   : > { %v2110_v53 = vpop.f32.mrf.mxu0 }
  0xfd   : > { %1112 = vst.msk [vmem:[%s2558_s22 + $0x90] sm:$0xff] %vm576_vm1, %v1048_v50  ;;  %v1046_v55 = vadd.f32 %v982_v48, %v776_v51  ;;  %v787_v56 = vadd.f32 %v2110_v53, %v2549_v36  ;;  %2169 = vmatprep.mubr.msk.bf16.mxu1 %vm576_vm1, %v1164_v49  ;;  %v995_v49 = vld [vmem:[%s2544_s17 + $0xe8] sm:$0xff]  ;;  %v1000_v53 = vld [vmem:[%s2544_s17 + $0x110] sm:$0xff] }
  0xfe   : > { %v778_v57 = vpop.f32.mrf.mxu0  ;;  %2170 = vmatmul.mubr.msk.bf16.gmra.mxu1 %vm576_vm1, %v1165_v52 }
  0xff   : > { %1110 = vst.msk [vmem:[%s2558_s22 + $0x80] sm:$0xff] %vm576_vm1, %v1046_v55  ;;  %v1049_v59 = vadd.f32 %v985_v54, %v787_v56  ;;  %v779_v60 = vadd.f32 %v2549_v36, %v778_v57  ;;  %v998_v57 = vld [vmem:[%s2544_s17 + $0x100] sm:$0xff] }
 0x100   : > { %v2113_v61 = vpop.f32.mrf.mxu0 }
 0x101   : > { %1113 = vst.msk [vmem:[%s2558_s22 + $0x98] sm:$0xff] %vm576_vm1, %v1049_v59  ;;  %v1047_v63 = vadd.f32 %v983_v58, %v779_v60  ;;  %v800_v0 = vadd.f32 %v2113_v61, %v2549_v36  ;;  %v1167_v6 = vpack.c.bf16 %v1049_v59, %v1048_v50 }
 0x102   : > { %v791_v1 = vpop.f32.mrf.mxu0 }
 0x103   : > { %1111 = vst.msk [vmem:[%s2558_s22 + $0x88] sm:$0xff] %vm576_vm1, %v1047_v63  ;;  %v1166_v3 = vpack.c.bf16 %v1047_v63, %v1046_v55  ;;  %v1052_v4 = vadd.f32 %v988_v62, %v800_v0  ;;  %v792_v5 = vadd.f32 %v2549_v36, %v791_v1  ;;  %v1001_v63 = vld [vmem:[%s2544_s17 + $0x118] sm:$0xff] }
 0x104   : > { %v2114_v7 = vpop.f32.mrf.mxu0 }
 0x105   : > { %1116 = vst.msk [vmem:[%s2558_s22 + $0xb0] sm:$0xff] %vm576_vm1, %v1052_v4  ;;  %v1050_v9 = vadd.f32 %v986_v2, %v792_v5  ;;  %v803_v10 = vadd.f32 %v2114_v7, %v2549_v36  ;;  %2173 = vmatprep.mubr.msk.bf16.mxu1 %vm576_vm1, %v1166_v3  ;;  %v999_v3 = vld [vmem:[%s2544_s17 + $0x108] sm:$0xff]  ;;  %v1004_v7 = vld [vmem:[%s2544_s17 + $0x130] sm:$0xff] }
 0x106   : > { %v794_v11 = vpop.f32.mrf.mxu0  ;;  %2174 = vmatmul.mubr.msk.bf16.gmra.mxu1 %vm576_vm1, %v1167_v6 }
 0x107   : > { %1114 = vst.msk [vmem:[%s2558_s22 + $0xa0] sm:$0xff] %vm576_vm1, %v1050_v9  ;;  %v1053_v13 = vadd.f32 %v989_v8, %v803_v10  ;;  %v795_v14 = vadd.f32 %v2549_v36, %v794_v11  ;;  %v1002_v11 = vld [vmem:[%s2544_s17 + $0x120] sm:$0xff] }
 0x108   : > { %v2117_v15 = vpop.f32.mrf.mxu0 }
 0x109   : > { %1117 = vst.msk [vmem:[%s2558_s22 + $0xb8] sm:$0xff] %vm576_vm1, %v1053_v13  ;;  %v1051_v17 = vadd.f32 %v987_v12, %v795_v14  ;;  %v816_v18 = vadd.f32 %v2117_v15, %v2549_v36  ;;  %v1169_v24 = vpack.c.bf16 %v1053_v13, %v1052_v4 }
 0x10a   : > { %v807_v19 = vpop.f32.mrf.mxu0 }
 0x10b   : > { %1115 = vst.msk [vmem:[%s2558_s22 + $0xa8] sm:$0xff] %vm576_vm1, %v1051_v17  ;;  %v1168_v21 = vpack.c.bf16 %v1051_v17, %v1050_v9  ;;  %v1056_v22 = vadd.f32 %v992_v16, %v816_v18  ;;  %v808_v23 = vadd.f32 %v2549_v36, %v807_v19  ;;  %v1005_v17 = vld [vmem:[%s2544_s17 + $0x138] sm:$0xff] }
 0x10c   : > { %v2118_v25 = vpop.f32.mrf.mxu0 }
 0x10d   : > { %1120 = vst.msk [vmem:[%s2558_s22 + $0xd0] sm:$0xff] %vm576_vm1, %v1056_v22  ;;  %v1054_v27 = vadd.f32 %v990_v20, %v808_v23  ;;  %v819_v28 = vadd.f32 %v2118_v25, %v2549_v36  ;;  %2177 = vmatprep.mubr.msk.bf16.mxu1 %vm576_vm1, %v1168_v21  ;;  %v1003_v21 = vld [vmem:[%s2544_s17 + $0x128] sm:$0xff]  ;;  %v1008_v25 = vld [vmem:[%s2544_s17 + $0x150] sm:$0xff] }
 0x10e   : > { %v810_v29 = vpop.f32.mrf.mxu0  ;;  %2178 = vmatmul.mubr.msk.bf16.gmra.mxu1 %vm576_vm1, %v1169_v24 }
 0x10f   : > { %1118 = vst.msk [vmem:[%s2558_s22 + $0xc0] sm:$0xff] %vm576_vm1, %v1054_v27  ;;  %v1057_v31 = vadd.f32 %v993_v26, %v819_v28  ;;  %v811_v32 = vadd.f32 %v2549_v36, %v810_v29  ;;  %v1006_v29 = vld [vmem:[%s2544_s17 + $0x140] sm:$0xff] }
 0x110   : > { %v2121_v33 = vpop.f32.mrf.mxu0 }
 0x111   : > { %1121 = vst.msk [vmem:[%s2558_s22 + $0xd8] sm:$0xff] %vm576_vm1, %v1057_v31  ;;  %v1055_v35 = vadd.f32 %v991_v30, %v811_v32  ;;  %v832_v37 = vadd.f32 %v2121_v33, %v2549_v36  ;;  %v1171_v43 = vpack.c.bf16 %v1057_v31, %v1056_v22 }
 0x112   : > { %v823_v38 = vpop.f32.mrf.mxu0 }
 0x113   : > { %1119 = vst.msk [vmem:[%s2558_s22 + $0xc8] sm:$0xff] %vm576_vm1, %v1055_v35  ;;  %v1170_v40 = vpack.c.bf16 %v1055_v35, %v1054_v27  ;;  %v1060_v41 = vadd.f32 %v996_v34, %v832_v37  ;;  %v824_v42 = vadd.f32 %v2549_v36, %v823_v38  ;;  %v1009_v35 = vld [vmem:[%s2544_s17 + $0x158] sm:$0xff] }
 0x114   : > { %v2122_v44 = vpop.f32.mrf.mxu0 }
 0x115   : > { %1124 = vst.msk [vmem:[%s2558_s22 + $0xf0] sm:$0xff] %vm576_vm1, %v1060_v41  ;;  %v1058_v46 = vadd.f32 %v994_v39, %v824_v42  ;;  %v835_v47 = vadd.f32 %v2122_v44, %v2549_v36  ;;  %2181 = vmatprep.mubr.msk.bf16.mxu1 %vm576_vm1, %v1170_v40  ;;  %v1007_v40 = vld [vmem:[%s2544_s17 + $0x148] sm:$0xff]  ;;  %v1012_v44 = vld [vmem:[%s2544_s17 + $0x170] sm:$0xff] }
 0x116   : > { %v826_v48 = vpop.f32.mrf.mxu0  ;;  %2182 = vmatmul.mubr.msk.bf16.gmra.mxu1 %vm576_vm1, %v1171_v43 }
 0x117   : > { %1122 = vst.msk [vmem:[%s2558_s22 + $0xe0] sm:$0xff] %vm576_vm1, %v1058_v46  ;;  %v1061_v50 = vadd.f32 %v997_v45, %v835_v47  ;;  %v827_v51 = vadd.f32 %v2549_v36, %v826_v48  ;;  %v1010_v48 = vld [vmem:[%s2544_s17 + $0x160] sm:$0xff] }
 0x118   : > { %v2125_v52 = vpop.f32.mrf.mxu0 }
 0x119   : > { %1125 = vst.msk [vmem:[%s2558_s22 + $0xf8] sm:$0xff] %vm576_vm1, %v1061_v50  ;;  %v1059_v54 = vadd.f32 %v995_v49, %v827_v51  ;;  %v848_v55 = vadd.f32 %v2125_v52, %v2549_v36  ;;  %v1173_v61 = vpack.c.bf16 %v1061_v50, %v1060_v41 }
 0x11a   : > { %v839_v56 = vpop.f32.mrf.mxu0 }
 0x11b   : > { %1123 = vst.msk [vmem:[%s2558_s22 + $0xe8] sm:$0xff] %vm576_vm1, %v1059_v54  ;;  %v1172_v58 = vpack.c.bf16 %v1059_v54, %v1058_v46  ;;  %v1064_v59 = vadd.f32 %v1000_v53, %v848_v55  ;;  %v840_v60 = vadd.f32 %v2549_v36, %v839_v56  ;;  %v1013_v54 = vld [vmem:[%s2544_s17 + $0x178] sm:$0xff] }
 0x11c   : > { %v2126_v62 = vpop.f32.mrf.mxu0 }
 0x11d   : > { %1128 = vst.msk [vmem:[%s2558_s22 + $0x110] sm:$0xff] %vm576_vm1, %v1064_v59  ;;  %v1062_v0 = vadd.f32 %v998_v57, %v840_v60  ;;  %v851_v1 = vadd.f32 %v2126_v62, %v2549_v36  ;;  %2185 = vmatprep.mubr.msk.bf16.mxu1 %vm576_vm1, %v1172_v58  ;;  %v1011_v58 = vld [vmem:[%s2544_s17 + $0x168] sm:$0xff]  ;;  %v1016_v62 = vld [vmem:[%s2544_s17 + $0x190] sm:$0xff] }
 0x11e   : > { %v842_v2 = vpop.f32.mrf.mxu0  ;;  %2186 = vmatmul.mubr.msk.bf16.gmra.mxu1 %vm576_vm1, %v1173_v61 }
 0x11f   : > { %1126 = vst.msk [vmem:[%s2558_s22 + $0x100] sm:$0xff] %vm576_vm1, %v1062_v0  ;;  %v1065_v4 = vadd.f32 %v1001_v63, %v851_v1  ;;  %v843_v5 = vadd.f32 %v2549_v36, %v842_v2  ;;  %v1014_v2 = vld [vmem:[%s2544_s17 + $0x180] sm:$0xff] }
 0x120   : > { %v2129_v6 = vpop.f32.mrf.mxu0 }
 0x121   : > { %1129 = vst.msk [vmem:[%s2558_s22 + $0x118] sm:$0xff] %vm576_vm1, %v1065_v4  ;;  %v1063_v8 = vadd.f32 %v999_v3, %v843_v5  ;;  %v864_v9 = vadd.f32 %v2129_v6, %v2549_v36  ;;  %v1175_v15 = vpack.c.bf16 %v1065_v4, %v1064_v59 }
 0x122   : > { %v855_v10 = vpop.f32.mrf.mxu0 }
 0x123   : > { %1127 = vst.msk [vmem:[%s2558_s22 + $0x108] sm:$0xff] %vm576_vm1, %v1063_v8  ;;  %v1174_v12 = vpack.c.bf16 %v1063_v8, %v1062_v0  ;;  %v1068_v13 = vadd.f32 %v1004_v7, %v864_v9  ;;  %v856_v14 = vadd.f32 %v2549_v36, %v855_v10  ;;  %v1017_v8 = vld [vmem:[%s2544_s17 + $0x198] sm:$0xff] }
 0x124   : > { %v2130_v16 = vpop.f32.mrf.mxu0 }
 0x125   : > { %1132 = vst.msk [vmem:[%s2558_s22 + $0x130] sm:$0xff] %vm576_vm1, %v1068_v13  ;;  %v1066_v18 = vadd.f32 %v1002_v11, %v856_v14  ;;  %v867_v19 = vadd.f32 %v2130_v16, %v2549_v36  ;;  %2189 = vmatprep.mubr.msk.bf16.mxu1 %vm576_vm1, %v1174_v12  ;;  %v1015_v12 = vld [vmem:[%s2544_s17 + $0x188] sm:$0xff]  ;;  %v1020_v16 = vld [vmem:[%s2544_s17 + $0x1b0] sm:$0xff] }
 0x126   : > { %v858_v20 = vpop.f32.mrf.mxu0  ;;  %2190 = vmatmul.mubr.msk.bf16.gmra.mxu1 %vm576_vm1, %v1175_v15 }
 0x127   : > { %1130 = vst.msk [vmem:[%s2558_s22 + $0x120] sm:$0xff] %vm576_vm1, %v1066_v18  ;;  %v1069_v22 = vadd.f32 %v1005_v17, %v867_v19  ;;  %v859_v23 = vadd.f32 %v2549_v36, %v858_v20  ;;  %v1018_v20 = vld [vmem:[%s2544_s17 + $0x1a0] sm:$0xff] }
 0x128   : > { %v2133_v24 = vpop.f32.mrf.mxu0 }
 0x129   : > { %1133 = vst.msk [vmem:[%s2558_s22 + $0x138] sm:$0xff] %vm576_vm1, %v1069_v22  ;;  %v1067_v26 = vadd.f32 %v1003_v21, %v859_v23  ;;  %v880_v27 = vadd.f32 %v2133_v24, %v2549_v36  ;;  %v1177_v33 = vpack.c.bf16 %v1069_v22, %v1068_v13 }
 0x12a   : > { %v871_v28 = vpop.f32.mrf.mxu0 }
 0x12b   : > { %1131 = vst.msk [vmem:[%s2558_s22 + $0x128] sm:$0xff] %vm576_vm1, %v1067_v26  ;;  %v1176_v30 = vpack.c.bf16 %v1067_v26, %v1066_v18  ;;  %v1072_v31 = vadd.f32 %v1008_v25, %v880_v27  ;;  %v872_v32 = vadd.f32 %v2549_v36, %v871_v28  ;;  %v1021_v26 = vld [vmem:[%s2544_s17 + $0x1b8] sm:$0xff] }
 0x12c   : > { %v2134_v34 = vpop.f32.mrf.mxu0 }
 0x12d   : > { %1136 = vst.msk [vmem:[%s2558_s22 + $0x150] sm:$0xff] %vm576_vm1, %v1072_v31  ;;  %v1070_v37 = vadd.f32 %v1006_v29, %v872_v32  ;;  %v883_v38 = vadd.f32 %v2134_v34, %v2549_v36  ;;  %2193 = vmatprep.mubr.msk.bf16.mxu1 %vm576_vm1, %v1176_v30  ;;  %v1019_v30 = vld [vmem:[%s2544_s17 + $0x1a8] sm:$0xff]  ;;  %v1024_v34 = vld [vmem:[%s2544_s17 + $0x1d0] sm:$0xff] }
 0x12e   : > { %v874_v39 = vpop.f32.mrf.mxu0  ;;  %2194 = vmatmul.mubr.msk.bf16.gmra.mxu1 %vm576_vm1, %v1177_v33 }
 0x12f   : > { %1134 = vst.msk [vmem:[%s2558_s22 + $0x140] sm:$0xff] %vm576_vm1, %v1070_v37  ;;  %v1073_v41 = vadd.f32 %v1009_v35, %v883_v38  ;;  %v875_v42 = vadd.f32 %v2549_v36, %v874_v39  ;;  %v1022_v39 = vld [vmem:[%s2544_s17 + $0x1c0] sm:$0xff] }
 0x130   : > { %v2137_v43 = vpop.f32.mrf.mxu0 }
 0x131   : > { %1137 = vst.msk [vmem:[%s2558_s22 + $0x158] sm:$0xff] %vm576_vm1, %v1073_v41  ;;  %v1071_v45 = vadd.f32 %v1007_v40, %v875_v42  ;;  %v896_v46 = vadd.f32 %v2137_v43, %v2549_v36  ;;  %v1179_v52 = vpack.c.bf16 %v1073_v41, %v1072_v31 }
 0x132   : > { %v887_v47 = vpop.f32.mrf.mxu0 }
 0x133   : > { %1135 = vst.msk [vmem:[%s2558_s22 + $0x148] sm:$0xff] %vm576_vm1, %v1071_v45  ;;  %v1178_v49 = vpack.c.bf16 %v1071_v45, %v1070_v37  ;;  %v1076_v50 = vadd.f32 %v1012_v44, %v896_v46  ;;  %v888_v51 = vadd.f32 %v2549_v36, %v887_v47  ;;  %v1025_v45 = vld [vmem:[%s2544_s17 + $0x1d8] sm:$0xff] }
 0x134   : > { %v2138_v53 = vpop.f32.mrf.mxu0 }
 0x135   : > { %1140 = vst.msk [vmem:[%s2558_s22 + $0x170] sm:$0xff] %vm576_vm1, %v1076_v50  ;;  %v1074_v55 = vadd.f32 %v1010_v48, %v888_v51  ;;  %v899_v56 = vadd.f32 %v2138_v53, %v2549_v36  ;;  %2197 = vmatprep.mubr.msk.bf16.mxu1 %vm576_vm1, %v1178_v49  ;;  %v1023_v49 = vld [vmem:[%s2544_s17 + $0x1c8] sm:$0xff]  ;;  %v1028_v53 = vld [vmem:[%s2544_s17 + $0x1f0] sm:$0xff] }
 0x136   : > { %v890_v57 = vpop.f32.mrf.mxu0  ;;  %2198 = vmatmul.mubr.msk.bf16.gmra.mxu1 %vm576_vm1, %v1179_v52 }
 0x137   : > { %1138 = vst.msk [vmem:[%s2558_s22 + $0x160] sm:$0xff] %vm576_vm1, %v1074_v55  ;;  %v1077_v59 = vadd.f32 %v1013_v54, %v899_v56  ;;  %v891_v60 = vadd.f32 %v2549_v36, %v890_v57  ;;  %v1026_v57 = vld [vmem:[%s2544_s17 + $0x1e0] sm:$0xff] }
 0x138   : > { %v2141_v61 = vpop.f32.mrf.mxu0 }
 0x139   : > { %1141 = vst.msk [vmem:[%s2558_s22 + $0x178] sm:$0xff] %vm576_vm1, %v1077_v59  ;;  %v1075_v63 = vadd.f32 %v1011_v58, %v891_v60  ;;  %v912_v0 = vadd.f32 %v2141_v61, %v2549_v36  ;;  %v1181_v6 = vpack.c.bf16 %v1077_v59, %v1076_v50 }
 0x13a   : > { %v903_v1 = vpop.f32.mrf.mxu0 }
 0x13b   : > { %1139 = vst.msk [vmem:[%s2558_s22 + $0x168] sm:$0xff] %vm576_vm1, %v1075_v63  ;;  %v1180_v3 = vpack.c.bf16 %v1075_v63, %v1074_v55  ;;  %v1080_v4 = vadd.f32 %v1016_v62, %v912_v0  ;;  %v904_v5 = vadd.f32 %v2549_v36, %v903_v1  ;;  %v1029_v63 = vld [vmem:[%s2544_s17 + $0x1f8] sm:$0xff] }
 0x13c   : > { %v2142_v7 = vpop.f32.mrf.mxu0 }
 0x13d   : > { %1144 = vst.msk [vmem:[%s2558_s22 + $0x190] sm:$0xff] %vm576_vm1, %v1080_v4  ;;  %v1078_v9 = vadd.f32 %v1014_v2, %v904_v5  ;;  %v915_v10 = vadd.f32 %v2142_v7, %v2549_v36  ;;  %2201 = vmatprep.mubr.msk.bf16.mxu1 %vm576_vm1, %v1180_v3  ;;  %v1027_v3 = vld [vmem:[%s2544_s17 + $0x1e8] sm:$0xff] }
 0x13e   : > { %v906_v11 = vpop.f32.mrf.mxu0  ;;  %2202 = vmatmul.mubr.msk.bf16.gmra.mxu1 %vm576_vm1, %v1181_v6 }
 0x13f   : > { %1142 = vst.msk [vmem:[%s2558_s22 + $0x180] sm:$0xff] %vm576_vm1, %v1078_v9  ;;  %v1081_v13 = vadd.f32 %v1017_v8, %v915_v10  ;;  %v907_v14 = vadd.f32 %v2549_v36, %v906_v11  ;;  %v2858_v10 = vld [vmem:[%s3173_s6] ss:$0 sm:$0xff] }
 0x140   : > { %v2145_v15 = vpop.f32.mrf.mxu0 }
 0x141   : > { %1145 = vst.msk [vmem:[%s2558_s22 + $0x198] sm:$0xff] %vm576_vm1, %v1081_v13  ;;  %v1079_v17 = vadd.f32 %v1015_v12, %v907_v14  ;;  %v928_v18 = vadd.f32 %v2145_v15, %v2549_v36  ;;  %v1183_v24 = vpack.c.bf16 %v1081_v13, %v1080_v4 }
 0x142   : > { %v919_v19 = vpop.f32.mrf.mxu0 }
 0x143   : > { %1143 = vst.msk [vmem:[%s2558_s22 + $0x188] sm:$0xff] %vm576_vm1, %v1079_v17  ;;  %v1182_v21 = vpack.c.bf16 %v1079_v17, %v1078_v9  ;;  %v1084_v22 = vadd.f32 %v1020_v16, %v928_v18  ;;  %v920_v23 = vadd.f32 %v2549_v36, %v919_v19  ;;  %v2846_v9 = vld [vmem:[%s3172_s5] ss:$0 sm:$0xff] }
 0x144   : > { %v2146_v25 = vpop.f32.mrf.mxu0 }
 0x145   : > { %1148 = vst.msk [vmem:[%s2558_s22 + $0x1b0] sm:$0xff] %vm576_vm1, %v1084_v22  ;;  %v1082_v27 = vadd.f32 %v1018_v20, %v920_v23  ;;  %v931_v28 = vadd.f32 %v2146_v25, %v2549_v36  ;;  %2205 = vmatprep.mubr.msk.bf16.mxu1 %vm576_vm1, %v1182_v21 }
 0x146   : > { %v922_v29 = vpop.f32.mrf.mxu0  ;;  %2206 = vmatmul.mubr.msk.bf16.gmra.mxu1 %vm576_vm1, %v1183_v24 }
 0x147   : > { %1146 = vst.msk [vmem:[%s2558_s22 + $0x1a0] sm:$0xff] %vm576_vm1, %v1082_v27  ;;  %v1085_v31 = vadd.f32 %v1021_v26, %v931_v28  ;;  %v923_v32 = vadd.f32 %v2549_v36, %v922_v29 }
 0x148   : > { %v2149_v33 = vpop.f32.mrf.mxu0 }
 0x149   : > { %1149 = vst.msk [vmem:[%s2558_s22 + $0x1b8] sm:$0xff] %vm576_vm1, %v1085_v31  ;;  %v1083_v35 = vadd.f32 %v1019_v30, %v923_v32  ;;  %v944_v37 = vadd.f32 %v2149_v33, %v2549_v36  ;;  %v1185_v43 = vpack.c.bf16 %v1085_v31, %v1084_v22 }
 0x14a   : > { %v935_v38 = vpop.f32.mrf.mxu0 }
 0x14b   : > { %1147 = vst.msk [vmem:[%s2558_s22 + $0x1a8] sm:$0xff] %vm576_vm1, %v1083_v35  ;;  %v1184_v40 = vpack.c.bf16 %v1083_v35, %v1082_v27  ;;  %v1088_v41 = vadd.f32 %v1024_v34, %v944_v37  ;;  %v936_v42 = vadd.f32 %v2549_v36, %v935_v38 }
 0x14c   : > { %v2150_v44 = vpop.f32.mrf.mxu0 }
 0x14d   : > { %1152 = vst.msk [vmem:[%s2558_s22 + $0x1d0] sm:$0xff] %vm576_vm1, %v1088_v41  ;;  %v1086_v46 = vadd.f32 %v1022_v39, %v936_v42  ;;  %v947_v47 = vadd.f32 %v2150_v44, %v2549_v36  ;;  %2209 = vmatprep.mubr.msk.bf16.mxu1 %vm576_vm1, %v1184_v40 }
 0x14e   : > { %v938_v48 = vpop.f32.mrf.mxu0  ;;  %2210 = vmatmul.mubr.msk.bf16.gmra.mxu1 %vm576_vm1, %v1185_v43 }
 0x14f   : > { %1150 = vst.msk [vmem:[%s2558_s22 + $0x1c0] sm:$0xff] %vm576_vm1, %v1086_v46  ;;  %v1089_v50 = vadd.f32 %v1025_v45, %v947_v47  ;;  %v939_v51 = vadd.f32 %v2549_v36, %v938_v48 }
 0x150   : > { %v2153_v52 = vpop.f32.mrf.mxu0 }
 0x151   : > { %1153 = vst.msk [vmem:[%s2558_s22 + $0x1d8] sm:$0xff] %vm576_vm1, %v1089_v50  ;;  %v1087_v54 = vadd.f32 %v1023_v49, %v939_v51  ;;  %v960_v55 = vadd.f32 %v2153_v52, %v2549_v36  ;;  %v1187_v61 = vpack.c.bf16 %v1089_v50, %v1088_v41 }
 0x152   : > { %v951_v56 = vpop.f32.mrf.mxu0 }
 0x153   : > { %1151 = vst.msk [vmem:[%s2558_s22 + $0x1c8] sm:$0xff] %vm576_vm1, %v1087_v54  ;;  %v1186_v58 = vpack.c.bf16 %v1087_v54, %v1086_v46  ;;  %v1092_v59 = vadd.f32 %v1028_v53, %v960_v55  ;;  %v952_v60 = vadd.f32 %v2549_v36, %v951_v56 }
 0x154   : > { %v2154_v62 = vpop.f32.mrf.mxu0 }
 0x155   : > { %1156 = vst.msk [vmem:[%s2558_s22 + $0x1f0] sm:$0xff] %vm576_vm1, %v1092_v59  ;;  %v1090_v0 = vadd.f32 %v1026_v57, %v952_v60  ;;  %v963_v1 = vadd.f32 %v2154_v62, %v2549_v36  ;;  %2213 = vmatprep.mubr.msk.bf16.mxu1 %vm576_vm1, %v1186_v58 }
 0x156   : > { %v954_v2 = vpop.f32.mrf.mxu0  ;;  %2214 = vmatmul.mubr.msk.bf16.gmra.mxu1 %vm576_vm1, %v1187_v61 }
 0x157   : > { %1154 = vst.msk [vmem:[%s2558_s22 + $0x1e0] sm:$0xff] %vm576_vm1, %v1090_v0  ;;  %v1093_v4 = vadd.f32 %v1029_v63, %v963_v1  ;;  %v955_v5 = vadd.f32 %v2549_v36, %v954_v2 }
 0x159   : > { %1157 = vst.msk [vmem:[%s2558_s22 + $0x1f8] sm:$0xff] %vm576_vm1, %v1093_v4  ;;  %v1091_v6 = vadd.f32 %v1027_v3, %v955_v5  ;;  %v1189_v8 = vpack.c.bf16 %v1093_v4, %v1092_v59 }
 0x15b   : > { %1155 = vst.msk [vmem:[%s2558_s22 + $0x1e8] sm:$0xff] %vm576_vm1, %v1091_v6  ;;  %v1188_v7 = vpack.c.bf16 %v1091_v6, %v1090_v0  ;;  %s2358_s22 = smov [#allocation2]  }
 0x15c   : > { %s2300_s25 = sshll.u32 %s2358_s22, 4  ;;  %s2301_s25 = int_to_ptr.vmem [resolvable:$false] %s2300_s25 }
 0x15d   : > { %2217 = vmatprep.mubr.msk.bf16.mxu1 %vm576_vm1, %v1188_v7  ;;  %s2302_s12 = scalar_lea.vmem %s2301_s25, 16384  ;;  %p2303_p0 = scmp.lt.s32.totalorder %s2870_s21, %s2301_s25 }
 0x15e   : > { %2218 = vmatmul.mubr.msk.bf16.gmra.mxu1 %vm576_vm1, %v1189_v8  ;;  %p2304_p1 = scmp.lt.s32.totalorder %s2302_s12, %s2296_s26 }
 0x160   : > { %p2305_p2 = por %p2304_p1, %p2303_p0 }
 0x162   : > { %p2306_p3 = pnand %p2305_p2, %p2299_p13 }
 0x1a6   : > { %v2159_v36 = vpop.f32.mrf.mxu1 }
 0x1a7   : > { %v1588_v11 = vmul.f32 %v2159_v36, %v2846_v9 }
 0x1a8   : > { %v1324_v12 = vpop.f32.mrf.mxu1 }
 0x1a9   : > { %v1659_v13 = vadd.f32 %v2858_v10, %v1588_v11  ;;  %v1586_v14 = vmul.f32 %v2846_v9, %v1324_v12 }
 0x1aa   : > { %v2160_v15 = vpop.f32.mrf.mxu1 }
 0x1ab   : > { %1723 = vst.msk [vmem:[%s2853_s13 + $0x10] sm:$0xff] %vm576_vm1, %v1659_v13  ;;  %v1657_v16 = vadd.f32 %v2858_v10, %v1586_v14  ;;  %v1589_v17 = vmul.f32 %v2160_v15, %v2846_v9 }
 0x1ac   : > { %2309 = shalt.err (!%p2306_p3)
}
 0x1ad   : > { %s2310_s10 = scalar_lea.hbm %s2866_s24, 8192  ;;  %s2314_s20 = scalar_lea.hbm %s3174_s7, 32768 }
 0x1ae   : > { %p2311_p4 = scmp.ne.s32.totalorder %s2866_s24, %s2310_s10  ;;  %p2315_p9 = scmp.lt.s32.totalorder %s2866_s24, %s3174_s7 }
 0x1af   : > { %p2316_p10 = scmp.lt.s32.totalorder %s2314_s20, %s2310_s10 }
 0x1b0   : > { %p2312_p7 = pnand %p2311_p4, %p2444_p5 }
 0x1b1   : > { %p2317_p11 = por %p2316_p10, %p2315_p9 }
 0x1b2   : > { %p2313_p8 = pneg %p2312_p7 }
 0x1b4   : > { %p2318_p12 = pnand %p2317_p11, %p2313_p8 }
 0x1b6   : > { %2321 = shalt.err (!%p2318_p12)
}
 0x1b7   : > { %s2359_s26 = smov 128   ;;  %s2360_s22 = smov 8   ;;  %v1327_v18 = vpop.f32.mrf.mxu1  ;;  %1721 = vst.msk [vmem:[%s2853_s13] sm:$0xff] %vm576_vm1, %v1657_v16  ;;  %v1660_v19 = vadd.f32 %v2858_v10, %v1589_v17 }
 0x1b8   : > { %2223 = dma.vmem_to_hbm [thread:$0]  (%p2444_p5), %s2870_s21, 8192, %s2866_s24, %s2878_s9, %s2359_s26, %s2359_s26, %s2360_s22   ;;  %v1587_v20 = vmul.f32 %v2846_v9, %v1327_v18 }
 0x1b9   : > { %v2163_v21 = vpop.f32.mrf.mxu1  ;;  %1724 = vst.msk [vmem:[%s2853_s13 + $0x18] sm:$0xff] %vm576_vm1, %v1660_v19 }
 0x1ba   : > { %v1658_v22 = vadd.f32 %v2858_v10, %v1587_v20  ;;  %v1592_v23 = vmul.f32 %v2163_v21, %v2846_v9 }
 0x1bb   : > { %v1340_v24 = vpop.f32.mrf.mxu1 }
 0x1bc   : > { %1722 = vst.msk [vmem:[%s2853_s13 + $0x8] sm:$0xff] %vm576_vm1, %v1658_v22  ;;  %v1663_v25 = vadd.f32 %v2858_v10, %v1592_v23  ;;  %v1590_v26 = vmul.f32 %v2846_v9, %v1340_v24 }
 0x1bd   : > { %v2164_v27 = vpop.f32.mrf.mxu1 }
 0x1be   : > { %1727 = vst.msk [vmem:[%s2853_s13 + $0x30] sm:$0xff] %vm576_vm1, %v1663_v25  ;;  %v1661_v28 = vadd.f32 %v2858_v10, %v1590_v26  ;;  %v1593_v29 = vmul.f32 %v2164_v27, %v2846_v9 }
 0x1bf   : > { %v1343_v30 = vpop.f32.mrf.mxu1 }
 0x1c0   : > { %1725 = vst.msk [vmem:[%s2853_s13 + $0x20] sm:$0xff] %vm576_vm1, %v1661_v28  ;;  %v1664_v31 = vadd.f32 %v2858_v10, %v1593_v29  ;;  %v1591_v32 = vmul.f32 %v2846_v9, %v1343_v30 }
 0x1c1   : > { %v2167_v33 = vpop.f32.mrf.mxu1 }
 0x1c2   : > { %1728 = vst.msk [vmem:[%s2853_s13 + $0x38] sm:$0xff] %vm576_vm1, %v1664_v31  ;;  %v1662_v34 = vadd.f32 %v2858_v10, %v1591_v32  ;;  %v1596_v35 = vmul.f32 %v2167_v33, %v2846_v9 }
 0x1c3   : > { %v1356_v37 = vpop.f32.mrf.mxu1 }
 0x1c4   : > { %1726 = vst.msk [vmem:[%s2853_s13 + $0x28] sm:$0xff] %vm576_vm1, %v1662_v34  ;;  %v1667_v38 = vadd.f32 %v2858_v10, %v1596_v35  ;;  %v1594_v39 = vmul.f32 %v2846_v9, %v1356_v37 }
 0x1c5   : > { %v2168_v40 = vpop.f32.mrf.mxu1 }
 0x1c6   : > { %1731 = vst.msk [vmem:[%s2853_s13 + $0x50] sm:$0xff] %vm576_vm1, %v1667_v38  ;;  %v1665_v41 = vadd.f32 %v2858_v10, %v1594_v39  ;;  %v1597_v42 = vmul.f32 %v2168_v40, %v2846_v9 }
 0x1c7   : > { %v1359_v43 = vpop.f32.mrf.mxu1 }
 0x1c8   : > { %1729 = vst.msk [vmem:[%s2853_s13 + $0x40] sm:$0xff] %vm576_vm1, %v1665_v41  ;;  %v1668_v44 = vadd.f32 %v2858_v10, %v1597_v42  ;;  %v1595_v45 = vmul.f32 %v2846_v9, %v1359_v43 }
 0x1c9   : > { %v2171_v46 = vpop.f32.mrf.mxu1 }
 0x1ca   : > { %1732 = vst.msk [vmem:[%s2853_s13 + $0x58] sm:$0xff] %vm576_vm1, %v1668_v44  ;;  %v1666_v47 = vadd.f32 %v2858_v10, %v1595_v45  ;;  %v1600_v48 = vmul.f32 %v2171_v46, %v2846_v9 }
 0x1cb   : > { %v1372_v49 = vpop.f32.mrf.mxu1 }
 0x1cc   : > { %1730 = vst.msk [vmem:[%s2853_s13 + $0x48] sm:$0xff] %vm576_vm1, %v1666_v47  ;;  %v1671_v50 = vadd.f32 %v2858_v10, %v1600_v48  ;;  %v1598_v51 = vmul.f32 %v2846_v9, %v1372_v49 }
 0x1cd   : > { %v2172_v52 = vpop.f32.mrf.mxu1 }
 0x1ce   : > { %1735 = vst.msk [vmem:[%s2853_s13 + $0x70] sm:$0xff] %vm576_vm1, %v1671_v50  ;;  %v1669_v53 = vadd.f32 %v2858_v10, %v1598_v51  ;;  %v1601_v54 = vmul.f32 %v2172_v52, %v2846_v9 }
 0x1cf   : > { %v1375_v55 = vpop.f32.mrf.mxu1 }
 0x1d0   : > { %1733 = vst.msk [vmem:[%s2853_s13 + $0x60] sm:$0xff] %vm576_vm1, %v1669_v53  ;;  %v1672_v56 = vadd.f32 %v2858_v10, %v1601_v54  ;;  %v1599_v57 = vmul.f32 %v2846_v9, %v1375_v55 }
 0x1d1   : > { %v2175_v58 = vpop.f32.mrf.mxu1 }
 0x1d2   : > { %1736 = vst.msk [vmem:[%s2853_s13 + $0x78] sm:$0xff] %vm576_vm1, %v1672_v56  ;;  %v1670_v59 = vadd.f32 %v2858_v10, %v1599_v57  ;;  %v1604_v60 = vmul.f32 %v2175_v58, %v2846_v9 }
 0x1d3   : > { %v1388_v61 = vpop.f32.mrf.mxu1 }
 0x1d4   : > { %1734 = vst.msk [vmem:[%s2853_s13 + $0x68] sm:$0xff] %vm576_vm1, %v1670_v59  ;;  %v1675_v62 = vadd.f32 %v2858_v10, %v1604_v60  ;;  %v1602_v63 = vmul.f32 %v2846_v9, %v1388_v61 }
 0x1d5   : > { %v2176_v0 = vpop.f32.mrf.mxu1 }
 0x1d6   : > { %1739 = vst.msk [vmem:[%s2853_s13 + $0x90] sm:$0xff] %vm576_vm1, %v1675_v62  ;;  %v1673_v1 = vadd.f32 %v2858_v10, %v1602_v63  ;;  %v1605_v2 = vmul.f32 %v2176_v0, %v2846_v9 }
 0x1d7   : > { %v1391_v3 = vpop.f32.mrf.mxu1 }
 0x1d8   : > { %1737 = vst.msk [vmem:[%s2853_s13 + $0x80] sm:$0xff] %vm576_vm1, %v1673_v1  ;;  %v1676_v4 = vadd.f32 %v2858_v10, %v1605_v2  ;;  %v1603_v5 = vmul.f32 %v2846_v9, %v1391_v3 }
 0x1d9   : > { %v2179_v6 = vpop.f32.mrf.mxu1 }
 0x1da   : > { %1740 = vst.msk [vmem:[%s2853_s13 + $0x98] sm:$0xff] %vm576_vm1, %v1676_v4  ;;  %v1674_v7 = vadd.f32 %v2858_v10, %v1603_v5  ;;  %v1608_v8 = vmul.f32 %v2179_v6, %v2846_v9 }
 0x1db   : > { %v1404_v36 = vpop.f32.mrf.mxu1 }
 0x1dc   : > { %1738 = vst.msk [vmem:[%s2853_s13 + $0x88] sm:$0xff] %vm576_vm1, %v1674_v7  ;;  %v1679_v11 = vadd.f32 %v2858_v10, %v1608_v8  ;;  %v1606_v12 = vmul.f32 %v2846_v9, %v1404_v36 }
 0x1dd   : > { %v2180_v13 = vpop.f32.mrf.mxu1 }
 0x1de   : > { %1743 = vst.msk [vmem:[%s2853_s13 + $0xb0] sm:$0xff] %vm576_vm1, %v1679_v11  ;;  %v1677_v14 = vadd.f32 %v2858_v10, %v1606_v12  ;;  %v1609_v15 = vmul.f32 %v2180_v13, %v2846_v9 }
 0x1df   : > { %v1407_v16 = vpop.f32.mrf.mxu1 }
 0x1e0   : > { %1741 = vst.msk [vmem:[%s2853_s13 + $0xa0] sm:$0xff] %vm576_vm1, %v1677_v14  ;;  %v1680_v17 = vadd.f32 %v2858_v10, %v1609_v15  ;;  %v1607_v18 = vmul.f32 %v2846_v9, %v1407_v16 }
 0x1e1   : > { %v2183_v19 = vpop.f32.mrf.mxu1 }
 0x1e2   : > { %1744 = vst.msk [vmem:[%s2853_s13 + $0xb8] sm:$0xff] %vm576_vm1, %v1680_v17  ;;  %v1678_v20 = vadd.f32 %v2858_v10, %v1607_v18  ;;  %v1612_v21 = vmul.f32 %v2183_v19, %v2846_v9 }
 0x1e3   : > { %v1420_v22 = vpop.f32.mrf.mxu1 }
 0x1e4   : > { %1742 = vst.msk [vmem:[%s2853_s13 + $0xa8] sm:$0xff] %vm576_vm1, %v1678_v20  ;;  %v1683_v23 = vadd.f32 %v2858_v10, %v1612_v21  ;;  %v1610_v24 = vmul.f32 %v2846_v9, %v1420_v22 }
 0x1e5   : > { %v2184_v25 = vpop.f32.mrf.mxu1 }
 0x1e6   : > { %1747 = vst.msk [vmem:[%s2853_s13 + $0xd0] sm:$0xff] %vm576_vm1, %v1683_v23  ;;  %v1681_v26 = vadd.f32 %v2858_v10, %v1610_v24  ;;  %v1613_v27 = vmul.f32 %v2184_v25, %v2846_v9 }
 0x1e7   : > { %v1423_v28 = vpop.f32.mrf.mxu1 }
 0x1e8   : > { %1745 = vst.msk [vmem:[%s2853_s13 + $0xc0] sm:$0xff] %vm576_vm1, %v1681_v26  ;;  %v1684_v29 = vadd.f32 %v2858_v10, %v1613_v27  ;;  %v1611_v30 = vmul.f32 %v2846_v9, %v1423_v28 }
 0x1e9   : > { %v2187_v31 = vpop.f32.mrf.mxu1 }
 0x1ea   : > { %1748 = vst.msk [vmem:[%s2853_s13 + $0xd8] sm:$0xff] %vm576_vm1, %v1684_v29  ;;  %v1682_v32 = vadd.f32 %v2858_v10, %v1611_v30  ;;  %v1616_v33 = vmul.f32 %v2187_v31, %v2846_v9 }
 0x1eb   : > { %v1436_v34 = vpop.f32.mrf.mxu1 }
 0x1ec   : > { %1746 = vst.msk [vmem:[%s2853_s13 + $0xc8] sm:$0xff] %vm576_vm1, %v1682_v32  ;;  %v1687_v35 = vadd.f32 %v2858_v10, %v1616_v33  ;;  %v1614_v37 = vmul.f32 %v2846_v9, %v1436_v34 }
 0x1ed   : > { %v2188_v38 = vpop.f32.mrf.mxu1 }
 0x1ee   : > { %1751 = vst.msk [vmem:[%s2853_s13 + $0xf0] sm:$0xff] %vm576_vm1, %v1687_v35  ;;  %v1685_v39 = vadd.f32 %v2858_v10, %v1614_v37  ;;  %v1617_v40 = vmul.f32 %v2188_v38, %v2846_v9 }
 0x1ef   : > { %v1439_v41 = vpop.f32.mrf.mxu1 }
 0x1f0   : > { %1749 = vst.msk [vmem:[%s2853_s13 + $0xe0] sm:$0xff] %vm576_vm1, %v1685_v39  ;;  %v1688_v42 = vadd.f32 %v2858_v10, %v1617_v40  ;;  %v1615_v43 = vmul.f32 %v2846_v9, %v1439_v41 }
 0x1f1   : > { %v2191_v44 = vpop.f32.mrf.mxu1 }
 0x1f2   : > { %1752 = vst.msk [vmem:[%s2853_s13 + $0xf8] sm:$0xff] %vm576_vm1, %v1688_v42  ;;  %v1686_v45 = vadd.f32 %v2858_v10, %v1615_v43  ;;  %v1620_v46 = vmul.f32 %v2191_v44, %v2846_v9 }
 0x1f3   : > { %v1452_v47 = vpop.f32.mrf.mxu1 }
 0x1f4   : > { %1750 = vst.msk [vmem:[%s2853_s13 + $0xe8] sm:$0xff] %vm576_vm1, %v1686_v45  ;;  %v1691_v48 = vadd.f32 %v2858_v10, %v1620_v46  ;;  %v1618_v49 = vmul.f32 %v2846_v9, %v1452_v47 }
 0x1f5   : > { %v2192_v50 = vpop.f32.mrf.mxu1 }
 0x1f6   : > { %1755 = vst.msk [vmem:[%s2853_s13 + $0x110] sm:$0xff] %vm576_vm1, %v1691_v48  ;;  %v1689_v51 = vadd.f32 %v2858_v10, %v1618_v49  ;;  %v1621_v52 = vmul.f32 %v2192_v50, %v2846_v9 }
 0x1f7   : > { %v1455_v53 = vpop.f32.mrf.mxu1 }
 0x1f8   : > { %1753 = vst.msk [vmem:[%s2853_s13 + $0x100] sm:$0xff] %vm576_vm1, %v1689_v51  ;;  %v1692_v54 = vadd.f32 %v2858_v10, %v1621_v52  ;;  %v1619_v55 = vmul.f32 %v2846_v9, %v1455_v53 }
 0x1f9   : > { %v2195_v56 = vpop.f32.mrf.mxu1 }
 0x1fa   : > { %1756 = vst.msk [vmem:[%s2853_s13 + $0x118] sm:$0xff] %vm576_vm1, %v1692_v54  ;;  %v1690_v57 = vadd.f32 %v2858_v10, %v1619_v55  ;;  %v1624_v58 = vmul.f32 %v2195_v56, %v2846_v9 }
 0x1fb   : > { %v1468_v59 = vpop.f32.mrf.mxu1 }
 0x1fc   : > { %1754 = vst.msk [vmem:[%s2853_s13 + $0x108] sm:$0xff] %vm576_vm1, %v1690_v57  ;;  %v1695_v60 = vadd.f32 %v2858_v10, %v1624_v58  ;;  %v1622_v61 = vmul.f32 %v2846_v9, %v1468_v59 }
 0x1fd   : > { %v2196_v62 = vpop.f32.mrf.mxu1 }
 0x1fe   : > { %1759 = vst.msk [vmem:[%s2853_s13 + $0x130] sm:$0xff] %vm576_vm1, %v1695_v60  ;;  %v1693_v63 = vadd.f32 %v2858_v10, %v1622_v61  ;;  %v1625_v0 = vmul.f32 %v2196_v62, %v2846_v9 }
 0x1ff   : > { %v1471_v1 = vpop.f32.mrf.mxu1 }
 0x200   : > { %1757 = vst.msk [vmem:[%s2853_s13 + $0x120] sm:$0xff] %vm576_vm1, %v1693_v63  ;;  %v1696_v2 = vadd.f32 %v2858_v10, %v1625_v0  ;;  %v1623_v3 = vmul.f32 %v2846_v9, %v1471_v1 }
 0x201   : > { %v2199_v4 = vpop.f32.mrf.mxu1 }
 0x202   : > { %1760 = vst.msk [vmem:[%s2853_s13 + $0x138] sm:$0xff] %vm576_vm1, %v1696_v2  ;;  %v1694_v5 = vadd.f32 %v2858_v10, %v1623_v3  ;;  %v1628_v6 = vmul.f32 %v2199_v4, %v2846_v9 }
 0x203   : > { %v1484_v7 = vpop.f32.mrf.mxu1 }
 0x204   : > { %1758 = vst.msk [vmem:[%s2853_s13 + $0x128] sm:$0xff] %vm576_vm1, %v1694_v5  ;;  %v1699_v8 = vadd.f32 %v2858_v10, %v1628_v6  ;;  %v1626_v36 = vmul.f32 %v2846_v9, %v1484_v7 }
 0x205   : > { %v2200_v11 = vpop.f32.mrf.mxu1 }
 0x206   : > { %1763 = vst.msk [vmem:[%s2853_s13 + $0x150] sm:$0xff] %vm576_vm1, %v1699_v8  ;;  %v1697_v12 = vadd.f32 %v2858_v10, %v1626_v36  ;;  %v1629_v13 = vmul.f32 %v2200_v11, %v2846_v9 }
 0x207   : > { %v1487_v14 = vpop.f32.mrf.mxu1 }
 0x208   : > { %1761 = vst.msk [vmem:[%s2853_s13 + $0x140] sm:$0xff] %vm576_vm1, %v1697_v12  ;;  %v1700_v15 = vadd.f32 %v2858_v10, %v1629_v13  ;;  %v1627_v16 = vmul.f32 %v2846_v9, %v1487_v14 }
 0x209   : > { %v2203_v17 = vpop.f32.mrf.mxu1 }
 0x20a   : > { %1764 = vst.msk [vmem:[%s2853_s13 + $0x158] sm:$0xff] %vm576_vm1, %v1700_v15  ;;  %v1698_v18 = vadd.f32 %v2858_v10, %v1627_v16  ;;  %v1632_v19 = vmul.f32 %v2203_v17, %v2846_v9 }
 0x20b   : > { %v1500_v20 = vpop.f32.mrf.mxu1 }
 0x20c   : > { %1762 = vst.msk [vmem:[%s2853_s13 + $0x148] sm:$0xff] %vm576_vm1, %v1698_v18  ;;  %v1703_v21 = vadd.f32 %v2858_v10, %v1632_v19  ;;  %v1630_v22 = vmul.f32 %v2846_v9, %v1500_v20 }
 0x20d   : > { %v2204_v23 = vpop.f32.mrf.mxu1 }
 0x20e   : > { %1767 = vst.msk [vmem:[%s2853_s13 + $0x170] sm:$0xff] %vm576_vm1, %v1703_v21  ;;  %v1701_v24 = vadd.f32 %v2858_v10, %v1630_v22  ;;  %v1633_v25 = vmul.f32 %v2204_v23, %v2846_v9 }
 0x20f   : > { %v1503_v26 = vpop.f32.mrf.mxu1 }
 0x210   : > { %1765 = vst.msk [vmem:[%s2853_s13 + $0x160] sm:$0xff] %vm576_vm1, %v1701_v24  ;;  %v1704_v27 = vadd.f32 %v2858_v10, %v1633_v25  ;;  %v1631_v28 = vmul.f32 %v2846_v9, %v1503_v26 }
 0x211   : > { %v2207_v29 = vpop.f32.mrf.mxu1 }
 0x212   : > { %1768 = vst.msk [vmem:[%s2853_s13 + $0x178] sm:$0xff] %vm576_vm1, %v1704_v27  ;;  %v1702_v30 = vadd.f32 %v2858_v10, %v1631_v28  ;;  %v1636_v31 = vmul.f32 %v2207_v29, %v2846_v9 }
 0x213   : > { %v1516_v32 = vpop.f32.mrf.mxu1 }
 0x214   : > { %1766 = vst.msk [vmem:[%s2853_s13 + $0x168] sm:$0xff] %vm576_vm1, %v1702_v30  ;;  %v1707_v33 = vadd.f32 %v2858_v10, %v1636_v31  ;;  %v1634_v34 = vmul.f32 %v2846_v9, %v1516_v32 }
 0x215   : > { %v2208_v35 = vpop.f32.mrf.mxu1 }
 0x216   : > { %1771 = vst.msk [vmem:[%s2853_s13 + $0x190] sm:$0xff] %vm576_vm1, %v1707_v33  ;;  %v1705_v37 = vadd.f32 %v2858_v10, %v1634_v34  ;;  %v1637_v38 = vmul.f32 %v2208_v35, %v2846_v9 }
 0x217   : > { %v1519_v39 = vpop.f32.mrf.mxu1 }
 0x218   : > { %1769 = vst.msk [vmem:[%s2853_s13 + $0x180] sm:$0xff] %vm576_vm1, %v1705_v37  ;;  %v1708_v40 = vadd.f32 %v2858_v10, %v1637_v38  ;;  %v1635_v41 = vmul.f32 %v2846_v9, %v1519_v39 }
 0x219   : > { %v2211_v42 = vpop.f32.mrf.mxu1 }
 0x21a   : > { %1772 = vst.msk [vmem:[%s2853_s13 + $0x198] sm:$0xff] %vm576_vm1, %v1708_v40  ;;  %v1706_v43 = vadd.f32 %v2858_v10, %v1635_v41  ;;  %v1640_v44 = vmul.f32 %v2211_v42, %v2846_v9 }
 0x21b   : > { %v1532_v45 = vpop.f32.mrf.mxu1 }
 0x21c   : > { %1770 = vst.msk [vmem:[%s2853_s13 + $0x188] sm:$0xff] %vm576_vm1, %v1706_v43  ;;  %v1711_v46 = vadd.f32 %v2858_v10, %v1640_v44  ;;  %v1638_v47 = vmul.f32 %v2846_v9, %v1532_v45 }
 0x21d   : > { %v2212_v48 = vpop.f32.mrf.mxu1 }
 0x21e   : > { %1775 = vst.msk [vmem:[%s2853_s13 + $0x1b0] sm:$0xff] %vm576_vm1, %v1711_v46  ;;  %v1709_v49 = vadd.f32 %v2858_v10, %v1638_v47  ;;  %v1641_v50 = vmul.f32 %v2212_v48, %v2846_v9 }
 0x21f   : > { %v1535_v51 = vpop.f32.mrf.mxu1 }
 0x220   : > { %1773 = vst.msk [vmem:[%s2853_s13 + $0x1a0] sm:$0xff] %vm576_vm1, %v1709_v49  ;;  %v1712_v52 = vadd.f32 %v2858_v10, %v1641_v50  ;;  %v1639_v53 = vmul.f32 %v2846_v9, %v1535_v51 }
 0x221   : > { %v2215_v54 = vpop.f32.mrf.mxu1 }
 0x222   : > { %1776 = vst.msk [vmem:[%s2853_s13 + $0x1b8] sm:$0xff] %vm576_vm1, %v1712_v52  ;;  %v1710_v55 = vadd.f32 %v2858_v10, %v1639_v53  ;;  %v1644_v56 = vmul.f32 %v2215_v54, %v2846_v9 }
 0x223   : > { %v1548_v57 = vpop.f32.mrf.mxu1 }
 0x224   : > { %1774 = vst.msk [vmem:[%s2853_s13 + $0x1a8] sm:$0xff] %vm576_vm1, %v1710_v55  ;;  %v1715_v58 = vadd.f32 %v2858_v10, %v1644_v56  ;;  %v1642_v59 = vmul.f32 %v2846_v9, %v1548_v57 }
 0x225   : > { %v2216_v60 = vpop.f32.mrf.mxu1 }
 0x226   : > { %1779 = vst.msk [vmem:[%s2853_s13 + $0x1d0] sm:$0xff] %vm576_vm1, %v1715_v58  ;;  %v1713_v61 = vadd.f32 %v2858_v10, %v1642_v59  ;;  %v1645_v62 = vmul.f32 %v2216_v60, %v2846_v9 }
 0x227   : > { %v1551_v63 = vpop.f32.mrf.mxu1 }
 0x228   : > { %1777 = vst.msk [vmem:[%s2853_s13 + $0x1c0] sm:$0xff] %vm576_vm1, %v1713_v61  ;;  %v1716_v0 = vadd.f32 %v2858_v10, %v1645_v62  ;;  %v1643_v1 = vmul.f32 %v2846_v9, %v1551_v63 }
 0x229   : > { %v2219_v2 = vpop.f32.mrf.mxu1 }
 0x22a   : > { %1780 = vst.msk [vmem:[%s2853_s13 + $0x1d8] sm:$0xff] %vm576_vm1, %v1716_v0  ;;  %v1714_v3 = vadd.f32 %v2858_v10, %v1643_v1  ;;  %v1648_v4 = vmul.f32 %v2219_v2, %v2846_v9 }
 0x22b   : > { %v1564_v5 = vpop.f32.mrf.mxu1 }
 0x22c   : > { %1778 = vst.msk [vmem:[%s2853_s13 + $0x1c8] sm:$0xff] %vm576_vm1, %v1714_v3  ;;  %v1719_v6 = vadd.f32 %v2858_v10, %v1648_v4  ;;  %v1646_v7 = vmul.f32 %v2846_v9, %v1564_v5 }
 0x22d   : > { %v2220_v8 = vpop.f32.mrf.mxu1 }
 0x22e   : > { %1783 = vst.msk [vmem:[%s2853_s13 + $0x1f0] sm:$0xff] %vm576_vm1, %v1719_v6  ;;  %v1717_v36 = vadd.f32 %v2858_v10, %v1646_v7  ;;  %v1649_v11 = vmul.f32 %v2220_v8, %v2846_v9 }
 0x22f   : > { %v1567_v12 = vpop.f32.mrf.mxu1 }
 0x230   : > { %1781 = vst.msk [vmem:[%s2853_s13 + $0x1e0] sm:$0xff] %vm576_vm1, %v1717_v36  ;;  %v1720_v13 = vadd.f32 %v2858_v10, %v1649_v11  ;;  %v1647_v14 = vmul.f32 %v2846_v9, %v1567_v12 }
 0x232   : > { %1784 = vst.msk [vmem:[%s2853_s13 + $0x1f8] sm:$0xff] %vm576_vm1, %v1720_v13  ;;  %v1718_v15 = vadd.f32 %v2858_v10, %v1647_v14 }
 0x234   : > { %1782 = vst.msk [vmem:[%s2853_s13 + $0x1e8] sm:$0xff] %vm576_vm1, %v1718_v15 }
 0x235 PF: > { %p2229_p5 = scmp.ge.s32.totalorder %s2356_s30, 2  ;;  %s1823_s15 = sand.u32 1, %s2344_s27  }
 0x236   : > { %s1824_s21 = scalar_lea.sflag [#allocation3], %s1823_s15 }
 0x237   : > { %p2226_p13 = pnand %p2229_p5, %p2448_p6 }
 0x239   : > { %p2227_p0 = pneg %p2226_p13 }
 0x23b   : > { %2339 = dma.done.wait (%p2227_p0), %s1824_s21, 8192  }
 0x23c   : > { %2341 = vsyncadd (%p2227_p0), %s1824_s21, 4294959104  ;;  %p19_p1 = scmp.ge.s32.totalorder %s2431_s11, 6   ;;  %s3178_s27 = smov %s2348_s28 }
 0x23d   : > { %s3179_s28 = smov %s2352_s29  ;;  %s3180_s29 = smov %s2442_s14 }
 0x23e   : > { %s3181_s30 = smov %s2431_s11  ;;  %21 = sbr.rel (!%p19_p1) target bundleno = 3 (0x3), region = 98 }
 0x243   :  { %1837 = vsyncpa [#allocation3], 1 }
 0x244   :  { %1839 = vsyncpa [#allocation3 + $0x1], 1 }

</bundles_post_ra>
